<compile_context>
chip_gen: v7x
topology: tpu7x:2x2x1
jax: 0.10.0
libtpu: 0.0.40
codegen_flags: <defaults>
</compile_context>

<pallas_src>
import functools

import jax
import jax.numpy as jnp
from jax import lax
from jax.experimental import pallas as pl
from jax.experimental.pallas import tpu as pltpu


# ------------------------------- Pallas kernel -------------------------------

def _ssh_fused_kernel(x_ref,
                      w1_ref, b1_ref,      # conv1_norelu
                      w2_ref, b2_ref,      # conv2 (leaky)
                      w2n_ref, b2n_ref,    # conv2_norelu
                      w3_ref, b3_ref,      # conv3 (leaky)
                      w3n_ref, b3n_ref,    # conv3_norelu
                      out_ref, *, H, W, Wp8):
    """One batch element of the full SSH module.

    x_ref:   (1, H, W, Cin)         bf16 NHWC input
    w*_ref:  (3, 3*Cin_i, Cout_i)   bf16, BN scale folded in, kw taps fused on K
    b*_ref:  (1, Cout_i)            f32 folded BN bias
    out_ref: (1, H, W, Cout_total)  concat(branch1, branch2, branch3), ReLU'd
    """

    def pad_act(y):
        """(H, W, C) activation -> (H+2, Wp8, C) zero-padded.

        Valid data at rows [1, H], cols [1, W]; everything else is 0.  Wp8 is a
        multiple of 8 so later (H, Wp8) <-> (H*Wp8,) reshapes are sublane
        aligned (free)."""
        C = y.shape[-1]
        zl = jnp.zeros((H, 1, C), y.dtype)
        zr = jnp.zeros((H, Wp8 - W - 1, C), y.dtype)
        yw = jnp.concatenate([zl, y, zr], axis=1)
        zrow = jnp.zeros((1, Wp8, C), y.dtype)
        return jnp.concatenate([zrow, yw, zrow], axis=0)

    def shift_w(xp, kw):
        """Shift left by kw along W with zero fill (2 shifts per conv, not 9)."""
        if kw == 0:
            return xp
        C = xp.shape[-1]
        fill = jnp.zeros((H + 2, kw, C), xp.dtype)
        return jnp.concatenate([xp[:, kw:, :], fill], axis=1)

    def conv_bn(xp, w_ref, b_ref, act):
        """3x3 conv + folded BN + activation.

        xp: (H+2, Wp8, Cin) bf16 zero-padded input.
        Returns (H, Wp8, Cout) f32; only columns [0, W) are valid."""
        k3cin = w_ref.shape[1]       # 3 * Cin
        cout = w_ref.shape[2]
        # Fuse the kw taps onto the lane/contraction axis.
        xcat = jnp.concatenate([shift_w(xp, kw) for kw in range(3)], axis=-1)
        acc = jnp.zeros((H * Wp8, cout), jnp.float32)
        for kh in range(3):
            # Leading-axis slice (cheap); sublane-aligned reshape (Wp8 % 8 == 0).
            patch = xcat[kh:kh + H].reshape(H * Wp8, k3cin)
            acc = acc + jnp.dot(patch, w_ref[kh],
                                preferred_element_type=jnp.float32)
        y = acc + b_ref[...]         # BN scale already folded into the weights
        if act == "leaky":
            y = jnp.where(y > 0, y, 0.01 * y)   # negative_slope=0.01 (per spec)
        elif act == "relu":
            y = jnp.maximum(y, 0.0)
        return y.reshape(H, Wp8, cout)

    x = x_ref[0]                     # (H, W, Cin) bf16
    xp = pad_act(x)

    # Branch 1 (post-concat ReLU folded in: relu(concat) == concat(relu)).
    c1 = conv_bn(xp, w1_ref, b1_ref, act="relu")

    # Branches 2 & 3 share conv2's output; intermediates stay in VMEM.
    c2a = conv_bn(xp, w2_ref, b2_ref, act="leaky")
    c2a_p = pad_act(c2a[:, :W, :].astype(jnp.bfloat16))
    c2 = conv_bn(c2a_p, w2n_ref, b2n_ref, act="relu")

    c3a = conv_bn(c2a_p, w3_ref, b3_ref, act="leaky")
    c3a_p = pad_act(c3a[:, :W, :].astype(jnp.bfloat16))
    c3 = conv_bn(c3a_p, w3n_ref, b3n_ref, act="relu")

    out = jnp.concatenate([c1, c2, c3], axis=-1)[:, :W, :]   # (H, W, Ctot)
    out_ref[0] = out.astype(out_ref.dtype)


# --------------------------------- wrappers ----------------------------------

def prepare_ssh_params(raw_params, eps=1e-5):
    """Fold BN (inference) into the conv weights and fuse the kw taps.

    raw_params: 5 tuples of PyTorch-layout params
        (w_oihw (Cout, Cin, 3, 3), gamma, beta, running_mean, running_var)
    Returns 5 tuples (w_fused bf16 (3, 3*Cin, Cout), bias f32 (1, Cout)).
    """
    prepped = []
    for w_oihw, gamma, beta, mean, var in raw_params:
        scale = gamma / jnp.sqrt(var + eps)               # (Cout,)
        bias = beta - mean * scale
        w_hwio = jnp.transpose(w_oihw, (2, 3, 1, 0))      # OIHW -> HWIO
        w_folded = w_hwio * scale[None, None, None, :]
        _, _, cin, cout = w_folded.shape
        w_fused = w_folded.reshape(3, 3 * cin, cout).astype(jnp.bfloat16)
        prepped.append((w_fused, bias.reshape(1, cout).astype(jnp.float32)))
    return prepped


def ssh_forward(x_nchw, prepped):
    """SSH forward. Input/output are NCHW f32 to match the PyTorch module."""
    N, Cin, H, W = x_nchw.shape
    Wp8 = ((W + 2 + 7) // 8) * 8          # sublane-aligned padded width
    c_tot = int(prepped[0][0].shape[-1] + prepped[2][0].shape[-1]
                + prepped[4][0].shape[-1])

    # NCHW -> NHWC; the bf16 cast fuses into the transpose so the kernel reads
    # half the bytes from HBM.
    x = jnp.transpose(x_nchw, (0, 2, 3, 1)).astype(jnp.bfloat16)

    kernel = functools.partial(_ssh_fused_kernel, H=H, W=W, Wp8=Wp8)

    in_specs = [pl.BlockSpec((1, H, W, Cin), lambda n: (n, 0, 0, 0))]
    args = [x]
    for w_fused, bias in prepped:
        in_specs.append(pl.BlockSpec(w_fused.shape, lambda n: (0, 0, 0)))
        in_specs.append(pl.BlockSpec(bias.shape, lambda n: (0, 0)))
        args.append(w_fused)
        args.append(bias)

    out_nhwc = pl.pallas_call(
        kernel,
        out_shape=jax.ShapeDtypeStruct((N, H, W, c_tot), x_nchw.dtype),
        grid=(N,),
        in_specs=in_specs,
        out_specs=pl.BlockSpec((1, H, W, c_tot), lambda n: (n, 0, 0, 0)),
        compiler_params=pltpu.CompilerParams(
            dimension_semantics=("parallel",),
            vmem_limit_bytes=32 * 1024 * 1024,
        ),
    )(*args)

    return jnp.transpose(out_nhwc, (0, 3, 1, 2))          # NHWC -> NCHW


# ----------------------------- pure-JAX references ---------------------------

def _ref_conv(x, w_hwio, scale, bias, act=None, *, bf16):
    if bf16:
        # Mirror the kernel's math: BN scale folded into bf16 weights, bf16
        # activations, f32 accumulation, bias/activation in f32.
        w = (w_hwio * scale[None, None, None, :]).astype(jnp.bfloat16)
        y = lax.conv_general_dilated(
            x.astype(jnp.bfloat16), w, (1, 1), "SAME",
            dimension_numbers=("NHWC", "HWIO", "NHWC"),
            preferred_element_type=jnp.float32)
        y = y + bias[None, None, None, :]
    else:
        # Literal (f32) PyTorch math: conv, then BN affine.
        y = lax.conv_general_dilated(
            x, w_hwio, (1, 1), "SAME",
            dimension_numbers=("NHWC", "HWIO", "NHWC"))
        y = y * scale[None, None, None, :] + bias[None, None, None, :]
    if act == "leaky":
        y = jnp.where(y > 0, y, 0.01 * y)
    return y


def ssh_reference(x_nchw, raw_params, *, bf16, eps=1e-5):
    x = jnp.transpose(x_nchw, (0, 2, 3, 1))
    convs = []
    for w_oihw, gamma, beta, mean, var in raw_params:
        scale = gamma / jnp.sqrt(var + eps)
        bias = beta - mean * scale
        convs.append((jnp.transpose(w_oihw, (2, 3, 1, 0)), scale, bias))
    c1 = _ref_conv(x, *convs[0], act=None, bf16=bf16)
    c2a = _ref_conv(x, *convs[1], act="leaky", bf16=bf16)
    c2 = _ref_conv(c2a, *convs[2], act=None, bf16=bf16)
    c3a = _ref_conv(c2a, *convs[3], act="leaky", bf16=bf16)
    c3 = _ref_conv(c3a, *convs[4], act=None, bf16=bf16)
    out = jnp.maximum(jnp.concatenate([c1, c2, c3], axis=-1), 0.0)
    return jnp.transpose(out, (0, 3, 1, 2)).astype(x_nchw.dtype)


# ----------------------------------- main -------------------------------------

def make_conv_bn_raw(key, cin, cout):
    """Deterministic PyTorch-style parameters for one conv_bn block."""
    k_w, k_g, k_b, k_m, k_v = jax.random.split(key, 5)
    w = jax.random.normal(k_w, (cout, cin, 3, 3), jnp.float32) * 0.1   # OIHW
    gamma = jax.random.uniform(k_g, (cout,), jnp.float32, 0.5, 1.5)
    beta = jax.random.normal(k_b, (cout,), jnp.float32) * 0.1
    mean = jax.random.normal(k_m, (cout,), jnp.float32) * 0.1
    var = jax.random.uniform(k_v, (cout,), jnp.float32, 0.5, 1.5)
    return (w, gamma, beta, mean, var)


if __name__ == "__main__":
    N, H, W = 2, 16, 16
    in_channel, out_channel = 4, 8   # out//2 = 4, out//4 = 2

    root = jax.random.PRNGKey(0)
    kx, k1, k2, k2n, k3, k3n = jax.random.split(root, 6)

    x = jax.random.normal(kx, (N, in_channel, H, W), jnp.float32)   # NCHW

    raw_params = [
        make_conv_bn_raw(k1, in_channel, out_channel // 2),          # conv1_norelu
        make_conv_bn_raw(k2, in_channel, out_channel // 4),          # conv2
        make_conv_bn_raw(k2n, out_channel // 4, out_channel // 4),   # conv2_norelu
        make_conv_bn_raw(k3, out_channel // 4, out_channel // 4),    # conv3
        make_conv_bn_raw(k3n, out_channel // 4, out_channel // 4),   # conv3_norelu
    ]
    prepped = prepare_ssh_params(raw_params)

    out = jax.block_until_ready(jax.jit(ssh_forward)(x, prepped))
    assert out.shape == (N, out_channel, H, W), out.shape

    # Tight check vs a reference that uses the same bf16-input / f32-accumulate
    # numerics as the kernel.
    ref_bf16 = jax.block_until_ready(ssh_reference(x, raw_params, bf16=True))
    err_bf16 = float(jnp.max(jnp.abs(out - ref_bf16)))
    assert jnp.allclose(out, ref_bf16, rtol=2e-3, atol=2e-3), err_bf16

    # Loose sanity check vs the literal f32 PyTorch math (bf16 matmul inputs
    # introduce ~0.4% relative error per layer).
    ref_f32 = jax.block_until_ready(ssh_reference(x, raw_params, bf16=False))
    err_f32 = float(jnp.max(jnp.abs(out - ref_f32)))
    assert jnp.allclose(out, ref_f32, rtol=1e-1, atol=1e-1), err_f32

    print("KERNEL_OK")
</pallas_src>

<mosaic_0001>
module attributes {stable_mosaic.version = 11 : i64} {
  func.func @_ssh_fused_kernel(%arg0: i32, %arg1: memref<1x16x16x4xbf16, #tpu.memory_space<vmem>>, %arg2: memref<3x12x4xbf16, #tpu.memory_space<vmem>>, %arg3: memref<1x4xf32, #tpu.memory_space<vmem>>, %arg4: memref<3x12x2xbf16, #tpu.memory_space<vmem>>, %arg5: memref<1x2xf32, #tpu.memory_space<vmem>>, %arg6: memref<3x6x2xbf16, #tpu.memory_space<vmem>>, %arg7: memref<1x2xf32, #tpu.memory_space<vmem>>, %arg8: memref<3x6x2xbf16, #tpu.memory_space<vmem>>, %arg9: memref<1x2xf32, #tpu.memory_space<vmem>>, %arg10: memref<3x6x2xbf16, #tpu.memory_space<vmem>>, %arg11: memref<1x2xf32, #tpu.memory_space<vmem>>, %arg12: memref<1x16x16x8xf32, #tpu.memory_space<vmem>>) attributes {dimension_semantics = [#tpu.dimension_semantics<parallel>], iteration_bounds = array<i64: 2>, scalar_prefetch = 0 : i64, scratch_operands = 0 : i64, tpu.core_type = #tpu.core_type<tc>, window_params = [{transform_indices = @transform_0, window_bounds = array<i64: 1, 16, 16, 4>}, {pipeline_mode = #tpu.pipeline_mode<synchronous>, transform_indices = @transform_1, window_bounds = array<i64: 3, 12, 4>}, {pipeline_mode = #tpu.pipeline_mode<synchronous>, transform_indices = @transform_2, window_bounds = array<i64: 1, 4>}, {pipeline_mode = #tpu.pipeline_mode<synchronous>, transform_indices = @transform_3, window_bounds = array<i64: 3, 12, 2>}, {pipeline_mode = #tpu.pipeline_mode<synchronous>, transform_indices = @transform_4, window_bounds = array<i64: 1, 2>}, {pipeline_mode = #tpu.pipeline_mode<synchronous>, transform_indices = @transform_5, window_bounds = array<i64: 3, 6, 2>}, {pipeline_mode = #tpu.pipeline_mode<synchronous>, transform_indices = @transform_6, window_bounds = array<i64: 1, 2>}, {pipeline_mode = #tpu.pipeline_mode<synchronous>, transform_indices = @transform_7, window_bounds = array<i64: 3, 6, 2>}, {pipeline_mode = #tpu.pipeline_mode<synchronous>, transform_indices = @transform_8, window_bounds = array<i64: 1, 2>}, {pipeline_mode = #tpu.pipeline_mode<synchronous>, transform_indices = @transform_9, window_bounds = array<i64: 3, 6, 2>}, {pipeline_mode = #tpu.pipeline_mode<synchronous>, transform_indices = @transform_10, window_bounds = array<i64: 1, 2>}, {transform_indices = @transform_11, window_bounds = array<i64: 1, 16, 16, 8>}]} {
    %c0 = arith.constant 0 : index
    %c0_0 = arith.constant 0 : index
    %c0_1 = arith.constant 0 : index
    %c0_2 = arith.constant 0 : index
    %0 = vector.load %arg1[%c0, %c0_0, %c0_1, %c0_2] : memref<1x16x16x4xbf16, #tpu.memory_space<vmem>>, vector<1x16x16x4xbf16>
    %1 = vector.shape_cast %0 : vector<1x16x16x4xbf16> to vector<16x16x4xbf16>
    %cst = arith.constant 0.000000e+00 : bf16
    %2 = vector.broadcast %cst : bf16 to vector<16x1x4xbf16>
    %cst_3 = arith.constant 0.000000e+00 : bf16
    %3 = vector.broadcast %cst_3 : bf16 to vector<16x7x4xbf16>
    %4 = tpu.concatenate %2, %1, %3 in 1 : vector<16x1x4xbf16>, vector<16x16x4xbf16>, vector<16x7x4xbf16> -> vector<16x24x4xbf16>
    %cst_4 = arith.constant 0.000000e+00 : bf16
    %5 = vector.broadcast %cst_4 : bf16 to vector<1x24x4xbf16>
    %6 = tpu.concatenate %5, %4, %5 in 0 : vector<1x24x4xbf16>, vector<16x24x4xbf16>, vector<1x24x4xbf16> -> vector<18x24x4xbf16>
    %cst_5 = arith.constant 0.000000e+00 : bf16
    %7 = vector.broadcast %cst_5 : bf16 to vector<18x1x4xbf16>
    %8 = vector.extract_strided_slice %6 {offsets = [0, 1, 0], sizes = [18, 23, 4], strides = [1, 1, 1]} : vector<18x24x4xbf16> to vector<18x23x4xbf16>
    %9 = tpu.concatenate %8, %7 in 1 : vector<18x23x4xbf16>, vector<18x1x4xbf16> -> vector<18x24x4xbf16>
    %cst_6 = arith.constant 0.000000e+00 : bf16
    %10 = vector.broadcast %cst_6 : bf16 to vector<18x2x4xbf16>
    %11 = vector.extract_strided_slice %6 {offsets = [0, 2, 0], sizes = [18, 22, 4], strides = [1, 1, 1]} : vector<18x24x4xbf16> to vector<18x22x4xbf16>
    %12 = tpu.concatenate %11, %10 in 1 : vector<18x22x4xbf16>, vector<18x2x4xbf16> -> vector<18x24x4xbf16>
    %13 = tpu.concatenate %6, %9, %12 in 2 : vector<18x24x4xbf16>, vector<18x24x4xbf16>, vector<18x24x4xbf16> -> vector<18x24x12xbf16>
    %cst_7 = arith.constant 0.000000e+00 : f32
    %14 = vector.broadcast %cst_7 : f32 to vector<384x4xf32>
    %15 = vector.extract_strided_slice %13 {offsets = [0, 0, 0], sizes = [16, 24, 12], strides = [1, 1, 1]} : vector<18x24x12xbf16> to vector<16x24x12xbf16>
    %16 = vector.shape_cast %15 : vector<16x24x12xbf16> to vector<384x12xbf16>
    %c0_8 = arith.constant 0 : index
    %c0_9 = arith.constant 0 : index
    %c0_10 = arith.constant 0 : index
    %17 = vector.load %arg2[%c0_8, %c0_9, %c0_10] : memref<3x12x4xbf16, #tpu.memory_space<vmem>>, vector<1x12x4xbf16>
    %18 = vector.shape_cast %17 : vector<1x12x4xbf16> to vector<12x4xbf16>
    %cst_11 = arith.constant dense<0.000000e+00> : vector<384x4xf32>
    %19 = tpu.matmul %16, %18, %cst_11 {dimension_numbers = #tpu.dot_dimension_numbers<[1], [0], [0], [1], [0, 0, 1, 1], [], []>} : vector<384x12xbf16>, vector<12x4xbf16>, vector<384x4xf32> -> vector<384x4xf32>
    %20 = arith.addf %14, %19 : vector<384x4xf32>
    %21 = vector.extract_strided_slice %13 {offsets = [1, 0, 0], sizes = [16, 24, 12], strides = [1, 1, 1]} : vector<18x24x12xbf16> to vector<16x24x12xbf16>
    %22 = vector.shape_cast %21 : vector<16x24x12xbf16> to vector<384x12xbf16>
    %c1 = arith.constant 1 : index
    %c0_12 = arith.constant 0 : index
    %c0_13 = arith.constant 0 : index
    %23 = vector.load %arg2[%c1, %c0_12, %c0_13] : memref<3x12x4xbf16, #tpu.memory_space<vmem>>, vector<1x12x4xbf16>
    %24 = vector.shape_cast %23 : vector<1x12x4xbf16> to vector<12x4xbf16>
    %cst_14 = arith.constant dense<0.000000e+00> : vector<384x4xf32>
    %25 = tpu.matmul %22, %24, %cst_14 {dimension_numbers = #tpu.dot_dimension_numbers<[1], [0], [0], [1], [0, 0, 1, 1], [], []>} : vector<384x12xbf16>, vector<12x4xbf16>, vector<384x4xf32> -> vector<384x4xf32>
    %26 = arith.addf %20, %25 : vector<384x4xf32>
    %27 = vector.extract_strided_slice %13 {offsets = [2, 0, 0], sizes = [16, 24, 12], strides = [1, 1, 1]} : vector<18x24x12xbf16> to vector<16x24x12xbf16>
    %28 = vector.shape_cast %27 : vector<16x24x12xbf16> to vector<384x12xbf16>
    %c2 = arith.constant 2 : index
    %c0_15 = arith.constant 0 : index
    %c0_16 = arith.constant 0 : index
    %29 = vector.load %arg2[%c2, %c0_15, %c0_16] : memref<3x12x4xbf16, #tpu.memory_space<vmem>>, vector<1x12x4xbf16>
    %30 = vector.shape_cast %29 : vector<1x12x4xbf16> to vector<12x4xbf16>
    %cst_17 = arith.constant dense<0.000000e+00> : vector<384x4xf32>
    %31 = tpu.matmul %28, %30, %cst_17 {dimension_numbers = #tpu.dot_dimension_numbers<[1], [0], [0], [1], [0, 0, 1, 1], [], []>} : vector<384x12xbf16>, vector<12x4xbf16>, vector<384x4xf32> -> vector<384x4xf32>
    %32 = arith.addf %26, %31 : vector<384x4xf32>
    %c0_18 = arith.constant 0 : index
    %c0_19 = arith.constant 0 : index
    %33 = vector.load %arg3[%c0_18, %c0_19] : memref<1x4xf32, #tpu.memory_space<vmem>>, vector<1x4xf32>
    %34 = vector.broadcast %33 : vector<1x4xf32> to vector<384x4xf32>
    %35 = arith.addf %32, %34 : vector<384x4xf32>
    %cst_20 = arith.constant 0.000000e+00 : f32
    %36 = vector.broadcast %cst_20 : f32 to vector<384x4xf32>
    %37 = arith.maximumf %35, %36 : vector<384x4xf32>
    %38 = vector.shape_cast %37 : vector<384x4xf32> to vector<16x24x4xf32>
    %cst_21 = arith.constant 0.000000e+00 : bf16
    %39 = vector.broadcast %cst_21 : bf16 to vector<18x1x4xbf16>
    %40 = vector.extract_strided_slice %6 {offsets = [0, 1, 0], sizes = [18, 23, 4], strides = [1, 1, 1]} : vector<18x24x4xbf16> to vector<18x23x4xbf16>
    %41 = tpu.concatenate %40, %39 in 1 : vector<18x23x4xbf16>, vector<18x1x4xbf16> -> vector<18x24x4xbf16>
    %cst_22 = arith.constant 0.000000e+00 : bf16
    %42 = vector.broadcast %cst_22 : bf16 to vector<18x2x4xbf16>
    %43 = vector.extract_strided_slice %6 {offsets = [0, 2, 0], sizes = [18, 22, 4], strides = [1, 1, 1]} : vector<18x24x4xbf16> to vector<18x22x4xbf16>
    %44 = tpu.concatenate %43, %42 in 1 : vector<18x22x4xbf16>, vector<18x2x4xbf16> -> vector<18x24x4xbf16>
    %45 = tpu.concatenate %6, %41, %44 in 2 : vector<18x24x4xbf16>, vector<18x24x4xbf16>, vector<18x24x4xbf16> -> vector<18x24x12xbf16>
    %cst_23 = arith.constant 0.000000e+00 : f32
    %46 = vector.broadcast %cst_23 : f32 to vector<384x2xf32>
    %47 = vector.extract_strided_slice %45 {offsets = [0, 0, 0], sizes = [16, 24, 12], strides = [1, 1, 1]} : vector<18x24x12xbf16> to vector<16x24x12xbf16>
    %48 = vector.shape_cast %47 : vector<16x24x12xbf16> to vector<384x12xbf16>
    %c0_24 = arith.constant 0 : index
    %c0_25 = arith.constant 0 : index
    %c0_26 = arith.constant 0 : index
    %49 = vector.load %arg4[%c0_24, %c0_25, %c0_26] : memref<3x12x2xbf16, #tpu.memory_space<vmem>>, vector<1x12x2xbf16>
    %50 = vector.shape_cast %49 : vector<1x12x2xbf16> to vector<12x2xbf16>
    %cst_27 = arith.constant dense<0.000000e+00> : vector<384x2xf32>
    %51 = tpu.matmul %48, %50, %cst_27 {dimension_numbers = #tpu.dot_dimension_numbers<[1], [0], [0], [1], [0, 0, 1, 1], [], []>} : vector<384x12xbf16>, vector<12x2xbf16>, vector<384x2xf32> -> vector<384x2xf32>
    %52 = arith.addf %46, %51 : vector<384x2xf32>
    %53 = vector.extract_strided_slice %45 {offsets = [1, 0, 0], sizes = [16, 24, 12], strides = [1, 1, 1]} : vector<18x24x12xbf16> to vector<16x24x12xbf16>
    %54 = vector.shape_cast %53 : vector<16x24x12xbf16> to vector<384x12xbf16>
    %c1_28 = arith.constant 1 : index
    %c0_29 = arith.constant 0 : index
    %c0_30 = arith.constant 0 : index
    %55 = vector.load %arg4[%c1_28, %c0_29, %c0_30] : memref<3x12x2xbf16, #tpu.memory_space<vmem>>, vector<1x12x2xbf16>
    %56 = vector.shape_cast %55 : vector<1x12x2xbf16> to vector<12x2xbf16>
    %cst_31 = arith.constant dense<0.000000e+00> : vector<384x2xf32>
    %57 = tpu.matmul %54, %56, %cst_31 {dimension_numbers = #tpu.dot_dimension_numbers<[1], [0], [0], [1], [0, 0, 1, 1], [], []>} : vector<384x12xbf16>, vector<12x2xbf16>, vector<384x2xf32> -> vector<384x2xf32>
    %58 = arith.addf %52, %57 : vector<384x2xf32>
    %59 = vector.extract_strided_slice %45 {offsets = [2, 0, 0], sizes = [16, 24, 12], strides = [1, 1, 1]} : vector<18x24x12xbf16> to vector<16x24x12xbf16>
    %60 = vector.shape_cast %59 : vector<16x24x12xbf16> to vector<384x12xbf16>
    %c2_32 = arith.constant 2 : index
    %c0_33 = arith.constant 0 : index
    %c0_34 = arith.constant 0 : index
    %61 = vector.load %arg4[%c2_32, %c0_33, %c0_34] : memref<3x12x2xbf16, #tpu.memory_space<vmem>>, vector<1x12x2xbf16>
    %62 = vector.shape_cast %61 : vector<1x12x2xbf16> to vector<12x2xbf16>
    %cst_35 = arith.constant dense<0.000000e+00> : vector<384x2xf32>
    %63 = tpu.matmul %60, %62, %cst_35 {dimension_numbers = #tpu.dot_dimension_numbers<[1], [0], [0], [1], [0, 0, 1, 1], [], []>} : vector<384x12xbf16>, vector<12x2xbf16>, vector<384x2xf32> -> vector<384x2xf32>
    %64 = arith.addf %58, %63 : vector<384x2xf32>
    %c0_36 = arith.constant 0 : index
    %c0_37 = arith.constant 0 : index
    %65 = vector.load %arg5[%c0_36, %c0_37] : memref<1x2xf32, #tpu.memory_space<vmem>>, vector<1x2xf32>
    %66 = vector.broadcast %65 : vector<1x2xf32> to vector<384x2xf32>
    %67 = arith.addf %64, %66 : vector<384x2xf32>
    %cst_38 = arith.constant 0.000000e+00 : f32
    %68 = vector.broadcast %cst_38 : f32 to vector<384x2xf32>
    %69 = arith.cmpf ogt, %67, %68 : vector<384x2xf32>
    %cst_39 = arith.constant 0.00999999977 : f32
    %70 = vector.broadcast %cst_39 : f32 to vector<384x2xf32>
    %71 = arith.mulf %70, %67 : vector<384x2xf32>
    %72 = arith.select %69, %67, %71 : vector<384x2xi1>, vector<384x2xf32>
    %73 = vector.shape_cast %72 : vector<384x2xf32> to vector<16x24x2xf32>
    %74 = vector.extract_strided_slice %73 {offsets = [0, 0, 0], sizes = [16, 16, 2], strides = [1, 1, 1]} : vector<16x24x2xf32> to vector<16x16x2xf32>
    %75 = arith.truncf %74 : vector<16x16x2xf32> to vector<16x16x2xbf16>
    %cst_40 = arith.constant 0.000000e+00 : bf16
    %76 = vector.broadcast %cst_40 : bf16 to vector<16x1x2xbf16>
    %cst_41 = arith.constant 0.000000e+00 : bf16
    %77 = vector.broadcast %cst_41 : bf16 to vector<16x7x2xbf16>
    %78 = tpu.concatenate %76, %75, %77 in 1 : vector<16x1x2xbf16>, vector<16x16x2xbf16>, vector<16x7x2xbf16> -> vector<16x24x2xbf16>
    %cst_42 = arith.constant 0.000000e+00 : bf16
    %79 = vector.broadcast %cst_42 : bf16 to vector<1x24x2xbf16>
    %80 = tpu.concatenate %79, %78, %79 in 0 : vector<1x24x2xbf16>, vector<16x24x2xbf16>, vector<1x24x2xbf16> -> vector<18x24x2xbf16>
    %cst_43 = arith.constant 0.000000e+00 : bf16
    %81 = vector.broadcast %cst_43 : bf16 to vector<18x1x2xbf16>
    %82 = vector.extract_strided_slice %80 {offsets = [0, 1, 0], sizes = [18, 23, 2], strides = [1, 1, 1]} : vector<18x24x2xbf16> to vector<18x23x2xbf16>
    %83 = tpu.concatenate %82, %81 in 1 : vector<18x23x2xbf16>, vector<18x1x2xbf16> -> vector<18x24x2xbf16>
    %cst_44 = arith.constant 0.000000e+00 : bf16
    %84 = vector.broadcast %cst_44 : bf16 to vector<18x2x2xbf16>
    %85 = vector.extract_strided_slice %80 {offsets = [0, 2, 0], sizes = [18, 22, 2], strides = [1, 1, 1]} : vector<18x24x2xbf16> to vector<18x22x2xbf16>
    %86 = tpu.concatenate %85, %84 in 1 : vector<18x22x2xbf16>, vector<18x2x2xbf16> -> vector<18x24x2xbf16>
    %87 = tpu.concatenate %80, %83, %86 in 2 : vector<18x24x2xbf16>, vector<18x24x2xbf16>, vector<18x24x2xbf16> -> vector<18x24x6xbf16>
    %cst_45 = arith.constant 0.000000e+00 : f32
    %88 = vector.broadcast %cst_45 : f32 to vector<384x2xf32>
    %89 = vector.extract_strided_slice %87 {offsets = [0, 0, 0], sizes = [16, 24, 6], strides = [1, 1, 1]} : vector<18x24x6xbf16> to vector<16x24x6xbf16>
    %90 = vector.shape_cast %89 : vector<16x24x6xbf16> to vector<384x6xbf16>
    %c0_46 = arith.constant 0 : index
    %c0_47 = arith.constant 0 : index
    %c0_48 = arith.constant 0 : index
    %91 = vector.load %arg6[%c0_46, %c0_47, %c0_48] : memref<3x6x2xbf16, #tpu.memory_space<vmem>>, vector<1x6x2xbf16>
    %92 = vector.shape_cast %91 : vector<1x6x2xbf16> to vector<6x2xbf16>
    %cst_49 = arith.constant dense<0.000000e+00> : vector<384x2xf32>
    %93 = tpu.matmul %90, %92, %cst_49 {dimension_numbers = #tpu.dot_dimension_numbers<[1], [0], [0], [1], [0, 0, 1, 1], [], []>} : vector<384x6xbf16>, vector<6x2xbf16>, vector<384x2xf32> -> vector<384x2xf32>
    %94 = arith.addf %88, %93 : vector<384x2xf32>
    %95 = vector.extract_strided_slice %87 {offsets = [1, 0, 0], sizes = [16, 24, 6], strides = [1, 1, 1]} : vector<18x24x6xbf16> to vector<16x24x6xbf16>
    %96 = vector.shape_cast %95 : vector<16x24x6xbf16> to vector<384x6xbf16>
    %c1_50 = arith.constant 1 : index
    %c0_51 = arith.constant 0 : index
    %c0_52 = arith.constant 0 : index
    %97 = vector.load %arg6[%c1_50, %c0_51, %c0_52] : memref<3x6x2xbf16, #tpu.memory_space<vmem>>, vector<1x6x2xbf16>
    %98 = vector.shape_cast %97 : vector<1x6x2xbf16> to vector<6x2xbf16>
    %cst_53 = arith.constant dense<0.000000e+00> : vector<384x2xf32>
    %99 = tpu.matmul %96, %98, %cst_53 {dimension_numbers = #tpu.dot_dimension_numbers<[1], [0], [0], [1], [0, 0, 1, 1], [], []>} : vector<384x6xbf16>, vector<6x2xbf16>, vector<384x2xf32> -> vector<384x2xf32>
    %100 = arith.addf %94, %99 : vector<384x2xf32>
    %101 = vector.extract_strided_slice %87 {offsets = [2, 0, 0], sizes = [16, 24, 6], strides = [1, 1, 1]} : vector<18x24x6xbf16> to vector<16x24x6xbf16>
    %102 = vector.shape_cast %101 : vector<16x24x6xbf16> to vector<384x6xbf16>
    %c2_54 = arith.constant 2 : index
    %c0_55 = arith.constant 0 : index
    %c0_56 = arith.constant 0 : index
    %103 = vector.load %arg6[%c2_54, %c0_55, %c0_56] : memref<3x6x2xbf16, #tpu.memory_space<vmem>>, vector<1x6x2xbf16>
    %104 = vector.shape_cast %103 : vector<1x6x2xbf16> to vector<6x2xbf16>
    %cst_57 = arith.constant dense<0.000000e+00> : vector<384x2xf32>
    %105 = tpu.matmul %102, %104, %cst_57 {dimension_numbers = #tpu.dot_dimension_numbers<[1], [0], [0], [1], [0, 0, 1, 1], [], []>} : vector<384x6xbf16>, vector<6x2xbf16>, vector<384x2xf32> -> vector<384x2xf32>
    %106 = arith.addf %100, %105 : vector<384x2xf32>
    %c0_58 = arith.constant 0 : index
    %c0_59 = arith.constant 0 : index
    %107 = vector.load %arg7[%c0_58, %c0_59] : memref<1x2xf32, #tpu.memory_space<vmem>>, vector<1x2xf32>
    %108 = vector.broadcast %107 : vector<1x2xf32> to vector<384x2xf32>
    %109 = arith.addf %106, %108 : vector<384x2xf32>
    %cst_60 = arith.constant 0.000000e+00 : f32
    %110 = vector.broadcast %cst_60 : f32 to vector<384x2xf32>
    %111 = arith.maximumf %109, %110 : vector<384x2xf32>
    %112 = vector.shape_cast %111 : vector<384x2xf32> to vector<16x24x2xf32>
    %cst_61 = arith.constant 0.000000e+00 : bf16
    %113 = vector.broadcast %cst_61 : bf16 to vector<18x1x2xbf16>
    %114 = vector.extract_strided_slice %80 {offsets = [0, 1, 0], sizes = [18, 23, 2], strides = [1, 1, 1]} : vector<18x24x2xbf16> to vector<18x23x2xbf16>
    %115 = tpu.concatenate %114, %113 in 1 : vector<18x23x2xbf16>, vector<18x1x2xbf16> -> vector<18x24x2xbf16>
    %cst_62 = arith.constant 0.000000e+00 : bf16
    %116 = vector.broadcast %cst_62 : bf16 to vector<18x2x2xbf16>
    %117 = vector.extract_strided_slice %80 {offsets = [0, 2, 0], sizes = [18, 22, 2], strides = [1, 1, 1]} : vector<18x24x2xbf16> to vector<18x22x2xbf16>
    %118 = tpu.concatenate %117, %116 in 1 : vector<18x22x2xbf16>, vector<18x2x2xbf16> -> vector<18x24x2xbf16>
    %119 = tpu.concatenate %80, %115, %118 in 2 : vector<18x24x2xbf16>, vector<18x24x2xbf16>, vector<18x24x2xbf16> -> vector<18x24x6xbf16>
    %cst_63 = arith.constant 0.000000e+00 : f32
    %120 = vector.broadcast %cst_63 : f32 to vector<384x2xf32>
    %121 = vector.extract_strided_slice %119 {offsets = [0, 0, 0], sizes = [16, 24, 6], strides = [1, 1, 1]} : vector<18x24x6xbf16> to vector<16x24x6xbf16>
    %122 = vector.shape_cast %121 : vector<16x24x6xbf16> to vector<384x6xbf16>
    %c0_64 = arith.constant 0 : index
    %c0_65 = arith.constant 0 : index
    %c0_66 = arith.constant 0 : index
    %123 = vector.load %arg8[%c0_64, %c0_65, %c0_66] : memref<3x6x2xbf16, #tpu.memory_space<vmem>>, vector<1x6x2xbf16>
    %124 = vector.shape_cast %123 : vector<1x6x2xbf16> to vector<6x2xbf16>
    %cst_67 = arith.constant dense<0.000000e+00> : vector<384x2xf32>
    %125 = tpu.matmul %122, %124, %cst_67 {dimension_numbers = #tpu.dot_dimension_numbers<[1], [0], [0], [1], [0, 0, 1, 1], [], []>} : vector<384x6xbf16>, vector<6x2xbf16>, vector<384x2xf32> -> vector<384x2xf32>
    %126 = arith.addf %120, %125 : vector<384x2xf32>
    %127 = vector.extract_strided_slice %119 {offsets = [1, 0, 0], sizes = [16, 24, 6], strides = [1, 1, 1]} : vector<18x24x6xbf16> to vector<16x24x6xbf16>
    %128 = vector.shape_cast %127 : vector<16x24x6xbf16> to vector<384x6xbf16>
    %c1_68 = arith.constant 1 : index
    %c0_69 = arith.constant 0 : index
    %c0_70 = arith.constant 0 : index
    %129 = vector.load %arg8[%c1_68, %c0_69, %c0_70] : memref<3x6x2xbf16, #tpu.memory_space<vmem>>, vector<1x6x2xbf16>
    %130 = vector.shape_cast %129 : vector<1x6x2xbf16> to vector<6x2xbf16>
    %cst_71 = arith.constant dense<0.000000e+00> : vector<384x2xf32>
    %131 = tpu.matmul %128, %130, %cst_71 {dimension_numbers = #tpu.dot_dimension_numbers<[1], [0], [0], [1], [0, 0, 1, 1], [], []>} : vector<384x6xbf16>, vector<6x2xbf16>, vector<384x2xf32> -> vector<384x2xf32>
    %132 = arith.addf %126, %131 : vector<384x2xf32>
    %133 = vector.extract_strided_slice %119 {offsets = [2, 0, 0], sizes = [16, 24, 6], strides = [1, 1, 1]} : vector<18x24x6xbf16> to vector<16x24x6xbf16>
    %134 = vector.shape_cast %133 : vector<16x24x6xbf16> to vector<384x6xbf16>
    %c2_72 = arith.constant 2 : index
    %c0_73 = arith.constant 0 : index
    %c0_74 = arith.constant 0 : index
    %135 = vector.load %arg8[%c2_72, %c0_73, %c0_74] : memref<3x6x2xbf16, #tpu.memory_space<vmem>>, vector<1x6x2xbf16>
    %136 = vector.shape_cast %135 : vector<1x6x2xbf16> to vector<6x2xbf16>
    %cst_75 = arith.constant dense<0.000000e+00> : vector<384x2xf32>
    %137 = tpu.matmul %134, %136, %cst_75 {dimension_numbers = #tpu.dot_dimension_numbers<[1], [0], [0], [1], [0, 0, 1, 1], [], []>} : vector<384x6xbf16>, vector<6x2xbf16>, vector<384x2xf32> -> vector<384x2xf32>
    %138 = arith.addf %132, %137 : vector<384x2xf32>
    %c0_76 = arith.constant 0 : index
    %c0_77 = arith.constant 0 : index
    %139 = vector.load %arg9[%c0_76, %c0_77] : memref<1x2xf32, #tpu.memory_space<vmem>>, vector<1x2xf32>
    %140 = vector.broadcast %139 : vector<1x2xf32> to vector<384x2xf32>
    %141 = arith.addf %138, %140 : vector<384x2xf32>
    %cst_78 = arith.constant 0.000000e+00 : f32
    %142 = vector.broadcast %cst_78 : f32 to vector<384x2xf32>
    %143 = arith.cmpf ogt, %141, %142 : vector<384x2xf32>
    %cst_79 = arith.constant 0.00999999977 : f32
    %144 = vector.broadcast %cst_79 : f32 to vector<384x2xf32>
    %145 = arith.mulf %144, %141 : vector<384x2xf32>
    %146 = arith.select %143, %141, %145 : vector<384x2xi1>, vector<384x2xf32>
    %147 = vector.shape_cast %146 : vector<384x2xf32> to vector<16x24x2xf32>
    %148 = vector.extract_strided_slice %147 {offsets = [0, 0, 0], sizes = [16, 16, 2], strides = [1, 1, 1]} : vector<16x24x2xf32> to vector<16x16x2xf32>
    %149 = arith.truncf %148 : vector<16x16x2xf32> to vector<16x16x2xbf16>
    %cst_80 = arith.constant 0.000000e+00 : bf16
    %150 = vector.broadcast %cst_80 : bf16 to vector<16x1x2xbf16>
    %cst_81 = arith.constant 0.000000e+00 : bf16
    %151 = vector.broadcast %cst_81 : bf16 to vector<16x7x2xbf16>
    %152 = tpu.concatenate %150, %149, %151 in 1 : vector<16x1x2xbf16>, vector<16x16x2xbf16>, vector<16x7x2xbf16> -> vector<16x24x2xbf16>
    %cst_82 = arith.constant 0.000000e+00 : bf16
    %153 = vector.broadcast %cst_82 : bf16 to vector<1x24x2xbf16>
    %154 = tpu.concatenate %153, %152, %153 in 0 : vector<1x24x2xbf16>, vector<16x24x2xbf16>, vector<1x24x2xbf16> -> vector<18x24x2xbf16>
    %cst_83 = arith.constant 0.000000e+00 : bf16
    %155 = vector.broadcast %cst_83 : bf16 to vector<18x1x2xbf16>
    %156 = vector.extract_strided_slice %154 {offsets = [0, 1, 0], sizes = [18, 23, 2], strides = [1, 1, 1]} : vector<18x24x2xbf16> to vector<18x23x2xbf16>
    %157 = tpu.concatenate %156, %155 in 1 : vector<18x23x2xbf16>, vector<18x1x2xbf16> -> vector<18x24x2xbf16>
    %cst_84 = arith.constant 0.000000e+00 : bf16
    %158 = vector.broadcast %cst_84 : bf16 to vector<18x2x2xbf16>
    %159 = vector.extract_strided_slice %154 {offsets = [0, 2, 0], sizes = [18, 22, 2], strides = [1, 1, 1]} : vector<18x24x2xbf16> to vector<18x22x2xbf16>
    %160 = tpu.concatenate %159, %158 in 1 : vector<18x22x2xbf16>, vector<18x2x2xbf16> -> vector<18x24x2xbf16>
    %161 = tpu.concatenate %154, %157, %160 in 2 : vector<18x24x2xbf16>, vector<18x24x2xbf16>, vector<18x24x2xbf16> -> vector<18x24x6xbf16>
    %cst_85 = arith.constant 0.000000e+00 : f32
    %162 = vector.broadcast %cst_85 : f32 to vector<384x2xf32>
    %163 = vector.extract_strided_slice %161 {offsets = [0, 0, 0], sizes = [16, 24, 6], strides = [1, 1, 1]} : vector<18x24x6xbf16> to vector<16x24x6xbf16>
    %164 = vector.shape_cast %163 : vector<16x24x6xbf16> to vector<384x6xbf16>
    %c0_86 = arith.constant 0 : index
    %c0_87 = arith.constant 0 : index
    %c0_88 = arith.constant 0 : index
    %165 = vector.load %arg10[%c0_86, %c0_87, %c0_88] : memref<3x6x2xbf16, #tpu.memory_space<vmem>>, vector<1x6x2xbf16>
    %166 = vector.shape_cast %165 : vector<1x6x2xbf16> to vector<6x2xbf16>
    %cst_89 = arith.constant dense<0.000000e+00> : vector<384x2xf32>
    %167 = tpu.matmul %164, %166, %cst_89 {dimension_numbers = #tpu.dot_dimension_numbers<[1], [0], [0], [1], [0, 0, 1, 1], [], []>} : vector<384x6xbf16>, vector<6x2xbf16>, vector<384x2xf32> -> vector<384x2xf32>
    %168 = arith.addf %162, %167 : vector<384x2xf32>
    %169 = vector.extract_strided_slice %161 {offsets = [1, 0, 0], sizes = [16, 24, 6], strides = [1, 1, 1]} : vector<18x24x6xbf16> to vector<16x24x6xbf16>
    %170 = vector.shape_cast %169 : vector<16x24x6xbf16> to vector<384x6xbf16>
    %c1_90 = arith.constant 1 : index
    %c0_91 = arith.constant 0 : index
    %c0_92 = arith.constant 0 : index
    %171 = vector.load %arg10[%c1_90, %c0_91, %c0_92] : memref<3x6x2xbf16, #tpu.memory_space<vmem>>, vector<1x6x2xbf16>
    %172 = vector.shape_cast %171 : vector<1x6x2xbf16> to vector<6x2xbf16>
    %cst_93 = arith.constant dense<0.000000e+00> : vector<384x2xf32>
    %173 = tpu.matmul %170, %172, %cst_93 {dimension_numbers = #tpu.dot_dimension_numbers<[1], [0], [0], [1], [0, 0, 1, 1], [], []>} : vector<384x6xbf16>, vector<6x2xbf16>, vector<384x2xf32> -> vector<384x2xf32>
    %174 = arith.addf %168, %173 : vector<384x2xf32>
    %175 = vector.extract_strided_slice %161 {offsets = [2, 0, 0], sizes = [16, 24, 6], strides = [1, 1, 1]} : vector<18x24x6xbf16> to vector<16x24x6xbf16>
    %176 = vector.shape_cast %175 : vector<16x24x6xbf16> to vector<384x6xbf16>
    %c2_94 = arith.constant 2 : index
    %c0_95 = arith.constant 0 : index
    %c0_96 = arith.constant 0 : index
    %177 = vector.load %arg10[%c2_94, %c0_95, %c0_96] : memref<3x6x2xbf16, #tpu.memory_space<vmem>>, vector<1x6x2xbf16>
    %178 = vector.shape_cast %177 : vector<1x6x2xbf16> to vector<6x2xbf16>
    %cst_97 = arith.constant dense<0.000000e+00> : vector<384x2xf32>
    %179 = tpu.matmul %176, %178, %cst_97 {dimension_numbers = #tpu.dot_dimension_numbers<[1], [0], [0], [1], [0, 0, 1, 1], [], []>} : vector<384x6xbf16>, vector<6x2xbf16>, vector<384x2xf32> -> vector<384x2xf32>
    %180 = arith.addf %174, %179 : vector<384x2xf32>
    %c0_98 = arith.constant 0 : index
    %c0_99 = arith.constant 0 : index
    %181 = vector.load %arg11[%c0_98, %c0_99] : memref<1x2xf32, #tpu.memory_space<vmem>>, vector<1x2xf32>
    %182 = vector.broadcast %181 : vector<1x2xf32> to vector<384x2xf32>
    %183 = arith.addf %180, %182 : vector<384x2xf32>
    %cst_100 = arith.constant 0.000000e+00 : f32
    %184 = vector.broadcast %cst_100 : f32 to vector<384x2xf32>
    %185 = arith.maximumf %183, %184 : vector<384x2xf32>
    %186 = vector.shape_cast %185 : vector<384x2xf32> to vector<16x24x2xf32>
    %187 = tpu.concatenate %38, %112, %186 in 2 : vector<16x24x4xf32>, vector<16x24x2xf32>, vector<16x24x2xf32> -> vector<16x24x8xf32>
    %188 = vector.extract_strided_slice %187 {offsets = [0, 0, 0], sizes = [16, 16, 8], strides = [1, 1, 1]} : vector<16x24x8xf32> to vector<16x16x8xf32>
    %c0_101 = arith.constant 0 : index
    %c0_102 = arith.constant 0 : index
    %c0_103 = arith.constant 0 : index
    %c0_104 = arith.constant 0 : index
    %189 = vector.load %arg12[%c0_101, %c0_102, %c0_103, %c0_104] : memref<1x16x16x8xf32, #tpu.memory_space<vmem>>, vector<1x16x16x8xf32>
    %190 = vector.shape_cast %189 : vector<1x16x16x8xf32> to vector<16x16x8xf32>
    %191 = vector.shape_cast %188 : vector<16x16x8xf32> to vector<1x16x16x8xf32>
    tpu.vector_store %arg12[%c0_101, %c0_102, %c0_103, %c0_104], %191 {strides = array<i32>} : memref<1x16x16x8xf32, #tpu.memory_space<vmem>>, vector<1x16x16x8xf32>,
    return
  }
  func.func @transform_0(%arg0: i32) -> (i32, i32, i32, i32) {
    %c0_i32 = arith.constant 0 : i32
    %c0_i32_0 = arith.constant 0 : i32
    %c0_i32_1 = arith.constant 0 : i32
    %c0_i32_2 = arith.constant 0 : i32
    return %arg0, %c0_i32, %c0_i32_0, %c0_i32_1 : i32, i32, i32, i32
  }
  func.func @transform_1(%arg0: i32) -> (i32, i32, i32) {
    %c0_i32 = arith.constant 0 : i32
    %c0_i32_0 = arith.constant 0 : i32
    %c0_i32_1 = arith.constant 0 : i32
    %c0_i32_2 = arith.constant 0 : i32
    return %c0_i32, %c0_i32_0, %c0_i32_1 : i32, i32, i32
  }
  func.func @transform_2(%arg0: i32) -> (i32, i32) {
    %c0_i32 = arith.constant 0 : i32
    %c0_i32_0 = arith.constant 0 : i32
    %c0_i32_1 = arith.constant 0 : i32
    return %c0_i32, %c0_i32_0 : i32, i32
  }
  func.func @transform_3(%arg0: i32) -> (i32, i32, i32) {
    %c0_i32 = arith.constant 0 : i32
    %c0_i32_0 = arith.constant 0 : i32
    %c0_i32_1 = arith.constant 0 : i32
    %c0_i32_2 = arith.constant 0 : i32
    return %c0_i32, %c0_i32_0, %c0_i32_1 : i32, i32, i32
  }
  func.func @transform_4(%arg0: i32) -> (i32, i32) {
    %c0_i32 = arith.constant 0 : i32
    %c0_i32_0 = arith.constant 0 : i32
    %c0_i32_1 = arith.constant 0 : i32
    return %c0_i32, %c0_i32_0 : i32, i32
  }
  func.func @transform_5(%arg0: i32) -> (i32, i32, i32) {
    %c0_i32 = arith.constant 0 : i32
    %c0_i32_0 = arith.constant 0 : i32
    %c0_i32_1 = arith.constant 0 : i32
    %c0_i32_2 = arith.constant 0 : i32
    return %c0_i32, %c0_i32_0, %c0_i32_1 : i32, i32, i32
  }
  func.func @transform_6(%arg0: i32) -> (i32, i32) {
    %c0_i32 = arith.constant 0 : i32
    %c0_i32_0 = arith.constant 0 : i32
    %c0_i32_1 = arith.constant 0 : i32
    return %c0_i32, %c0_i32_0 : i32, i32
  }
  func.func @transform_7(%arg0: i32) -> (i32, i32, i32) {
    %c0_i32 = arith.constant 0 : i32
    %c0_i32_0 = arith.constant 0 : i32
    %c0_i32_1 = arith.constant 0 : i32
    %c0_i32_2 = arith.constant 0 : i32
    return %c0_i32, %c0_i32_0, %c0_i32_1 : i32, i32, i32
  }
  func.func @transform_8(%arg0: i32) -> (i32, i32) {
    %c0_i32 = arith.constant 0 : i32
    %c0_i32_0 = arith.constant 0 : i32
    %c0_i32_1 = arith.constant 0 : i32
    return %c0_i32, %c0_i32_0 : i32, i32
  }
  func.func @transform_9(%arg0: i32) -> (i32, i32, i32) {
    %c0_i32 = arith.constant 0 : i32
    %c0_i32_0 = arith.constant 0 : i32
    %c0_i32_1 = arith.constant 0 : i32
    %c0_i32_2 = arith.constant 0 : i32
    return %c0_i32, %c0_i32_0, %c0_i32_1 : i32, i32, i32
  }
  func.func @transform_10(%arg0: i32) -> (i32, i32) {
    %c0_i32 = arith.constant 0 : i32
    %c0_i32_0 = arith.constant 0 : i32
    %c0_i32_1 = arith.constant 0 : i32
    return %c0_i32, %c0_i32_0 : i32, i32
  }
  func.func @transform_11(%arg0: i32) -> (i32, i32, i32, i32) {
    %c0_i32 = arith.constant 0 : i32
    %c0_i32_0 = arith.constant 0 : i32
    %c0_i32_1 = arith.constant 0 : i32
    %c0_i32_2 = arith.constant 0 : i32
    return %arg0, %c0_i32, %c0_i32_0, %c0_i32_1 : i32, i32, i32, i32
  }
}

</mosaic_0001>

<bundles_post_ra>
// kernel: ssh_forward.1
= control target key start
LH: loop header
LB: loop body
LE: loop exit
PB: predicated region body
PF: predicated region fallthrough
CT: control target
= control target key end

     0   :  { %s10022_s17 = smov 0   ;;  %s14202_s0 = inlined_call_operand.vmem [shape: bf16[2,16,16,4], index: 0, kind: input, shape index: {}]   ;;  %s14203_s1 = inlined_call_operand.vmem [shape: bf16[3,12,4], index: 1, kind: input, shape index: {}]   ;;  %s14204_s2 = inlined_call_operand.vmem [shape: f32[1,4], index: 2, kind: input, shape index: {}]   ;;  %s14205_s3 = inlined_call_operand.vmem [shape: bf16[3,12,2], index: 3, kind: input, shape index: {}]   ;;  %s14206_s4 = inlined_call_operand.vmem [shape: f32[1,2], index: 4, kind: input, shape index: {}]   ;;  %s14207_s5 = inlined_call_operand.vmem [shape: bf16[3,6,2], index: 5, kind: input, shape index: {}]   ;;  %s14208_s6 = inlined_call_operand.vmem [shape: f32[1,2], index: 6, kind: input, shape index: {}]   ;;  %s14209_s7 = inlined_call_operand.vmem [shape: bf16[3,6,2], index: 7, kind: input, shape index: {}]   ;;  %s14210_s8 = inlined_call_operand.vmem [shape: f32[1,2], index: 8, kind: input, shape index: {}]   ;;  %s14211_s9 = inlined_call_operand.vmem [shape: bf16[3,6,2], index: 9, kind: input, shape index: {}]   ;;  %s14212_s10 = inlined_call_operand.vmem [shape: f32[1,2], index: 10, kind: input, shape index: {}]   ;;  %s14213_s11 = inlined_call_operand.vmem [shape: f32[2,16,16,8], index: 11, kind: output, shape index: {}]  }
   0x1 LB: > { %s8285_s18 = sadd.s32 4294967295, %s9955_s17   ;;  %p8289_p0 = scmp.ge.s32.totalorder %s9955_s17, 1  ;;  %s9955_s17 = sphi %s10022_s17, %s21_s17  }
   0x2   : > { %p337_p1 = scmp.lt.s32.totalorder %s9955_s17, 3 }
   0x4   : > { %p338_p2 = pnand %p8289_p0, %p337_p1 }
   0x6   : > { %341 = sbr.rel (%p338_p2) target bundleno = 1957 (0x7a5), region = 64 }
   0xd   : > { %p377_p3 = scmp.lt.s32.totalorder %s8285_s18, 1  ;;  %vm644_vm0 = vcmask 1040384   ;;  %vm645_vm1 = vsmask.f32 256  ;;  %vm1049_vm2 = vcmask 1042432   ;;  %vm998_vm3 = vcmask 1046528  }
   0xe   : > { %vm10040_vm4 = vmand %vm644_vm0, %vm645_vm1  ;;  %v14226_v4 = vmov 0  ;;  %vm945_vm5 = vcmask 1043456   ;;  %vm946_vm6 = vsmask.f32 3328  ;;  %s9957_s23 = smov 8   ;;  %v14229_v35 = vmov 0 }
   0xf   : > { %s14398_s18 = smov (!%p377_p3, %s8285_s18), 1  ;;  %v14227_v4 = vsel %vm10040_vm4, 4294967295, %v14226_v4  ;;  %vm679_vm7 = vsmask.f32 7424  ;;  %vm10081_vm8 = vmand %vm945_vm5, %vm946_vm6  ;;  %s9958_s24 = smov 4   ;;  %vm1584_vm9 = vcmask 1045504  }
  0x10   : > { %s8748_s19 = sshll.u32 %s14398_s18, 7  ;;  %14228 = vst [vmem:[#allocation2_spill] sm:$0xff] %v14227_v4  ;;  %v14230_v35 = vsel %vm10081_vm8, 4294967295, %v14229_v35  ;;  %vm1254_vm10 = vcmask 31744   ;;  %vm1323_vm11 = vcmask 64512   ;;  %vm1511_vm12 = vcmask 97280  }
  0x11   : > { %s10036_s22 = scalar_lea.vmem %s14202_s0, %s8748_s19  ;;  %14231 = vst [vmem:[#allocation3_spill] sm:$0xff] %v14230_v35  ;;  %s9960_s20 = smov 2  }
  0x12   : > { %v9926_v0 = vld [vmem:[%s10036_s22 + $0x40] sm:$0xff]   ;;  %v9927_v1 = vld [vmem:[%s10036_s22 + $0x48] sm:$0xff]   ;;  %v9928_v7 = vld [vmem:[%s10036_s22 + $0x50] sm:$0xff]   ;;  %s9961_s14 = smov 6   ;;  %s8749_s15 = sshll.u32 %s14398_s18, 8 }
  0x13   : > { %v557_v2 = vshrl.u32 %v9926_v0, 16  ;;  %v560_v3 = vshll.u32 %v9926_v0, 16  ;;  %v564_v5 = vshrl.u32 %v9927_v1, 16  ;;  %v567_v6 = vshll.u32 %v9927_v1, 16  ;;  %v9929_v8 = vld [vmem:[%s10036_s22 + $0x58] sm:$0xff]   ;;  %v10057_v20 = vld [vmem:[%s10036_s22 + $0x68] sm:$0xff]   ;;  %s14056_s21 = scalar_lea.vmem %s14213_s11, %s8749_s15 }
  0x14   : > { %v571_v11 = vshrl.u32 %v9928_v7, 16  ;;  %v574_v14 = vshll.u32 %v9928_v7, 16  ;;  %v578_v15 = vshrl.u32 %v9929_v8, 16  ;;  %v581_v32 = vshll.u32 %v9929_v8, 16 }
  0x15   : > { %v559_v9 = vrot.slane %v557_v2, 7  ;;  %v566_v10 = vrot.slane %v564_v5, 7  ;;  %v592_v37 = vshrl.u32 %v10057_v20, 16 }
  0x16   : > { %v573_v36 = vrot.slane %v571_v11, 7  ;;  %v580_v41 = vrot.slane %v578_v15, 7 }
  0x17   : > { %v10048_v12 = vsel %vm10040_vm4, %v559_v9, 0  ;;  %v562_v13 = vor.u32 %v560_v3, %v559_v9  ;;  %v569_v17 = vor.u32 %v567_v6, %v566_v10  ;;  %v10053_v18 = vsel %vm10040_vm4, %v566_v10, 0  ;;  %v9931_v6 = vld [vmem:[%s10036_s22 + $0x60] sm:$0xff]  }
  0x18   : > { %v1026_v16 = vrot.slane %v10048_v12, 1  ;;  %v816_v19 = vshll.u32 %v10048_v12, 16  ;;  %v1029_v21 = vrot.slane %v10053_v18, 1  ;;  %v820_v22 = vshrl.u32 %v10048_v12, 16 }
  0x19   : > { %v10063_v23 = vsel %vm10040_vm4, 0, %v562_v13  ;;  %v831_v24 = vshll.u32 %v10053_v18, 16  ;;  %v10069_v26 = vsel %vm10040_vm4, 0, %v569_v17  ;;  %v835_v31 = vshrl.u32 %v10053_v18, 16 }
  0x1a   : > { %v1069_v25 = vsel %vm1049_vm2, %v1026_v16, 0  ;;  %v10071_v27 = vrot.slane %v816_v19, 1  ;;  %v1025_v28 = vrot.slane %v10063_v23, 1  ;;  %v1028_v29 = vrot.slane %v10069_v26, 1 }
  0x1b   : > { %1224 = vrot.lane.b32.xlu1 %v1069_v25, %s9957_s23  ;;  %v833_v30 = vrot.slane %v831_v24, 1  ;;  %v1071_v33 = vsel %vm1049_vm2, %v1029_v21, 0  ;;  %v826_v40 = vshll.u32 %v10069_v26, 16  ;;  %v576_v43 = vor.u32 %v574_v14, %v573_v36 }
  0x1c   : > { %v822_v34 = vor.u32 %v820_v22, %v10071_v27  ;;  %v1030_v38 = vsel %vm998_vm3, %v1028_v29, %v1029_v21  ;;  %v1027_v42 = vsel %vm998_vm3, %v1025_v28, %v1026_v16  ;;  %v10092_v44 = vsel %vm10040_vm4, %v573_v36, 0 }
  0x1d   : > { %v837_v39 = vor.u32 %v835_v31, %v833_v30  ;;  %1226 = vrot.lane.b32.xlu0 %v1030_v38, %s9957_s23  ;;  %v824_v45 = vshrl.u32 %v10069_v26, 16  ;;  %v828_v47 = vrot.slane %v826_v40, 1  ;;  %v583_v48 = vor.u32 %v581_v32, %v580_v41  ;;  %v9932_v31 = vld [vmem:[%s10036_s22 + $0x70] sm:$0xff]  }
  0x1e   : > { %v957_v46 = vsel %vm10081_vm8, %v822_v34, 0  ;;  %v809_v49 = vshrl.u32 %v10063_v23, 16  ;;  %v10101_v50 = vsel %vm10040_vm4, 0, %v576_v43  ;;  %v1032_v51 = vrot.slane %v10092_v44, 1 }
  0x1f   : > { %1228 = vrot.lane.b32.xlu1 %v1071_v33, %s9957_s23  ;;  %v10106_v52 = vsel %vm10040_vm4, %v580_v41, 0  ;;  %v811_v53 = vshll.u32 %v10063_v23, 16  ;;  %v958_v54 = vsel %vm10081_vm8, %v837_v39, 0  ;;  %v1031_v55 = vrot.slane %v10101_v50, 1 }
  0x20   : > { %v861_v56 = vshll.u32 %v10106_v52, 16  ;;  %v865_v57 = vshrl.u32 %v10106_v52, 16  ;;  %v829_v58 = vor.u32 %v828_v47, %v824_v45  ;;  %v839_v59 = vshrl.u32 %v10101_v50, 16  ;;  %v9933_v47 = vld [vmem:[%s10036_s22 + $0x78] sm:$0xff]  }
  0x21   : > { %1139 = vrot.lane.b32.xlu0 %v957_v46, %s9958_s24  ;;  %v841_v60 = vshll.u32 %v10101_v50, 16  ;;  %v846_v61 = vshll.u32 %v10092_v44, 16  ;;  %v10121_v63 = vsel %vm10040_vm4, 0, %v583_v48  ;;  %v1033_v0 = vsel %vm998_vm3, %v1031_v55, %v1032_v51 }
  0x22   : > { %v863_v62 = vrot.slane %v861_v56, 1  ;;  %v813_v2 = vrot.slane %v811_v53, 1  ;;  %v856_v3 = vshll.u32 %v10121_v63, 16  ;;  %v834_v7 = vsel %vm679_vm7, %v829_v58, %v833_v30 }
  0x23   : > { %1222 = vrot.lane.b32.xlu1 %v1027_v42, %s9957_s23  ;;  %v843_v1 = vrot.slane %v841_v60, 1  ;;  %v848_v8 = vrot.slane %v846_v61, 1  ;;  %v854_v11 = vshrl.u32 %v10121_v63, 16  ;;  %v594_v15 = vrot.slane %v592_v37, 7 }
  0x24   : > { %v867_v5 = vor.u32 %v865_v57, %v863_v62  ;;  %v858_v13 = vrot.slane %v856_v3, 1  ;;  %v814_v14 = vor.u32 %v813_v2, %v809_v49  ;;  %v595_v16 = vshll.u32 %v10057_v20, 16 }
  0x25   : > { %1143 = vrot.lane.b32.xlu0 %v958_v54, %s9958_s24  ;;  %v844_v10 = vor.u32 %v843_v1, %v839_v59  ;;  %v585_v17 = vshrl.u32 %v9931_v6, 16  ;;  %v588_v19 = vshll.u32 %v9931_v6, 16  ;;  %v1034_v21 = vrot.slane %v10121_v63, 1 }
  0x26   : > { %v960_v9 = vsel %vm10081_vm8, %v867_v5, 0  ;;  %v850_v22 = vshrl.u32 %v10092_v44, 16  ;;  %v597_v24 = vor.u32 %v595_v16, %v594_v15  ;;  %v859_v28 = vor.u32 %v858_v13, %v854_v11 }
  0x27   : > { %1230 = vrot.lane.b32.xlu1 %v1033_v0, %s9957_s23  ;;  %v849_v25 = vsel %vm679_vm7, %v844_v10, %v848_v8  ;;  %v1035_v29 = vrot.slane %v10106_v52, 1  ;;  %v587_v30 = vrot.slane %v585_v17, 7  ;;  %v819_v20 = vsel %vm679_vm7, %v814_v14, %v10071_v27 }
  0x28   : > { %v10146_v32 = vsel %vm10040_vm4, 0, %v597_v24  ;;  %v10150_v33 = vsel %vm10040_vm4, %v594_v15, 0  ;;  %v852_v37 = vor.u32 %v850_v22, %v848_v8  ;;  %v864_v27 = vsel %vm679_vm7, %v859_v28, %v863_v62 }
  0x29   : > { %1141 = vrot.lane.b32.xlu0 %v834_v7, %s9958_s24  ;;  %v886_v34 = vshll.u32 %v10146_v32, 16  ;;  %v590_v36 = vor.u32 %v588_v19, %v587_v30  ;;  %v10156_v38 = vsel %vm10040_vm4, %v587_v30, 0  ;;  %v1036_v39 = vsel %vm998_vm3, %v1034_v21, %v1035_v29  ;;  %v9934_v7 = vld [vmem:[%s10036_s22] sm:$0xff]  }
  0x2a   : > { %v876_v40 = vshll.u32 %v10156_v38, 16  ;;  %v599_v41 = vshrl.u32 %v9932_v31, 16  ;;  %v884_v42 = vshrl.u32 %v10146_v32, 16  ;;  %v891_v45 = vshll.u32 %v10150_v33, 16 }
  0x2b   : > { %1151 = vrot.lane.b32.xlu1 %v960_v9, %s9958_s24  ;;  %v888_v43 = vrot.slane %v886_v34, 1  ;;  %v10166_v46 = vsel %vm10040_vm4, 0, %v590_v36  ;;  %v959_v48 = vsel %vm10081_vm8, %v852_v37, 0  ;;  %v1073_v49 = vsel %vm1049_vm2, %v1032_v51, 0 }
  0x2c   : > { %v878_v53 = vrot.slane %v876_v40, 1  ;;  %v880_v54 = vshrl.u32 %v10156_v38, 16  ;;  %v871_v55 = vshll.u32 %v10166_v46, 16  ;;  %v602_v56 = vshll.u32 %v9932_v31, 16 }
  0x2d   : > { %1145 = vrot.lane.b32.xlu0 %v849_v25, %s9958_s24  ;;  %v889_v57 = vor.u32 %v888_v43, %v884_v42  ;;  %v893_v58 = vrot.slane %v891_v45, 1  ;;  %v601_v59 = vrot.slane %v599_v41, 7  ;;  %v606_v60 = vshrl.u32 %v9933_v47, 16 }
  0x2e   : > { %v1075_v61 = vsel %vm1049_vm2, %v1035_v29, 0  ;;  %v882_v51 = vor.u32 %v880_v54, %v878_v53  ;;  %v869_v62 = vshrl.u32 %v10166_v46, 16  ;;  %v873_v0 = vrot.slane %v871_v55, 1 }
  0x2f   : > { %1137 = vrot.lane.b32.xlu1 %v819_v20, %s9958_s24  ;;  %v609_v1 = vshll.u32 %v9933_v47, 16  ;;  %v894_v2 = vsel %vm679_vm7, %v889_v57, %v893_v58  ;;  %v1038_v3 = vrot.slane %v10156_v38, 1  ;;  %v604_v5 = vor.u32 %v602_v56, %v601_v59  ;;  %v9935_v57 = vld [vmem:[%s10036_s22 + $0x8] sm:$0xff]  }
  0x30   : > { %v608_v6 = vrot.slane %v606_v60, 7  ;;  %v961_v8 = vsel %vm10081_vm8, %v882_v51, 0  ;;  %v874_v9 = vor.u32 %v873_v0, %v869_v62  ;;  %v1037_v11 = vrot.slane %v10166_v46, 1 }
  0x31   : > { %1149 = vrot.lane.b32.xlu0 %v864_v27, %s9958_s24  ;;  %v1077_v10 = vsel %vm1049_vm2, %v1038_v3, 0  ;;  %v10193_v13 = vsel %vm10040_vm4, 0, %v604_v5  ;;  %v501_v16 = vshrl.u32 %v9934_v7, 16  ;;  %v1040_v17 = vrot.slane %v10146_v32, 1 }
  0x32   : > { %v611_v14 = vor.u32 %v609_v1, %v608_v6  ;;  %v10197_v15 = vsel %vm10040_vm4, %v608_v6, 0  ;;  %v1041_v19 = vrot.slane %v10150_v33, 1  ;;  %v895_v21 = vshrl.u32 %v10150_v33, 16 }
  0x33   : > { %1234 = vrot.lane.b32.xlu1 %v1036_v39, %s9957_s23  ;;  %v879_v22 = vsel %vm679_vm7, %v874_v9, %v878_v53  ;;  %v901_v24 = vshll.u32 %v10193_v13, 16  ;;  %v1039_v25 = vsel %vm998_vm3, %v1037_v11, %v1038_v3  ;;  %v10209_v28 = vsel %vm10040_vm4, %v601_v59, 0 }
  0x34   : > { %v921_v29 = vshll.u32 %v10197_v15, 16  ;;  %v10214_v30 = vsel %vm10040_vm4, 0, %v611_v14  ;;  %v503_v31 = vrot.slane %v501_v16, 7  ;;  %v504_v20 = vshll.u32 %v9934_v7, 16  ;;  %v9936_v7 = vld [vmem:[%s10036_s22 + $0x10] sm:$0xff]  }
  0x35   : > { %1147 = vrot.lane.b32.xlu0 %v959_v48, %s9958_s24  ;;  %v1042_v34 = vsel %vm998_vm3, %v1040_v17, %v1041_v19  ;;  %v1079_v36 = vsel %vm1049_vm2, %v1041_v19, 0  ;;  %v897_v37 = vor.u32 %v895_v21, %v893_v58  ;;  %v899_v27 = vshrl.u32 %v10193_v13, 16 }
  0x36   : > { %v903_v39 = vrot.slane %v901_v24, 1  ;;  %v906_v40 = vshll.u32 %v10209_v28, 16  ;;  %v916_v41 = vshll.u32 %v10214_v30, 16  ;;  %v1043_v42 = vrot.slane %v10193_v13, 1 }
  0x37   : > { %1232 = vrot.lane.b32.xlu1 %v1073_v49, %s9957_s23  ;;  %v1044_v43 = vrot.slane %v10209_v28, 1  ;;  %v923_v45 = vrot.slane %v921_v29, 1  ;;  %v925_v47 = vshrl.u32 %v10197_v15, 16  ;;  %v506_v48 = vor.u32 %v504_v20, %v503_v31 }
  0x38   : > { %v962_v49 = vsel %vm10081_vm8, %v897_v37, 0  ;;  %v904_v53 = vor.u32 %v903_v39, %v899_v27  ;;  %v908_v54 = vrot.slane %v906_v40, 1  ;;  %v914_v55 = vshrl.u32 %v10214_v30, 16  ;;  %v9937_v27 = vld [vmem:[%s10036_s22 + $0x20] sm:$0xff]  }
  0x39   : > { %1236 = vrot.lane.b32.xlu0 %v1075_v61, %s9957_s23  ;;  %v918_v56 = vrot.slane %v916_v41, 1  ;;  %v1045_v58 = vsel %vm998_vm3, %v1043_v42, %v1044_v43  ;;  %v927_v59 = vor.u32 %v925_v47, %v923_v45  ;;  %v10235_v60 = vsel %vm10040_vm4, 0, %v506_v48  ;;  %v9942_v48 = vld [vmem:[%s14203_s1 + $0x8] sm:$0x3f]  }
  0x3a   : > { %v1047_v61 = vrot.slane %v10197_v15, 1  ;;  %v910_v51 = vshrl.u32 %v10209_v28, 16  ;;  %v909_v62 = vsel %vm679_vm7, %v904_v53, %v908_v54  ;;  %v1046_v1 = vrot.slane %v10214_v30, 1  ;;  %9878 = vmatprep.subr.msk.bf16.mxu1 %vm1584_vm9, %v9942_v48  ;;  %9877 = vmatprep.subr.msk.bf16.mxu0 %vm1584_vm9, %v9942_v48 }
  0x3b   : > { %1157 = vrot.lane.b32.xlu1 %v894_v2, %s9958_s24  ;;  %v919_v0 = vor.u32 %v918_v56, %v914_v55  ;;  %v508_v2 = vshrl.u32 %v9935_v57, 16  ;;  %v964_v3 = vsel %vm10081_vm8, %v927_v59, 0  ;;  %v10247_v5 = vsel %vm10040_vm4, %v503_v31, 0  ;;  %v10296_v59 = vld [vmem:[%s14203_s1] sm:$0x3f]  }
  0x3c   : > { %v691_v6 = vshll.u32 %v10235_v60, 16  ;;  %v696_v11 = vshll.u32 %v10247_v5, 16  ;;  %v689_v16 = vshrl.u32 %v10235_v60, 16  ;;  %v511_v19 = vshll.u32 %v9935_v57, 16 }
  0x3d   : > { %1155 = vrot.lane.b32.xlu0 %v961_v8, %s9958_s24  ;;  %v912_v8 = vor.u32 %v910_v51, %v908_v54  ;;  %v924_v9 = vsel %vm679_vm7, %v919_v0, %v923_v45  ;;  %v510_v14 = vrot.slane %v508_v2, 7  ;;  %v515_v21 = vshrl.u32 %v9936_v7, 16  ;;  %v9938_v0 = vld [vmem:[%s10036_s22 + $0x18] sm:$0xff]  }
  0x3e   : > { %v693_v17 = vrot.slane %v691_v6, 1  ;;  %v1081_v24 = vsel %vm1049_vm2, %v1044_v43, 0  ;;  %v9959_v29 = vmov 0   ;;  %v518_v37 = vshll.u32 %v9936_v7, 16 }
  0x3f   : > { %1240 = vrot.lane.b32.xlu1 %v1077_v10, %s9957_s23  ;;  %v1048_v10 = vsel %vm998_vm3, %v1046_v1, %v1047_v61  ;;  %v685_v31 = vrot.slane %v9959_v29, 1  ;;  %v1083_v39 = vsel %vm1049_vm2, %v1047_v61, 0  ;;  %v1002_v41 = vrot.slane %v10247_v5, 1 }
  0x40   : > { %v694_v20 = vor.u32 %v693_v17, %v689_v16  ;;  %v1001_v43 = vrot.slane %v10235_v60, 1  ;;  %v529_v53 = vshrl.u32 %v9937_v27, 16  ;;  %v700_v55 = vshrl.u32 %v10247_v5, 16 }
  0x41   : > { %1153 = vrot.lane.b32.xlu0 %v879_v22, %s9958_s24  ;;  %v963_v22 = vsel %vm10081_vm8, %v912_v8, 0  ;;  %v948_v40 = vsel %vm10081_vm8, %v685_v31, 0  ;;  %v1051_v56 = vsel %vm1049_vm2, %v685_v31, 0  ;;  %v10290_v57 = vsel %vm10040_vm4, %v510_v14, 0 }
  0x42   : > { %v10283_v54 = vpack.i.bf16 %v685_v31, %v948_v40  ;;  %v1003_v61 = vsel %vm998_vm3, %v1001_v43, %v1002_v41  ;;  %v531_v1 = vrot.slane %v529_v53, 7  ;;  %v532_v2 = vshll.u32 %v9937_v27, 16  ;;  %v9939_v53 = vld [vmem:[%s10036_s22 + $0x28] sm:$0xff]  }
  0x43   : > { %1238 = vrot.lane.b32.xlu1 %v1039_v25, %s9957_s23  ;;  %v698_v25 = vrot.slane %v696_v11, 1  ;;  %v10310_v6 = vpack.i.bf16 %v685_v31, %v1051_v56  ;;  %v1053_v7 = vsel %vm1049_vm2, %v1002_v41, 0  ;;  %v715_v41 = vshrl.u32 %v10290_v57, 16 }
  0x45   : > { %1242 = vrot.lane.b32.xlu0 %v1042_v34, %s9957_s23  ;;  %v513_v34 = vor.u32 %v511_v19, %v510_v14  ;;  %v699_v42 = vsel %vm679_vm7, %v694_v20, %v698_v25  ;;  %14232 = vst [vmem:[#allocation4_spill] sm:$0xff] %v10310_v6  ;;  %v702_v8 = vor.u32 %v700_v55, %v698_v25  ;;  %v711_v14 = vshll.u32 %v10290_v57, 16 }
  0x47   : > { %1244 = vrot.lane.b32.xlu1 %v1079_v36, %s9957_s23  ;;  %v517_v36 = vrot.slane %v515_v21, 7  ;;  %v10273_v45 = vsel %vm10040_vm4, 0, %v513_v34  ;;  %v949_v25 = vsel %vm10081_vm8, %v702_v8, 0  ;;  %v713_v31 = vrot.slane %v711_v14, 1 }
  0x48   : > { %v1004_v17 = vrot.slane %v10273_v45, 1  ;;  %v536_v8 = vshrl.u32 %v9939_v53, 16 }
  0x49   : > { %1159 = vrot.lane.b32.xlu0 %v962_v49, %s9958_s24  ;;  %v520_v47 = vor.u32 %v518_v37, %v517_v36  ;;  %v10280_v49 = vsel %vm10040_vm4, %v517_v36, 0 }
  0x4a   : > { %v726_v51 = vshll.u32 %v10280_v49, 16  ;;  %v730_v21 = vshrl.u32 %v10280_v49, 16 }
  0x4b   : > { %1246 = vrot.lane.b32.xlu1 %v1045_v58, %s9957_s23  ;;  %v706_v58 = vshll.u32 %v10273_v45, 16 }
  0x4c   : > { %v728_v19 = vrot.slane %v726_v51, 1  ;;  %v10349_v51 = vsel %vm10040_vm4, %v531_v1, 0 }
  0x4d   : > { %1161 = vrot.lane.b32.xlu0 %v909_v62, %s9958_s24  ;;  %v10302_v62 = vsel %vm10040_vm4, 0, %v520_v47  ;;  %v708_v11 = vrot.slane %v706_v58, 1  ;;  %v756_v14 = vshll.u32 %v10349_v51, 16 }
  0x4e   : > { %v721_v16 = vshll.u32 %v10302_v62, 16  ;;  %v719_v20 = vshrl.u32 %v10302_v62, 16  ;;  %v732_v37 = vor.u32 %v730_v21, %v728_v19  ;;  %v1007_v47 = vrot.slane %v10302_v62, 1 }
  0x4f   : > { %1167 = vrot.lane.b32.xlu1 %v964_v3, %s9958_s24  ;;  %v1586_v3 = vsel %vm1584_vm9, %v9942_v48, 0  ;;  %v1008_v48 = vrot.slane %v10280_v49, 1 }
  0x50   : > { %9876 = vmatpush3.bf16.msra.mxu1 %v1586_v3  ;;  %9126 = vmatpush3.bf16.msra.mxu0 %v1586_v3  ;;  %v723_v34 = vrot.slane %v721_v16, 1  ;;  %v951_v55 = vsel %vm10081_vm8, %v732_v37, 0  ;;  %v9940_v16 = vld [vmem:[%s10036_s22 + $0x30] sm:$0xff]  }
  0x51   : > { %1165 = vrot.lane.b32.xlu0 %v924_v9, %s9958_s24  ;;  %v1005_v9 = vrot.slane %v10290_v57, 1  ;;  %9879 = vmatprep.subr.msk.bf16.mxu1 %vm1584_vm9, %v10296_v59  ;;  %v1009_v3 = vsel %vm998_vm3, %v1007_v47, %v1008_v48 }
  0x52   : > { %v724_v43 = vor.u32 %v723_v34, %v719_v20  ;;  %v538_v20 = vrot.slane %v536_v8, 7  ;;  %v543_v34 = vshrl.u32 %v9940_v16, 16 }
  0x53   : > { %1250 = vrot.lane.b32.xlu1 %v1048_v10, %s9957_s23  ;;  %v704_v10 = vshrl.u32 %v10273_v45, 16  ;;  %v1006_v36 = vsel %vm998_vm3, %v1004_v17, %v1005_v9 }
  0x54   : > { %v545_v47 = vrot.slane %v543_v34, 7 }
  0x55   : > { %1163 = vrot.lane.b32.xlu0 %v963_v22, %s9958_s24  ;;  %v522_v22 = vshrl.u32 %v9938_v0, 16  ;;  %v709_v29 = vor.u32 %v708_v11, %v704_v10 }
  0x57   : > { %1248 = vrot.lane.b32.xlu1 %v1081_v24, %s9957_s23  ;;  %v534_v24 = vor.u32 %v532_v2, %v531_v1  ;;  %v524_v27 = vrot.slane %v522_v22, 7  ;;  %v729_v2 = vsel %vm679_vm7, %v724_v43, %v728_v19  ;;  %v1055_v19 = vsel %vm1049_vm2, %v1005_v9, 0 }
  0x59   : > { %1252 = vrot.lane.b32.xlu0 %v1083_v39, %s9957_s23  ;;  %v525_v39 = vshll.u32 %v9938_v0, 16  ;;  %v10331_v40 = vsel %vm10040_vm4, 0, %v534_v24  ;;  %v717_v0 = vor.u32 %v715_v41, %v713_v31 }
  0x5a   : > { %v751_v56 = vshll.u32 %v10331_v40, 16  ;;  %v749_v10 = vshrl.u32 %v10331_v40, 16  ;;  %v1013_v8 = vrot.slane %v10331_v40, 1 }
  0x5b   : > { %1105 = vrot.lane.b32.xlu1 %v699_v42, %s9958_s24  ;;  %v714_v42 = vsel %vm679_vm7, %v709_v29, %v713_v31  ;;  %v527_v58 = vor.u32 %v525_v39, %v524_v27  ;;  %v950_v17 = vsel %vm10081_vm8, %v717_v0, 0  ;;  %v758_v31 = vrot.slane %v756_v14, 1 }
  0x5c   : > { %v753_v11 = vrot.slane %v751_v56, 1  ;;  %v546_v39 = vshll.u32 %v9940_v16, 16 }
  0x5d   : > { %9907 = vrot.lane.b32.xlu0 %v10283_v54, %s9958_s24  ;;  %v10360_v1 = vsel %vm10040_vm4, 0, %v527_v58 }
  0x5e   : > { %v736_v24 = vshll.u32 %v10360_v1, 16  ;;  %v754_v29 = vor.u32 %v753_v11, %v749_v10  ;;  %v734_v37 = vshrl.u32 %v10360_v1, 16  ;;  %v1010_v58 = vrot.slane %v10360_v1, 1 }
  0x5f   : > { %1190 = vrot.lane.b32.xlu1 %v1003_v61, %s9957_s23  ;;  %v10345_v61 = vsel %vm10040_vm4, %v524_v27, 0  ;;  %v1014_v10 = vrot.slane %v10349_v51, 1  ;;  %v760_v11 = vshrl.u32 %v10349_v51, 16 }
  0x60   : > { %v745_v22 = vshrl.u32 %v10345_v61, 16  ;;  %v738_v27 = vrot.slane %v736_v24, 1  ;;  %v759_v41 = vsel %vm679_vm7, %v754_v29, %v758_v31 }
  0x61   : > { %9912 = vrot.lane.b32.xlu0 %v10310_v6, %s9957_s23  ;;  %v1061_v34 = vsel %vm1049_vm2, %v1014_v10, 0 }
  0x63   : > { %1192 = vrot.lane.b32.xlu1 %v1053_v7, %s9957_s23  ;;  %v741_v7 = vshll.u32 %v10345_v61, 16 }
  0x65   : > { %1107 = vrot.lane.b32.xlu0 %v949_v25, %s9958_s24  ;;  %v743_v21 = vrot.slane %v741_v7, 1  ;;  %v539_v25 = vshll.u32 %v9939_v53, 16  ;;  %v9941_v53 = vld [vmem:[%s10036_s22 + $0x38] sm:$0xff]  }
  0x66   : > { %v550_v7 = vshrl.u32 %v9941_v53, 16  ;;  %v553_v29 = vshll.u32 %v9941_v53, 16 }
  0x67   : > { %1194 = vrot.lane.b32.xlu1 %v1006_v36, %s9957_s23  ;;  %v1057_v36 = vsel %vm1049_vm2, %v1008_v48, 0  ;;  %v747_v9 = vor.u32 %v745_v22, %v743_v21  ;;  %v541_v43 = vor.u32 %v539_v25, %v538_v20 }
  0x68   : > { %v552_v25 = vrot.slane %v550_v7, 7 }
  0x69   : > { %1109 = vrot.lane.b32.xlu0 %v714_v42, %s9958_s24  ;;  %v1011_v42 = vrot.slane %v10345_v61, 1  ;;  %v952_v48 = vsel %vm10081_vm8, %v747_v9, 0  ;;  %v10385_v0 = vsel %vm10040_vm4, 0, %v541_v43 }
  0x6a   : > { %v766_v16 = vshll.u32 %v10385_v0, 16 }
  0x6b   : > { %1115 = vrot.lane.b32.xlu1 %v951_v55, %s9958_s24  ;;  %v739_v55 = vor.u32 %v738_v27, %v734_v37  ;;  %v1059_v56 = vsel %vm1049_vm2, %v1011_v42, 0 }
  0x6c   : > { %v768_v9 = vrot.slane %v766_v16, 1 }
  0x6d   : > { %1113 = vrot.lane.b32.xlu0 %v729_v2, %s9958_s24  ;;  %v548_v2 = vor.u32 %v546_v39, %v545_v47  ;;  %v744_v14 = vsel %vm679_vm7, %v739_v55, %v743_v21  ;;  %v1015_v21 = vsel %vm998_vm3, %v1013_v8, %v1014_v10  ;;  %v1016_v39 = vrot.slane %v10385_v0, 1 }
  0x6f   : > { %1198 = vrot.lane.b32.xlu1 %v1009_v3, %s9957_s23  ;;  %v10389_v3 = vsel %vm10040_vm4, %v545_v47, 0  ;;  %v10406_v24 = vsel %vm10040_vm4, 0, %v548_v2  ;;  %v555_v47 = vor.u32 %v553_v29, %v552_v25 }
  0x70   : > { %v786_v22 = vshll.u32 %v10389_v3, 16  ;;  %v781_v27 = vshll.u32 %v10406_v24, 16  ;;  %v790_v43 = vshrl.u32 %v10389_v3, 16  ;;  %v779_v55 = vshrl.u32 %v10406_v24, 16 }
  0x71   : > { %1111 = vrot.lane.b32.xlu0 %v950_v17, %s9958_s24  ;;  %v1012_v17 = vsel %vm998_vm3, %v1010_v58, %v1011_v42  ;;  %v10426_v7 = vsel %vm10040_vm4, 0, %v555_v47 }
  0x72   : > { %v788_v42 = vrot.slane %v786_v22, 1  ;;  %v10438_v22 = vsel %vm10040_vm4, %v552_v25, 0  ;;  %v796_v29 = vshll.u32 %v10426_v7, 16 }
  0x73   : > { %1196 = vrot.lane.b32.xlu1 %v1055_v19, %s9957_s23  ;;  %v10401_v19 = vsel %vm10040_vm4, %v538_v20, 0  ;;  %v764_v20 = vshrl.u32 %v10385_v0, 16 }
  0x74   : > { %v771_v37 = vshll.u32 %v10401_v19, 16  ;;  %v792_v2 = vor.u32 %v790_v43, %v788_v42  ;;  %v805_v43 = vshrl.u32 %v10438_v22, 16 }
  0x75   : > { %1200 = vrot.lane.b32.xlu0 %v1057_v36, %s9957_s23  ;;  %v762_v36 = vor.u32 %v760_v11, %v758_v31  ;;  %v769_v53 = vor.u32 %v768_v9, %v764_v20  ;;  %v1020_v11 = vrot.slane %v10389_v3, 1  ;;  %v794_v9 = vshrl.u32 %v10426_v7, 16 }
  0x76   : > { %v955_v16 = vsel %vm10081_vm8, %v792_v2, 0  ;;  %v1022_v2 = vrot.slane %v10426_v7, 1 }
  0x77   : > { %1121 = vrot.lane.b32.xlu1 %v759_v41, %s9958_s24  ;;  %v1017_v41 = vrot.slane %v10401_v19, 1  ;;  %v953_v31 = vsel %vm10081_vm8, %v762_v36, 0  ;;  %v801_v36 = vshll.u32 %v10438_v22, 16 }
  0x79   : > { %1119 = vrot.lane.b32.xlu0 %v952_v48, %s9958_s24  ;;  %v773_v48 = vrot.slane %v771_v37, 1  ;;  %v1018_v58 = vsel %vm998_vm3, %v1016_v39, %v1017_v41  ;;  %v798_v37 = vrot.slane %v796_v29, 1  ;;  %v803_v39 = vrot.slane %v801_v36, 1 }
  0x7a   : > { %v1063_v47 = vsel %vm1049_vm2, %v1017_v41, 0  ;;  %v10462_v41 = vld [vmem:[%s14203_s1 + $0x10] sm:$0x3f]  }
  0x7b   : > { %1204 = vrot.lane.b32.xlu1 %v1059_v56, %s9957_s23  ;;  %v783_v56 = vrot.slane %v781_v27, 1  ;;  %v774_v8 = vsel %vm679_vm7, %v769_v53, %v773_v48  ;;  %9880 = vmatprep.subr.msk.bf16.mxu0 %vm1584_vm9, %v10462_v41 }
  0x7d   : > { %1117 = vrot.lane.b32.xlu0 %v744_v14, %s9958_s24  ;;  %v784_v10 = vor.u32 %v783_v56, %v779_v55  ;;  %v775_v14 = vshrl.u32 %v10401_v19, 16  ;;  %v807_v55 = vor.u32 %v805_v43, %v803_v39 }
  0x7f   : > { %1202 = vrot.lane.b32.xlu1 %v1012_v17, %s9957_s23  ;;  %v1019_v17 = vrot.slane %v10406_v24, 1 }
  0x81   : > { %1206 = vrot.lane.b32.xlu0 %v1015_v21, %s9957_s23  ;;  %v789_v21 = vsel %vm679_vm7, %v784_v10, %v788_v42  ;;  %v1021_v20 = vsel %vm998_vm3, %v1019_v17, %v1020_v11 }
  0x83   : > { %1208 = vrot.lane.b32.xlu1 %v1061_v34, %s9957_s23  ;;  %v777_v34 = vor.u32 %v775_v14, %v773_v48  ;;  %v1065_v48 = vsel %vm1049_vm2, %v1020_v11, 0  ;;  %v956_v11 = vsel %vm10081_vm8, %v807_v55, 0 }
  0x85   : > { %1123 = vrot.lane.b32.xlu0 %v953_v31, %s9958_s24  ;;  %v954_v25 = vsel %vm10081_vm8, %v777_v34, 0  ;;  %v799_v31 = vor.u32 %v798_v37, %v794_v9 }
  0x87   : > { %1210 = vrot.lane.b32.xlu1 %v1018_v58, %s9957_s23  ;;  %v804_v58 = vsel %vm679_vm7, %v799_v31, %v803_v39 }
  0x89   : > { %1125 = vrot.lane.b32.xlu0 %v774_v8, %s9958_s24  ;;  %v1023_v8 = vrot.slane %v10438_v22, 1 }
  0x8b   : > { %1131 = vrot.lane.b32.xlu1 %v955_v16, %s9958_s24  ;;  %v1024_v16 = vsel %vm998_vm3, %v1022_v2, %v1023_v8  ;;  %v1067_v29 = vsel %vm1049_vm2, %v1023_v8, 0 }
  0x8d   : > { %v1225_v27 = vpop.permute.xlu1 %1224  ;;  %1129 = vrot.lane.b32.xlu0 %v789_v21, %s9958_s24 }
  0x8f   : > { %1214 = vrot.lane.b32.xlu1 %v1021_v20, %s9957_s23  ;;  %v1227_v42 = vpop.permute.xlu0 %1226 }
  0x91   : > { %v1229_v53 = vpop.permute.xlu1 %1228  ;;  %1127 = vrot.lane.b32.xlu0 %v954_v25, %s9958_s24 }
  0x93   : > { %1212 = vrot.lane.b32.xlu1 %v1063_v47, %s9957_s23  ;;  %v1140_v56 = vpop.permute.xlu0 %1139 }
  0x94   : > { %v1294_v37 = vsel %vm1254_vm10, %v10048_v12, %v1140_v56 }
  0x95   : > { %v1223_v10 = vpop.permute.xlu1 %1222  ;;  %1216 = vrot.lane.b32.xlu0 %v1065_v48, %s9957_s23  ;;  %v10489_v47 = vsel %vm1323_vm11, %v1294_v37, %v1225_v27  ;;  %v10506_v27 = vld [vmem:[%s14205_s3 + $0x8] sm:$0x3f]  }
  0x97   : > { %1133 = vrot.lane.b32.xlu1 %v804_v58, %s9958_s24  ;;  %v1144_v14 = vpop.permute.xlu0 %1143 }
  0x98   : > { %v1298_v21 = vsel %vm1254_vm10, %v10053_v18, %v1144_v14 }
  0x99   : > { %v1231_v17 = vpop.permute.xlu1 %1230  ;;  %1135 = vrot.lane.b32.xlu0 %v956_v11, %s9958_s24  ;;  %v10485_v25 = vsel %vm1323_vm11, %v1298_v21, %v1229_v53  ;;  %v1899_v53 = vsel %vm1584_vm9, %v10296_v59, 0 }
  0x9b   : > { %1218 = vrot.lane.b32.xlu1 %v1024_v16, %s9957_s23  ;;  %v1142_v34 = vpop.permute.xlu0 %1141 }
  0x9c   : > { %v1296_v36 = vsel %vm1254_vm10, %v10069_v26, %v1142_v34  ;;  %v1456_v26 = vunpack.c.l.b16 %v10485_v25 }
  0x9d   : > { %v1152_v20 = vpop.permute.xlu1 %1151  ;;  %v10479_v9 = vsel %vm1323_vm11, %v1296_v36, %v1227_v42  ;;  %1220 = vrot.lane.b32.xlu0 %v1067_v29, %s9957_s23 }
  0x9e   : > { %v1455_v18 = vunpack.c.h.b16 %v10479_v9  ;;  %v10499_v12 = vcombine.low %v10489_v47, %v10479_v9  ;;  %v1306_v14 = vsel %vm1254_vm10, %v10106_v52, %v1152_v20 }
  0x9f   : > { %v1146_v39 = vpop.permute.xlu0 %1145  ;;  %9917 = vrot.lane.b32.xlu1 %v10283_v54, %s9960_s20 }
  0xa0   : > { %v1300_v58 = vsel %vm1254_vm10, %v10101_v50, %v1146_v39 }
  0xa1   : > { %v1138_v43 = vpop.permute.xlu1 %1137  ;;  %v10537_v50 = vsel %vm1323_vm11, %v1300_v58, %v1231_v17 }
  0xa2   : > { %v1292_v42 = vsel %vm1254_vm10, %v10063_v23, %v1138_v43  ;;  %v10510_v23 = vpack.c.b16 %v1456_v26, %v1455_v18 }
  0xa3   : > { %v10495_v31 = vsel %vm1323_vm11, %v1292_v42, %v1223_v10  ;;  %v1150_v48 = vpop.permute.xlu0 %1149 }
  0xa4   : > { %9151 = vmatprep.mubr.msk.bf16.mxu1 %vm1511_vm12, %v10495_v31  ;;  %v1304_v59 = vsel %vm1254_vm10, %v10121_v63, %v1150_v48 }
  0xa5   : > { %9152 = vmatmul.mubr.msk.bf16.vlgmr.msra.gmra.mrb[0].mxu1 %vm1511_vm12, %v10499_v12  ;;  %v1235_v55 = vpop.permute.xlu1 %1234 }
  0xa6   : > { %9155 = vmatprep.mubr.msk.bf16.mxu1 %vm1511_vm12, %v10510_v23  ;;  %9176 = vmatpush3.bf16.msra.mxu1 %v1899_v53  ;;  %v10525_v10 = vsel %vm1323_vm11, %v1304_v59, %v1235_v55 }
  0xa7   : > { %9881 = vmatprep.subr.msk.bf16.mxu1 %vm1584_vm9, %v10506_v27  ;;  %v1148_v56 = vpop.permute.xlu0 %1147  ;;  %v1461_v36 = vunpack.c.h.b16 %v10525_v10 }
  0xa8   : > { %v1302_v2 = vsel %vm1254_vm10, %v10092_v44, %v1148_v56 }
  0xa9   : > { %v1233_v8 = vpop.permute.xlu1 %1232 }
  0xaa   : > { %v10528_v11 = vsel %vm1323_vm11, %v1302_v2, %v1233_v8 }
  0xab   : > { %v10532_v63 = vcombine.low %v10528_v11, %v10525_v10  ;;  %v1237_v16 = vpop.permute.xlu0 %1236 }
  0xac   : > { %v10540_v44 = vsel %vm1323_vm11, %v1306_v14, %v1237_v16 }
  0xad   : > { %9156 = vmatmul.mubr.msk.bf16.gmra.mrb[4].mxu1 %vm1511_vm12, %v10537_v50  ;;  %v1158_v29 = vpop.permute.xlu1 %1157  ;;  %v1462_v21 = vunpack.c.l.b16 %v10540_v44 }
  0xae   : > { %9159 = vmatprep.mubr.msk.bf16.mxu1 %vm1511_vm12, %v10532_v63  ;;  %v1312_v26 = vsel %vm1254_vm10, %v10146_v32, %v1158_v29 }
  0xaf   : > { %v1156_v34 = vpop.permute.xlu0 %1155  ;;  %v10548_v20 = vpack.c.b16 %v1462_v21, %v1461_v36 }
  0xb0   : > { %v1310_v43 = vsel %vm1254_vm10, %v10156_v38, %v1156_v34 }
  0xb1   : > { %v1241_v52 = vpop.permute.xlu1 %1240 }
  0xb2   : > { %v10567_v48 = vsel %vm1323_vm11, %v1310_v43, %v1241_v52 }
  0xb3   : > { %v1154_v17 = vpop.permute.xlu0 %1153 }
  0xb4   : > { %v1308_v37 = vsel %vm1254_vm10, %v10166_v46, %v1154_v17 }
  0xb5   : > { %9160 = vmatmul.mubr.msk.bf16.gmra.mrb[8].mxu1 %vm1511_vm12, %v10548_v20  ;;  %v1239_v39 = vpop.permute.xlu1 %1238 }
  0xb6   : > { %v10555_v18 = vsel %vm1323_vm11, %v1308_v37, %v1239_v39 }
  0xb7   : > { %9163 = vmatprep.mubr.msk.bf16.mxu1 %vm1511_vm12, %v10555_v18  ;;  %v1243_v42 = vpop.permute.xlu0 %1242 }
  0xb8   : > { %v10564_v53 = vsel %vm1323_vm11, %v1312_v26, %v1243_v42 }
  0xb9   : > { %v1245_v46 = vpop.permute.xlu1 %1244  ;;  %v10571_v55 = vcombine.low %v10567_v48, %v10564_v53  ;;  %v1467_v58 = vunpack.c.h.b16 %v10564_v53 }
  0xbb   : > { %v1160_v59 = vpop.permute.xlu0 %1159 }
  0xbc   : > { %v1314_v38 = vsel %vm1254_vm10, %v10150_v33, %v1160_v59 }
  0xbd   : > { %9164 = vmatmul.mubr.msk.bf16.gmra.mrb[12].mxu1 %vm1511_vm12, %v10571_v55  ;;  %v1247_v32 = vpop.permute.xlu1 %1246  ;;  %v10578_v56 = vsel %vm1323_vm11, %v1314_v38, %v1245_v46 }
  0xbe   : > { %v1468_v2 = vunpack.c.l.b16 %v10578_v56 }
  0xbf   : > { %v1162_v8 = vpop.permute.xlu0 %1161 }
  0xc0   : > { %v10582_v14 = vpack.c.b16 %v1468_v2, %v1467_v58  ;;  %v1316_v16 = vsel %vm1254_vm10, %v10193_v13, %v1162_v8 }
  0xc1   : > { %v1168_v29 = vpop.permute.xlu1 %1167  ;;  %v10589_v21 = vsel %vm1323_vm11, %v1316_v16, %v1247_v32 }
  0xc2   : > { %9167 = vmatprep.mubr.msk.bf16.mxu1 %vm1511_vm12, %v10582_v14  ;;  %v1322_v26 = vsel %vm1254_vm10, %v10197_v15, %v1168_v29 }
  0xc3   : > { %v1166_v33 = vpop.permute.xlu0 %1165 }
  0xc4   : > { %v1320_v36 = vsel %vm1254_vm10, %v10214_v30, %v1166_v33 }
  0xc5   : > { %9168 = vmatmul.mubr.msk.bf16.gmra.mrb[16].mxu1 %vm1511_vm12, %v10589_v21  ;;  %v1251_v34 = vpop.permute.xlu1 %1250 }
  0xc6   : > { %v10598_v37 = vsel %vm1323_vm11, %v1320_v36, %v1251_v34 }
  0xc7   : > { %v1164_v52 = vpop.permute.xlu0 %1163  ;;  %v1477_v46 = vunpack.c.h.b16 %v10598_v37 }
  0xc8   : > { %v1318_v17 = vsel %vm1254_vm10, %v10209_v28, %v1164_v52 }
  0xc9   : > { %v1249_v13 = vpop.permute.xlu1 %1248 }
  0xca   : > { %v10601_v39 = vsel %vm1323_vm11, %v1318_v17, %v1249_v13 }
  0xcb   : > { %v10605_v43 = vcombine.low %v10601_v39, %v10598_v37  ;;  %v1253_v42 = vpop.permute.xlu0 %1252 }
  0xcc   : > { %v10610_v30 = vsel %vm1323_vm11, %v1322_v26, %v1253_v42 }
  0xcd   : > { %9171 = vmatprep.mubr.msk.bf16.mxu1 %vm1511_vm12, %v10605_v43  ;;  %v1106_v28 = vpop.permute.xlu1 %1105  ;;  %v1478_v59 = vunpack.c.l.b16 %v10610_v30 }
  0xce   : > { %v1260_v38 = vsel %vm1254_vm10, %v10235_v60, %v1106_v28  ;;  %v2456_v28 = vsel %vm1584_vm9, %v10506_v27, 0 }
  0xcf   : > { %v10618_v32 = vpack.c.b16 %v1478_v59, %v1477_v46  ;;  %v9908_v58 = vpop.permute.xlu0 %9907  ;;  %v10646_v46 = vld [vmem:[%s14205_s3 + $0x10] sm:$0x3f]  }
  0xd0   : > { %v9910_v15 = vunpack.i.h.bf16 %v9908_v58  ;;  %v9909_v8 = vunpack.i.l.bf16 %v9908_v58 }
  0xd1   : > { %v1191_v2 = vpop.permute.xlu1 %1190  ;;  %9172 = vmatmul.mubr.msk.bf16.gmra.mrb[20].mxu1 %vm1511_vm12, %v10618_v32 }
  0xd2   : > { %v10623_v16 = vsel %vm1323_vm11, %v1260_v38, %v1191_v2  ;;  %v1256_v60 = vsel %vm1254_vm10, 0, %v9910_v15  ;;  %v1258_v52 = vsel %vm1254_vm10, 0, %v9909_v8 }
  0xd3   : > { %9127 = vmatprep.mubr.msk.bf16.mxu0 %vm1511_vm12, %v10623_v16  ;;  %v9913_v29 = vpop.permute.xlu0 %9912  ;;  %v1428_v2 = vunpack.c.h.b16 %v10623_v16 }
  0xd4   : > { %v9915_v33 = vunpack.i.h.bf16 %v9913_v29  ;;  %v9914_v34 = vunpack.i.l.bf16 %v9913_v29 }
  0xd5   : > { %v1193_v36 = vpop.permute.xlu1 %1192 }
  0xd6   : > { %v10630_v17 = vsel %vm1323_vm11, %v1258_v52, %v9914_v34  ;;  %v10633_v13 = vsel %vm1323_vm11, %v1256_v60, %v9915_v33  ;;  %v10673_v60 = vld [vmem:[%s14205_s3] sm:$0x3f]  }
  0xd7   : > { %v10637_v26 = vcombine.low %v10630_v17, %v10623_v16  ;;  %9177 = vmatprep.mubr.msk.bf16.mxu1 %vm1511_vm12, %v10633_v13  ;;  %v1108_v42 = vpop.permute.xlu0 %1107 }
  0xd8   : > { %v1262_v59 = vsel %vm1254_vm10, %v10247_v5, %v1108_v42 }
  0xd9   : > { %v1195_v38 = vpop.permute.xlu1 %1194  ;;  %v1331_v58 = vsel %vm1323_vm11, %v1262_v59, %v1193_v36  ;;  %9178 = vmatmul.mubr.msk.bf16.vlgmr.msra.gmra.mrb[24].mxu1 %vm1511_vm12, %v10637_v26  ;;  %v2131_v36 = vsel %vm1584_vm9, %v10462_v41, 0 }
  0xda   : > { %v1429_v15 = vunpack.c.l.b16 %v1331_v58  ;;  %9276 = vmatpush3.bf16.msra.mxu1 %v2456_v28 }
  0xdb   : > { %v1110_v8 = vpop.permute.xlu0 %1109  ;;  %9883 = vmatprep.subr.msk.bf16.mxu1 %vm1584_vm9, %v10646_v46 }
  0xdc   : > { %v10656_v27 = vpack.c.b16 %v1429_v15, %v1428_v2  ;;  %v1264_v29 = vsel %vm1254_vm10, %v10273_v45, %v1110_v8 }
  0xdd   : > { %v1116_v5 = vpop.permute.xlu1 %1115  ;;  %v10661_v33 = vsel %vm1323_vm11, %v1264_v29, %v1195_v38 }
  0xde   : > { %9181 = vmatprep.mubr.msk.bf16.mxu1 %vm1511_vm12, %v10656_v27  ;;  %v10666_v34 = vcombine.low %v1331_v58, %v10661_v33  ;;  %v1431_v2 = vunpack.c.h.b16 %v10661_v33 }
  0xdf   : > { %v1114_v52 = vpop.permute.xlu0 %1113 }
  0xe0   : > { %9128 = vmatmul.mubr.msk.bf16.vlgmr.msra.gmra.mrb[0].mxu0 %vm1511_vm12, %v10666_v34  ;;  %v1268_v42 = vsel %vm1254_vm10, %v10302_v62, %v1114_v52  ;;  %v1270_v62 = vsel %vm1254_vm10, %v10280_v49, %v1116_v5 }
  0xe1   : > { %v1199_v45 = vpop.permute.xlu1 %1198  ;;  %9182 = vmatmul.mubr.msk.bf16.gmra.mrb[28].mxu1 %vm1511_vm12, %v10661_v33  ;;  %9226 = vmatpush3.bf16.msra.mxu0 %v2131_v36 }
  0xe2   : > { %9882 = vmatprep.subr.msk.bf16.mxu0 %vm1584_vm9, %v10673_v60  ;;  %v10686_v38 = vsel %vm1323_vm11, %v1268_v42, %v1199_v45 }
  0xe3   : > { %v1112_v41 = vpop.permute.xlu0 %1111  ;;  %v1434_v45 = vunpack.c.h.b16 %v10686_v38 }
  0xe4   : > { %v1266_v28 = vsel %vm1254_vm10, %v10290_v57, %v1112_v41 }
  0xe5   : > { %v1197_v59 = vpop.permute.xlu1 %1196 }
  0xe6   : > { %v1335_v58 = vsel %vm1323_vm11, %v1266_v28, %v1197_v59 }
  0xe7   : > { %v1432_v15 = vunpack.c.l.b16 %v1335_v58  ;;  %v10691_v8 = vcombine.low %v1335_v58, %v10686_v38  ;;  %v1201_v29 = vpop.permute.xlu0 %1200 }
  0xe8   : > { %v1339_v57 = vsel %vm1323_vm11, %v1270_v62, %v1201_v29 }
  0xe9   : > { %v10695_v36 = vpack.c.b16 %v1432_v15, %v1431_v2  ;;  %9185 = vmatprep.mubr.msk.bf16.mxu1 %vm1511_vm12, %v10691_v8  ;;  %v1122_v52 = vpop.permute.xlu1 %1121  ;;  %v1435_v42 = vunpack.c.l.b16 %v1339_v57 }
  0xeb   : > { %9131 = vmatprep.mubr.msk.bf16.mxu0 %vm1511_vm12, %v10695_v36  ;;  %v10703_v41 = vpack.c.b16 %v1435_v42, %v1434_v45  ;;  %v1120_v28 = vpop.permute.xlu0 %1119  ;;  %v1276_v42 = vsel %vm1254_vm10, %v10331_v40, %v1122_v52 }
  0xec   : > { %9132 = vmatmul.mubr.msk.bf16.gmra.mrb[4].mxu0 %vm1511_vm12, %v10686_v38  ;;  %v1274_v49 = vsel %vm1254_vm10, %v10345_v61, %v1120_v28 }
  0xed   : > { %v1205_v5 = vpop.permute.xlu1 %1204  ;;  %9186 = vmatmul.mubr.msk.bf16.gmra.mrb[32].mxu1 %vm1511_vm12, %v10703_v41 }
  0xee   : > { %v1343_v59 = vsel %vm1323_vm11, %v1274_v49, %v1205_v5 }
  0xef   : > { %v1118_v58 = vpop.permute.xlu0 %1117  ;;  %v1438_v29 = vunpack.c.l.b16 %v1343_v59 }
  0xf0   : > { %v1272_v2 = vsel %vm1254_vm10, %v10360_v1, %v1118_v58 }
  0xf1   : > { %v1203_v15 = vpop.permute.xlu1 %1202 }
  0xf2   : > { %v10715_v62 = vsel %vm1323_vm11, %v1272_v2, %v1203_v15 }
  0xf3   : > { %9189 = vmatprep.mubr.msk.bf16.mxu1 %vm1511_vm12, %v10715_v62  ;;  %v10720_v61 = vcombine.low %v1339_v57, %v10715_v62  ;;  %v1437_v45 = vunpack.c.h.b16 %v10715_v62  ;;  %v1207_v28 = vpop.permute.xlu0 %1206 }
  0xf4   : > { %v10726_v49 = vsel %vm1323_vm11, %v1276_v42, %v1207_v28 }
  0xf5   : > { %9135 = vmatprep.mubr.msk.bf16.mxu0 %vm1511_vm12, %v10720_v61  ;;  %v1209_v1 = vpop.permute.xlu1 %1208  ;;  %v10730_v5 = vpack.c.b16 %v1438_v29, %v1437_v45  ;;  %v10733_v58 = vcombine.low %v1343_v59, %v10726_v49  ;;  %v1440_v15 = vunpack.c.h.b16 %v10726_v49 }
  0xf7   : > { %9136 = vmatmul.mubr.msk.bf16.gmra.mrb[8].mxu0 %vm1511_vm12, %v10730_v5  ;;  %v1124_v57 = vpop.permute.xlu0 %1123  ;;  %9190 = vmatmul.mubr.msk.bf16.gmra.mrb[36].mxu1 %vm1511_vm12, %v10733_v58 }
  0xf8   : > { %9139 = vmatprep.mubr.msk.bf16.mxu0 %vm1511_vm12, %v10726_v49  ;;  %v1278_v40 = vsel %vm1254_vm10, %v10349_v51, %v1124_v57 }
  0xf9   : > { %v1211_v52 = vpop.permute.xlu1 %1210  ;;  %v1347_v2 = vsel %vm1323_vm11, %v1278_v40, %v1209_v1 }
  0xfa   : > { %v1441_v59 = vunpack.c.l.b16 %v1347_v2 }
  0xfb   : > { %v1126_v29 = vpop.permute.xlu0 %1125 }
  0xfc   : > { %v10745_v45 = vpack.c.b16 %v1441_v59, %v1440_v15  ;;  %v1280_v42 = vsel %vm1254_vm10, %v10385_v0, %v1126_v29 }
  0xfd   : > { %v1132_v28 = vpop.permute.xlu1 %1131  ;;  %v10750_v35 = vsel %vm1323_vm11, %v1280_v42, %v1211_v52 }
  0xfe   : > { %9193 = vmatprep.mubr.msk.bf16.mxu1 %vm1511_vm12, %v10745_v45  ;;  %v10755_v51 = vcombine.low %v1347_v2, %v10750_v35  ;;  %v1443_v29 = vunpack.c.h.b16 %v10750_v35  ;;  %v1286_v6 = vsel %vm1254_vm10, %v10389_v3, %v1132_v28 }
  0xff   : > { %v1130_v1 = vpop.permute.xlu0 %1129  ;;  %9194 = vmatmul.mubr.msk.bf16.gmra.mrb[40].mxu1 %vm1511_vm12, %v10750_v35 }
 0x100   : > { %9140 = vmatmul.mubr.msk.bf16.gmra.mrb[12].mxu0 %vm1511_vm12, %v10755_v51  ;;  %v1284_v0 = vsel %vm1254_vm10, %v10406_v24, %v1130_v1 }
 0x101   : > { %v1215_v57 = vpop.permute.xlu1 %1214 }
 0x102   : > { %v10766_v59 = vsel %vm1323_vm11, %v1284_v0, %v1215_v57 }
 0x103   : > { %v1128_v40 = vpop.permute.xlu0 %1127  ;;  %v1446_v0 = vunpack.c.h.b16 %v10766_v59 }
 0x104   : > { %v1282_v52 = vsel %vm1254_vm10, %v10401_v19, %v1128_v40 }
 0x105   : > { %v1213_v15 = vpop.permute.xlu1 %1212 }
 0x106   : > { %v1351_v2 = vsel %vm1323_vm11, %v1282_v52, %v1213_v15 }
 0x107   : > { %v1444_v42 = vunpack.c.l.b16 %v1351_v2  ;;  %v10771_v4 = vcombine.low %v1351_v2, %v10766_v59  ;;  %v1217_v24 = vpop.permute.xlu0 %1216 }
 0x108   : > { %v1355_v19 = vsel %vm1323_vm11, %v1286_v6, %v1217_v24  ;;  %v1452_v24 = vunpack.c.h.b16 %v10495_v31 }
 0x109   : > { %v10775_v1 = vpack.c.b16 %v1444_v42, %v1443_v29  ;;  %9197 = vmatprep.mubr.msk.bf16.mxu1 %vm1511_vm12, %v10771_v4  ;;  %v1134_v57 = vpop.permute.xlu1 %1133  ;;  %v1447_v40 = vunpack.c.l.b16 %v1355_v19 }
 0x10a   : > { %v1288_v52 = vsel %vm1254_vm10, %v10426_v7, %v1134_v57 }
 0x10b   : > { %9143 = vmatprep.mubr.msk.bf16.mxu0 %vm1511_vm12, %v10775_v1  ;;  %v10785_v15 = vpack.c.b16 %v1447_v40, %v1446_v0  ;;  %v1136_v3 = vpop.permute.xlu0 %1135  ;;  %v1453_v0 = vunpack.c.l.b16 %v10489_v47  ;;  %v10824_v47 = vcombine.low %v10485_v25, %v10537_v50  ;;  %v1458_v25 = vunpack.c.h.b16 %v10537_v50 }
 0x10c   : > { %9144 = vmatmul.mubr.msk.bf16.gmra.mrb[16].mxu0 %vm1511_vm12, %v10766_v59  ;;  %v1290_v28 = vsel %vm1254_vm10, %v10438_v22, %v1136_v3  ;;  %v2673_v3 = vsel %vm1584_vm9, %v10673_v60, 0  ;;  %v1464_v60 = vunpack.c.h.b16 %v10555_v18 }
 0x10d   : > { %v1219_v6 = vpop.permute.xlu1 %1218  ;;  %9198 = vmatmul.mubr.msk.bf16.gmra.mrb[44].mxu1 %vm1511_vm12, %v10785_v15 }
 0x10e   : > { %v10794_v2 = vsel %vm1323_vm11, %v1288_v52, %v1219_v6  ;;  %v10812_v52 = vpack.c.b16 %v1453_v0, %v1452_v24  ;;  %v1459_v6 = vunpack.c.l.b16 %v10528_v11  ;;  %v1465_v11 = vunpack.c.l.b16 %v10567_v48 }
 0x10f   : > { %v10797_v7 = vcombine.low %v1355_v19, %v10794_v2  ;;  %9201 = vmatprep.mubr.msk.bf16.mxu1 %vm1511_vm12, %v10794_v2  ;;  %v1221_v29 = vpop.permute.xlu0 %1220  ;;  %v1449_v42 = vunpack.c.h.b16 %v10794_v2  ;;  %v10866_v48 = vcombine.low %v10578_v56, %v10589_v21  ;;  %v1470_v24 = vunpack.c.h.b16 %v10589_v21 }
 0x110   : > { %v1359_v57 = vsel %vm1323_vm11, %v1290_v28, %v1221_v29  ;;  %v10838_v28 = vpack.c.b16 %v1459_v6, %v1458_v25  ;;  %v10852_v29 = vcombine.low %v10540_v44, %v10555_v18  ;;  %v1471_v44 = vunpack.c.l.b16 %v10601_v39 }
 0x111   : > { %9147 = vmatprep.mubr.msk.bf16.mxu0 %vm1511_vm12, %v10797_v7  ;;  %v1450_v22 = vunpack.c.l.b16 %v1359_v57  ;;  %v10810_v19 = vcombine.low %v1359_v57, %v10495_v31  ;;  %v2893_v56 = vsel %vm1584_vm9, %v10646_v46, 0  ;;  %v10932_v39 = vcombine.low %v10610_v30, %v10633_v13 }
 0x112   : > { %v10878_v57 = vpack.c.b16 %v1471_v44, %v1470_v24  ;;  %v1425_v46 = vunpack.c.h.b16 %v10633_v13 }
 0x113   : > { %v10807_v40 = vpack.c.b16 %v1450_v22, %v1449_v42  ;;  %v10854_v42 = vpack.c.b16 %v1465_v11, %v1464_v60 }
 0x115   : > { %9148 = vmatmul.mubr.msk.bf16.gmra.mrb[20].mxu0 %vm1511_vm12, %v10807_v40  ;;  %9202 = vmatmul.mubr.msk.bf16.gmra.mrb[48].mxu1 %vm1511_vm12, %v10810_v19 }
 0x116   : > { %9205 = vmatprep.mubr.msk.bf16.mxu1 %vm1511_vm12, %v10812_v52  ;;  %9227 = vmatprep.mubr.msk.bf16.mxu0 %vm1511_vm12, %v10661_v33 }
 0x11d   : > { %9206 = vmatmul.mubr.msk.bf16.gmra.mrb[52].mxu1 %vm1511_vm12, %v10479_v9  ;;  %9228 = vmatmul.mubr.msk.bf16.vlgmr.msra.gmra.mrb[24].mxu0 %vm1511_vm12, %v10691_v8 }
 0x11e   : > { %9209 = vmatprep.mubr.msk.bf16.mxu1 %vm1511_vm12, %v10824_v47  ;;  %9231 = vmatprep.mubr.msk.bf16.mxu0 %vm1511_vm12, %v10703_v41 }
 0x11f   : > { %9326 = vmatpush3.bf16.msra.mxu0 %v2673_v3 }
 0x125   : > { %9210 = vmatmul.mubr.msk.bf16.gmra.mrb[56].mxu1 %vm1511_vm12, %v10838_v28  ;;  %9232 = vmatmul.mubr.msk.bf16.gmra.mrb[28].mxu0 %vm1511_vm12, %v10715_v62 }
 0x126   : > { %9213 = vmatprep.mubr.msk.bf16.mxu1 %vm1511_vm12, %v10525_v10  ;;  %9235 = vmatprep.mubr.msk.bf16.mxu0 %vm1511_vm12, %v10733_v58 }
 0x12d   : > { %9214 = vmatmul.mubr.msk.bf16.gmra.mrb[60].mxu1 %vm1511_vm12, %v10852_v29  ;;  %9236 = vmatmul.mubr.msk.bf16.gmra.mrb[32].mxu0 %vm1511_vm12, %v10745_v45 }
 0x12e   : > { %9217 = vmatprep.mubr.msk.bf16.mxu1 %vm1511_vm12, %v10854_v42  ;;  %9239 = vmatprep.mubr.msk.bf16.mxu0 %vm1511_vm12, %v10750_v35 }
 0x135   : > { %9218 = vmatmul.mubr.msk.bf16.gmra.mrb[64].mxu1 %vm1511_vm12, %v10564_v53  ;;  %9240 = vmatmul.mubr.msk.bf16.gmra.mrb[36].mxu0 %vm1511_vm12, %v10771_v4 }
 0x136   : > { %9221 = vmatprep.mubr.msk.bf16.mxu1 %vm1511_vm12, %v10866_v48  ;;  %9243 = vmatprep.mubr.msk.bf16.mxu0 %vm1511_vm12, %v10785_v15 }
 0x13d   : > { %9222 = vmatmul.mubr.msk.bf16.gmra.mrb[68].mxu1 %vm1511_vm12, %v10878_v57  ;;  %9244 = vmatmul.mubr.msk.bf16.gmra.mrb[40].mxu0 %vm1511_vm12, %v10794_v2 }
 0x13e   : > { %9247 = vmatprep.mubr.msk.bf16.mxu0 %vm1511_vm12, %v10810_v19  ;;  %9277 = vmatprep.mubr.msk.bf16.mxu1 %vm1511_vm12, %v10623_v16  ;;  %v1426_v16 = vunpack.c.l.b16 %v10630_v17 }
 0x145   : > { %9248 = vmatmul.mubr.msk.bf16.gmra.mrb[44].mxu0 %vm1511_vm12, %v10812_v52  ;;  %9278 = vmatmul.mubr.msk.bf16.vlgmr.msra.gmra.mrb[72].mxu1 %vm1511_vm12, %v10666_v34  ;;  %v10944_v34 = vpack.c.b16 %v1426_v16, %v1425_v46 }
 0x146   : > { %9376 = vmatpush3.bf16.msra.mxu1 %v2893_v56  ;;  %9251 = vmatprep.mubr.msk.bf16.mxu0 %vm1511_vm12, %v10479_v9 }
 0x147   : > { %9281 = vmatprep.mubr.msk.bf16.mxu1 %vm1511_vm12, %v10695_v36 }
 0x14d   : > { %9252 = vmatmul.mubr.msk.bf16.gmra.mrb[48].mxu0 %vm1511_vm12, %v10824_v47  ;;  %9282 = vmatmul.mubr.msk.bf16.gmra.mrb[76].mxu1 %vm1511_vm12, %v10686_v38 }
 0x14e   : > { %9255 = vmatprep.mubr.msk.bf16.mxu0 %vm1511_vm12, %v10838_v28  ;;  %9285 = vmatprep.mubr.msk.bf16.mxu1 %vm1511_vm12, %v10720_v61 }
 0x155   : > { %9256 = vmatmul.mubr.msk.bf16.gmra.mrb[52].mxu0 %vm1511_vm12, %v10525_v10  ;;  %9286 = vmatmul.mubr.msk.bf16.gmra.mrb[80].mxu1 %vm1511_vm12, %v10730_v5 }
 0x156   : > { %9259 = vmatprep.mubr.msk.bf16.mxu0 %vm1511_vm12, %v10852_v29  ;;  %9289 = vmatprep.mubr.msk.bf16.mxu1 %vm1511_vm12, %v10726_v49 }
 0x15d   : > { %9260 = vmatmul.mubr.msk.bf16.gmra.mrb[56].mxu0 %vm1511_vm12, %v10854_v42  ;;  %9290 = vmatmul.mubr.msk.bf16.gmra.mrb[84].mxu1 %vm1511_vm12, %v10755_v51 }
 0x15e   : > { %9263 = vmatprep.mubr.msk.bf16.mxu0 %vm1511_vm12, %v10564_v53  ;;  %9293 = vmatprep.mubr.msk.bf16.mxu1 %vm1511_vm12, %v10775_v1 }
 0x165   : > { %9264 = vmatmul.mubr.msk.bf16.gmra.mrb[60].mxu0 %vm1511_vm12, %v10866_v48  ;;  %9294 = vmatmul.mubr.msk.bf16.gmra.mrb[88].mxu1 %vm1511_vm12, %v10766_v59 }
 0x166   : > { %9267 = vmatprep.mubr.msk.bf16.mxu0 %vm1511_vm12, %v10878_v57  ;;  %9297 = vmatprep.mubr.msk.bf16.mxu1 %vm1511_vm12, %v10797_v7 }
 0x16d   : > { %9268 = vmatmul.mubr.msk.bf16.gmra.mrb[64].mxu0 %vm1511_vm12, %v10598_v37  ;;  %9298 = vmatmul.mubr.msk.bf16.gmra.mrb[92].mxu1 %vm1511_vm12, %v10807_v40 }
 0x16e   : > { %9271 = vmatprep.mubr.msk.bf16.mxu0 %vm1511_vm12, %v10932_v39  ;;  %9301 = vmatprep.mubr.msk.bf16.mxu1 %vm1511_vm12, %v10495_v31 }
 0x175   : > { %9272 = vmatmul.mubr.msk.bf16.gmra.mrb[68].mxu0 %vm1511_vm12, %v10944_v34  ;;  %9302 = vmatmul.mubr.msk.bf16.gmra.mrb[96].mxu1 %vm1511_vm12, %v10499_v12 }
 0x176   : > { %9305 = vmatprep.mubr.msk.bf16.mxu1 %vm1511_vm12, %v10510_v23  ;;  %9327 = vmatprep.mubr.msk.bf16.mxu0 %vm1511_vm12, %v10633_v13 }
 0x178   : > { %v9153_v30 = vpop.f32.mrb[0].mxu1 }
 0x179   : > { %v10954_v31 = vpop.f32.mrb[1].mxu1 }
 0x17a   : > { %v10956_v17 = vpop.f32.mrb[2].mxu1 }
 0x17b   : > { %v10958_v38 = vpop.f32.mrb[3].mxu1 }
 0x17d   : > { %9306 = vmatmul.mubr.msk.bf16.gmra.mrb[100].mxu1 %vm1511_vm12, %v10537_v50  ;;  %9328 = vmatmul.mubr.msk.bf16.vlgmr.msra.gmra.mrb[72].mxu0 %vm1511_vm12, %v10637_v26 }
 0x17e   : > { %9309 = vmatprep.mubr.msk.bf16.mxu1 %vm1511_vm12, %v10532_v63  ;;  %9331 = vmatprep.mubr.msk.bf16.mxu0 %vm1511_vm12, %v10656_v27 }
 0x180   : > { %v10968_v12 = vpop.f32.mrb[4].mxu1 }
 0x181   : > { %v10970_v23 = vpop.f32.mrb[5].mxu1 }
 0x182   : > { %v10972_v13 = vpop.f32.mrb[6].mxu1 }
 0x183   : > { %v1728_v36 = vpop.f32.mrb[7].mxu1 }
 0x185   : > { %9310 = vmatmul.mubr.msk.bf16.gmra.mrb[104].mxu1 %vm1511_vm12, %v10548_v20  ;;  %9332 = vmatmul.mubr.msk.bf16.gmra.mrb[76].mxu0 %vm1511_vm12, %v10661_v33 }
 0x186   : > { %9313 = vmatprep.mubr.msk.bf16.mxu1 %vm1511_vm12, %v10555_v18  ;;  %9335 = vmatprep.mubr.msk.bf16.mxu0 %vm1511_vm12, %v10691_v8 }
 0x188   : > { %v10982_v63 = vpop.f32.mrb[8].mxu1 }
 0x189   : > { %v1740_v50 = vpop.f32.mrb[9].mxu1 }
 0x18a   : > { %v9162_v26 = vpop.f32.mrb[10].mxu1 }
 0x18b   : > { %v10984_v27 = vpop.f32.mrb[11].mxu1 }
 0x18d   : > { %9314 = vmatmul.mubr.msk.bf16.gmra.mrb[108].mxu1 %vm1511_vm12, %v10571_v55  ;;  %9336 = vmatmul.mubr.msk.bf16.gmra.mrb[80].mxu0 %vm1511_vm12, %v10703_v41 }
 0x18e   : > { %9317 = vmatprep.mubr.msk.bf16.mxu1 %vm1511_vm12, %v10582_v14  ;;  %9339 = vmatprep.mubr.msk.bf16.mxu0 %vm1511_vm12, %v10715_v62 }
 0x190   : > { %v9165_v20 = vpop.f32.mrb[12].mxu1 }
 0x191   : > { %v10994_v18 = vpop.f32.mrb[13].mxu1 }
 0x192   : > { %v10996_v61 = vpop.f32.mrb[14].mxu1 }
 0x193   : > { %v10998_v49 = vpop.f32.mrb[15].mxu1 }
 0x195   : > { %9318 = vmatmul.mubr.msk.bf16.gmra.mrb[112].mxu1 %vm1511_vm12, %v10589_v21  ;;  %9340 = vmatmul.mubr.msk.bf16.gmra.mrb[84].mxu0 %vm1511_vm12, %v10733_v58 }
 0x196   : > { %9321 = vmatprep.mubr.msk.bf16.mxu1 %vm1511_vm12, %v10605_v43  ;;  %9343 = vmatprep.mubr.msk.bf16.mxu0 %vm1511_vm12, %v10745_v45 }
 0x198   : > { %v11008_v55 = vpop.f32.mrb[16].mxu1 }
 0x199   : > { %v11010_v14 = vpop.f32.mrb[17].mxu1 }
 0x19a   : > { %v11012_v5 = vpop.f32.mrb[18].mxu1 }
 0x19b   : > { %v1772_v51 = vpop.f32.mrb[19].mxu1 }
 0x19d   : > { %9322 = vmatmul.mubr.msk.bf16.gmra.mrb[116].mxu1 %vm1511_vm12, %v10618_v32  ;;  %9344 = vmatmul.mubr.msk.bf16.gmra.mrb[88].mxu0 %vm1511_vm12, %v10750_v35 }
 0x19e   : > { %9347 = vmatprep.mubr.msk.bf16.mxu0 %vm1511_vm12, %v10771_v4  ;;  %9377 = vmatprep.mubr.msk.bf16.mxu1 %vm1511_vm12, %v10661_v33 }
 0x1a4   : > { %v11022_v21 = vpop.f32.mrb[20].mxu1 }
 0x1a5   : > { %v1784_v43 = vpop.f32.mrb[21].mxu1  ;;  %9348 = vmatmul.mubr.msk.bf16.gmra.mrb[92].mxu0 %vm1511_vm12, %v10785_v15  ;;  %9378 = vmatmul.mubr.msk.bf16.vlgmr.msra.gmra.mrb[120].mxu1 %vm1511_vm12, %v10691_v8 }
 0x1a6   : > { %v9174_v59 = vpop.f32.mrb[22].mxu1  ;;  %9351 = vmatprep.mubr.msk.bf16.mxu0 %vm1511_vm12, %v10794_v2  ;;  %9381 = vmatprep.mubr.msk.bf16.mxu1 %vm1511_vm12, %v10703_v41 }
 0x1a7   : > { %v11032_v32 = vpop.f32.mrb[23].mxu1 }
 0x1ac   : > { %v9179_v1 = vpop.f32.mrb[24].mxu1 }
 0x1ad   : > { %v1935_v33 = vpop.f32.mrb[25].mxu1  ;;  %9352 = vmatmul.mubr.msk.bf16.gmra.mrb[96].mxu0 %vm1511_vm12, %v10810_v19  ;;  %9382 = vmatmul.mubr.msk.bf16.gmra.mrb[124].mxu1 %vm1511_vm12, %v10715_v62 }
 0x1ae   : > { %v9180_v7 = vpop.f32.mrb[26].mxu1  ;;  %9355 = vmatprep.mubr.msk.bf16.mxu0 %vm1511_vm12, %v10812_v52  ;;  %9385 = vmatprep.mubr.msk.bf16.mxu1 %vm1511_vm12, %v10733_v58 }
 0x1af   : > { %v1938_v8 = vpop.f32.mrb[27].mxu1 }
 0x1b3   : > { %v9129_v22 = vpop.f32.mrb[0].mxu0 }
 0x1b4   : > { %v1622_v41 = vpop.f32.mrb[1].mxu0  ;;  %v9183_v0 = vpop.f32.mrb[28].mxu1 }
 0x1b5   : > { %v11042_v40 = vadd.f32 %v1935_v33, %v1622_v41  ;;  %v9130_v3 = vpop.f32.mrb[2].mxu0  ;;  %v1950_v6 = vpop.f32.mrb[29].mxu1  ;;  %9356 = vmatmul.mubr.msk.bf16.gmra.mrb[100].mxu0 %vm1511_vm12, %v10479_v9  ;;  %9386 = vmatmul.mubr.msk.bf16.gmra.mrb[128].mxu1 %vm1511_vm12, %v10745_v45 }
 0x1b6   : > { %v11048_v62 = vadd.f32 %v9180_v7, %v9130_v3  ;;  %v1625_v25 = vpop.f32.mrb[3].mxu0  ;;  %v9184_v60 = vpop.f32.mrb[30].mxu1  ;;  %9359 = vmatprep.mubr.msk.bf16.mxu0 %vm1511_vm12, %v10824_v47  ;;  %9389 = vmatprep.mubr.msk.bf16.mxu1 %vm1511_vm12, %v10750_v35 }
 0x1b7   : > { %v11054_v58 = vadd.f32 %v1938_v8, %v1625_v25  ;;  %v1953_v11 = vpop.f32.mrb[31].mxu1 }
 0x1bd   : > { %9360 = vmatmul.mubr.msk.bf16.gmra.mrb[104].mxu0 %vm1511_vm12, %v10838_v28  ;;  %9390 = vmatmul.mubr.msk.bf16.gmra.mrb[132].mxu1 %vm1511_vm12, %v10771_v4 }
 0x1be   : > { %9363 = vmatprep.mubr.msk.bf16.mxu0 %vm1511_vm12, %v10525_v10  ;;  %9393 = vmatprep.mubr.msk.bf16.mxu1 %vm1511_vm12, %v10785_v15 }
 0x1bf   : > { %v9133_v45 = vpop.f32.mrb[4].mxu0 }
 0x1c0   : > { %v11064_v44 = vadd.f32 %v9183_v0, %v9133_v45  ;;  %v1637_v24 = vpop.f32.mrb[5].mxu0  ;;  %v9187_v56 = vpop.f32.mrb[32].mxu1 }
 0x1c1   : > { %v11066_v35 = vadd.f32 %v1950_v6, %v1637_v24  ;;  %v9134_v16 = vpop.f32.mrb[6].mxu0  ;;  %v1965_v30 = vpop.f32.mrb[33].mxu1 }
 0x1c2   : > { %v11068_v46 = vadd.f32 %v9184_v60, %v9134_v16  ;;  %v1640_v36 = vpop.f32.mrb[7].mxu0  ;;  %v9188_v50 = vpop.f32.mrb[34].mxu1 }
 0x1c3   : > { %v1967_v4 = vpop.f32.mrb[35].mxu1 }
 0x1c5   : > { %9364 = vmatmul.mubr.msk.bf16.gmra.mrb[108].mxu0 %vm1511_vm12, %v10852_v29  ;;  %9394 = vmatmul.mubr.msk.bf16.gmra.mrb[136].mxu1 %vm1511_vm12, %v10794_v2 }
 0x1c6   : > { %9367 = vmatprep.mubr.msk.bf16.mxu0 %vm1511_vm12, %v10854_v42  ;;  %9397 = vmatprep.mubr.msk.bf16.mxu1 %vm1511_vm12, %v10810_v19 }
 0x1ca   : > { %v9137_v15 = vpop.f32.mrb[8].mxu0  ;;  %v9191_v20 = vpop.f32.mrb[36].mxu1 }
 0x1cb   : > { %v11078_v26 = vadd.f32 %v9187_v56, %v9137_v15  ;;  %v1652_v51 = vpop.f32.mrb[9].mxu0  ;;  %v1979_v43 = vpop.f32.mrb[37].mxu1 }
 0x1cc   : > { %v9138_v59 = vpop.f32.mrb[10].mxu0  ;;  %v9192_v1 = vpop.f32.mrb[38].mxu1 }
 0x1cd   : > { %v1654_v33 = vpop.f32.mrb[11].mxu0  ;;  %v1982_v8 = vpop.f32.mrb[39].mxu1  ;;  %9368 = vmatmul.mubr.msk.bf16.gmra.mrb[112].mxu0 %vm1511_vm12, %v10564_v53  ;;  %9398 = vmatmul.mubr.msk.bf16.gmra.mrb[140].mxu1 %vm1511_vm12, %v10812_v52 }
 0x1ce   : > { %v11080_v7 = vadd.f32 %v1967_v4, %v1654_v33  ;;  %9371 = vmatprep.mubr.msk.bf16.mxu0 %vm1511_vm12, %v10866_v48  ;;  %9401 = vmatprep.mubr.msk.bf16.mxu1 %vm1511_vm12, %v10479_v9 }
 0x1d2   : > { %v9195_v2 = vpop.f32.mrb[40].mxu1 }
 0x1d3   : > { %v9141_v19 = vpop.f32.mrb[12].mxu0  ;;  %v1994_v22 = vpop.f32.mrb[41].mxu1 }
 0x1d4   : > { %v1666_v41 = vpop.f32.mrb[13].mxu0  ;;  %v9196_v0 = vpop.f32.mrb[42].mxu1 }
 0x1d5   : > { %v11090_v3 = vadd.f32 %v1979_v43, %v1666_v41  ;;  %v9142_v6 = vpop.f32.mrb[14].mxu0  ;;  %v1997_v25 = vpop.f32.mrb[43].mxu1  ;;  %9372 = vmatmul.mubr.msk.bf16.gmra.mrb[116].mxu0 %vm1511_vm12, %v10878_v57  ;;  %9402 = vmatmul.mubr.msk.bf16.gmra.mrb[144].mxu1 %vm1511_vm12, %v10824_v47 }
 0x1d6   : > { %v11096_v52 = vadd.f32 %v9192_v1, %v9142_v6  ;;  %v1669_v60 = vpop.f32.mrb[15].mxu0  ;;  %9405 = vmatprep.mubr.msk.bf16.mxu1 %vm1511_vm12, %v10838_v28 }
 0x1d7   : > { %v11100_v9 = vadd.f32 %v1982_v8, %v1669_v60 }
 0x1dd   : > { %9406 = vmatmul.mubr.msk.bf16.gmra.mrb[148].mxu1 %vm1511_vm12, %v10525_v10 }
 0x1de   : > { %9409 = vmatprep.mubr.msk.bf16.mxu1 %vm1511_vm12, %v10852_v29 }
 0x1df   : > { %v9145_v11 = vpop.f32.mrb[16].mxu0 }
 0x1e0   : > { %v11106_v45 = vadd.f32 %v9195_v2, %v9145_v11  ;;  %v1681_v24 = vpop.f32.mrb[17].mxu0  ;;  %v9199_v47 = vpop.f32.mrb[44].mxu1 }
 0x1e1   : > { %v11108_v56 = vadd.f32 %v1994_v22, %v1681_v24  ;;  %v9146_v16 = vpop.f32.mrb[18].mxu0  ;;  %v2009_v36 = vpop.f32.mrb[45].mxu1 }
 0x1e2   : > { %v11110_v30 = vadd.f32 %v9196_v0, %v9146_v16  ;;  %v1684_v28 = vpop.f32.mrb[19].mxu0  ;;  %v9200_v50 = vpop.f32.mrb[46].mxu1 }
 0x1e3   : > { %v2011_v4 = vpop.f32.mrb[47].mxu1 }
 0x1e5   : > { %9410 = vmatmul.mubr.msk.bf16.gmra.mrb[152].mxu1 %vm1511_vm12, %v10854_v42 }
 0x1e6   : > { %9413 = vmatprep.mubr.msk.bf16.mxu1 %vm1511_vm12, %v10564_v53 }
 0x1e8   : > { %v9149_v10 = vpop.f32.mrb[20].mxu0  ;;  %v9203_v29 = vpop.f32.mrb[48].mxu1 }
 0x1e9   : > { %v11116_v15 = vadd.f32 %v9199_v47, %v9149_v10  ;;  %v1696_v20 = vpop.f32.mrb[21].mxu0  ;;  %v2023_v51 = vpop.f32.mrb[49].mxu1 }
 0x1ea   : > { %v11119_v43 = vadd.f32 %v2023_v51, %v10954_v31  ;;  %v9150_v59 = vpop.f32.mrb[22].mxu0  ;;  %v9204_v1 = vpop.f32.mrb[50].mxu1 }
 0x1eb   : > { %v11122_v33 = vadd.f32 %v9204_v1, %v10956_v17  ;;  %v1698_v8 = vpop.f32.mrb[23].mxu0  ;;  %v2026_v2 = vpop.f32.mrb[51].mxu1 }
 0x1ec   : > { %v11124_v42 = vadd.f32 %v2011_v4, %v1698_v8  ;;  %v11127_v53 = vadd.f32 %v2026_v2, %v10958_v38 }
 0x1ed   : > { %9414 = vmatmul.mubr.msk.bf16.gmra.mrb[156].mxu1 %vm1511_vm12, %v10866_v48 }
 0x1ee   : > { %9417 = vmatprep.mubr.msk.bf16.mxu1 %vm1511_vm12, %v10878_v57 }
 0x1f0   : > { %v9207_v31 = vpop.f32.mrb[52].mxu1  ;;  %v9229_v19 = vpop.f32.mrb[24].mxu0 }
 0x1f1   : > { %v11134_v22 = vadd.f32 %v9207_v31, %v10968_v12  ;;  %v2038_v17 = vpop.f32.mrb[53].mxu1  ;;  %v2167_v41 = vpop.f32.mrb[25].mxu0 }
 0x1f2   : > { %v11137_v0 = vadd.f32 %v2038_v17, %v10970_v23  ;;  %v11140_v6 = vadd.f32 %v2167_v41, %v11042_v40  ;;  %v9208_v38 = vpop.f32.mrb[54].mxu1  ;;  %v9230_v25 = vpop.f32.mrb[26].mxu0  ;;  %v14242_v17 = vld [vmem:[#allocation4_spill] sm:$0xff] }
 0x1f3   : > { %v11143_v48 = vadd.f32 %v9208_v38, %v10972_v13  ;;  %v11146_v57 = vadd.f32 %v9230_v25, %v11048_v62  ;;  %v2041_v60 = vpop.f32.mrb[55].mxu1  ;;  %v2170_v11 = vpop.f32.mrb[27].mxu0  ;;  %9922 = vrot.lane.b32.xlu1 %v14242_v17, %s9958_s24 }
 0x1f4   : > { %14233 = vst [vmem:[#allocation5_spill] sm:$0xff] %v11140_v6  ;;  %v11149_v12 = vadd.f32 %v2170_v11, %v11054_v58 }
 0x1f5   : > { %14234 = vst [vmem:[#allocation6_spill] sm:$0xff] %v11146_v57  ;;  %9418 = vmatmul.mubr.msk.bf16.gmra.mrb[160].mxu1 %vm1511_vm12, %v10598_v37 }
 0x1f6   : > { %14235 = vst [vmem:[#allocation7_spill] sm:$0xff] %v11149_v12  ;;  %9421 = vmatprep.mubr.msk.bf16.mxu1 %vm1511_vm12, %v10932_v39 }
 0x1f8   : > { %v9211_v23 = vpop.f32.mrb[56].mxu1  ;;  %v9233_v40 = vpop.f32.mrb[28].mxu0 }
 0x1f9   : > { %v11156_v24 = vadd.f32 %v9211_v23, %v10982_v63  ;;  %v11159_v13 = vadd.f32 %v9233_v40, %v11064_v44  ;;  %v2053_v62 = vpop.f32.mrb[57].mxu1  ;;  %v2182_v47 = vpop.f32.mrb[29].mxu0 }
 0x1fa   : > { %v11162_v16 = vadd.f32 %v2182_v47, %v11066_v35  ;;  %v9212_v58 = vpop.f32.mrb[58].mxu1  ;;  %v9234_v36 = vpop.f32.mrb[30].mxu0 }
 0x1fb   : > { %14236 = vst [vmem:[#allocation8_spill] sm:$0xff] %v11159_v13  ;;  %v11165_v37 = vadd.f32 %v9234_v36, %v11068_v46  ;;  %v2055_v28 = vpop.f32.mrb[59].mxu1  ;;  %v2185_v39 = vpop.f32.mrb[31].mxu0 }
 0x1fc   : > { %14237 = vst [vmem:[#allocation9_spill] sm:$0xff] %v11162_v16  ;;  %v11168_v50 = vadd.f32 %v2055_v28, %v10984_v27 }
 0x1fd   : > { %14238 = vst [vmem:[#allocation10_spill] sm:$0xff] %v11165_v37  ;;  %9422 = vmatmul.mubr.msk.bf16.gmra.mrb[164].mxu1 %vm1511_vm12, %v10944_v34 }
 0x200   : > { %v9215_v63 = vpop.f32.mrb[60].mxu1  ;;  %v9237_v44 = vpop.f32.mrb[32].mxu0 }
 0x201   : > { %v11173_v4 = vadd.f32 %v9237_v44, %v11078_v26  ;;  %v2067_v35 = vpop.f32.mrb[61].mxu1  ;;  %v2197_v10 = vpop.f32.mrb[33].mxu0 }
 0x202   : > { %v11176_v29 = vadd.f32 %v2067_v35, %v10994_v18  ;;  %v9216_v46 = vpop.f32.mrb[62].mxu1  ;;  %v9238_v20 = vpop.f32.mrb[34].mxu0 }
 0x203   : > { %14239 = vst [vmem:[#allocation11_spill] sm:$0xff] %v11173_v4  ;;  %v11179_v51 = vadd.f32 %v9216_v46, %v10996_v61  ;;  %v2070_v27 = vpop.f32.mrb[63].mxu1  ;;  %v2199_v59 = vpop.f32.mrb[35].mxu0 }
 0x204   : > { %v11182_v1 = vadd.f32 %v2070_v27, %v10998_v49  ;;  %v11185_v34 = vadd.f32 %v2199_v59, %v11080_v7 }
 0x206   : > { %14240 = vst [vmem:[#allocation12_spill] sm:$0xff] %v11185_v34 }
 0x208   : > { %v9219_v26 = vpop.f32.mrb[64].mxu1  ;;  %v9241_v18 = vpop.f32.mrb[36].mxu0 }
 0x209   : > { %v11190_v8 = vadd.f32 %v9219_v26, %v11008_v55  ;;  %v2082_v2 = vpop.f32.mrb[65].mxu1  ;;  %v2211_v61 = vpop.f32.mrb[37].mxu0 }
 0x20a   : > { %v11193_v31 = vadd.f32 %v2082_v2, %v11010_v14  ;;  %v11196_v49 = vadd.f32 %v2211_v61, %v11090_v3  ;;  %v9220_v19 = vpop.f32.mrb[66].mxu1  ;;  %v9242_v7 = vpop.f32.mrb[38].mxu0 }
 0x20b   : > { %v11201_v54 = vadd.f32 %v9220_v19, %v11012_v5  ;;  %v11204_v41 = vadd.f32 %v9242_v7, %v11096_v52  ;;  %v2085_v55 = vpop.f32.mrb[67].mxu1  ;;  %v2214_v38 = vpop.f32.mrb[39].mxu0 }
 0x20c   : > { %14241 = vst [vmem:[#allocation13_spill] sm:$0xff] %v11196_v49  ;;  %v11207_v25 = vadd.f32 %v2214_v38, %v11100_v9 }
 0x20d   : > { %14243 = vst [vmem:[#allocation4_spill] sm:$0xff] %v11204_v41 }
 0x20e   : > { %14244 = vst [vmem:[#allocation14_spill] sm:$0xff] %v11207_v25 }
 0x210   : > { %v9223_v14 = vpop.f32.mrb[68].mxu1  ;;  %v9245_v60 = vpop.f32.mrb[40].mxu0 }
 0x211   : > { %v11210_v3 = vadd.f32 %v9223_v14, %v11022_v21  ;;  %v11213_v11 = vadd.f32 %v9245_v60, %v11106_v45  ;;  %v2097_v23 = vpop.f32.mrb[69].mxu1  ;;  %v2226_v40 = vpop.f32.mrb[41].mxu0 }
 0x212   : > { %v11216_v5 = vadd.f32 %v2226_v40, %v11108_v56  ;;  %v9224_v52 = vpop.f32.mrb[70].mxu1  ;;  %v9246_v62 = vpop.f32.mrb[42].mxu0 }
 0x213   : > { %14245 = vst [vmem:[#allocation15_spill] sm:$0xff] %v11213_v11  ;;  %v11219_v47 = vadd.f32 %v9246_v62, %v11110_v30  ;;  %v2099_v9 = vpop.f32.mrb[71].mxu1  ;;  %v2229_v58 = vpop.f32.mrb[43].mxu0 }
 0x214   : > { %14246 = vst [vmem:[#allocation16_spill] sm:$0xff] %v11216_v5  ;;  %v11222_v36 = vadd.f32 %v2099_v9, %v11032_v32 }
 0x215   : > { %14247 = vst [vmem:[#allocation17_spill] sm:$0xff] %v11219_v47 }
 0x218   : > { %v9249_v21 = vpop.f32.mrb[44].mxu0  ;;  %v9279_v28 = vpop.f32.mrb[72].mxu1 }
 0x219   : > { %v11225_v45 = vadd.f32 %v9249_v21, %v11116_v15  ;;  %v2241_v39 = vpop.f32.mrb[45].mxu0  ;;  %v11227_v63 = vpop.f32.mrb[73].mxu1 }
 0x21a   : > { %v9250_v56 = vpop.f32.mrb[46].mxu0  ;;  %v11229_v44 = vpop.f32.mrb[74].mxu1 }
 0x21b   : > { %14248 = vst [vmem:[#allocation18_spill] sm:$0xff] %v11225_v45  ;;  %v2243_v35 = vpop.f32.mrb[47].mxu0  ;;  %v11231_v10 = vpop.f32.mrb[75].mxu1 }
 0x21c   : > { %v11234_v30 = vadd.f32 %v2243_v35, %v11124_v42 }
 0x21e   : > { %14249 = vst [vmem:[#allocation19_spill] sm:$0xff] %v11234_v30 }
 0x220   : > { %v9253_v46 = vpop.f32.mrb[48].mxu0  ;;  %v11236_v32 = vpop.f32.mrb[76].mxu1 }
 0x221   : > { %v2255_v20 = vpop.f32.mrb[49].mxu0  ;;  %v11238_v27 = vpop.f32.mrb[77].mxu1 }
 0x222   : > { %v11241_v15 = vadd.f32 %v2255_v20, %v11119_v43  ;;  %v9254_v59 = vpop.f32.mrb[50].mxu0  ;;  %v11243_v26 = vpop.f32.mrb[78].mxu1 }
 0x223   : > { %v11246_v18 = vadd.f32 %v9254_v59, %v11122_v33  ;;  %v2258_v2 = vpop.f32.mrb[51].mxu0  ;;  %v2510_v61 = vpop.f32.mrb[79].mxu1 }
 0x224   : > { %14250 = vst [vmem:[#allocation20_spill] sm:$0xff] %v11241_v15  ;;  %v11249_v42 = vadd.f32 %v2258_v2, %v11127_v53 }
 0x225   : > { %14251 = vst [vmem:[#allocation21_spill] sm:$0xff] %v11246_v18 }
 0x226   : > { %14252 = vst [vmem:[#allocation22_spill] sm:$0xff] %v11249_v42 }
 0x228   : > { %v9257_v19 = vpop.f32.mrb[52].mxu0  ;;  %v11251_v7 = vpop.f32.mrb[80].mxu1 }
 0x229   : > { %v11254_v17 = vadd.f32 %v9257_v19, %v11134_v22  ;;  %v2270_v55 = vpop.f32.mrb[53].mxu0  ;;  %v2522_v43 = vpop.f32.mrb[81].mxu1 }
 0x22a   : > { %v11257_v38 = vadd.f32 %v2270_v55, %v11137_v0  ;;  %v9258_v14 = vpop.f32.mrb[54].mxu0  ;;  %v9288_v60 = vpop.f32.mrb[82].mxu1 }
 0x22b   : > { %14253 = vst [vmem:[#allocation23_spill] sm:$0xff] %v11254_v17  ;;  %v11260_v33 = vadd.f32 %v9258_v14, %v11143_v48  ;;  %v2273_v23 = vpop.f32.mrb[55].mxu0  ;;  %v11262_v40 = vpop.f32.mrb[83].mxu1 }
 0x22c   : > { %14254 = vst [vmem:[#allocation24_spill] sm:$0xff] %v11257_v38 }
 0x22d   : > { %14255 = vst [vmem:[#allocation25_spill] sm:$0xff] %v11260_v33 }
 0x230   : > { %v9261_v53 = vpop.f32.mrb[56].mxu0  ;;  %v9291_v52 = vpop.f32.mrb[84].mxu1 }
 0x231   : > { %v11265_v62 = vadd.f32 %v9261_v53, %v11156_v24  ;;  %v2285_v22 = vpop.f32.mrb[57].mxu0  ;;  %v11267_v9 = vpop.f32.mrb[85].mxu1 }
 0x232   : > { %v9262_v58 = vpop.f32.mrb[58].mxu0  ;;  %v11269_v21 = vpop.f32.mrb[86].mxu1 }
 0x233   : > { %14256 = vst [vmem:[#allocation26_spill] sm:$0xff] %v11265_v62  ;;  %v2287_v0 = vpop.f32.mrb[59].mxu0  ;;  %v11271_v28 = vpop.f32.mrb[87].mxu1 }
 0x234   : > { %v11274_v48 = vadd.f32 %v2287_v0, %v11168_v50 }
 0x236   : > { %14257 = vst [vmem:[#allocation27_spill] sm:$0xff] %v11274_v48 }
 0x238   : > { %v9265_v39 = vpop.f32.mrb[60].mxu0  ;;  %v11276_v56 = vpop.f32.mrb[88].mxu1 }
 0x239   : > { %v2299_v35 = vpop.f32.mrb[61].mxu0  ;;  %v11278_v46 = vpop.f32.mrb[89].mxu1 }
 0x23a   : > { %v11281_v24 = vadd.f32 %v2299_v35, %v11176_v29  ;;  %v9266_v20 = vpop.f32.mrb[62].mxu0  ;;  %v11283_v59 = vpop.f32.mrb[90].mxu1 }
 0x23b   : > { %v11286_v2 = vadd.f32 %v9266_v20, %v11179_v51  ;;  %v2302_v61 = vpop.f32.mrb[63].mxu0  ;;  %v2554_v19 = vpop.f32.mrb[91].mxu1 }
 0x23c   : > { %14258 = vst [vmem:[#allocation28_spill] sm:$0xff] %v11281_v24  ;;  %v11289_v50 = vadd.f32 %v2302_v61, %v11182_v1 }
 0x23d   : > { %14259 = vst [vmem:[#allocation29_spill] sm:$0xff] %v11286_v2 }
 0x23e   : > { %14260 = vst [vmem:[#allocation30_spill] sm:$0xff] %v11289_v50 }
 0x240   : > { %v9269_v55 = vpop.f32.mrb[64].mxu0  ;;  %v11291_v43 = vpop.f32.mrb[92].mxu1 }
 0x241   : > { %v11294_v14 = vadd.f32 %v9269_v55, %v11190_v8  ;;  %v2314_v60 = vpop.f32.mrb[65].mxu0  ;;  %v2566_v29 = vpop.f32.mrb[93].mxu1 }
 0x242   : > { %v11297_v23 = vadd.f32 %v2314_v60, %v11193_v31  ;;  %v9270_v53 = vpop.f32.mrb[66].mxu0  ;;  %v9300_v52 = vpop.f32.mrb[94].mxu1 }
 0x243   : > { %14261 = vst [vmem:[#allocation31_spill] sm:$0xff] %v11294_v14  ;;  %v11300_v51 = vadd.f32 %v9270_v53, %v11201_v54  ;;  %v2317_v22 = vpop.f32.mrb[67].mxu0  ;;  %v11302_v58 = vpop.f32.mrb[95].mxu1 }
 0x244   : > { %14262 = vst [vmem:[#allocation32_spill] sm:$0xff] %v11297_v23 }
 0x245   : > { %14263 = vst [vmem:[#allocation33_spill] sm:$0xff] %v11300_v51 }
 0x248   : > { %v9273_v1 = vpop.f32.mrb[68].mxu0  ;;  %v9303_v0 = vpop.f32.mrb[96].mxu1 }
 0x249   : > { %v11305_v39 = vadd.f32 %v9273_v1, %v11210_v3  ;;  %v2329_v8 = vpop.f32.mrb[69].mxu0  ;;  %v11307_v35 = vpop.f32.mrb[97].mxu1 }
 0x24a   : > { %v9274_v20 = vpop.f32.mrb[70].mxu0  ;;  %v11309_v61 = vpop.f32.mrb[98].mxu1 }
 0x24b   : > { %14264 = vst [vmem:[#allocation34_spill] sm:$0xff] %v11305_v39  ;;  %v2331_v31 = vpop.f32.mrb[71].mxu0  ;;  %v11311_v19 = vpop.f32.mrb[99].mxu1 }
 0x24c   : > { %v11314_v54 = vadd.f32 %v2331_v31, %v11222_v36 }
 0x24e   : > { %14265 = vst [vmem:[#allocation35_spill] sm:$0xff] %v11314_v54 }
 0x250   : > { %v11316_v55 = vpop.f32.mrb[100].mxu1  ;;  %v9329_v60 = vpop.f32.mrb[72].mxu0 }
 0x251   : > { %v11318_v29 = vpop.f32.mrb[101].mxu1  ;;  %v2709_v53 = vpop.f32.mrb[73].mxu0 }
 0x252   : > { %v11320_v3 = vpop.f32.mrb[102].mxu1  ;;  %v9330_v52 = vpop.f32.mrb[74].mxu0  ;;  %v2710_v22 = vadd.f32 %v2709_v53, %v11227_v63 }
 0x253   : > { %v2598_v1 = vpop.f32.mrb[103].mxu1  ;;  %v2712_v0 = vpop.f32.mrb[75].mxu0  ;;  %v2720_v8 = vadd.f32 %v9330_v52, %v11229_v44 }
 0x254   : > { %v11325_v20 = vadd.f32 %v2712_v0, %v11231_v10 }
 0x258   : > { %v11327_v36 = vpop.f32.mrb[104].mxu1  ;;  %v9333_v31 = vpop.f32.mrb[76].mxu0 }
 0x259   : > { %v2610_v54 = vpop.f32.mrb[105].mxu1  ;;  %v2724_v60 = vpop.f32.mrb[77].mxu0  ;;  %v11330_v39 = vadd.f32 %v9333_v31, %v11236_v32  ;;  %v4232_v32 = vld [vmem:[%s14207_s5] sm:$0x7] }
 0x25a   : > { %v9312_v13 = vpop.f32.mrb[106].mxu1  ;;  %v9334_v57 = vpop.f32.mrb[78].mxu0  ;;  %v11333_v12 = vadd.f32 %v2724_v60, %v11238_v27  ;;  %9885 = vmatprep.subr.msk.bf16.mxu1 %vm1049_vm2, %v4232_v32 }
 0x25b   : > { %v11335_v63 = vpop.f32.mrb[107].mxu1  ;;  %v2727_v53 = vpop.f32.mrb[79].mxu0  ;;  %v11338_v44 = vadd.f32 %v9334_v57, %v11243_v26  ;;  %v8487_v13 = vld [vmem:[%s14207_s5 + $0x4] sm:$0x7] }
 0x25c   : > { %9884 = vmatprep.subr.msk.bf16.mxu0 %vm1049_vm2, %v8487_v13  ;;  %v4338_v26 = vsel %vm1049_vm2, %v8487_v13, 0 }
 0x25d   : > { %9426 = vmatpush3.bf16.msra.mxu0 %v4338_v26 }
 0x260   : > { %v9315_v10 = vpop.f32.mrb[108].mxu1  ;;  %v9337_v52 = vpop.f32.mrb[80].mxu0 }
 0x261   : > { %v11340_v1 = vpop.f32.mrb[109].mxu1  ;;  %v2739_v54 = vpop.f32.mrb[81].mxu0  ;;  %v11343_v0 = vadd.f32 %v9337_v52, %v11251_v7  ;;  %v4646_v7 = vsel %vm1049_vm2, %v4232_v32, 0 }
 0x262   : > { %v11351_v27 = vpop.f32.mrb[110].mxu1  ;;  %v9338_v57 = vpop.f32.mrb[82].mxu0  ;;  %9476 = vmatpush3.bf16.msra.mxu1 %v4646_v7 }
 0x263   : > { %v11357_v31 = vpop.f32.mrb[111].mxu1  ;;  %v2741_v60 = vpop.f32.mrb[83].mxu0 }
 0x264   : > { %v11360_v53 = vadd.f32 %v2741_v60, %v11262_v40 }
 0x268   : > { %v11362_v10 = vpop.f32.mrb[112].mxu1  ;;  %v9341_v52 = vpop.f32.mrb[84].mxu0 }
 0x269   : > { %v11364_v54 = vpop.f32.mrb[113].mxu1  ;;  %v2753_v57 = vpop.f32.mrb[85].mxu0 }
 0x26a   : > { %v11366_v6 = vpop.f32.mrb[114].mxu1  ;;  %v9342_v13 = vpop.f32.mrb[86].mxu0  ;;  %v11369_v14 = vadd.f32 %v2753_v57, %v11267_v9 }
 0x26b   : > { %v2642_v32 = vpop.f32.mrb[115].mxu1  ;;  %v2756_v2 = vpop.f32.mrb[87].mxu0  ;;  %v11372_v26 = vadd.f32 %v9342_v13, %v11269_v21 }
 0x26c   : > { %v11375_v40 = vadd.f32 %v2756_v2, %v11271_v28 }
 0x270   : > { %v11377_v7 = vpop.f32.mrb[116].mxu1  ;;  %v9345_v60 = vpop.f32.mrb[88].mxu0 }
 0x271   : > { %v2654_v52 = vpop.f32.mrb[117].mxu1  ;;  %v2768_v51 = vpop.f32.mrb[89].mxu0  ;;  %v11380_v24 = vadd.f32 %v9345_v60, %v11276_v56  ;;  %v11393_v56 = vld [vmem:[%s14206_s4] ss:$0 sm:$0xff] }
 0x272   : > { %v9324_v23 = vpop.f32.mrb[118].mxu1  ;;  %v9346_v48 = vpop.f32.mrb[90].mxu0  ;;  %v11383_v9 = vadd.f32 %v2768_v51, %v11278_v46 }
 0x273   : > { %v11385_v57 = vpop.f32.mrb[119].mxu1  ;;  %v2771_v21 = vpop.f32.mrb[91].mxu0  ;;  %v11388_v13 = vadd.f32 %v9346_v48, %v11283_v59 }
 0x278   : > { %v9349_v28 = vpop.f32.mrb[92].mxu0  ;;  %v9379_v2 = vpop.f32.mrb[120].mxu1 }
 0x279   : > { %v2783_v32 = vpop.f32.mrb[93].mxu0  ;;  %v2929_v50 = vpop.f32.mrb[121].mxu1  ;;  %v11396_v23 = vadd.f32 %v9349_v28, %v11291_v43 }
 0x27a   : > { %v3104_v46 = vadd.f32 %v2929_v50, %v2710_v22  ;;  %v9350_v51 = vpop.f32.mrb[94].mxu0  ;;  %v9380_v60 = vpop.f32.mrb[122].mxu1 }
 0x27b   : > { %v3106_v52 = vadd.f32 %v9380_v60, %v2720_v8  ;;  %v2785_v21 = vpop.f32.mrb[95].mxu0  ;;  %v2932_v17 = vpop.f32.mrb[123].mxu1 }
 0x27c   : > { %v3143_v48 = vadd.f32 %v11393_v56, %v3104_v46  ;;  %v3105_v59 = vadd.f32 %v2932_v17, %v11325_v20  ;;  %v11401_v2 = vadd.f32 %v2785_v21, %v11302_v58 }
 0x27d   : > { %v3145_v43 = vadd.f32 %v11393_v56, %v3106_v52 }
 0x27e   : > { %v3207_v32 = vmul.f32 0.01, %v3143_v48  ;;  %v3144_v62 = vadd.f32 %v11393_v56, %v3105_v59  ;;  %vm3175_vm13 = vcmp.gt.f32.partialorder %v3143_v48, 0.0 }
 0x27f   : > { %vm3177_vm15 = vcmp.gt.f32.partialorder %v3145_v43, 0.0 }
 0x280   : > { %vm3176_vm14 = vcmp.gt.f32.partialorder %v3144_v62, 0.0  ;;  %v3208_v50 = vmul.f32 0.01, %v3144_v62  ;;  %v9353_v22 = vpop.f32.mrb[96].mxu0  ;;  %v9383_v28 = vpop.f32.mrb[124].mxu1  ;;  %v3239_v46 = vsel %vm3175_vm13, %v3143_v48, %v3207_v32 }
 0x281   : > { %v3108_v8 = vadd.f32 %v9383_v28, %v11330_v39  ;;  %v2797_v51 = vpop.f32.mrb[97].mxu0  ;;  %v2944_v60 = vpop.f32.mrb[125].mxu1  ;;  %v3209_v28 = vmul.f32 0.01, %v3145_v43 }
 0x282   : > { %v3240_v18 = vsel %vm3176_vm14, %v3144_v62, %v3208_v50  ;;  %v3107_v17 = vadd.f32 %v2944_v60, %v11333_v12  ;;  %v9354_v58 = vpop.f32.mrb[98].mxu0  ;;  %v9384_v20 = vpop.f32.mrb[126].mxu1  ;;  %v11408_v21 = vadd.f32 %v2797_v51, %v11307_v35 }
 0x283   : > { %v3271_v59 = vpack.c.bf16 %v3240_v18, %v3239_v46  ;;  %v3147_v52 = vadd.f32 %v11393_v56, %v3108_v8  ;;  %v3109_v33 = vadd.f32 %v9384_v20, %v11338_v44  ;;  %v2800_v22 = vpop.f32.mrb[99].mxu0  ;;  %v2947_v15 = vpop.f32.mrb[127].mxu1  ;;  %v11413_v39 = vadd.f32 %v9354_v58, %v11309_v61 }
 0x284   : > { %v3146_v62 = vadd.f32 %v11393_v56, %v3107_v17  ;;  %v11417_v12 = vadd.f32 %v2800_v22, %v11311_v19  ;;  %v3241_v15 = vsel %vm3177_vm15, %v3145_v43, %v3209_v28 }
 0x285   : > { %v3288_v48 = vshrl.u32 %v3271_v59, 16  ;;  %v3211_v35 = vmul.f32 0.01, %v3147_v52  ;;  %v3148_v32 = vadd.f32 %v11393_v56, %v3109_v33  ;;  %v3291_v50 = vshll.u32 %v3271_v59, 16 }
 0x286   : > { %vm3178_vm0 = vcmp.gt.f32.partialorder %v3146_v62, 0.0  ;;  %v3210_v18 = vmul.f32 0.01, %v3146_v62  ;;  %vm3179_vm1 = vcmp.gt.f32.partialorder %v3147_v52, 0.0 }
 0x287   : > { %v3290_v44 = vrot.slane %v3288_v48, 7  ;;  %vm3180_vm5 = vcmp.gt.f32.partialorder %v3148_v32, 0.0  ;;  %v3212_v61 = vmul.f32 0.01, %v3148_v32  ;;  %v3243_v22 = vsel %vm3179_vm1, %v3147_v52, %v3211_v35 }
 0x288   : > { %v3242_v8 = vsel %vm3178_vm0, %v3146_v62, %v3210_v18  ;;  %v11420_v51 = vpop.f32.mrb[100].mxu0  ;;  %v9387_v60 = vpop.f32.mrb[128].mxu1 }
 0x289   : > { %v11422_v46 = vpack.c.bf16 %v3242_v8, %v3241_v15  ;;  %v3111_v19 = vadd.f32 %v9387_v60, %v11343_v0  ;;  %v11425_v17 = vpop.f32.mrb[101].mxu0  ;;  %v2959_v58 = vpop.f32.mrb[129].mxu1  ;;  %v11429_v33 = vsel %vm10040_vm4, %v3290_v44, 0  ;;  %v3293_v59 = vor.u32 %v3291_v50, %v3290_v44 }
 0x28a   : > { %v3244_v43 = vsel %vm3180_vm5, %v3148_v32, %v3212_v61  ;;  %v11431_v28 = vpop.f32.mrb[102].mxu0  ;;  %v9388_v62 = vpop.f32.mrb[130].mxu1  ;;  %v3768_v48 = vrot.slane %v11429_v33, 1  ;;  %v3471_v18 = vshll.u32 %v11429_v33, 16  ;;  %v3475_v38 = vshrl.u32 %v11429_v33, 16 }
 0x28b   : > { %v3295_v15 = vshrl.u32 %v11422_v46, 16  ;;  %v3273_v0 = vpack.c.bf16 %v3244_v43, %v3243_v22  ;;  %v3150_v8 = vadd.f32 %v11393_v56, %v3111_v19  ;;  %v2815_v60 = vpop.f32.mrb[103].mxu0  ;;  %v2961_v58 = vpop.f32.mrb[131].mxu1  ;;  %v11442_v35 = vsel %vm10040_vm4, 0, %v3293_v59 }
 0x28c   : > { %v3110_v50 = vadd.f32 %v2961_v58, %v11360_v53  ;;  %v3816_v52 = vsel %vm1049_vm2, %v3768_v48, 0  ;;  %v3473_v32 = vrot.slane %v3471_v18, 1  ;;  %v3298_v44 = vshll.u32 %v11422_v46, 16 }
 0x28d   : > { %v3302_v61 = vshrl.u32 %v3273_v0, 16  ;;  %vm3182_vm6 = vcmp.gt.f32.partialorder %v3150_v8, 0.0  ;;  %v3214_v22 = vmul.f32 0.01, %v3150_v8  ;;  %3953 = vrot.lane.b32.xlu1 %v3816_v52, %s9958_s24  ;;  %v3767_v43 = vrot.slane %v11442_v35, 1 }
 0x28e   : > { %v3149_v19 = vadd.f32 %v11393_v56, %v3110_v50  ;;  %v3297_v62 = vrot.slane %v3295_v15, 7  ;;  %v3477_v53 = vor.u32 %v3475_v38, %v3473_v32  ;;  %v3305_v60 = vshll.u32 %v3273_v0, 16 }
 0x28f   : > { %v3246_v58 = vsel %vm3182_vm6, %v3150_v8, %v3214_v22  ;;  %v3304_v30 = vrot.slane %v3302_v61, 7  ;;  %v3466_v59 = vshll.u32 %v11442_v35, 16  ;;  %v3769_v46 = vsel %vm998_vm3, %v3767_v43, %v3768_v48 }
 0x290   : > { %vm3181_vm9 = vcmp.gt.f32.partialorder %v3149_v19, 0.0  ;;  %v3213_v18 = vmul.f32 0.01, %v3149_v19  ;;  %v9361_v42 = vpop.f32.mrb[104].mxu0  ;;  %v9391_v11 = vpop.f32.mrb[132].mxu1  ;;  %v3464_v45 = vshrl.u32 %v11442_v35, 16  ;;  %3951 = vrot.lane.b32.xlu0 %v3769_v46, %s9958_s24 }
 0x291   : > { %v11453_v50 = vadd.f32 %v9361_v42, %v11327_v36  ;;  %v2827_v15 = vpop.f32.mrb[105].mxu0  ;;  %v2973_v38 = vpop.f32.mrb[133].mxu1  ;;  %v11457_v0 = vsel %vm10040_vm4, %v3297_v62, 0  ;;  %v3719_v52 = vsel %vm10081_vm8, %v3477_v53, 0  ;;  %v3307_v61 = vor.u32 %v3305_v60, %v3304_v30 }
 0x292   : > { %v3245_v48 = vsel %vm3181_vm9, %v3149_v19, %v3213_v18  ;;  %v3112_v11 = vadd.f32 %v2973_v38, %v11369_v14  ;;  %v9362_v22 = vpop.f32.mrb[106].mxu0  ;;  %v9392_v43 = vpop.f32.mrb[134].mxu1  ;;  %v3771_v46 = vrot.slane %v11457_v0, 1  ;;  %v11465_v42 = vsel %vm10040_vm4, %v3304_v30, 0 }
 0x293   : > { %v3274_v36 = vpack.c.bf16 %v3246_v58, %v3245_v48  ;;  %v3114_v15 = vadd.f32 %v9392_v43, %v11372_v26  ;;  %v2829_v41 = vpop.f32.mrb[107].mxu0  ;;  %v2976_v47 = vpop.f32.mrb[135].mxu1  ;;  %v3774_v49 = vrot.slane %v11465_v42, 1  ;;  %v3468_v53 = vrot.slane %v3466_v59, 1 }
 0x294   : > { %v3151_v19 = vadd.f32 %v11393_v56, %v3112_v11  ;;  %v11471_v14 = vadd.f32 %v2829_v41, %v11335_v63  ;;  %v3113_v60 = vadd.f32 %v2976_v47, %v11375_v40  ;;  %v3818_v30 = vsel %vm1049_vm2, %v3771_v46, 0  ;;  %3869 = vrot.lane.b32.xlu0 %v3719_v52, %s9960_s20 }
 0x295   : > { %v3309_v18 = vshrl.u32 %v3274_v36, 16  ;;  %v3153_v58 = vadd.f32 %v11393_v56, %v3114_v15  ;;  %v3300_v26 = vor.u32 %v3298_v44, %v3297_v62  ;;  %3957 = vrot.lane.b32.xlu1 %v3818_v30, %s9958_s24  ;;  %v3469_v41 = vor.u32 %v3468_v53, %v3464_v45 }
 0x296   : > { %vm3183_vm12 = vcmp.gt.f32.partialorder %v3151_v19, 0.0  ;;  %v3215_v59 = vmul.f32 0.01, %v3151_v19  ;;  %v3152_v38 = vadd.f32 %v11393_v56, %v3113_v60  ;;  %v3312_v47 = vshll.u32 %v3274_v36, 16 }
 0x297   : > { %v11481_v63 = vrot.slane %v3309_v18, 7  ;;  %v3820_v40 = vsel %vm1049_vm2, %v3774_v49, 0  ;;  %v11486_v48 = vsel %vm10040_vm4, 0, %v3307_v61  ;;  %vm3185_vm13 = vcmp.gt.f32.partialorder %v3153_v58, 0.0 }
 0x298   : > { %vm3184_vm14 = vcmp.gt.f32.partialorder %v3152_v38, 0.0  ;;  %v3216_v44 = vmul.f32 0.01, %v3152_v38  ;;  %v3474_v62 = vsel %vm679_vm7, %v3469_v41, %v3473_v32  ;;  %v9365_v52 = vpop.f32.mrb[108].mxu0  ;;  %v9395_v11 = vpop.f32.mrb[136].mxu1  ;;  %v3247_v22 = vsel %vm3183_vm12, %v3151_v19, %v3215_v59 }
 0x299   : > { %v3217_v43 = vmul.f32 0.01, %v3153_v58  ;;  %3961 = vrot.lane.b32.xlu1 %v3820_v40, %s9958_s24  ;;  %3867 = vrot.lane.b32.xlu0 %v3474_v62, %s9960_s20  ;;  %v3116_v45 = vadd.f32 %v9395_v11, %v11380_v24  ;;  %v2841_v36 = vpop.f32.mrb[109].mxu0  ;;  %v2988_v15 = vpop.f32.mrb[137].mxu1  ;;  %v3773_v61 = vrot.slane %v11486_v48, 1  ;;  %v11499_v19 = vsel %vm10040_vm4, 0, %v3300_v26 }
 0x29a   : > { %v3248_v53 = vsel %vm3184_vm14, %v3152_v38, %v3216_v44  ;;  %v11494_v60 = vadd.f32 %v2841_v36, %v11340_v1  ;;  %v3115_v32 = vadd.f32 %v2988_v15, %v11383_v9  ;;  %v9366_v30 = vpop.f32.mrb[110].mxu0  ;;  %v9396_v18 = vpop.f32.mrb[138].mxu1  ;;  %v3770_v26 = vrot.slane %v11499_v19, 1 }
 0x29b   : > { %v11501_v59 = vpack.c.bf16 %v3248_v53, %v3247_v22  ;;  %v3155_v24 = vadd.f32 %v11393_v56, %v3116_v45  ;;  %v11505_v41 = vadd.f32 %v9366_v30, %v11351_v27  ;;  %v3117_v38 = vadd.f32 %v9396_v18, %v11388_v13  ;;  %v2844_v40 = vpop.f32.mrb[111].mxu0  ;;  %v2991_v1 = vpop.f32.mrb[139].mxu1 }
 0x29c   : > { %v3154_v44 = vadd.f32 %v11393_v56, %v3115_v32  ;;  %v11510_v9 = vadd.f32 %v2844_v40, %v11357_v31  ;;  %v3775_v62 = vsel %vm998_vm3, %v3773_v61, %v3774_v49  ;;  %v3314_v52 = vor.u32 %v3312_v47, %v11481_v63 }
 0x29d   : > { %vm3187_vm15 = vcmp.gt.f32.partialorder %v3155_v24, 0.0  ;;  %v3219_v11 = vmul.f32 0.01, %v3155_v24  ;;  %3959 = vrot.lane.b32.xlu1 %v3775_v62, %s9958_s24  ;;  %v3156_v13 = vadd.f32 %v11393_v56, %v3117_v38  ;;  %v3772_v22 = vsel %vm998_vm3, %v3770_v26, %v3771_v46 }
 0x29e   : > { %vm3186_vm0 = vcmp.gt.f32.partialorder %v3154_v44, 0.0  ;;  %v3218_v27 = vmul.f32 0.01, %v3154_v44  ;;  %v3249_v31 = vsel %vm3185_vm13, %v3153_v58, %v3217_v43  ;;  %3955 = vrot.lane.b32.xlu0 %v3772_v22, %s9958_s24  ;;  %v3481_v49 = vshll.u32 %v11499_v19, 16 }
 0x29f   : > { %v3251_v45 = vsel %vm3187_vm15, %v3155_v24, %v3219_v11  ;;  %v3486_v47 = vshll.u32 %v11457_v0, 16  ;;  %vm3188_vm1 = vcmp.gt.f32.partialorder %v3156_v13, 0.0  ;;  %v3220_v15 = vmul.f32 0.01, %v3156_v13 }
 0x2a0   : > { %v3250_v36 = vsel %vm3186_vm0, %v3154_v44, %v3218_v27  ;;  %v3479_v61 = vshrl.u32 %v11499_v19, 16  ;;  %v9369_v53 = vpop.f32.mrb[112].mxu0  ;;  %v9399_v32 = vpop.f32.mrb[140].mxu1  ;;  %v3483_v18 = vrot.slane %v3481_v49, 1  ;;  %v3490_v40 = vshrl.u32 %v11457_v0, 16 }
 0x2a1   : > { %v11525_v30 = vpack.c.bf16 %v3250_v36, %v3249_v31  ;;  %v3488_v46 = vrot.slane %v3486_v47, 1  ;;  %v11528_v58 = vadd.f32 %v9369_v53, %v11362_v10  ;;  %v2856_v43 = vpop.f32.mrb[113].mxu0  ;;  %v3003_v24 = vpop.f32.mrb[141].mxu1  ;;  %v3252_v38 = vsel %vm3188_vm1, %v3156_v13, %v3220_v15 }
 0x2a2   : > { %v3119_v1 = vadd.f32 %v9399_v32, %v11396_v23  ;;  %v11533_v44 = vadd.f32 %v2856_v43, %v11364_v54  ;;  %v9370_v62 = vpop.f32.mrb[114].mxu0  ;;  %v9400_v26 = vpop.f32.mrb[142].mxu1  ;;  %v11535_v11 = vpack.c.bf16 %v3252_v38, %v3251_v45  ;;  %v3484_v27 = vor.u32 %v3483_v18, %v3479_v61 }
 0x2a3   : > { %v2859_v22 = vpop.f32.mrb[115].mxu0  ;;  %v3005_v31 = vpop.f32.mrb[143].mxu1  ;;  %v11539_v10 = vsel %vm10040_vm4, 0, %v3314_v52  ;;  %v3492_v49 = vor.u32 %v3490_v40, %v3488_v46  ;;  %v11543_v47 = vadd.f32 %v9370_v62, %v11366_v6  ;;  %v3316_v23 = vshrl.u32 %v11501_v59, 16 }
 0x2a4   : > { %v3158_v13 = vadd.f32 %v11393_v56, %v3119_v1  ;;  %v3118_v54 = vadd.f32 %v3005_v31, %v11401_v2  ;;  %v3489_v45 = vsel %vm679_vm7, %v3484_v27, %v3488_v46  ;;  %v11551_v36 = vsel %vm10040_vm4, %v11481_v63, 0 }
 0x2a5   : > { %3871 = vrot.lane.b32.xlu1 %v3489_v45, %s9960_s20  ;;  %v3720_v52 = vsel %vm10081_vm8, %v3492_v49, 0  ;;  %v3776_v2 = vrot.slane %v11539_v10, 1  ;;  %v3777_v61 = vrot.slane %v11551_v36, 1  ;;  %v3501_v53 = vshll.u32 %v11465_v42, 16 }
 0x2a6   : > { %vm3190_vm5 = vcmp.gt.f32.partialorder %v3158_v13, 0.0  ;;  %v3222_v15 = vmul.f32 0.01, %v3158_v13  ;;  %v3157_v6 = vadd.f32 %v11393_v56, %v3118_v54  ;;  %3873 = vrot.lane.b32.xlu0 %v3720_v52, %s9960_s20  ;;  %v3505_v63 = vshrl.u32 %v11465_v42, 16 }
 0x2a7   : > { %v3516_v46 = vshll.u32 %v11551_v36, 16  ;;  %v3778_v38 = vsel %vm998_vm3, %v3776_v2, %v3777_v61  ;;  %v3503_v40 = vrot.slane %v3501_v53, 1  ;;  %v3520_v1 = vshrl.u32 %v11551_v36, 16 }
 0x2a8   : > { %v3254_v32 = vsel %vm3190_vm5, %v3158_v13, %v3222_v15  ;;  %vm3189_vm6 = vcmp.gt.f32.partialorder %v3157_v6, 0.0  ;;  %v3221_v18 = vmul.f32 0.01, %v3157_v6  ;;  %v9373_v43 = vpop.f32.mrb[116].mxu0  ;;  %v9403_v24 = vpop.f32.mrb[144].mxu1  ;;  %v3494_v62 = vshrl.u32 %v11486_v48, 16 }
 0x2a9   : > { %v2871_v26 = vpop.f32.mrb[117].mxu0  ;;  %v3017_v27 = vpop.f32.mrb[145].mxu1  ;;  %3963 = vrot.lane.b32.xlu1 %v3778_v38, %s9958_s24  ;;  %v11567_v31 = vrot.slane %v3516_v46, 1  ;;  %v3496_v49 = vshll.u32 %v11486_v48, 16  ;;  %v11571_v13 = vadd.f32 %v9373_v43, %v11377_v7  ;;  %v3507_v15 = vor.u32 %v3505_v63, %v3503_v40 }
 0x2aa   : > { %v3253_v22 = vsel %vm3189_vm6, %v3157_v6, %v3221_v18  ;;  %v9374_v54 = vpop.f32.mrb[118].mxu0  ;;  %v9404_v45 = vpop.f32.mrb[146].mxu1  ;;  %v3120_v2 = vadd.f32 %v3017_v27, %v11408_v21  ;;  %v3323_v26 = vshrl.u32 %v11525_v30, 16  ;;  %v3326_v27 = vshll.u32 %v11525_v30, 16 }
 0x2ab   : > { %v11573_v52 = vpack.c.bf16 %v3254_v32, %v3253_v22  ;;  %v3122_v53 = vadd.f32 %v9404_v45, %v11413_v39  ;;  %v2873_v24 = vpop.f32.mrb[119].mxu0  ;;  %v3020_v6 = vpop.f32.mrb[147].mxu1  ;;  %v3522_v18 = vor.u32 %v3520_v1, %v11567_v31  ;;  %v3498_v46 = vrot.slane %v3496_v49, 1 }
 0x2ac   : > { %v11579_v38 = vadd.f32 %v2873_v24, %v11385_v57  ;;  %v3121_v7 = vadd.f32 %v3020_v6, %v11417_v12  ;;  %v3721_v43 = vsel %vm10081_vm8, %v3507_v15, 0  ;;  %v3159_v32 = vadd.f32 %v11393_v56, %v3120_v2 }
 0x2ad   : > { %3877 = vrot.lane.b32.xlu0 %v3721_v43, %s9960_s20  ;;  %v3722_v21 = vsel %vm10081_vm8, %v3522_v18, 0  ;;  %v3499_v39 = vor.u32 %v3498_v46, %v3494_v62  ;;  %v3319_v1 = vshll.u32 %v11501_v59, 16  ;;  %v3318_v12 = vrot.slane %v3316_v23, 7 }
 0x2ae   : > { %v3160_v63 = vadd.f32 %v11393_v56, %v3121_v7  ;;  %3881 = vrot.lane.b32.xlu1 %v3722_v21, %s9960_s20  ;;  %vm3191_vm9 = vcmp.gt.f32.partialorder %v3159_v32, 0.0  ;;  %v3223_v57 = vmul.f32 0.01, %v3159_v32  ;;  %v3330_v22 = vshrl.u32 %v11535_v11, 16 }
 0x2af   : > { %v3504_v54 = vsel %vm679_vm7, %v3499_v39, %v3503_v40  ;;  %v3161_v62 = vadd.f32 %v11393_v56, %v3122_v53  ;;  %v3321_v15 = vor.u32 %v3319_v1, %v3318_v12  ;;  %v11599_v23 = vsel %vm10040_vm4, %v3318_v12, 0 }
 0x2b0   : > { %vm3192_vm12 = vcmp.gt.f32.partialorder %v3160_v63, 0.0  ;;  %v9407_v49 = vpop.f32.mrb[148].mxu1  ;;  %v3224_v45 = vmul.f32 0.01, %v3160_v63  ;;  %v3255_v2 = vsel %vm3191_vm9, %v3159_v32, %v3223_v57  ;;  %v3822_v24 = vsel %vm1049_vm2, %v3777_v61, 0 }
 0x2b1   : > { %v3032_v59 = vpop.f32.mrb[149].mxu1  ;;  %3875 = vrot.lane.b32.xlu0 %v3504_v54, %s9960_s20  ;;  %v3509_v6 = vshrl.u32 %v11539_v10, 16  ;;  %v3780_v40 = vrot.slane %v11599_v23, 1  ;;  %v11606_v53 = vsel %vm10040_vm4, 0, %v3321_v15  ;;  %v3511_v7 = vshll.u32 %v11539_v10, 16 }
 0x2b2   : > { %v9408_v18 = vpop.f32.mrb[150].mxu1  ;;  %v3256_v46 = vsel %vm3192_vm12, %v3160_v63, %v3224_v45  ;;  %v3779_v21 = vrot.slane %v11606_v53, 1  ;;  %v2820_v61 = vadd.f32 %v11420_v51, %v11316_v55  ;;  %v2813_v39 = vadd.f32 %v11425_v17, %v11318_v29 }
 0x2b3   : > { %v3035_v43 = vpop.f32.mrb[151].mxu1  ;;  %v11609_v32 = vpack.c.bf16 %v3256_v46, %v3255_v2  ;;  %v3824_v63 = vsel %vm1049_vm2, %v3780_v40, 0  ;;  %v3513_v1 = vrot.slane %v3511_v7, 1  ;;  %v2823_v57 = vadd.f32 %v11431_v28, %v11320_v3 }
 0x2b4   : > { %v3325_v12 = vrot.slane %v3323_v26, 7  ;;  %v3333_v54 = vshll.u32 %v11535_v11, 16  ;;  %v3337_v45 = vshrl.u32 %v11573_v52, 16  ;;  %v3225_v15 = vmul.f32 0.01, %v3161_v62  ;;  %3969 = vrot.lane.b32.xlu1 %v3824_v63, %s9958_s24 }
 0x2b5   : > { %3965 = vrot.lane.b32.xlu0 %v3822_v24, %s9958_s24  ;;  %v3124_v55 = vadd.f32 %v9407_v49, %v2820_v61  ;;  %vm3193_vm13 = vcmp.gt.f32.partialorder %v3161_v62, 0.0  ;;  %v3514_v51 = vor.u32 %v3513_v1, %v3509_v6  ;;  %v3123_v29 = vadd.f32 %v3032_v59, %v2813_v39 }
 0x2b6   : > { %v3125_v17 = vadd.f32 %v9408_v18, %v2823_v57  ;;  %v3781_v2 = vsel %vm998_vm3, %v3779_v21, %v3780_v40  ;;  %v11627_v3 = vsel %vm10040_vm4, %v3325_v12, 0  ;;  %v3531_v28 = vshll.u32 %v11599_v23, 16 }
 0x2b7   : > { %v3163_v46 = vadd.f32 %v11393_v56, %v3124_v55  ;;  %v3519_v26 = vsel %vm679_vm7, %v3514_v51, %v11567_v31  ;;  %v3162_v49 = vadd.f32 %v11393_v56, %v3123_v29  ;;  %v3783_v59 = vrot.slane %v11627_v3, 1  ;;  %v11646_v29 = vld [vmem:[%s14207_s5 + $0x8] sm:$0x7] }
 0x2b8   : > { %v9411_v11 = vpop.f32.mrb[152].mxu1  ;;  %v3164_v24 = vadd.f32 %v11393_v56, %v3125_v17  ;;  %v3257_v18 = vsel %vm3193_vm13, %v3161_v62, %v3225_v15  ;;  %3967 = vrot.lane.b32.xlu1 %v3781_v2, %s9958_s24  ;;  %v3533_v7 = vrot.slane %v3531_v28, 1  ;;  %v3535_v63 = vshrl.u32 %v11599_v23, 16  ;;  %9886 = vmatprep.subr.msk.bf16.mxu0 %vm1049_vm2, %v11646_v29 }
 0x2b9   : > { %v3047_v6 = vpop.f32.mrb[153].mxu1  ;;  %3879 = vrot.lane.b32.xlu0 %v3519_v26, %s9960_s20  ;;  %vm3195_vm14 = vcmp.gt.f32.partialorder %v3163_v46, 0.0  ;;  %v3227_v40 = vmul.f32 0.01, %v3163_v46  ;;  %vm3194_vm15 = vcmp.gt.f32.partialorder %v3162_v49, 0.0  ;;  %v3826_v39 = vsel %vm1049_vm2, %v3783_v59, 0 }
 0x2ba   : > { %v9412_v43 = vpop.f32.mrb[154].mxu1  ;;  %v3226_v21 = vmul.f32 0.01, %v3162_v49  ;;  %vm3196_vm0 = vcmp.gt.f32.partialorder %v3164_v24, 0.0  ;;  %v3228_v31 = vmul.f32 0.01, %v3164_v24 }
 0x2bb   : > { %v3259_v61 = vsel %vm3195_vm14, %v3163_v46, %v3227_v40  ;;  %v3332_v62 = vrot.slane %v3330_v22, 7  ;;  %v3049_v1 = vpop.f32.mrb[155].mxu1  ;;  %v3524_v55 = vshrl.u32 %v11606_v53, 16  ;;  %v3526_v51 = vshll.u32 %v11606_v53, 16  ;;  %v11664_v6 = vld [vmem:[%s14209_s7 + $0x4] sm:$0x7] }
 0x2bc   : > { %v3258_v57 = vsel %vm3194_vm15, %v3162_v49, %v3226_v21  ;;  %v3260_v15 = vsel %vm3196_vm0, %v3164_v24, %v3228_v31  ;;  %3973 = vrot.lane.b32.xlu1 %v3826_v39, %s9958_s24  ;;  %v3537_v46 = vor.u32 %v3535_v63, %v3533_v7  ;;  %v3127_v49 = vadd.f32 %v9411_v11, %v11453_v50 }
 0x2bd   : > { %v11648_v17 = vpack.c.bf16 %v3258_v57, %v3257_v18  ;;  %v11650_v2 = vpack.c.bf16 %v3260_v15, %v3259_v61  ;;  %v3335_v22 = vor.u32 %v3333_v54, %v3332_v62  ;;  %v11655_v28 = vsel %vm10040_vm4, %v3332_v62, 0  ;;  %9887 = vmatprep.subr.msk.bf16.mxu1 %vm1049_vm2, %v11664_v6 }
 0x2be   : > { %v3528_v26 = vrot.slane %v3526_v51, 1  ;;  %v3126_v24 = vadd.f32 %v3049_v1, %v11471_v14  ;;  %v3339_v18 = vrot.slane %v3337_v45, 7  ;;  %v3344_v54 = vshrl.u32 %v11609_v32, 16 }
 0x2bf   : > { %v3328_v40 = vor.u32 %v3326_v27, %v3325_v12  ;;  %v3723_v50 = vsel %vm10081_vm8, %v3537_v46, 0  ;;  %v3786_v14 = vrot.slane %v11655_v28, 1  ;;  %v3166_v21 = vadd.f32 %v11393_v56, %v3127_v49 }
 0x2c0   : > { %v9415_v43 = vpop.f32.mrb[156].mxu1  ;;  %v3529_v11 = vor.u32 %v3528_v26, %v3524_v55  ;;  %v3340_v45 = vshll.u32 %v11573_v52, 16  ;;  %3885 = vrot.lane.b32.xlu0 %v3723_v50, %s9960_s20  ;;  %v3165_v30 = vadd.f32 %v11393_v56, %v3126_v24  ;;  %v11680_v27 = vsel %vm10040_vm4, 0, %v3335_v22 }
 0x2c1   : > { %v3061_v31 = vpop.f32.mrb[157].mxu1  ;;  %v3828_v61 = vsel %vm1049_vm2, %v3786_v14, 0  ;;  %vm3198_vm1 = vcmp.gt.f32.partialorder %v3166_v21, 0.0  ;;  %v3230_v39 = vmul.f32 0.01, %v3166_v21  ;;  %v11683_v1 = vrot.slane %v3344_v54, 7 }
 0x2c2   : > { %v9416_v12 = vpop.f32.mrb[158].mxu1  ;;  %v3342_v62 = vor.u32 %v3340_v45, %v3339_v18  ;;  %3977 = vrot.lane.b32.xlu1 %v3828_v61, %s9958_s24  ;;  %vm3197_vm5 = vcmp.gt.f32.partialorder %v3165_v30, 0.0  ;;  %v3229_v52 = vmul.f32 0.01, %v3165_v30  ;;  %v3534_v57 = vsel %vm679_vm7, %v3529_v11, %v3533_v7 }
 0x2c3   : > { %v3064_v63 = vpop.f32.mrb[159].mxu1  ;;  %v3785_v15 = vrot.slane %v11680_v27, 1  ;;  %v11690_v55 = vsel %vm10040_vm4, 0, %v3328_v40  ;;  %v3546_v51 = vshll.u32 %v11627_v3, 16  ;;  %v3262_v46 = vsel %vm3198_vm1, %v3166_v21, %v3230_v39 }
 0x2c4   : > { %3883 = vrot.lane.b32.xlu0 %v3534_v57, %s9960_s20  ;;  %v3261_v22 = vsel %vm3197_vm5, %v3165_v30, %v3229_v52  ;;  %v3782_v26 = vrot.slane %v11690_v55, 1  ;;  %v3541_v49 = vshll.u32 %v11690_v55, 16  ;;  %v3550_v43 = vshrl.u32 %v11627_v3, 16 }
 0x2c5   : > { %v11696_v24 = vpack.c.bf16 %v3262_v46, %v3261_v22  ;;  %v3787_v7 = vsel %vm998_vm3, %v3785_v15, %v3786_v14  ;;  %v3548_v54 = vrot.slane %v3546_v51, 1  ;;  %v3539_v40 = vshrl.u32 %v11690_v55, 16 }
 0x2c6   : > { %3975 = vrot.lane.b32.xlu1 %v3787_v7, %s9958_s24  ;;  %v3543_v50 = vrot.slane %v3541_v49, 1  ;;  %v3128_v11 = vadd.f32 %v3061_v31, %v11494_v60  ;;  %v3130_v21 = vadd.f32 %v9416_v12, %v11505_v41  ;;  %v3784_v30 = vsel %vm998_vm3, %v3782_v26, %v3783_v59 }
 0x2c7   : > { %v3552_v61 = vor.u32 %v3550_v43, %v3548_v54  ;;  %v3129_v14 = vadd.f32 %v3064_v63, %v11510_v9  ;;  %v3347_v52 = vshll.u32 %v11609_v32, 16  ;;  %v11714_v41 = vsel %vm10040_vm4, 0, %v3342_v62 }
 0x2c8   : > { %v9419_v45 = vpop.f32.mrb[160].mxu1  ;;  %3971 = vrot.lane.b32.xlu0 %v3784_v30, %s9958_s24  ;;  %v3544_v57 = vor.u32 %v3543_v50, %v3539_v40  ;;  %v3167_v15 = vadd.f32 %v11393_v56, %v3128_v11  ;;  %v11718_v59 = vsel %vm10040_vm4, %v3339_v18, 0  ;;  %v3351_v63 = vshrl.u32 %v11648_v17, 16 }
 0x2c9   : > { %v3076_v39 = vpop.f32.mrb[161].mxu1  ;;  %v3168_v60 = vadd.f32 %v11393_v56, %v3129_v14  ;;  %v3349_v31 = vor.u32 %v3347_v52, %v11683_v1  ;;  %v3724_v46 = vsel %vm10081_vm8, %v3552_v61, 0  ;;  %v3169_v18 = vadd.f32 %v11393_v56, %v3130_v21 }
 0x2ca   : > { %v9420_v51 = vpop.f32.mrb[162].mxu1  ;;  %v3549_v32 = vsel %vm679_vm7, %v3544_v57, %v3548_v54  ;;  %vm3199_vm6 = vcmp.gt.f32.partialorder %v3167_v15, 0.0  ;;  %v3231_v12 = vmul.f32 0.01, %v3167_v15  ;;  %v3788_v22 = vrot.slane %v11714_v41, 1 }
 0x2cb   : > { %v3079_v9 = vpop.f32.mrb[163].mxu1  ;;  %3887 = vrot.lane.b32.xlu1 %v3549_v32, %s9960_s20  ;;  %vm3200_vm9 = vcmp.gt.f32.partialorder %v3168_v60, 0.0  ;;  %v3232_v62 = vmul.f32 0.01, %v3168_v60  ;;  %v3789_v26 = vrot.slane %v11718_v59, 1  ;;  %v3561_v49 = vshll.u32 %v11655_v28, 16 }
 0x2cc   : > { %3889 = vrot.lane.b32.xlu0 %v3724_v46, %s9960_s20  ;;  %v3358_v7 = vshrl.u32 %v11650_v2, 16  ;;  %v3263_v54 = vsel %vm3199_vm6, %v3167_v15, %v3231_v12  ;;  %v3576_v40 = vshll.u32 %v11718_v59, 16  ;;  %v3565_v61 = vshrl.u32 %v11655_v28, 16 }
 0x2cd   : > { %v3264_v43 = vsel %vm3200_vm9, %v3168_v60, %v3232_v62  ;;  %v3790_v11 = vsel %vm998_vm3, %v3788_v22, %v3789_v26  ;;  %v3563_v30 = vrot.slane %v3561_v49, 1  ;;  %v3580_v52 = vshrl.u32 %v11718_v59, 16 }
 0x2ce   : > { %v11733_v50 = vpack.c.bf16 %v3264_v43, %v3263_v54  ;;  %v11738_v14 = vrot.slane %v3576_v40, 1  ;;  %v3556_v57 = vshll.u32 %v11680_v27, 16  ;;  %v3132_v15 = vadd.f32 %v9419_v45, %v11528_v58 }
 0x2cf   : > { %3979 = vrot.lane.b32.xlu1 %v3790_v11, %s9958_s24  ;;  %v3233_v9 = vmul.f32 0.01, %v3169_v18  ;;  %v3567_v32 = vor.u32 %v3565_v61, %v3563_v30  ;;  %v3554_v12 = vshrl.u32 %v11680_v27, 16  ;;  %v3131_v46 = vadd.f32 %v3076_v39, %v11533_v44 }
 0x2d0   : > { %v9423_v21 = vpop.f32.mrb[164].mxu1  ;;  %v3582_v22 = vor.u32 %v3580_v52, %v11738_v14  ;;  %v3558_v49 = vrot.slane %v3556_v57, 1  ;;  %v3171_v54 = vadd.f32 %v11393_v56, %v3132_v15  ;;  %v3133_v43 = vadd.f32 %v9420_v51, %v11543_v47 }
 0x2d1   : > { %v3091_v60 = vpop.f32.mrb[165].mxu1  ;;  %vm3201_vm12 = vcmp.gt.f32.partialorder %v3169_v18, 0.0  ;;  %v3725_v58 = vsel %vm10081_vm8, %v3567_v32, 0  ;;  %v3170_v45 = vadd.f32 %v11393_v56, %v3131_v46  ;;  %v11754_v11 = vsel %vm10040_vm4, %v11683_v1, 0 }
 0x2d2   : > { %v9424_v62 = vpop.f32.mrb[166].mxu1  ;;  %v3353_v44 = vrot.slane %v3351_v63, 7  ;;  %3893 = vrot.lane.b32.xlu0 %v3725_v58, %s9960_s20  ;;  %v3726_v39 = vsel %vm10081_vm8, %v3582_v22, 0  ;;  %v3559_v61 = vor.u32 %v3558_v49, %v3554_v12  ;;  %v3235_v47 = vmul.f32 0.01, %v3171_v54 }
 0x2d3   : > { %v3093_v40 = vpop.f32.mrb[167].mxu1  ;;  %3897 = vrot.lane.b32.xlu1 %v3726_v39, %s9960_s20  ;;  %vm3203_vm13 = vcmp.gt.f32.partialorder %v3171_v54, 0.0  ;;  %vm3202_vm14 = vcmp.gt.f32.partialorder %v3170_v45, 0.0  ;;  %v3234_v51 = vmul.f32 0.01, %v3170_v45  ;;  %v3172_v52 = vadd.f32 %v11393_v56, %v3133_v43 }
 0x2d4   : > { %v3360_v57 = vrot.slane %v3358_v7, 7  ;;  %v3265_v15 = vsel %vm3201_vm12, %v3169_v18, %v3233_v9  ;;  %v3564_v1 = vsel %vm679_vm7, %v3559_v61, %v3563_v30  ;;  %v3792_v63 = vrot.slane %v11754_v11, 1 }
 0x2d5   : > { %v3266_v60 = vsel %vm3202_vm14, %v3170_v45, %v3234_v51  ;;  %vm3204_vm15 = vcmp.gt.f32.partialorder %v3172_v52, 0.0  ;;  %v3236_v32 = vmul.f32 0.01, %v3172_v52  ;;  %v11765_v12 = vsel %vm10040_vm4, 0, %v3349_v31 }
 0x2d6   : > { %3891 = vrot.lane.b32.xlu0 %v3564_v1, %s9960_s20  ;;  %v3267_v46 = vsel %vm3203_vm13, %v3171_v54, %v3235_v47  ;;  %v11768_v62 = vpack.c.bf16 %v3266_v60, %v3265_v15  ;;  %v3832_v22 = vsel %vm1049_vm2, %v3792_v63, 0  ;;  %v3791_v18 = vrot.slane %v11765_v12, 1 }
 0x2d7   : > { %v3268_v7 = vsel %vm3204_vm15, %v3172_v52, %v3236_v32  ;;  %3985 = vrot.lane.b32.xlu1 %v3832_v22, %s9958_s24  ;;  %v3571_v30 = vshll.u32 %v11714_v41, 16  ;;  %v3135_v9 = vadd.f32 %v9423_v21, %v11571_v13  ;;  %v3134_v49 = vadd.f32 %v3093_v40, %v11579_v38 }
 0x2d8   : > { %v3365_v31 = vshrl.u32 %v11696_v24, 16  ;;  %v11777_v43 = vpack.c.bf16 %v3268_v7, %v3267_v46  ;;  %v3830_v54 = vsel %vm1049_vm2, %v3789_v26, 0  ;;  %v3569_v58 = vshrl.u32 %v11714_v41, 16 }
 0x2d9   : > { %v3573_v45 = vrot.slane %v3571_v30, 1  ;;  %v3174_v39 = vadd.f32 %v11393_v56, %v3135_v9  ;;  %v3173_v61 = vadd.f32 %v11393_v56, %v3134_v49  ;;  %v11785_v47 = vsel %vm10040_vm4, %v3353_v44, 0 }
 0x2da   : > { %v3354_v13 = vshll.u32 %v11648_v17, 16  ;;  %v3361_v38 = vshll.u32 %v11650_v2, 16  ;;  %3981 = vrot.lane.b32.xlu0 %v3830_v54, %s9958_s24  ;;  %v3793_v21 = vsel %vm998_vm3, %v3791_v18, %v3792_v63  ;;  %v3795_v26 = vrot.slane %v11785_v47, 1 }
 0x2db   : > { %3983 = vrot.lane.b32.xlu1 %v3793_v21, %s9958_s24  ;;  %v3574_v40 = vor.u32 %v3573_v45, %v3569_v58  ;;  %vm3206_vm0 = vcmp.gt.f32.partialorder %v3174_v39, 0.0  ;;  %v3238_v51 = vmul.f32 0.01, %v3174_v39  ;;  %vm3205_vm1 = vcmp.gt.f32.partialorder %v3173_v61, 0.0 }
 0x2dc   : > { %v3356_v56 = vor.u32 %v3354_v13, %v3353_v44  ;;  %v3363_v52 = vor.u32 %v3361_v38, %v3360_v57  ;;  %v3368_v15 = vshll.u32 %v11696_v24, 16  ;;  %v3237_v1 = vmul.f32 0.01, %v3173_v61 }
 0x2dd   : > { %v3367_v17 = vrot.slane %v3365_v31, 7  ;;  %v3579_v2 = vsel %vm679_vm7, %v3574_v40, %v11738_v14  ;;  %v3834_v60 = vsel %vm1049_vm2, %v3795_v26, 0  ;;  %v3591_v63 = vshll.u32 %v11754_v11, 16 }
 0x2de   : > { %3895 = vrot.lane.b32.xlu0 %v3579_v2, %s9960_s20  ;;  %v3270_v32 = vsel %vm3206_vm0, %v3174_v39, %v3238_v51  ;;  %v3269_v46 = vsel %vm3205_vm1, %v3173_v61, %v3237_v1  ;;  %v3595_v22 = vshrl.u32 %v11754_v11, 16  ;;  %v11802_v44 = vsel %vm10040_vm4, %v3360_v57, 0 }
 0x2df   : > { %v11804_v24 = vpack.c.bf16 %v3270_v32, %v3269_v46  ;;  %3989 = vrot.lane.b32.xlu1 %v3834_v60, %s9958_s24  ;;  %v3593_v18 = vrot.slane %v3591_v63, 1  ;;  %v3798_v14 = vrot.slane %v11802_v44, 1  ;;  %v3586_v7 = vshll.u32 %v11765_v12, 16 }
 0x2e0   : > { %v11811_v30 = vsel %vm10040_vm4, 0, %v3363_v52  ;;  %v11815_v9 = vsel %vm10040_vm4, 0, %v3356_v56  ;;  %v3370_v49 = vor.u32 %v3368_v15, %v3367_v17  ;;  %v3584_v31 = vshrl.u32 %v11765_v12, 16 }
 0x2e1   : > { %v3597_v57 = vor.u32 %v3595_v22, %v3593_v18  ;;  %v3836_v54 = vsel %vm1049_vm2, %v3798_v14, 0  ;;  %v3588_v58 = vrot.slane %v3586_v7, 1  ;;  %v3797_v45 = vrot.slane %v11811_v30, 1 }
 0x2e2   : > { %v3606_v39 = vshll.u32 %v11785_v47, 16  ;;  %v3601_v13 = vshll.u32 %v11815_v9, 16  ;;  %v3372_v38 = vshrl.u32 %v11733_v50, 16  ;;  %v3379_v40 = vshrl.u32 %v11768_v62, 16 }
 0x2e3   : > { %v3727_v61 = vsel %vm10081_vm8, %v3597_v57, 0  ;;  %3993 = vrot.lane.b32.xlu1 %v3836_v54, %s9958_s24  ;;  %v3589_v21 = vor.u32 %v3588_v58, %v3584_v31  ;;  %v3599_v51 = vshrl.u32 %v11815_v9, 16  ;;  %v11831_v52 = vsel %vm10040_vm4, %v3367_v17, 0 }
 0x2e4   : > { %3901 = vrot.lane.b32.xlu0 %v3727_v61, %s9960_s20  ;;  %v3603_v56 = vrot.slane %v3601_v13, 1  ;;  %v3799_v15 = vsel %vm998_vm3, %v3797_v45, %v3798_v14  ;;  %v3794_v1 = vrot.slane %v11815_v9, 1  ;;  %v3608_v2 = vrot.slane %v3606_v39, 1 }
 0x2e5   : > { %v11837_v60 = vsel %vm10040_vm4, 0, %v3370_v49  ;;  %v3594_v63 = vsel %vm679_vm7, %v3589_v21, %v3593_v18  ;;  %v3621_v46 = vshll.u32 %v11802_v44, 16  ;;  %v3636_v22 = vshll.u32 %v11831_v52, 16 }
 0x2e6   : > { %v3604_v32 = vor.u32 %v3603_v56, %v3599_v51  ;;  %v3374_v17 = vrot.slane %v3372_v38, 7  ;;  %v3610_v14 = vshrl.u32 %v11785_v47, 16  ;;  %v3381_v7 = vrot.slane %v3379_v40, 7 }
 0x2e7   : > { %3991 = vrot.lane.b32.xlu1 %v3799_v15, %s9958_s24  ;;  %v3800_v49 = vrot.slane %v11837_v60, 1  ;;  %v11847_v31 = vrot.slane %v3636_v22, 1  ;;  %v3796_v18 = vsel %vm998_vm3, %v3794_v1, %v3795_v26  ;;  %v3623_v58 = vrot.slane %v3621_v46, 1 }
 0x2e8   : > { %3899 = vrot.lane.b32.xlu0 %v3594_v63, %s9960_s20  ;;  %v3609_v57 = vsel %vm679_vm7, %v3604_v32, %v3608_v2  ;;  %v3612_v54 = vor.u32 %v3610_v14, %v3608_v2  ;;  %v3616_v45 = vshll.u32 %v11811_v30, 16  ;;  %v3375_v39 = vshll.u32 %v11733_v50, 16 }
 0x2e9   : > { %v3801_v61 = vrot.slane %v11831_v52, 1  ;;  %v3640_v13 = vshrl.u32 %v11831_v52, 16  ;;  %v3382_v38 = vshll.u32 %v11768_v62, 16  ;;  %v3625_v21 = vshrl.u32 %v11802_v44, 16  ;;  %v11867_v62 = vpop.permute.xlu1 %9917 }
 0x2ea   : > { %v3377_v40 = vor.u32 %v3375_v39, %v3374_v17  ;;  %v11862_v56 = vsel %vm10040_vm4, %v3374_v17, 0  ;;  %v3728_v15 = vsel %vm10081_vm8, %v3612_v54, 0  ;;  %v3618_v2 = vrot.slane %v3616_v45, 1 }
 0x2eb   : > { %3903 = vrot.lane.b32.xlu1 %v3609_v57, %s9960_s20  ;;  %v3802_v26 = vsel %vm998_vm3, %v3800_v49, %v3801_v61  ;;  %v3642_v51 = vor.u32 %v3640_v13, %v11847_v31  ;;  %v3384_v50 = vor.u32 %v3382_v38, %v3381_v7  ;;  %v3627_v1 = vor.u32 %v3625_v21, %v3623_v58 }
 0x2ec   : > { %3987 = vrot.lane.b32.xlu0 %v3796_v18, %s9958_s24  ;;  %v3386_v63 = vshrl.u32 %v11777_v43, 16  ;;  %v3614_v32 = vshrl.u32 %v11811_v30, 16  ;;  %v3804_v46 = vrot.slane %v11862_v56, 1  ;;  %v11877_v17 = vsel %vm10040_vm4, 0, %v3377_v40 }
 0x2ed   : > { %v3730_v22 = vsel %vm10081_vm8, %v3642_v51, 0  ;;  %v3631_v14 = vshll.u32 %v11837_v60, 16  ;;  %v9920_v57 = vunpack.i.h.bf16 %v11867_v62  ;;  %v3729_v49 = vsel %vm10081_vm8, %v3627_v1, 0  ;;  %v11892_v21 = vpop.permute.xlu1 %9922 }
 0x2ee   : > { %v3619_v18 = vor.u32 %v3618_v2, %v3614_v32  ;;  %v11886_v54 = vsel %vm10040_vm4, 0, %v3384_v50  ;;  %vm4015_vm5 = vcmask 15360   ;;  %v3388_v45 = vrot.slane %v3386_v63, 7 }
 0x2ef   : > { %3995 = vrot.lane.b32.xlu1 %v3802_v26, %s9958_s24  ;;  %v3393_v39 = vshrl.u32 %v11804_v24, 16  ;;  %v3840_v13 = vsel %vm1049_vm2, %v3804_v46, 0  ;;  %v3803_v38 = vrot.slane %v11877_v17, 1  ;;  %v3633_v40 = vrot.slane %v3631_v14, 1 }
 0x2f0   : > { %3905 = vrot.lane.b32.xlu0 %v3728_v15, %s9960_s20  ;;  %v3661_v26 = vshll.u32 %v11886_v54, 16  ;;  %v4017_v51 = vsel %vm4015_vm5, 0, %v9920_v57  ;;  %v9925_v50 = vunpack.i.h.bf16 %v11892_v21  ;;  %v3389_v15 = vshll.u32 %v11777_v43, 16 }
 0x2f1   : > { %v3624_v1 = vsel %vm679_vm7, %v3619_v18, %v3623_v58  ;;  %v11902_v2 = vsel %vm10040_vm4, %v3381_v7, 0  ;;  %v3651_v63 = vshll.u32 %v11862_v56, 16  ;;  %v3629_v32 = vshrl.u32 %v11837_v60, 16 }
 0x2f2   : > { %v3395_v14 = vrot.slane %v3393_v39, 7  ;;  %v11908_v57 = vsel %vm1254_vm10, %v4017_v51, %v9925_v50  ;;  %v3805_v43 = vsel %vm998_vm3, %v3803_v38, %v3804_v46  ;;  %v3663_v18 = vrot.slane %v3661_v26, 1 }
 0x2f3   : > { %3913 = vrot.lane.b32.xlu1 %v3730_v22, %s9960_s20  ;;  %v3391_v22 = vor.u32 %v3389_v15, %v3388_v45  ;;  %14268 = vst [vmem:[#allocation36_spill] sm:$0xff] %v11908_v57  ;;  %v3634_v58 = vor.u32 %v3633_v40, %v3629_v32  ;;  %v3838_v7 = vsel %vm1049_vm2, %v3801_v61, 0  ;;  %vm4264_vm6 = vcmask 48128  }
 0x2f4   : > { %3909 = vrot.lane.b32.xlu0 %v3729_v49, %s9960_s20  ;;  %v3807_v49 = vrot.slane %v11902_v2, 1  ;;  %v3396_v15 = vshll.u32 %v11804_v24, 16  ;;  %v3659_v39 = vshrl.u32 %v11886_v54, 16  ;;  %v3666_v46 = vshll.u32 %v11902_v2, 16  ;;  %9477 = vmatprep.mubr.msk.bf16.mxu1 %vm4264_vm6, %v11908_v57 }
 0x2f5   : > { %v3655_v38 = vshrl.u32 %v11862_v56, 16  ;;  %v3639_v40 = vsel %vm679_vm7, %v3634_v58, %v11847_v31  ;;  %v11932_v32 = vsel %vm10040_vm4, %v3395_v14, 0  ;;  %v3644_v58 = vshrl.u32 %v11877_v17, 16 }
 0x2f6   : > { %v3398_v61 = vor.u32 %v3396_v15, %v3395_v14  ;;  %v3842_v26 = vsel %vm1049_vm2, %v3807_v49, 0  ;;  %v3664_v51 = vor.u32 %v3663_v18, %v3659_v39  ;;  %v9919_v18 = vunpack.i.l.bf16 %v11867_v62 }
 0x2f7   : > { %4001 = vrot.lane.b32.xlu1 %v3840_v13, %s9958_s24  ;;  %v3653_v13 = vrot.slane %v3651_v63, 1  ;;  %v11928_v63 = vsel %vm10040_vm4, 0, %v3391_v22  ;;  %v3696_v39 = vshll.u32 %v11932_v32, 16  ;;  %v3813_v34 = vrot.slane %v11932_v32, 1 }
 0x2f8   : > { %3907 = vrot.lane.b32.xlu0 %v3624_v1, %s9960_s20  ;;  %v3646_v1 = vshll.u32 %v11877_v17, 16  ;;  %v3809_v15 = vrot.slane %v11928_v63, 1  ;;  %v11945_v14 = vsel %vm10040_vm4, 0, %v3398_v61  ;;  %v9924_v61 = vunpack.i.l.bf16 %v11892_v21 }
 0x2f9   : > { %v3657_v24 = vor.u32 %v3655_v38, %v3653_v13  ;;  %v3806_v38 = vrot.slane %v11886_v54, 1  ;;  %v3670_v21 = vshrl.u32 %v11902_v2, 16 }
 0x2fa   : > { %v3648_v50 = vrot.slane %v3646_v1, 1  ;;  %v11939_v1 = vsel %vm10040_vm4, %v3388_v45, 0 }
 0x2fb   : > { %3999 = vrot.lane.b32.xlu1 %v3805_v43, %s9958_s24  ;;  %v3668_v43 = vrot.slane %v3666_v46, 1  ;;  %v3731_v46 = vsel %vm10081_vm8, %v3657_v24, 0  ;;  %v3810_v45 = vrot.slane %v11939_v1, 1  ;;  %v4019_v24 = vsel %vm4015_vm5, 0, %v9919_v18 }
 0x2fc   : > { %3997 = vrot.lane.b32.xlu0 %v3838_v7, %s9958_s24  ;;  %v3649_v62 = vor.u32 %v3648_v50, %v3644_v58  ;;  %v11962_v58 = vrot.slane %v3696_v39, 1  ;;  %v3700_v18 = vshrl.u32 %v11932_v32, 16 }
 0x2fd   : > { %v3669_v22 = vsel %vm679_vm7, %v3664_v51, %v3668_v43  ;;  %v3812_v51 = vrot.slane %v11945_v14, 1  ;;  %v3811_v50 = vsel %vm998_vm3, %v3809_v15, %v3810_v45 }
 0x2ff   : > { %4005 = vrot.lane.b32.xlu1 %v3842_v26, %s9958_s24  ;;  %v3954_v7 = vpop.permute.xlu1 %3953 }
 0x300   : > { %3911 = vrot.lane.b32.xlu0 %v3639_v40, %s9960_s20 }
 0x302   : > { %v3952_v31 = vpop.permute.xlu0 %3951 }
 0x303   : > { %3919 = vrot.lane.b32.xlu1 %v3669_v22, %s9960_s20  ;;  %v3681_v22 = vshll.u32 %v11939_v1, 16 }
 0x304   : > { %3917 = vrot.lane.b32.xlu0 %v3731_v46, %s9960_s20  ;;  %v3654_v46 = vsel %vm679_vm7, %v3649_v62, %v3653_v13  ;;  %v3814_v13 = vsel %vm998_vm3, %v3812_v51, %v3813_v34  ;;  %v3672_v62 = vor.u32 %v3670_v21, %v3668_v43  ;;  %v5190_v43 = vsel %vm1049_vm2, %v11664_v6, 0 }
 0x306   : > { %v3870_v40 = vpop.permute.xlu0 %3869 }
 0x307   : > { %v11954_v26 = vpop.permute.xlu1 %3957  ;;  %v4023_v5 = vsel %vm4015_vm5, %v11429_v33, %v3870_v40  ;;  %4007 = vrot.lane.b32.xlu1 %v3811_v50, %s9958_s24  ;;  %v3808_v33 = vsel %vm998_vm3, %v3806_v38, %v3807_v49  ;;  %v11974_v40 = vsel %vm1254_vm10, %v4019_v24, %v9924_v61  ;;  %v3702_v49 = vor.u32 %v3700_v18, %v11962_v58 }
 0x308   : > { %3915 = vrot.lane.b32.xlu0 %v3654_v46, %s9960_s20  ;;  %v4091_v15 = vsel %vm1254_vm10, %v4023_v5, %v3954_v7  ;;  %v3683_v38 = vrot.slane %v3681_v22, 1  ;;  %v3676_v46 = vshll.u32 %v11928_v63, 16  ;;  %v3732_v22 = vsel %vm10081_vm8, %v3672_v62, 0 }
 0x309   : > { %v4189_v7 = vunpack.c.l.b16 %v4091_v15  ;;  %v3734_v24 = vsel %vm10081_vm8, %v3702_v49, 0 }
 0x30a   : > { %v3678_v6 = vrot.slane %v3676_v46, 1 }
 0x30b   : > { %v3868_v39 = vpop.permute.xlu0 %3867  ;;  %v11981_v25 = vpop.permute.xlu1 %3961  ;;  %4011 = vrot.lane.b32.xlu1 %v3814_v13, %s9958_s24  ;;  %v3674_v13 = vshrl.u32 %v11928_v63, 16 }
 0x30c   : > { %v4021_v50 = vsel %vm4015_vm5, %v11442_v35, %v3868_v39  ;;  %4003 = vrot.lane.b32.xlu0 %v3808_v33, %s9958_s24  ;;  %v3691_v33 = vshll.u32 %v11945_v14, 16 }
 0x30d   : > { %v11986_v5 = vsel %vm1254_vm10, %v4021_v50, %v3952_v31  ;;  %v3685_v31 = vshrl.u32 %v11939_v1, 16  ;;  %v3844_v50 = vsel %vm1049_vm2, %v3810_v45, 0  ;;  %v3679_v49 = vor.u32 %v3678_v6, %v3674_v13 }
 0x30e   : > { %v4188_v61 = vunpack.c.h.b16 %v11986_v5  ;;  %9427 = vmatprep.mubr.msk.bf16.mxu0 %vm4264_vm6, %v11986_v5  ;;  %v11994_v35 = vcombine.low %v11974_v40, %v11986_v5  ;;  %v3693_v46 = vrot.slane %v3691_v33, 1 }
 0x30f   : > { %3929 = vrot.lane.b32.xlu1 %v3734_v24, %s9960_s20  ;;  %v3687_v21 = vor.u32 %v3685_v31, %v3683_v38  ;;  %v3960_v18 = vpop.permute.xlu1 %3959  ;;  %v3684_v24 = vsel %vm679_vm7, %v3679_v49, %v3683_v38  ;;  %v4872_v38 = vsel %vm1049_vm2, %v11646_v29, 0 }
 0x310   : > { %9478 = vmatmul.mubr.msk.bf16.vlgmr.msra.gmra.mrb[168].mxu1 %vm4264_vm6, %v11994_v35  ;;  %v12002_v51 = vpack.c.b16 %v4189_v7, %v4188_v61  ;;  %3921 = vrot.lane.b32.xlu0 %v3732_v22, %s9960_s20  ;;  %v3956_v39 = vpop.permute.xlu0 %3955  ;;  %v3689_v7 = vshrl.u32 %v11945_v14, 16 }
 0x311   : > { %9576 = vmatpush3.bf16.msra.mxu1 %v5190_v43  ;;  %v3733_v62 = vsel %vm10081_vm8, %v3687_v21, 0 }
 0x312   : > { %9481 = vmatprep.mubr.msk.bf16.mxu1 %vm4264_vm6, %v12002_v51  ;;  %v3694_v22 = vor.u32 %v3693_v46, %v3689_v7 }
 0x313   : > { %4009 = vrot.lane.b32.xlu1 %v3844_v50, %s9958_s24 }
 0x314   : > { %3925 = vrot.lane.b32.xlu0 %v3733_v62, %s9960_s20  ;;  %v3846_v62 = vsel %vm1049_vm2, %v3813_v34, 0 }
 0x317   : > { %v3872_v61 = vpop.permute.xlu1 %3871 }
 0x318   : > { %v3874_v43 = vpop.permute.xlu0 %3873  ;;  %v4025_v31 = vsel %vm4015_vm5, %v11499_v19, %v3872_v61  ;;  %3923 = vrot.lane.b32.xlu0 %v3684_v24, %s9960_s20  ;;  %v12068_v61 = vld [vmem:[%s14209_s7 + $0x8] sm:$0x7] }
 0x319   : > { %v4027_v45 = vsel %vm4015_vm5, %v11457_v0, %v3874_v43  ;;  %v12026_v21 = vsel %vm1254_vm10, %v4025_v31, %v3956_v39  ;;  %9889 = vmatprep.subr.msk.bf16.mxu1 %vm1049_vm2, %v12068_v61 }
 0x31a   : > { %v4095_v6 = vsel %vm1254_vm10, %v4027_v45, %v11954_v26  ;;  %v12032_v33 = vcombine.low %v4091_v15, %v12026_v21  ;;  %9482 = vmatmul.mubr.msk.bf16.gmra.mrb[172].mxu1 %vm4264_vm6, %v12026_v21  ;;  %v4191_v19 = vunpack.c.h.b16 %v12026_v21  ;;  %v12044_v26 = vld [vmem:[%s14209_s7] sm:$0x7]  ;;  %v3699_v15 = vsel %vm679_vm7, %v3694_v22, %v11962_v58 }
 0x31b   : > { %v4192_v0 = vunpack.c.l.b16 %v4095_v6  ;;  %v3964_v13 = vpop.permute.xlu1 %3963 }
 0x31c   : > { %9428 = vmatmul.mubr.msk.bf16.vlgmr.msra.gmra.mrb[120].mxu0 %vm4264_vm6, %v12032_v33  ;;  %3927 = vrot.lane.b32.xlu0 %v3699_v15, %s9960_s20 }
 0x31d   : > { %v12048_v39 = vpack.c.b16 %v4192_v0, %v4191_v19  ;;  %9526 = vmatpush3.bf16.msra.mxu0 %v4872_v38 }
 0x31e   : > { %9888 = vmatprep.subr.msk.bf16.mxu0 %vm1049_vm2, %v12044_v26 }
 0x31f   : > { %v3878_v29 = vpop.permute.xlu0 %3877  ;;  %9431 = vmatprep.mubr.msk.bf16.mxu0 %vm4264_vm6, %v12048_v39 }
 0x320   : > { %v4031_v50 = vsel %vm4015_vm5, %v11465_v42, %v3878_v29  ;;  %v3882_v58 = vpop.permute.xlu1 %3881  ;;  %4013 = vrot.lane.b32.xlu0 %v3846_v62, %s9958_s24 }
 0x321   : > { %v4099_v49 = vsel %vm1254_vm10, %v4031_v50, %v11981_v25 }
 0x322   : > { %v4195_v34 = vunpack.c.l.b16 %v4099_v49 }
 0x323   : > { %v3876_v46 = vpop.permute.xlu0 %3875 }
 0x324   : > { %v4029_v7 = vsel %vm4015_vm5, %v11486_v48, %v3876_v46 }
 0x325   : > { %v12071_v42 = vsel %vm1254_vm10, %v4029_v7, %v3960_v18  ;;  %v4035_v18 = vsel %vm4015_vm5, %v11551_v36, %v3882_v58 }
 0x326   : > { %v4194_v43 = vunpack.c.h.b16 %v12071_v42  ;;  %9432 = vmatmul.mubr.msk.bf16.gmra.mrb[124].mxu0 %vm4264_vm6, %v12071_v42  ;;  %v12079_v25 = vcombine.low %v4095_v6, %v12071_v42  ;;  %v3970_v31 = vpop.permute.xlu1 %3969 }
 0x327   : > { %v3966_v48 = vpop.permute.xlu0 %3965 }
 0x328   : > { %9485 = vmatprep.mubr.msk.bf16.mxu1 %vm4264_vm6, %v12079_v25  ;;  %v12083_v24 = vpack.c.b16 %v4195_v34, %v4194_v43  ;;  %v4103_v22 = vsel %vm1254_vm10, %v4035_v18, %v3966_v48 }
 0x329   : > { %v4198_v0 = vunpack.c.l.b16 %v4103_v22 }
 0x32a   : > { %9486 = vmatmul.mubr.msk.bf16.gmra.mrb[176].mxu1 %vm4264_vm6, %v12083_v24  ;;  %v3968_v19 = vpop.permute.xlu1 %3967 }
 0x32b   : > { %v3880_v45 = vpop.permute.xlu0 %3879 }
 0x32c   : > { %v4033_v6 = vsel %vm4015_vm5, %v11539_v10, %v3880_v45 }
 0x32d   : > { %v12093_v38 = vsel %vm1254_vm10, %v4033_v6, %v3964_v13 }
 0x32e   : > { %9489 = vmatprep.mubr.msk.bf16.mxu1 %vm4264_vm6, %v12093_v38  ;;  %v12098_v15 = vcombine.low %v4099_v49, %v12093_v38  ;;  %v4197_v36 = vunpack.c.h.b16 %v12093_v38  ;;  %v3974_v29 = vpop.permute.xlu1 %3973 }
 0x330   : > { %9435 = vmatprep.mubr.msk.bf16.mxu0 %vm4264_vm6, %v12098_v15  ;;  %v12103_v50 = vpack.c.b16 %v4198_v0, %v4197_v36 }
 0x332   : > { %9436 = vmatmul.mubr.msk.bf16.gmra.mrb[128].mxu0 %vm4264_vm6, %v12103_v50  ;;  %v3886_v10 = vpop.permute.xlu0 %3885 }
 0x333   : > { %v4039_v13 = vsel %vm4015_vm5, %v11599_v23, %v3886_v10 }
 0x334   : > { %v3978_v62 = vpop.permute.xlu1 %3977  ;;  %v4107_v58 = vsel %vm1254_vm10, %v4039_v13, %v3970_v31 }
 0x335   : > { %v4201_v43 = vunpack.c.l.b16 %v4107_v58 }
 0x336   : > { %v3884_v49 = vpop.permute.xlu0 %3883 }
 0x337   : > { %v4037_v46 = vsel %vm4015_vm5, %v11606_v53, %v3884_v49 }
 0x338   : > { %v12113_v7 = vsel %vm1254_vm10, %v4037_v46, %v3968_v19  ;;  %v3976_v34 = vpop.permute.xlu1 %3975 }
 0x339   : > { %v4200_v48 = vunpack.c.h.b16 %v12113_v7  ;;  %9439 = vmatprep.mubr.msk.bf16.mxu0 %vm4264_vm6, %v12113_v7  ;;  %v12119_v18 = vcombine.low %v4103_v22, %v12113_v7 }
 0x33a   : > { %v3972_v23 = vpop.permute.xlu0 %3971 }
 0x33b   : > { %9490 = vmatmul.mubr.msk.bf16.gmra.mrb[180].mxu1 %vm4264_vm6, %v12119_v18  ;;  %v12123_v31 = vpack.c.b16 %v4201_v43, %v4200_v48 }
 0x33d   : > { %9493 = vmatprep.mubr.msk.bf16.mxu1 %vm4264_vm6, %v12123_v31  ;;  %v3888_v53 = vpop.permute.xlu1 %3887 }
 0x33e   : > { %v3890_v45 = vpop.permute.xlu0 %3889  ;;  %v4041_v19 = vsel %vm4015_vm5, %v11690_v55, %v3888_v53 }
 0x33f   : > { %v4043_v6 = vsel %vm4015_vm5, %v11627_v3, %v3890_v45  ;;  %v12132_v22 = vsel %vm1254_vm10, %v4041_v19, %v3972_v23 }
 0x340   : > { %v4111_v0 = vsel %vm1254_vm10, %v4043_v6, %v3974_v29  ;;  %v12136_v36 = vcombine.low %v4107_v58, %v12132_v22  ;;  %v4203_v10 = vunpack.c.h.b16 %v12132_v22 }
 0x341   : > { %v4204_v13 = vunpack.c.l.b16 %v4111_v0  ;;  %v3980_v49 = vpop.permute.xlu1 %3979 }
 0x342   : > { %9440 = vmatmul.mubr.msk.bf16.gmra.mrb[132].mxu0 %vm4264_vm6, %v12136_v36 }
 0x343   : > { %9494 = vmatmul.mubr.msk.bf16.gmra.mrb[184].mxu1 %vm4264_vm6, %v12132_v22  ;;  %v12143_v55 = vpack.c.b16 %v4204_v13, %v4203_v10 }
 0x344   : > { %v3894_v3 = vpop.permute.xlu0 %3893 }
 0x345   : > { %9443 = vmatprep.mubr.msk.bf16.mxu0 %vm4264_vm6, %v12143_v55  ;;  %v4047_v29 = vsel %vm4015_vm5, %v11655_v28, %v3894_v3  ;;  %v3898_v58 = vpop.permute.xlu1 %3897 }
 0x346   : > { %v4115_v46 = vsel %vm1254_vm10, %v4047_v29, %v3978_v62 }
 0x347   : > { %v4207_v45 = vunpack.c.l.b16 %v4115_v46 }
 0x348   : > { %v3892_v43 = vpop.permute.xlu0 %3891 }
 0x349   : > { %v4045_v48 = vsel %vm4015_vm5, %v11680_v27, %v3892_v43  ;;  %v3986_v23 = vpop.permute.xlu1 %3985 }
 0x34a   : > { %v12153_v53 = vsel %vm1254_vm10, %v4045_v48, %v3976_v34  ;;  %v4051_v34 = vsel %vm4015_vm5, %v11718_v59, %v3898_v58 }
 0x34b   : > { %v4206_v19 = vunpack.c.h.b16 %v12153_v53  ;;  %9444 = vmatmul.mubr.msk.bf16.gmra.mrb[136].mxu0 %vm4264_vm6, %v12153_v53  ;;  %v12159_v6 = vcombine.low %v4111_v0, %v12153_v53 }
 0x34c   : > { %v3982_v28 = vpop.permute.xlu0 %3981 }
 0x34d   : > { %9497 = vmatprep.mubr.msk.bf16.mxu1 %vm4264_vm6, %v12159_v6  ;;  %v12163_v62 = vpack.c.b16 %v4207_v45, %v4206_v19  ;;  %v3984_v27 = vpop.permute.xlu1 %3983  ;;  %v4119_v10 = vsel %vm1254_vm10, %v4051_v34, %v3982_v28 }
 0x34e   : > { %v4210_v43 = vunpack.c.l.b16 %v4119_v10 }
 0x34f   : > { %9498 = vmatmul.mubr.msk.bf16.gmra.mrb[188].mxu1 %vm4264_vm6, %v12163_v62 }
 0x350   : > { %v3896_v13 = vpop.permute.xlu0 %3895 }
 0x351   : > { %v4049_v0 = vsel %vm4015_vm5, %v11714_v41, %v3896_v13  ;;  %v3990_v3 = vpop.permute.xlu1 %3989 }
 0x352   : > { %v12173_v29 = vsel %vm1254_vm10, %v4049_v0, %v3980_v49 }
 0x353   : > { %9501 = vmatprep.mubr.msk.bf16.mxu1 %vm4264_vm6, %v12173_v29  ;;  %v12178_v48 = vcombine.low %v4115_v46, %v12173_v29  ;;  %v4209_v59 = vunpack.c.h.b16 %v12173_v29 }
 0x355   : > { %9447 = vmatprep.mubr.msk.bf16.mxu0 %vm4264_vm6, %v12178_v48  ;;  %v12183_v58 = vpack.c.b16 %v4210_v43, %v4209_v59  ;;  %v3994_v45 = vpop.permute.xlu1 %3993 }
 0x356   : > { %v3902_v41 = vpop.permute.xlu0 %3901 }
 0x357   : > { %v4055_v49 = vsel %vm4015_vm5, %v11754_v11, %v3902_v41  ;;  %9448 = vmatmul.mubr.msk.bf16.gmra.mrb[140].mxu0 %vm4264_vm6, %v12183_v58 }
 0x358   : > { %v4123_v28 = vsel %vm1254_vm10, %v4055_v49, %v3986_v23 }
 0x359   : > { %v3992_v19 = vpop.permute.xlu1 %3991  ;;  %v4213_v0 = vunpack.c.l.b16 %v4123_v28 }
 0x35a   : > { %v3900_v46 = vpop.permute.xlu0 %3899 }
 0x35b   : > { %v4053_v34 = vsel %vm4015_vm5, %v11765_v12, %v3900_v46 }
 0x35c   : > { %v12193_v13 = vsel %vm1254_vm10, %v4053_v34, %v3984_v27 }
 0x35d   : > { %v4212_v43 = vunpack.c.h.b16 %v12193_v13  ;;  %9451 = vmatprep.mubr.msk.bf16.mxu0 %vm4264_vm6, %v12193_v13  ;;  %v12199_v11 = vcombine.low %v4119_v10, %v12193_v13  ;;  %v3904_v59 = vpop.permute.xlu1 %3903 }
 0x35e   : > { %v3988_v41 = vpop.permute.xlu0 %3987  ;;  %v4057_v23 = vsel %vm4015_vm5, %v11815_v9, %v3904_v59 }
 0x35f   : > { %9502 = vmatmul.mubr.msk.bf16.gmra.mrb[192].mxu1 %vm4264_vm6, %v12199_v11  ;;  %v12205_v12 = vpack.c.b16 %v4213_v0, %v4212_v43  ;;  %v12208_v27 = vsel %vm1254_vm10, %v4057_v23, %v3988_v41 }
 0x360   : > { %v12211_v49 = vcombine.low %v4123_v28, %v12208_v27  ;;  %v4215_v34 = vunpack.c.h.b16 %v12208_v27 }
 0x361   : > { %9505 = vmatprep.mubr.msk.bf16.mxu1 %vm4264_vm6, %v12205_v12  ;;  %v3996_v10 = vpop.permute.xlu1 %3995 }
 0x362   : > { %v3906_v46 = vpop.permute.xlu0 %3905  ;;  %9452 = vmatmul.mubr.msk.bf16.gmra.mrb[144].mxu0 %vm4264_vm6, %v12211_v49 }
 0x363   : > { %v4059_v9 = vsel %vm4015_vm5, %v11785_v47, %v3906_v46 }
 0x364   : > { %v4127_v0 = vsel %vm1254_vm10, %v4059_v9, %v3990_v3 }
 0x365   : > { %v4216_v43 = vunpack.c.l.b16 %v4127_v0  ;;  %v3914_v59 = vpop.permute.xlu1 %3913 }
 0x366   : > { %v3910_v41 = vpop.permute.xlu0 %3909 }
 0x367   : > { %v4063_v28 = vsel %vm4015_vm5, %v11802_v44, %v3910_v41  ;;  %9506 = vmatmul.mubr.msk.bf16.gmra.mrb[196].mxu1 %vm4264_vm6, %v12208_v27  ;;  %v12225_v23 = vpack.c.b16 %v4216_v43, %v4215_v34 }
 0x368   : > { %v4131_v47 = vsel %vm1254_vm10, %v4063_v28, %v3994_v45 }
 0x369   : > { %9455 = vmatprep.mubr.msk.bf16.mxu0 %vm4264_vm6, %v12225_v23  ;;  %v4002_v4 = vpop.permute.xlu1 %4001  ;;  %v4219_v37 = vunpack.c.l.b16 %v4131_v47 }
 0x36a   : > { %v3908_v46 = vpop.permute.xlu0 %3907 }
 0x36b   : > { %v4061_v3 = vsel %vm4015_vm5, %v11811_v30, %v3908_v46  ;;  %v4067_v30 = vsel %vm4015_vm5, %v11831_v52, %v3914_v59 }
 0x36c   : > { %v12233_v9 = vsel %vm1254_vm10, %v4061_v3, %v3992_v19 }
 0x36d   : > { %v4218_v44 = vunpack.c.h.b16 %v12233_v9  ;;  %9456 = vmatmul.mubr.msk.bf16.gmra.mrb[148].mxu0 %vm4264_vm6, %v12233_v9  ;;  %v12239_v34 = vcombine.low %v4127_v0, %v12233_v9  ;;  %v4000_v43 = vpop.permute.xlu1 %3999 }
 0x36e   : > { %v3998_v41 = vpop.permute.xlu0 %3997 }
 0x36f   : > { %9509 = vmatprep.mubr.msk.bf16.mxu1 %vm4264_vm6, %v12239_v34  ;;  %v12243_v45 = vpack.c.b16 %v4219_v37, %v4218_v44  ;;  %v4135_v28 = vsel %vm1254_vm10, %v4067_v30, %v3998_v41 }
 0x370   : > { %v4222_v16 = vunpack.c.l.b16 %v4135_v28 }
 0x371   : > { %9510 = vmatmul.mubr.msk.bf16.gmra.mrb[200].mxu1 %vm4264_vm6, %v12243_v45  ;;  %v4006_v19 = vpop.permute.xlu1 %4005 }
 0x372   : > { %v3912_v46 = vpop.permute.xlu0 %3911 }
 0x373   : > { %v4065_v0 = vsel %vm4015_vm5, %v11837_v60, %v3912_v46 }
 0x374   : > { %v12253_v3 = vsel %vm1254_vm10, %v4065_v0, %v3996_v10 }
 0x375   : > { %9513 = vmatprep.mubr.msk.bf16.mxu1 %vm4264_vm6, %v12253_v3  ;;  %v12258_v37 = vcombine.low %v4131_v47, %v12253_v3  ;;  %v4221_v52 = vunpack.c.h.b16 %v12253_v3  ;;  %v3920_v59 = vpop.permute.xlu1 %3919 }
 0x376   : > { %v3918_v44 = vpop.permute.xlu0 %3917 }
 0x377   : > { %v4071_v41 = vsel %vm4015_vm5, %v11862_v56, %v3918_v44  ;;  %9459 = vmatprep.mubr.msk.bf16.mxu0 %vm4264_vm6, %v12258_v37  ;;  %v12265_v60 = vpack.c.b16 %v4222_v16, %v4221_v52 }
 0x378   : > { %v4139_v30 = vsel %vm1254_vm10, %v4071_v41, %v4002_v4  ;;  %v4073_v4 = vsel %vm4015_vm5, %v11886_v54, %v3920_v59 }
 0x379   : > { %9460 = vmatmul.mubr.msk.bf16.gmra.mrb[152].mxu0 %vm4264_vm6, %v12265_v60  ;;  %v4008_v10 = vpop.permute.xlu1 %4007  ;;  %v4225_v8 = vunpack.c.l.b16 %v4139_v30 }
 0x37a   : > { %v3916_v47 = vpop.permute.xlu0 %3915 }
 0x37b   : > { %v4069_v46 = vsel %vm4015_vm5, %v11877_v17, %v3916_v47 }
 0x37c   : > { %v12273_v0 = vsel %vm1254_vm10, %v4069_v46, %v4000_v43 }
 0x37d   : > { %v4224_v56 = vunpack.c.h.b16 %v12273_v0  ;;  %9463 = vmatprep.mubr.msk.bf16.mxu0 %vm4264_vm6, %v12273_v0  ;;  %v12279_v16 = vcombine.low %v4135_v28, %v12273_v0  ;;  %v4012_v52 = vpop.permute.xlu1 %4011 }
 0x37e   : > { %v4004_v44 = vpop.permute.xlu0 %4003 }
 0x37f   : > { %v12284_v41 = vsel %vm1254_vm10, %v4073_v4, %v4004_v44  ;;  %9514 = vmatmul.mubr.msk.bf16.gmra.mrb[204].mxu1 %vm4264_vm6, %v12279_v16  ;;  %v12288_v17 = vpack.c.b16 %v4225_v8, %v4224_v56 }
 0x380   : > { %v12291_v43 = vcombine.low %v4139_v30, %v12284_v41  ;;  %v4227_v46 = vunpack.c.h.b16 %v12284_v41 }
 0x381   : > { %9517 = vmatprep.mubr.msk.bf16.mxu1 %vm4264_vm6, %v12288_v17  ;;  %v3930_v28 = vpop.permute.xlu1 %3929 }
 0x382   : > { %v3922_v47 = vpop.permute.xlu0 %3921  ;;  %9464 = vmatmul.mubr.msk.bf16.gmra.mrb[156].mxu0 %vm4264_vm6, %v12291_v43 }
 0x383   : > { %v4075_v54 = vsel %vm4015_vm5, %v11902_v2, %v3922_v47 }
 0x384   : > { %v4143_v59 = vsel %vm1254_vm10, %v4075_v54, %v4006_v19 }
 0x385   : > { %v4228_v8 = vunpack.c.l.b16 %v4143_v59  ;;  %v4010_v56 = vpop.permute.xlu1 %4009 }
 0x386   : > { %v3926_v4 = vpop.permute.xlu0 %3925 }
 0x387   : > { %v12301_v30 = vpack.c.b16 %v4228_v8, %v4227_v46  ;;  %v4079_v44 = vsel %vm4015_vm5, %v11939_v1, %v3926_v4  ;;  %9518 = vmatmul.mubr.msk.bf16.gmra.mrb[208].mxu1 %vm4264_vm6, %v12284_v41 }
 0x388   : > { %v4147_v20 = vsel %vm1254_vm10, %v4079_v44, %v4010_v56 }
 0x389   : > { %9467 = vmatprep.mubr.msk.bf16.mxu0 %vm4264_vm6, %v12301_v30  ;;  %v4231_v47 = vunpack.c.l.b16 %v4147_v20 }
 0x38a   : > { %v3924_v2 = vpop.permute.xlu0 %3923 }
 0x38b   : > { %v4077_v19 = vsel %vm4015_vm5, %v11928_v63, %v3924_v2 }
 0x38c   : > { %v12313_v54 = vsel %vm1254_vm10, %v4077_v19, %v4008_v10 }
 0x38d   : > { %v4230_v46 = vunpack.c.h.b16 %v12313_v54  ;;  %9468 = vmatmul.mubr.msk.bf16.gmra.mrb[160].mxu0 %vm4264_vm6, %v12313_v54  ;;  %v12319_v1 = vcombine.low %v4143_v59, %v12313_v54  ;;  %v4083_v59 = vsel %vm4015_vm5, %v11932_v32, %v3930_v28  ;;  %v5402_v32 = vsel %vm1049_vm2, %v12044_v26, 0 }
 0x38e   : > { %v3928_v8 = vpop.permute.xlu0 %3927 }
 0x38f   : > { %v4081_v56 = vsel %vm4015_vm5, %v11945_v14, %v3928_v8  ;;  %9521 = vmatprep.mubr.msk.bf16.mxu1 %vm4264_vm6, %v12319_v1  ;;  %v12325_v63 = vpack.c.b16 %v4231_v47, %v4230_v46 }
 0x390   : > { %v12328_v10 = vsel %vm1254_vm10, %v4081_v56, %v4012_v52 }
 0x391   : > { %9522 = vmatmul.mubr.msk.bf16.gmra.mrb[212].mxu1 %vm4264_vm6, %v12325_v63  ;;  %v8495_v4 = vcombine.low %v4147_v20, %v12328_v10  ;;  %v4236_v52 = vunpack.c.h.b16 %v12328_v10  ;;  %v5616_v20 = vsel %vm1049_vm2, %v12068_v61, 0 }
 0x392   : > { %v4014_v44 = vpop.permute.xlu0 %4013  ;;  %9577 = vmatprep.mubr.msk.bf16.mxu1 %vm4264_vm6, %v11986_v5 }
 0x393   : > { %v12338_v14 = vsel %vm1254_vm10, %v4083_v59, %v4014_v44  ;;  %9471 = vmatprep.mubr.msk.bf16.mxu0 %vm4264_vm6, %v8495_v4 }
 0x394   : > { %v4237_v2 = vunpack.c.l.b16 %v12338_v14 }
 0x396   : > { %v12343_v19 = vpack.c.b16 %v4237_v2, %v4236_v52 }
 0x398   : > { %9472 = vmatmul.mubr.msk.bf16.gmra.mrb[164].mxu0 %vm4264_vm6, %v12343_v19 }
 0x399   : > { %9527 = vmatprep.mubr.msk.bf16.mxu0 %vm4264_vm6, %v12026_v21  ;;  %9578 = vmatmul.mubr.msk.bf16.vlgmr.msra.gmra.mrb[216].mxu1 %vm4264_vm6, %v12032_v33 }
 0x39a   : > { %9581 = vmatprep.mubr.msk.bf16.mxu1 %vm4264_vm6, %v12048_v39  ;;  %9676 = vmatpush3.bf16.msra.mxu1 %v5616_v20 }
 0x3a0   : > { %9528 = vmatmul.mubr.msk.bf16.vlgmr.msra.gmra.mrb[168].mxu0 %vm4264_vm6, %v12079_v25 }
 0x3a1   : > { %9626 = vmatpush3.bf16.msra.mxu0 %v5402_v32  ;;  %9531 = vmatprep.mubr.msk.bf16.mxu0 %vm4264_vm6, %v12083_v24 }
 0x3a2   : > { %9582 = vmatmul.mubr.msk.bf16.gmra.mrb[220].mxu1 %vm4264_vm6, %v12071_v42 }
 0x3a3   : > { %9585 = vmatprep.mubr.msk.bf16.mxu1 %vm4264_vm6, %v12098_v15 }
 0x3a8   : > { %9532 = vmatmul.mubr.msk.bf16.gmra.mrb[172].mxu0 %vm4264_vm6, %v12093_v38 }
 0x3a9   : > { %9535 = vmatprep.mubr.msk.bf16.mxu0 %vm4264_vm6, %v12119_v18 }
 0x3aa   : > { %9586 = vmatmul.mubr.msk.bf16.gmra.mrb[224].mxu1 %vm4264_vm6, %v12103_v50 }
 0x3ab   : > { %9589 = vmatprep.mubr.msk.bf16.mxu1 %vm4264_vm6, %v12113_v7 }
 0x3b0   : > { %9536 = vmatmul.mubr.msk.bf16.gmra.mrb[176].mxu0 %vm4264_vm6, %v12123_v31 }
 0x3b1   : > { %9539 = vmatprep.mubr.msk.bf16.mxu0 %vm4264_vm6, %v12132_v22 }
 0x3b2   : > { %9590 = vmatmul.mubr.msk.bf16.gmra.mrb[228].mxu1 %vm4264_vm6, %v12136_v36 }
 0x3b3   : > { %9593 = vmatprep.mubr.msk.bf16.mxu1 %vm4264_vm6, %v12143_v55  ;;  %v12438_v55 = vcombine.low %v12338_v14, %v11908_v57 }
 0x3b8   : > { %9540 = vmatmul.mubr.msk.bf16.gmra.mrb[180].mxu0 %vm4264_vm6, %v12159_v6 }
 0x3b9   : > { %9543 = vmatprep.mubr.msk.bf16.mxu0 %vm4264_vm6, %v12163_v62 }
 0x3ba   : > { %9594 = vmatmul.mubr.msk.bf16.gmra.mrb[232].mxu1 %vm4264_vm6, %v12153_v53 }
 0x3bb   : > { %9597 = vmatprep.mubr.msk.bf16.mxu1 %vm4264_vm6, %v12178_v48 }
 0x3c0   : > { %9544 = vmatmul.mubr.msk.bf16.gmra.mrb[184].mxu0 %vm4264_vm6, %v12173_v29 }
 0x3c1   : > { %9547 = vmatprep.mubr.msk.bf16.mxu0 %vm4264_vm6, %v12199_v11 }
 0x3c2   : > { %9598 = vmatmul.mubr.msk.bf16.gmra.mrb[236].mxu1 %vm4264_vm6, %v12183_v58 }
 0x3c3   : > { %9601 = vmatprep.mubr.msk.bf16.mxu1 %vm4264_vm6, %v12193_v13 }
 0x3c8   : > { %9548 = vmatmul.mubr.msk.bf16.gmra.mrb[188].mxu0 %vm4264_vm6, %v12205_v12 }
 0x3c9   : > { %9551 = vmatprep.mubr.msk.bf16.mxu0 %vm4264_vm6, %v12208_v27 }
 0x3ca   : > { %9602 = vmatmul.mubr.msk.bf16.gmra.mrb[240].mxu1 %vm4264_vm6, %v12211_v49 }
 0x3cb   : > { %9605 = vmatprep.mubr.msk.bf16.mxu1 %vm4264_vm6, %v12225_v23  ;;  %v4185_v23 = vunpack.c.h.b16 %v11908_v57 }
 0x3d0   : > { %9552 = vmatmul.mubr.msk.bf16.gmra.mrb[192].mxu0 %vm4264_vm6, %v12239_v34 }
 0x3d1   : > { %9555 = vmatprep.mubr.msk.bf16.mxu0 %vm4264_vm6, %v12243_v45 }
 0x3d2   : > { %9606 = vmatmul.mubr.msk.bf16.gmra.mrb[244].mxu1 %vm4264_vm6, %v12233_v9  ;;  %v4186_v9 = vunpack.c.l.b16 %v11974_v40 }
 0x3d3   : > { %9609 = vmatprep.mubr.msk.bf16.mxu1 %vm4264_vm6, %v12258_v37 }
 0x3d4   : > { %v12456_v37 = vpack.c.b16 %v4186_v9, %v4185_v23 }
 0x3d6   : > { %14269 = vst [vmem:[#allocation37_spill] sm:$0xff] %v12456_v37 }
 0x3d8   : > { %9556 = vmatmul.mubr.msk.bf16.gmra.mrb[196].mxu0 %vm4264_vm6, %v12253_v3 }
 0x3d9   : > { %9559 = vmatprep.mubr.msk.bf16.mxu0 %vm4264_vm6, %v12279_v16 }
 0x3da   : > { %9610 = vmatmul.mubr.msk.bf16.gmra.mrb[248].mxu1 %vm4264_vm6, %v12265_v60 }
 0x3db   : > { %9613 = vmatprep.mubr.msk.bf16.mxu1 %vm4264_vm6, %v12273_v0 }
 0x3e0   : > { %9560 = vmatmul.mubr.msk.bf16.gmra.mrb[200].mxu0 %vm4264_vm6, %v12288_v17 }
 0x3e1   : > { %9563 = vmatprep.mubr.msk.bf16.mxu0 %vm4264_vm6, %v12284_v41 }
 0x3e2   : > { %9614 = vmatmul.mubr.msk.bf16.gmra.mrb[252].mxu1 %vm4264_vm6, %v12291_v43 }
 0x3e3   : > { %v9479_v5 = vpop.f32.mrb[168].mxu1  ;;  %9617 = vmatprep.mubr.msk.bf16.mxu1 %vm4264_vm6, %v12301_v30 }
 0x3e4   : > { %v4682_v33 = vpop.f32.mrb[169].mxu1 }
 0x3e5   : > { %v9480_v26 = vpop.f32.mrb[170].mxu1 }
 0x3e6   : > { %v4685_v39 = vpop.f32.mrb[171].mxu1 }
 0x3e8   : > { %9564 = vmatmul.mubr.msk.bf16.gmra.mrb[204].mxu0 %vm4264_vm6, %v12319_v1 }
 0x3e9   : > { %9567 = vmatprep.mubr.msk.bf16.mxu0 %vm4264_vm6, %v12325_v63 }
 0x3ea   : > { %9618 = vmatmul.mubr.msk.bf16.gmra.mrb[0].mxu1 %vm4264_vm6, %v12313_v54 }
 0x3eb   : > { %9621 = vmatprep.mubr.msk.bf16.mxu1 %vm4264_vm6, %v8495_v4 }
 0x3ed   : > { %v9483_v61 = vpop.f32.mrb[172].mxu1 }
 0x3ee   : > { %v4697_v42 = vpop.f32.mrb[173].mxu1 }
 0x3ef   : > { %v9429_v15 = vpop.f32.mrb[120].mxu0  ;;  %v9484_v50 = vpop.f32.mrb[174].mxu1 }
 0x3f0   : > { %v4374_v7 = vpop.f32.mrb[121].mxu0  ;;  %v4700_v36 = vpop.f32.mrb[175].mxu1  ;;  %9568 = vmatmul.mubr.msk.bf16.gmra.mrb[208].mxu0 %vm4264_vm6, %v12328_v10 }
 0x3f1   : > { %v12440_v53 = vadd.f32 %v4682_v33, %v4374_v7  ;;  %v9430_v48 = vpop.f32.mrb[122].mxu0  ;;  %9571 = vmatprep.mubr.msk.bf16.mxu0 %vm4264_vm6, %v12438_v55 }
 0x3f2   : > { %v12444_v58 = vadd.f32 %v9480_v26, %v9430_v48  ;;  %v4377_v13 = vpop.f32.mrb[123].mxu0  ;;  %9622 = vmatmul.mubr.msk.bf16.gmra.mrb[4].mxu1 %vm4264_vm6, %v12343_v19 }
 0x3f3   : > { %v12448_v49 = vadd.f32 %v4685_v39, %v4377_v13  ;;  %9677 = vmatprep.mubr.msk.bf16.mxu1 %vm4264_vm6, %v12026_v21 }
 0x3f8   : > { %9572 = vmatmul.mubr.msk.bf16.gmra.mrb[212].mxu0 %vm4264_vm6, %v12456_v37 }
 0x3f9   : > { %v9433_v60 = vpop.f32.mrb[124].mxu0  ;;  %9627 = vmatprep.mubr.msk.bf16.mxu0 %vm4264_vm6, %v11908_v57 }
 0x3fa   : > { %v12460_v0 = vadd.f32 %v9483_v61, %v9433_v60  ;;  %v4389_v43 = vpop.f32.mrb[125].mxu0  ;;  %9678 = vmatmul.mubr.msk.bf16.vlgmr.msra.gmra.mrb[8].mxu1 %vm4264_vm6, %v12079_v25 }
 0x3fb   : > { %v12464_v28 = vadd.f32 %v4697_v42, %v4389_v43  ;;  %v9434_v30 = vpop.f32.mrb[126].mxu0  ;;  %9681 = vmatprep.mubr.msk.bf16.mxu1 %vm4264_vm6, %v12083_v24 }
 0x3fc   : > { %v12468_v47 = vadd.f32 %v9484_v50, %v9434_v30  ;;  %v4392_v54 = vpop.f32.mrb[127].mxu0 }
 0x3fd   : > { %v9487_v46 = vpop.f32.mrb[176].mxu1 }
 0x3fe   : > { %v4712_v8 = vpop.f32.mrb[177].mxu1 }
 0x3ff   : > { %v9488_v56 = vpop.f32.mrb[178].mxu1 }
 0x400   : > { %v4714_v4 = vpop.f32.mrb[179].mxu1  ;;  %9628 = vmatmul.mubr.msk.bf16.vlgmr.msra.gmra.mrb[216].mxu0 %vm4264_vm6, %v11994_v35 }
 0x401   : > { %9631 = vmatprep.mubr.msk.bf16.mxu0 %vm4264_vm6, %v12002_v51 }
 0x402   : > { %9682 = vmatmul.mubr.msk.bf16.gmra.mrb[12].mxu1 %vm4264_vm6, %v12093_v38 }
 0x403   : > { %9685 = vmatprep.mubr.msk.bf16.mxu1 %vm4264_vm6, %v12119_v18 }
 0x405   : > { %v9437_v59 = vpop.f32.mrb[128].mxu0 }
 0x406   : > { %v12480_v44 = vadd.f32 %v9487_v46, %v9437_v59  ;;  %v4404_v14 = vpop.f32.mrb[129].mxu0 }
 0x407   : > { %v9438_v52 = vpop.f32.mrb[130].mxu0 }
 0x408   : > { %v4406_v2 = vpop.f32.mrb[131].mxu0  ;;  %9632 = vmatmul.mubr.msk.bf16.gmra.mrb[220].mxu0 %vm4264_vm6, %v12026_v21 }
 0x409   : > { %v12482_v19 = vadd.f32 %v4714_v4, %v4406_v2  ;;  %9635 = vmatprep.mubr.msk.bf16.mxu0 %vm4264_vm6, %v12079_v25 }
 0x40a   : > { %9686 = vmatmul.mubr.msk.bf16.gmra.mrb[16].mxu1 %vm4264_vm6, %v12123_v31 }
 0x40b   : > { %9689 = vmatprep.mubr.msk.bf16.mxu1 %vm4264_vm6, %v12132_v22 }
 0x40e   : > { %v9491_v35 = vpop.f32.mrb[180].mxu1 }
 0x40f   : > { %v4726_v51 = vpop.f32.mrb[181].mxu1 }
 0x410   : > { %v9492_v20 = vpop.f32.mrb[182].mxu1  ;;  %9636 = vmatmul.mubr.msk.bf16.gmra.mrb[224].mxu0 %vm4264_vm6, %v12083_v24 }
 0x411   : > { %v4729_v32 = vpop.f32.mrb[183].mxu1  ;;  %9639 = vmatprep.mubr.msk.bf16.mxu0 %vm4264_vm6, %v12093_v38 }
 0x412   : > { %9690 = vmatmul.mubr.msk.bf16.gmra.mrb[20].mxu1 %vm4264_vm6, %v12159_v6 }
 0x413   : > { %9693 = vmatprep.mubr.msk.bf16.mxu1 %vm4264_vm6, %v12163_v62 }
 0x415   : > { %v9441_v21 = vpop.f32.mrb[132].mxu0 }
 0x416   : > { %v9495_v25 = vpop.f32.mrb[184].mxu1  ;;  %v4418_v5 = vpop.f32.mrb[133].mxu0 }
 0x417   : > { %v12500_v33 = vadd.f32 %v4726_v51, %v4418_v5  ;;  %v4741_v26 = vpop.f32.mrb[185].mxu1  ;;  %v9442_v39 = vpop.f32.mrb[134].mxu0 }
 0x418   : > { %v12502_v61 = vadd.f32 %v9492_v20, %v9442_v39  ;;  %v9496_v24 = vpop.f32.mrb[186].mxu1  ;;  %v4421_v42 = vpop.f32.mrb[135].mxu0  ;;  %9640 = vmatmul.mubr.msk.bf16.gmra.mrb[228].mxu0 %vm4264_vm6, %v12119_v18 }
 0x419   : > { %v12506_v38 = vadd.f32 %v4729_v32, %v4421_v42  ;;  %v4744_v15 = vpop.f32.mrb[187].mxu1  ;;  %9643 = vmatprep.mubr.msk.bf16.mxu0 %vm4264_vm6, %v12123_v31 }
 0x41a   : > { %9694 = vmatmul.mubr.msk.bf16.gmra.mrb[24].mxu1 %vm4264_vm6, %v12173_v29 }
 0x41b   : > { %9697 = vmatprep.mubr.msk.bf16.mxu1 %vm4264_vm6, %v12199_v11 }
 0x41e   : > { %v9445_v50 = vpop.f32.mrb[136].mxu0 }
 0x41f   : > { %v12514_v7 = vadd.f32 %v9495_v25, %v9445_v50  ;;  %v4433_v36 = vpop.f32.mrb[137].mxu0 }
 0x420   : > { %9644 = vmatmul.mubr.msk.bf16.gmra.mrb[232].mxu0 %vm4264_vm6, %v12132_v22  ;;  %v12518_v18 = vadd.f32 %v4741_v26, %v4433_v36  ;;  %v9446_v48 = vpop.f32.mrb[138].mxu0 }
 0x421   : > { %9647 = vmatprep.mubr.msk.bf16.mxu0 %vm4264_vm6, %v12159_v6  ;;  %v12522_v31 = vadd.f32 %v9496_v24, %v9446_v48  ;;  %v4436_v13 = vpop.f32.mrb[139].mxu0 }
 0x422   : > { %9698 = vmatmul.mubr.msk.bf16.gmra.mrb[28].mxu1 %vm4264_vm6, %v12205_v12  ;;  %v9499_v23 = vpop.f32.mrb[188].mxu1 }
 0x423   : > { %9701 = vmatprep.mubr.msk.bf16.mxu1 %vm4264_vm6, %v12208_v27  ;;  %v4756_v9 = vpop.f32.mrb[189].mxu1 }
 0x424   : > { %v9500_v60 = vpop.f32.mrb[190].mxu1 }
 0x425   : > { %v4758_v43 = vpop.f32.mrb[191].mxu1 }
 0x428   : > { %9648 = vmatmul.mubr.msk.bf16.gmra.mrb[236].mxu0 %vm4264_vm6, %v12163_v62 }
 0x429   : > { %9651 = vmatprep.mubr.msk.bf16.mxu0 %vm4264_vm6, %v12173_v29 }
 0x42a   : > { %9702 = vmatmul.mubr.msk.bf16.gmra.mrb[32].mxu1 %vm4264_vm6, %v12239_v34  ;;  %v9449_v22 = vpop.f32.mrb[140].mxu0 }
 0x42b   : > { %9705 = vmatprep.mubr.msk.bf16.mxu1 %vm4264_vm6, %v12243_v45  ;;  %v12536_v6 = vadd.f32 %v9499_v23, %v9449_v22  ;;  %v4448_v30 = vpop.f32.mrb[141].mxu0 }
 0x42c   : > { %v9450_v54 = vpop.f32.mrb[142].mxu0 }
 0x42d   : > { %v4450_v46 = vpop.f32.mrb[143].mxu0 }
 0x42e   : > { %v12538_v8 = vadd.f32 %v4758_v43, %v4450_v46 }
 0x430   : > { %9652 = vmatmul.mubr.msk.bf16.gmra.mrb[240].mxu0 %vm4264_vm6, %v12199_v11 }
 0x431   : > { %9655 = vmatprep.mubr.msk.bf16.mxu0 %vm4264_vm6, %v12205_v12 }
 0x432   : > { %9706 = vmatmul.mubr.msk.bf16.gmra.mrb[36].mxu1 %vm4264_vm6, %v12253_v3  ;;  %v9503_v62 = vpop.f32.mrb[192].mxu1 }
 0x433   : > { %9709 = vmatprep.mubr.msk.bf16.mxu1 %vm4264_vm6, %v12279_v16  ;;  %v4770_v29 = vpop.f32.mrb[193].mxu1 }
 0x434   : > { %v9504_v56 = vpop.f32.mrb[194].mxu1 }
 0x435   : > { %v4773_v4 = vpop.f32.mrb[195].mxu1  ;;  %v9453_v59 = vpop.f32.mrb[144].mxu0 }
 0x436   : > { %v4462_v14 = vpop.f32.mrb[145].mxu0 }
 0x437   : > { %v12548_v52 = vadd.f32 %v4770_v29, %v4462_v14  ;;  %v9454_v2 = vpop.f32.mrb[146].mxu0 }
 0x438   : > { %9656 = vmatmul.mubr.msk.bf16.gmra.mrb[244].mxu0 %vm4264_vm6, %v12208_v27  ;;  %v12552_v11 = vadd.f32 %v9504_v56, %v9454_v2  ;;  %v4465_v12 = vpop.f32.mrb[147].mxu0 }
 0x439   : > { %9659 = vmatprep.mubr.msk.bf16.mxu0 %vm4264_vm6, %v12239_v34  ;;  %v12556_v35 = vadd.f32 %v4773_v4, %v4465_v12 }
 0x43a   : > { %9710 = vmatmul.mubr.msk.bf16.gmra.mrb[40].mxu1 %vm4264_vm6, %v12288_v17  ;;  %v9507_v51 = vpop.f32.mrb[196].mxu1 }
 0x43b   : > { %9713 = vmatprep.mubr.msk.bf16.mxu1 %vm4264_vm6, %v12284_v41  ;;  %v4785_v20 = vpop.f32.mrb[197].mxu1 }
 0x43c   : > { %v9508_v32 = vpop.f32.mrb[198].mxu1 }
 0x43d   : > { %v4788_v21 = vpop.f32.mrb[199].mxu1 }
 0x440   : > { %9660 = vmatmul.mubr.msk.bf16.gmra.mrb[248].mxu0 %vm4264_vm6, %v12243_v45  ;;  %v9457_v27 = vpop.f32.mrb[148].mxu0 }
 0x441   : > { %9663 = vmatprep.mubr.msk.bf16.mxu0 %vm4264_vm6, %v12253_v3  ;;  %v12566_v34 = vadd.f32 %v9507_v51, %v9457_v27  ;;  %v4477_v25 = vpop.f32.mrb[149].mxu0 }
 0x442   : > { %9714 = vmatmul.mubr.msk.bf16.gmra.mrb[44].mxu1 %vm4264_vm6, %v12319_v1  ;;  %v12570_v5 = vadd.f32 %v4785_v20, %v4477_v25  ;;  %v9458_v26 = vpop.f32.mrb[150].mxu0 }
 0x443   : > { %9717 = vmatprep.mubr.msk.bf16.mxu1 %vm4264_vm6, %v12325_v63  ;;  %v12574_v39 = vadd.f32 %v9508_v32, %v9458_v26  ;;  %v4480_v24 = vpop.f32.mrb[151].mxu0 }
 0x444   : > { %v9511_v45 = vpop.f32.mrb[200].mxu1 }
 0x445   : > { %v4800_v42 = vpop.f32.mrb[201].mxu1 }
 0x446   : > { %v9512_v15 = vpop.f32.mrb[202].mxu1 }
 0x447   : > { %v4802_v50 = vpop.f32.mrb[203].mxu1 }
 0x448   : > { %9664 = vmatmul.mubr.msk.bf16.gmra.mrb[252].mxu0 %vm4264_vm6, %v12279_v16 }
 0x449   : > { %9667 = vmatprep.mubr.msk.bf16.mxu0 %vm4264_vm6, %v12288_v17 }
 0x44a   : > { %9718 = vmatmul.mubr.msk.bf16.gmra.mrb[48].mxu1 %vm4264_vm6, %v12328_v10 }
 0x44b   : > { %9721 = vmatprep.mubr.msk.bf16.mxu1 %vm4264_vm6, %v12438_v55 }
 0x44c   : > { %v9461_v3 = vpop.f32.mrb[152].mxu0 }
 0x44d   : > { %v12584_v36 = vadd.f32 %v9511_v45, %v9461_v3  ;;  %v4492_v48 = vpop.f32.mrb[153].mxu0 }
 0x44e   : > { %v9462_v13 = vpop.f32.mrb[154].mxu0 }
 0x44f   : > { %v4494_v23 = vpop.f32.mrb[155].mxu0 }
 0x450   : > { %v12586_v9 = vadd.f32 %v4802_v50, %v4494_v23  ;;  %9668 = vmatmul.mubr.msk.bf16.gmra.mrb[0].mxu0 %vm4264_vm6, %v12284_v41 }
 0x451   : > { %9671 = vmatprep.mubr.msk.bf16.mxu0 %vm4264_vm6, %v12319_v1 }
 0x452   : > { %9722 = vmatmul.mubr.msk.bf16.gmra.mrb[52].mxu1 %vm4264_vm6, %v12456_v37  ;;  %v9515_v16 = vpop.f32.mrb[204].mxu1 }
 0x453   : > { %9777 = vmatprep.mubr.msk.bf16.mxu1 %vm4264_vm6, %v11908_v57  ;;  %v4814_v17 = vpop.f32.mrb[205].mxu1 }
 0x454   : > { %v9516_v10 = vpop.f32.mrb[206].mxu1 }
 0x455   : > { %v9465_v55 = vpop.f32.mrb[156].mxu0  ;;  %v4817_v60 = vpop.f32.mrb[207].mxu1 }
 0x456   : > { %v4506_v43 = vpop.f32.mrb[157].mxu0 }
 0x457   : > { %v12596_v22 = vadd.f32 %v4814_v17, %v4506_v43  ;;  %v9466_v30 = vpop.f32.mrb[158].mxu0 }
 0x458   : > { %v12598_v54 = vadd.f32 %v9516_v10, %v9466_v30  ;;  %v4509_v41 = vpop.f32.mrb[159].mxu0  ;;  %9672 = vmatmul.mubr.msk.bf16.gmra.mrb[4].mxu0 %vm4264_vm6, %v12325_v63 }
 0x459   : > { %v12602_v1 = vadd.f32 %v4817_v60, %v4509_v41 }
 0x45a   : > { %v9519_v46 = vpop.f32.mrb[208].mxu1 }
 0x45b   : > { %v4829_v62 = vpop.f32.mrb[209].mxu1 }
 0x45c   : > { %v9520_v29 = vpop.f32.mrb[210].mxu1 }
 0x45d   : > { %v4832_v56 = vpop.f32.mrb[211].mxu1 }
 0x460   : > { %v9469_v4 = vpop.f32.mrb[160].mxu0 }
 0x461   : > { %v12604_v59 = vadd.f32 %v9519_v46, %v9469_v4  ;;  %v4521_v14 = vpop.f32.mrb[161].mxu0 }
 0x462   : > { %v12606_v2 = vadd.f32 %v4829_v62, %v4521_v14  ;;  %v9470_v12 = vpop.f32.mrb[162].mxu0 }
 0x463   : > { %v12608_v51 = vadd.f32 %v9520_v29, %v9470_v12  ;;  %v4524_v20 = vpop.f32.mrb[163].mxu0 }
 0x464   : > { %v9523_v32 = vpop.f32.mrb[212].mxu1 }
 0x465   : > { %v4844_v21 = vpop.f32.mrb[213].mxu1 }
 0x466   : > { %v9524_v27 = vpop.f32.mrb[214].mxu1 }
 0x467   : > { %v4846_v63 = vpop.f32.mrb[215].mxu1 }
 0x46b   : > { %v9473_v25 = vpop.f32.mrb[164].mxu0 }
 0x46c   : > { %v12610_v26 = vadd.f32 %v9523_v32, %v9473_v25  ;;  %v4536_v24 = vpop.f32.mrb[165].mxu0  ;;  %v9579_v45 = vpop.f32.mrb[216].mxu1 }
 0x46d   : > { %v9474_v42 = vpop.f32.mrb[166].mxu0  ;;  %v12612_v15 = vpop.f32.mrb[217].mxu1 }
 0x46e   : > { %v4538_v50 = vpop.f32.mrb[167].mxu0  ;;  %v12614_v3 = vpop.f32.mrb[218].mxu1 }
 0x46f   : > { %v12616_v48 = vadd.f32 %v4846_v63, %v4538_v50  ;;  %v12618_v13 = vpop.f32.mrb[219].mxu1 }
 0x473   : > { %v9529_v23 = vpop.f32.mrb[168].mxu0 }
 0x474   : > { %v4908_v16 = vpop.f32.mrb[169].mxu0 }
 0x475   : > { %v12621_v17 = vadd.f32 %v4908_v16, %v12440_v53  ;;  %v12623_v10 = vpop.f32.mrb[220].mxu1  ;;  %v9530_v55 = vpop.f32.mrb[170].mxu0 }
 0x476   : > { %v12626_v60 = vadd.f32 %v9530_v55, %v12444_v58  ;;  %v12628_v43 = vpop.f32.mrb[221].mxu1  ;;  %v4911_v30 = vpop.f32.mrb[171].mxu0 }
 0x477   : > { %v12631_v41 = vadd.f32 %v4911_v30, %v12448_v49  ;;  %v12633_v46 = vpop.f32.mrb[222].mxu1 }
 0x478   : > { %14270 = vst [vmem:[#allocation38_spill] sm:$0xff] %v12626_v60  ;;  %v5244_v62 = vpop.f32.mrb[223].mxu1 }
 0x47b   : > { %v9533_v29 = vpop.f32.mrb[172].mxu0 }
 0x47c   : > { %v12636_v56 = vadd.f32 %v9533_v29, %v12460_v0  ;;  %v4923_v53 = vpop.f32.mrb[173].mxu0 }
 0x47d   : > { %v12639_v4 = vadd.f32 %v4923_v53, %v12464_v28  ;;  %v12641_v14 = vpop.f32.mrb[224].mxu1  ;;  %v9534_v58 = vpop.f32.mrb[174].mxu0 }
 0x47e   : > { %14271 = vst [vmem:[#allocation39_spill] sm:$0xff] %v12636_v56  ;;  %v12644_v12 = vadd.f32 %v9534_v58, %v12468_v47  ;;  %v5256_v20 = vpop.f32.mrb[225].mxu1  ;;  %v4926_v49 = vpop.f32.mrb[175].mxu0 }
 0x47f   : > { %v9588_v32 = vpop.f32.mrb[226].mxu1 }
 0x480   : > { %v12646_v21 = vpop.f32.mrb[227].mxu1 }
 0x483   : > { %v9537_v27 = vpop.f32.mrb[176].mxu0 }
 0x484   : > { %v12649_v63 = vadd.f32 %v9537_v27, %v12480_v44  ;;  %v4938_v0 = vpop.f32.mrb[177].mxu0 }
 0x485   : > { %v9591_v25 = vpop.f32.mrb[228].mxu1  ;;  %v9538_v24 = vpop.f32.mrb[178].mxu0 }
 0x486   : > { %14272 = vst [vmem:[#allocation40_spill] sm:$0xff] %v12649_v63  ;;  %v12651_v28 = vpop.f32.mrb[229].mxu1  ;;  %v4940_v45 = vpop.f32.mrb[179].mxu0 }
 0x487   : > { %v12654_v42 = vadd.f32 %v4940_v45, %v12482_v19  ;;  %v12656_v47 = vpop.f32.mrb[230].mxu1 }
 0x488   : > { %v12658_v50 = vpop.f32.mrb[231].mxu1 }
 0x489   : > { %14273 = vst [vmem:[#allocation41_spill] sm:$0xff] %v12654_v42 }
 0x48b   : > { %v9541_v23 = vpop.f32.mrb[180].mxu0 }
 0x48c   : > { %v4952_v16 = vpop.f32.mrb[181].mxu0 }
 0x48d   : > { %v12661_v55 = vadd.f32 %v4952_v16, %v12500_v33  ;;  %v12663_v44 = vpop.f32.mrb[232].mxu1  ;;  %v9542_v30 = vpop.f32.mrb[182].mxu0 }
 0x48e   : > { %v12666_v62 = vadd.f32 %v9542_v30, %v12502_v61  ;;  %v12668_v29 = vpop.f32.mrb[233].mxu1  ;;  %v4955_v53 = vpop.f32.mrb[183].mxu0 }
 0x48f   : > { %14274 = vst [vmem:[#allocation42_spill] sm:$0xff] %v12661_v55  ;;  %v12671_v19 = vadd.f32 %v4955_v53, %v12506_v38  ;;  %v12673_v58 = vpop.f32.mrb[234].mxu1 }
 0x490   : > { %14275 = vst [vmem:[#allocation43_spill] sm:$0xff] %v12666_v62  ;;  %v5288_v20 = vpop.f32.mrb[235].mxu1 }
 0x491   : > { %14276 = vst [vmem:[#allocation44_spill] sm:$0xff] %v12671_v19 }
 0x493   : > { %v9545_v49 = vpop.f32.mrb[184].mxu0 }
 0x494   : > { %v12676_v32 = vadd.f32 %v9545_v49, %v12514_v7  ;;  %v4967_v33 = vpop.f32.mrb[185].mxu0 }
 0x495   : > { %v12679_v27 = vadd.f32 %v4967_v33, %v12518_v18  ;;  %v12681_v0 = vpop.f32.mrb[236].mxu1  ;;  %v9546_v61 = vpop.f32.mrb[186].mxu0 }
 0x496   : > { %14277 = vst [vmem:[#allocation45_spill] sm:$0xff] %v12676_v32  ;;  %v12684_v25 = vadd.f32 %v9546_v61, %v12522_v31  ;;  %v5300_v24 = vpop.f32.mrb[237].mxu1  ;;  %v4970_v38 = vpop.f32.mrb[187].mxu0 }
 0x497   : > { %14278 = vst [vmem:[#allocation46_spill] sm:$0xff] %v12679_v27  ;;  %v9600_v45 = vpop.f32.mrb[238].mxu1 }
 0x498   : > { %14279 = vst [vmem:[#allocation47_spill] sm:$0xff] %v12684_v25  ;;  %v12686_v23 = vpop.f32.mrb[239].mxu1 }
 0x49b   : > { %v9549_v16 = vpop.f32.mrb[188].mxu0 }
 0x49c   : > { %v12689_v30 = vadd.f32 %v9549_v16, %v12536_v6  ;;  %v4982_v7 = vpop.f32.mrb[189].mxu0 }
 0x49d   : > { %v9603_v53 = vpop.f32.mrb[240].mxu1  ;;  %v9550_v20 = vpop.f32.mrb[190].mxu0 }
 0x49e   : > { %14280 = vst [vmem:[#allocation48_spill] sm:$0xff] %v12689_v30  ;;  %v12691_v18 = vpop.f32.mrb[241].mxu1  ;;  %v4984_v49 = vpop.f32.mrb[191].mxu0 }
 0x49f   : > { %v12694_v33 = vadd.f32 %v4984_v49, %v12538_v8  ;;  %v12696_v31 = vpop.f32.mrb[242].mxu1 }
 0x4a0   : > { %v12698_v61 = vpop.f32.mrb[243].mxu1 }
 0x4a1   : > { %14281 = vst [vmem:[#allocation49_spill] sm:$0xff] %v12694_v33 }
 0x4a3   : > { %v9553_v24 = vpop.f32.mrb[192].mxu0 }
 0x4a4   : > { %v4996_v38 = vpop.f32.mrb[193].mxu0 }
 0x4a5   : > { %v12701_v45 = vadd.f32 %v4996_v38, %v12548_v52  ;;  %v12703_v6 = vpop.f32.mrb[244].mxu1  ;;  %v9554_v16 = vpop.f32.mrb[194].mxu0 }
 0x4a6   : > { %v12706_v7 = vadd.f32 %v9554_v16, %v12552_v11  ;;  %v12708_v53 = vpop.f32.mrb[245].mxu1  ;;  %v4999_v20 = vpop.f32.mrb[195].mxu0 }
 0x4a7   : > { %14282 = vst [vmem:[#allocation50_spill] sm:$0xff] %v12701_v45  ;;  %v12711_v8 = vadd.f32 %v4999_v20, %v12556_v35  ;;  %v12713_v49 = vpop.f32.mrb[246].mxu1 }
 0x4a8   : > { %14283 = vst [vmem:[#allocation51_spill] sm:$0xff] %v12706_v7  ;;  %v5332_v37 = vpop.f32.mrb[247].mxu1 }
 0x4a9   : > { %14284 = vst [vmem:[#allocation52_spill] sm:$0xff] %v12711_v8 }
 0x4ab   : > { %v9557_v24 = vpop.f32.mrb[196].mxu0 }
 0x4ac   : > { %v12716_v57 = vadd.f32 %v9557_v24, %v12566_v34  ;;  %v5011_v52 = vpop.f32.mrb[197].mxu0 }
 0x4ad   : > { %v12719_v38 = vadd.f32 %v5011_v52, %v12570_v5  ;;  %v12721_v45 = vpop.f32.mrb[248].mxu1  ;;  %v9558_v11 = vpop.f32.mrb[198].mxu0 }
 0x4ae   : > { %14285 = vst [vmem:[#allocation53_spill] sm:$0xff] %v12716_v57  ;;  %v12724_v16 = vadd.f32 %v9558_v11, %v12574_v39  ;;  %v5344_v7 = vpop.f32.mrb[249].mxu1  ;;  %v5014_v35 = vpop.f32.mrb[199].mxu0 }
 0x4af   : > { %14286 = vst [vmem:[#allocation54_spill] sm:$0xff] %v12719_v38  ;;  %v9612_v20 = vpop.f32.mrb[250].mxu1 }
 0x4b0   : > { %14287 = vst [vmem:[#allocation55_spill] sm:$0xff] %v12724_v16  ;;  %v12726_v33 = vpop.f32.mrb[251].mxu1 }
 0x4b3   : > { %v9561_v37 = vpop.f32.mrb[200].mxu0 }
 0x4b4   : > { %v12729_v8 = vadd.f32 %v9561_v37, %v12584_v36  ;;  %v5026_v34 = vpop.f32.mrb[201].mxu0  ;;  %v8654_v36 = vld [vmem:[%s14211_s9 + $0x4] sm:$0x7] }
 0x4b5   : > { %v9615_v24 = vpop.f32.mrb[252].mxu1  ;;  %v9562_v57 = vpop.f32.mrb[202].mxu0  ;;  %9890 = vmatprep.subr.msk.bf16.mxu0 %vm1049_vm2, %v8654_v36 }
 0x4b6   : > { %14288 = vst [vmem:[#allocation56_spill] sm:$0xff] %v12729_v8  ;;  %v12731_v5 = vpop.f32.mrb[253].mxu1  ;;  %v5028_v52 = vpop.f32.mrb[203].mxu0 }
 0x4b7   : > { %v12734_v38 = vadd.f32 %v5028_v52, %v12586_v9  ;;  %v12736_v39 = vpop.f32.mrb[254].mxu1  ;;  %v7038_v9 = vsel %vm1049_vm2, %v8654_v36, 0 }
 0x4b8   : > { %v12738_v7 = vpop.f32.mrb[255].mxu1  ;;  %9726 = vmatpush3.bf16.msra.mxu0 %v7038_v9 }
 0x4b9   : > { %14289 = vst [vmem:[#allocation57_spill] sm:$0xff] %v12734_v38 }
 0x4bb   : > { %v9565_v11 = vpop.f32.mrb[204].mxu0 }
 0x4bc   : > { %v5040_v35 = vpop.f32.mrb[205].mxu0 }
 0x4bd   : > { %v12744_v20 = vadd.f32 %v5040_v35, %v12596_v22  ;;  %v12746_v57 = vpop.f32.mrb[0].mxu1  ;;  %v9566_v37 = vpop.f32.mrb[206].mxu0 }
 0x4be   : > { %v12751_v34 = vadd.f32 %v9566_v37, %v12598_v54  ;;  %v12753_v24 = vpop.f32.mrb[1].mxu1  ;;  %v5043_v52 = vpop.f32.mrb[207].mxu0 }
 0x4bf   : > { %14290 = vst [vmem:[#allocation58_spill] sm:$0xff] %v12744_v20  ;;  %v12756_v11 = vadd.f32 %v5043_v52, %v12602_v1  ;;  %v12758_v38 = vpop.f32.mrb[2].mxu1 }
 0x4c0   : > { %14291 = vst [vmem:[#allocation59_spill] sm:$0xff] %v12751_v34  ;;  %v5376_v22 = vpop.f32.mrb[3].mxu1 }
 0x4c1   : > { %14292 = vst [vmem:[#allocation60_spill] sm:$0xff] %v12756_v11 }
 0x4c3   : > { %v9569_v35 = vpop.f32.mrb[208].mxu0 }
 0x4c4   : > { %v12761_v20 = vadd.f32 %v9569_v35, %v12604_v59  ;;  %v5055_v8 = vpop.f32.mrb[209].mxu0 }
 0x4c5   : > { %v12764_v36 = vadd.f32 %v5055_v8, %v12606_v2  ;;  %v12766_v54 = vpop.f32.mrb[4].mxu1  ;;  %v9570_v37 = vpop.f32.mrb[210].mxu0 }
 0x4c6   : > { %14293 = vst [vmem:[#allocation61_spill] sm:$0xff] %v12761_v20  ;;  %v12769_v34 = vadd.f32 %v9570_v37, %v12608_v51  ;;  %v5388_v9 = vpop.f32.mrb[5].mxu1  ;;  %v5058_v1 = vpop.f32.mrb[211].mxu0 }
 0x4c7   : > { %14294 = vst [vmem:[#allocation62_spill] sm:$0xff] %v12764_v36  ;;  %v9624_v52 = vpop.f32.mrb[6].mxu1 }
 0x4c8   : > { %14295 = vst [vmem:[#allocation63_spill] sm:$0xff] %v12769_v34  ;;  %v12771_v11 = vpop.f32.mrb[7].mxu1 }
 0x4cb   : > { %v9573_v22 = vpop.f32.mrb[212].mxu0 }
 0x4cc   : > { %v12774_v16 = vadd.f32 %v9573_v22, %v12610_v26  ;;  %v5070_v59 = vpop.f32.mrb[213].mxu0  ;;  %v12783_v26 = vld [vmem:[%s14210_s8] ss:$0 sm:$0xff] }
 0x4cd   : > { %v9679_v35 = vpop.f32.mrb[8].mxu1  ;;  %v9574_v20 = vpop.f32.mrb[214].mxu0 }
 0x4ce   : > { %14296 = vst [vmem:[#allocation64_spill] sm:$0xff] %v12774_v16  ;;  %v5652_v2 = vpop.f32.mrb[9].mxu1  ;;  %v5072_v8 = vpop.f32.mrb[215].mxu0 }
 0x4cf   : > { %v12777_v36 = vadd.f32 %v5072_v8, %v12616_v48  ;;  %v9680_v32 = vpop.f32.mrb[10].mxu1 }
 0x4d0   : > { %v5655_v51 = vpop.f32.mrb[11].mxu1 }
 0x4d1   : > { %14297 = vst [vmem:[#allocation65_spill] sm:$0xff] %v12777_v36 }
 0x4d3   : > { %v9629_v37 = vpop.f32.mrb[216].mxu0 }
 0x4d4   : > { %v5438_v9 = vpop.f32.mrb[217].mxu0 }
 0x4d5   : > { %v5439_v1 = vadd.f32 %v5438_v9, %v12612_v15  ;;  %v9683_v52 = vpop.f32.mrb[12].mxu1  ;;  %v9630_v34 = vpop.f32.mrb[218].mxu0 }
 0x4d6   : > { %v5449_v20 = vadd.f32 %v9630_v34, %v12614_v3  ;;  %v5667_v22 = vpop.f32.mrb[13].mxu1  ;;  %v5441_v59 = vpop.f32.mrb[219].mxu0 }
 0x4d7   : > { %v5827_v35 = vadd.f32 %v5652_v2, %v5439_v1  ;;  %v5442_v48 = vadd.f32 %v5441_v59, %v12618_v13  ;;  %v9684_v8 = vpop.f32.mrb[14].mxu1 }
 0x4d8   : > { %v5829_v36 = vadd.f32 %v9680_v32, %v5449_v20  ;;  %v5670_v37 = vpop.f32.mrb[15].mxu1 }
 0x4d9   : > { %v5866_v16 = vadd.f32 %v12783_v26, %v5827_v35  ;;  %v5828_v15 = vadd.f32 %v5655_v51, %v5442_v48 }
 0x4da   : > { %v5868_v3 = vadd.f32 %v12783_v26, %v5829_v36 }
 0x4db   : > { %v5930_v9 = vmul.f32 0.01, %v5866_v16  ;;  %v5867_v30 = vadd.f32 %v12783_v26, %v5828_v15  ;;  %v9633_v62 = vpop.f32.mrb[220].mxu0  ;;  %vm5898_vm9 = vcmp.gt.f32.partialorder %v5866_v16, 0.0 }
 0x4dc   : > { %v5461_v25 = vadd.f32 %v9633_v62, %v12623_v10  ;;  %v5453_v55 = vpop.f32.mrb[221].mxu0  ;;  %v5932_v42 = vmul.f32 0.01, %v5868_v3  ;;  %vm5900_vm13 = vcmp.gt.f32.partialorder %v5868_v3, 0.0 }
 0x4dd   : > { %vm5899_vm12 = vcmp.gt.f32.partialorder %v5867_v30, 0.0  ;;  %v5931_v34 = vmul.f32 0.01, %v5867_v30  ;;  %v5454_v13 = vadd.f32 %v5453_v55, %v12628_v43  ;;  %v9687_v2 = vpop.f32.mrb[16].mxu1  ;;  %v9634_v32 = vpop.f32.mrb[222].mxu0  ;;  %v5962_v35 = vsel %vm5898_vm9, %v5866_v16, %v5930_v9 }
 0x4de   : > { %v5831_v1 = vadd.f32 %v9683_v52, %v5461_v25  ;;  %v5464_v20 = vadd.f32 %v9634_v32, %v12633_v46  ;;  %v5682_v51 = vpop.f32.mrb[17].mxu1  ;;  %v5456_v59 = vpop.f32.mrb[223].mxu0  ;;  %v5964_v9 = vsel %vm5900_vm13, %v5868_v3, %v5932_v42 }
 0x4df   : > { %v5963_v48 = vsel %vm5899_vm12, %v5867_v30, %v5931_v34  ;;  %v5830_v37 = vadd.f32 %v5667_v22, %v5454_v13  ;;  %v9688_v15 = vpop.f32.mrb[18].mxu1 }
 0x4e0   : > { %v5994_v27 = vpack.c.bf16 %v5963_v48, %v5962_v35  ;;  %v5870_v10 = vadd.f32 %v12783_v26, %v5831_v1  ;;  %v5832_v62 = vadd.f32 %v9684_v8, %v5464_v20  ;;  %v5684_v36 = vpop.f32.mrb[19].mxu1 }
 0x4e1   : > { %v5869_v19 = vadd.f32 %v12783_v26, %v5830_v37 }
 0x4e2   : > { %v5934_v43 = vmul.f32 0.01, %v5870_v10  ;;  %v5871_v55 = vadd.f32 %v12783_v26, %v5832_v62  ;;  %vm5902_vm14 = vcmp.gt.f32.partialorder %v5870_v10, 0.0  ;;  %v6011_v16 = vshrl.u32 %v5994_v27, 16 }
 0x4e3   : > { %vm5901_vm15 = vcmp.gt.f32.partialorder %v5869_v19, 0.0  ;;  %v5933_v46 = vmul.f32 0.01, %v5869_v19  ;;  %v9637_v25 = vpop.f32.mrb[224].mxu0  ;;  %v6014_v8 = vshll.u32 %v5994_v27, 16 }
 0x4e4   : > { %vm5903_vm0 = vcmp.gt.f32.partialorder %v5871_v55, 0.0  ;;  %v5935_v30 = vmul.f32 0.01, %v5871_v55  ;;  %v5476_v52 = vadd.f32 %v9637_v25, %v12641_v14  ;;  %v5468_v22 = vpop.f32.mrb[225].mxu0  ;;  %v6013_v1 = vrot.slane %v6011_v16, 7 }
 0x4e5   : > { %v5965_v34 = vsel %vm5901_vm15, %v5869_v19, %v5933_v46  ;;  %v9691_v13 = vpop.f32.mrb[20].mxu1  ;;  %v9638_v32 = vpop.f32.mrb[226].mxu0  ;;  %v5966_v20 = vsel %vm5902_vm14, %v5870_v10, %v5934_v43 }
 0x4e6   : > { %v12797_v51 = vpack.c.bf16 %v5965_v34, %v5964_v9  ;;  %v5967_v59 = vsel %vm5903_vm0, %v5871_v55, %v5935_v30  ;;  %v5834_v35 = vadd.f32 %v9687_v2, %v5476_v52  ;;  %v5696_v48 = vpop.f32.mrb[21].mxu1  ;;  %v5470_v37 = vpop.f32.mrb[227].mxu0  ;;  %v12804_v42 = vsel %vm10040_vm4, %v6013_v1, 0 }
 0x4e7   : > { %v12799_v15 = vpack.c.bf16 %v5967_v59, %v5966_v20  ;;  %v5471_v62 = vadd.f32 %v5470_v37, %v12646_v21  ;;  %v9692_v56 = vpop.f32.mrb[22].mxu1  ;;  %v6016_v19 = vor.u32 %v6014_v8, %v6013_v1  ;;  %v6491_v10 = vrot.slane %v12804_v42, 1 }
 0x4e8   : > { %v5873_v27 = vadd.f32 %v12783_v26, %v5834_v35  ;;  %v5699_v3 = vpop.f32.mrb[23].mxu1  ;;  %v6194_v43 = vshll.u32 %v12804_v42, 16  ;;  %v6198_v55 = vshrl.u32 %v12804_v42, 16  ;;  %v6021_v30 = vshll.u32 %v12797_v51, 16 }
 0x4e9   : > { %v5833_v2 = vadd.f32 %v5684_v36, %v5471_v62  ;;  %v12812_v46 = vsel %vm10040_vm4, 0, %v6016_v19  ;;  %v6539_v25 = vsel %vm1049_vm2, %v6491_v10, 0  ;;  %v6018_v9 = vshrl.u32 %v12797_v51, 16 }
 0x4ea   : > { %vm5905_vm1 = vcmp.gt.f32.partialorder %v5873_v27, 0.0  ;;  %v5937_v21 = vmul.f32 0.01, %v5873_v27  ;;  %v6196_v16 = vrot.slane %v6194_v43, 1  ;;  %6668 = vrot.lane.b32.xlu1 %v6539_v25, %s9958_s24  ;;  %v6490_v36 = vrot.slane %v12812_v46, 1 }
 0x4eb   : > { %v5872_v52 = vadd.f32 %v12783_v26, %v5833_v2  ;;  %v9641_v22 = vpop.f32.mrb[228].mxu0  ;;  %v6189_v32 = vshll.u32 %v12812_v46, 16  ;;  %v6025_v1 = vshrl.u32 %v12799_v15, 16 }
 0x4ec   : > { %v5969_v8 = vsel %vm5905_vm1, %v5873_v27, %v5937_v21  ;;  %v5482_v34 = vpop.f32.mrb[229].mxu0  ;;  %v6200_v13 = vor.u32 %v6198_v55, %v6196_v16  ;;  %v6492_v62 = vsel %vm998_vm3, %v6490_v36, %v6491_v10  ;;  %v6020_v55 = vrot.slane %v6018_v9, 7 }
 0x4ed   : > { %vm5904_vm9 = vcmp.gt.f32.partialorder %v5872_v52, 0.0  ;;  %v5936_v20 = vmul.f32 0.01, %v5872_v52  ;;  %v5483_v59 = vadd.f32 %v5482_v34, %v12651_v28  ;;  %v9695_v35 = vpop.f32.mrb[24].mxu1  ;;  %v9642_v37 = vpop.f32.mrb[230].mxu0  ;;  %v6191_v21 = vrot.slane %v6189_v32, 1 }
 0x4ee   : > { %v5493_v19 = vadd.f32 %v9642_v37, %v12656_v47  ;;  %v5711_v43 = vpop.f32.mrb[25].mxu1  ;;  %v5485_v2 = vpop.f32.mrb[231].mxu0  ;;  %v6442_v27 = vsel %vm10081_vm8, %v6200_v13, 0  ;;  %6666 = vrot.lane.b32.xlu1 %v6492_v62, %s9958_s24  ;;  %v6187_v28 = vshrl.u32 %v12812_v46, 16  ;;  %v12835_v34 = vsel %vm10040_vm4, %v6020_v55, 0 }
 0x4ef   : > { %v5968_v25 = vsel %vm5904_vm9, %v5872_v52, %v5936_v20  ;;  %v5835_v22 = vadd.f32 %v5696_v48, %v5483_v59  ;;  %v5486_v63 = vadd.f32 %v5485_v2, %v12658_v50  ;;  %v9696_v60 = vpop.f32.mrb[26].mxu1  ;;  %6588 = vrot.lane.b32.xlu0 %v6442_v27, %s9960_s20  ;;  %v6027_v9 = vrot.slane %v6025_v1, 7 }
 0x4f0   : > { %v12831_v10 = vpack.c.bf16 %v5969_v8, %v5968_v25  ;;  %v5837_v47 = vadd.f32 %v9692_v56, %v5493_v19  ;;  %v5714_v36 = vpop.f32.mrb[27].mxu1  ;;  %v6494_v50 = vrot.slane %v12835_v34, 1  ;;  %v6192_v13 = vor.u32 %v6191_v21, %v6187_v28 }
 0x4f1   : > { %v5874_v48 = vadd.f32 %v12783_v26, %v5835_v22  ;;  %v5836_v52 = vadd.f32 %v5699_v3, %v5486_v63  ;;  %v6028_v32 = vshll.u32 %v12799_v15, 16  ;;  %v6023_v59 = vor.u32 %v6021_v30, %v6020_v55 }
 0x4f2   : > { %v6032_v20 = vshrl.u32 %v12831_v10, 16  ;;  %v5876_v8 = vadd.f32 %v12783_v26, %v5837_v47  ;;  %v6541_v62 = vsel %vm1049_vm2, %v6494_v50, 0  ;;  %v6035_v19 = vshll.u32 %v12831_v10, 16 }
 0x4f3   : > { %vm5906_vm12 = vcmp.gt.f32.partialorder %v5874_v48, 0.0  ;;  %v5938_v56 = vmul.f32 0.01, %v5874_v48  ;;  %v5875_v37 = vadd.f32 %v12783_v26, %v5836_v52  ;;  %v9645_v1 = vpop.f32.mrb[232].mxu0  ;;  %6672 = vrot.lane.b32.xlu1 %v6541_v62, %s9958_s24  ;;  %v6197_v3 = vsel %vm679_vm7, %v6192_v13, %v6196_v16  ;;  %v12861_v13 = vld [vmem:[%s14211_s9] sm:$0x7] }
 0x4f4   : > { %v5940_v63 = vmul.f32 0.01, %v5876_v8  ;;  %v5497_v15 = vpop.f32.mrb[233].mxu0  ;;  %v6030_v2 = vor.u32 %v6028_v32, %v6027_v9  ;;  %v12847_v27 = vrot.slane %v6032_v20, 7  ;;  %6586 = vrot.lane.b32.xlu0 %v6197_v3, %s9960_s20  ;;  %v5505_v55 = vadd.f32 %v9645_v1, %v12663_v44  ;;  %9891 = vmatprep.subr.msk.bf16.mxu1 %vm1049_vm2, %v12861_v13 }
 0x4f5   : > { %vm5907_vm13 = vcmp.gt.f32.partialorder %v5875_v37, 0.0  ;;  %v5939_v30 = vmul.f32 0.01, %v5875_v37  ;;  %v9699_v21 = vpop.f32.mrb[28].mxu1  ;;  %v9646_v25 = vpop.f32.mrb[234].mxu0  ;;  %v5970_v22 = vsel %vm5906_vm12, %v5874_v48, %v5938_v56  ;;  %v5498_v28 = vadd.f32 %v5497_v15, %v12668_v29 }
 0x4f6   : > { %v5508_v47 = vadd.f32 %v9646_v25, %v12673_v58  ;;  %v5726_v36 = vpop.f32.mrb[29].mxu1  ;;  %v5500_v16 = vpop.f32.mrb[235].mxu0  ;;  %v12856_v52 = vsel %vm10040_vm4, %v6027_v9, 0  ;;  %v5839_v32 = vadd.f32 %v9695_v35, %v5505_v55  ;;  %v12866_v29 = vsel %vm10040_vm4, 0, %v6023_v59 }
 0x4f7   : > { %v5971_v44 = vsel %vm5907_vm13, %v5875_v37, %v5939_v30  ;;  %v9700_v20 = vpop.f32.mrb[30].mxu1  ;;  %v6497_v48 = vrot.slane %v12856_v52, 1  ;;  %v5838_v9 = vadd.f32 %v5711_v43, %v5498_v28  ;;  %v6493_v62 = vrot.slane %v12866_v29, 1 }
 0x4f8   : > { %v12870_v58 = vpack.c.bf16 %v5971_v44, %v5970_v22  ;;  %v5840_v56 = vadd.f32 %v9696_v60, %v5508_v47  ;;  %v5728_v1 = vpop.f32.mrb[31].mxu1  ;;  %v5878_v37 = vadd.f32 %v12783_v26, %v5839_v32  ;;  %v12877_v3 = vsel %vm10040_vm4, 0, %v6030_v2 }
 0x4f9   : > { %v6543_v35 = vsel %vm1049_vm2, %v6497_v48, 0  ;;  %v6209_v59 = vshll.u32 %v12835_v34, 16  ;;  %vm5908_vm14 = vcmp.gt.f32.partialorder %v5876_v8, 0.0  ;;  %v5877_v15 = vadd.f32 %v12783_v26, %v5838_v9 }
 0x4fa   : > { %v5879_v30 = vadd.f32 %v12783_v26, %v5840_v56  ;;  %6676 = vrot.lane.b32.xlu1 %v6543_v35, %s9958_s24  ;;  %v6495_v60 = vsel %vm998_vm3, %v6493_v62, %v6494_v50  ;;  %vm5910_vm15 = vcmp.gt.f32.partialorder %v5878_v37, 0.0  ;;  %v5942_v43 = vmul.f32 0.01, %v5878_v37 }
 0x4fb   : > { %6670 = vrot.lane.b32.xlu0 %v6495_v60, %s9958_s24  ;;  %v6496_v55 = vrot.slane %v12877_v3, 1  ;;  %v6211_v25 = vrot.slane %v6209_v59, 1  ;;  %v9649_v2 = vpop.f32.mrb[236].mxu0  ;;  %vm5909_vm0 = vcmp.gt.f32.partialorder %v5877_v15, 0.0  ;;  %v5941_v22 = vmul.f32 0.01, %v5877_v15 }
 0x4fc   : > { %vm5911_vm1 = vcmp.gt.f32.partialorder %v5879_v30, 0.0  ;;  %v5943_v28 = vmul.f32 0.01, %v5879_v30  ;;  %v5972_v47 = vsel %vm5908_vm14, %v5876_v8, %v5940_v63  ;;  %v6213_v16 = vshrl.u32 %v12835_v34, 16  ;;  %v5512_v50 = vpop.f32.mrb[237].mxu0 }
 0x4fd   : > { %v6498_v36 = vsel %vm998_vm3, %v6496_v55, %v6497_v48  ;;  %v5520_v44 = vadd.f32 %v9649_v2, %v12681_v0  ;;  %v9703_v32 = vpop.f32.mrb[32].mxu1  ;;  %v5974_v20 = vsel %vm5910_vm15, %v5878_v37, %v5942_v43  ;;  %v5973_v9 = vsel %vm5909_vm0, %v5877_v15, %v5941_v22  ;;  %v9650_v62 = vpop.f32.mrb[238].mxu0 }
 0x4fe   : > { %v5975_v56 = vsel %vm5911_vm1, %v5879_v30, %v5943_v28  ;;  %6674 = vrot.lane.b32.xlu1 %v6498_v36, %s9958_s24  ;;  %v5740_v35 = vpop.f32.mrb[33].mxu1  ;;  %v6204_v59 = vshll.u32 %v12866_v29, 16  ;;  %v12892_v60 = vpack.c.bf16 %v5973_v9, %v5972_v47  ;;  %v6215_v63 = vor.u32 %v6213_v16, %v6211_v25  ;;  %v5514_v55 = vpop.f32.mrb[239].mxu0 }
 0x4ff   : > { %v12894_v8 = vpack.c.bf16 %v5975_v56, %v5974_v20  ;;  %v5842_v48 = vadd.f32 %v9699_v21, %v5520_v44  ;;  %v9704_v0 = vpop.f32.mrb[34].mxu1  ;;  %v5515_v2 = vadd.f32 %v5514_v55, %v12686_v23  ;;  %v6202_v37 = vshrl.u32 %v12866_v29, 16 }
 0x500   : > { %v6206_v15 = vrot.slane %v6204_v59, 1  ;;  %v6224_v30 = vshll.u32 %v12856_v52, 16  ;;  %v5743_v43 = vpop.f32.mrb[35].mxu1  ;;  %v6443_v22 = vsel %vm10081_vm8, %v6215_v63, 0  ;;  %v6228_v47 = vshrl.u32 %v12856_v52, 16 }
 0x501   : > { %v5881_v28 = vadd.f32 %v12783_v26, %v5842_v48  ;;  %6592 = vrot.lane.b32.xlu0 %v6443_v22, %s9960_s20  ;;  %v5841_v21 = vadd.f32 %v5728_v1, %v5515_v2  ;;  %v6037_v23 = vor.u32 %v6035_v19, %v12847_v27  ;;  %v12911_v32 = vsel %vm10040_vm4, %v12847_v27, 0 }
 0x502   : > { %v6207_v36 = vor.u32 %v6206_v15, %v6202_v37  ;;  %v6226_v16 = vrot.slane %v6224_v30, 1  ;;  %v6500_v59 = vrot.slane %v12911_v32, 1  ;;  %v6217_v27 = vshrl.u32 %v12877_v3, 16 }
 0x503   : > { %vm5913_vm9 = vcmp.gt.f32.partialorder %v5881_v28, 0.0  ;;  %v5945_v50 = vmul.f32 0.01, %v5881_v28  ;;  %v9653_v20 = vpop.f32.mrb[240].mxu0  ;;  %v5880_v9 = vadd.f32 %v12783_v26, %v5841_v21  ;;  %v12917_v62 = vsel %vm10040_vm4, 0, %v6037_v23 }
 0x504   : > { %v6212_v1 = vsel %vm679_vm7, %v6207_v36, %v6211_v25  ;;  %v6230_v56 = vor.u32 %v6228_v47, %v6226_v16  ;;  %v5526_v10 = vpop.f32.mrb[241].mxu0  ;;  %v6499_v19 = vrot.slane %v12917_v62, 1  ;;  %v6219_v63 = vshll.u32 %v12877_v3, 16 }
 0x505   : > { %6590 = vrot.lane.b32.xlu1 %v6212_v1, %s9960_s20  ;;  %v12924_v48 = vpop.f32.mrb[36].mxu1  ;;  %v9654_v55 = vpop.f32.mrb[242].mxu0  ;;  %vm5912_vm12 = vcmp.gt.f32.partialorder %v5880_v9, 0.0  ;;  %v5944_v25 = vmul.f32 0.01, %v5880_v9  ;;  %v5527_v37 = vadd.f32 %v5526_v10, %v12691_v18  ;;  %v5977_v22 = vsel %vm5913_vm9, %v5881_v28, %v5945_v50 }
 0x506   : > { %v6444_v2 = vsel %vm10081_vm8, %v6230_v56, 0  ;;  %v12929_v15 = vpop.f32.mrb[37].mxu1  ;;  %v5529_v30 = vpop.f32.mrb[243].mxu0  ;;  %v6221_v47 = vrot.slane %v6219_v63, 1  ;;  %v5537_v21 = vadd.f32 %v9654_v55, %v12696_v31  ;;  %v6501_v1 = vsel %vm998_vm3, %v6499_v19, %v6500_v59 }
 0x507   : > { %6596 = vrot.lane.b32.xlu0 %v6444_v2, %s9960_s20  ;;  %v5530_v36 = vadd.f32 %v5529_v30, %v12698_v61  ;;  %v9708_v23 = vpop.f32.mrb[38].mxu1  ;;  %v5976_v20 = vsel %vm5912_vm12, %v5880_v9, %v5944_v25  ;;  %v5843_v44 = vadd.f32 %v5740_v35, %v5527_v37  ;;  %v6239_v56 = vshll.u32 %v12911_v32, 16 }
 0x508   : > { %v5758_v18 = vpop.f32.mrb[39].mxu1  ;;  %v12937_v10 = vpack.c.bf16 %v5977_v22, %v5976_v20  ;;  %v6222_v28 = vor.u32 %v6221_v47, %v6217_v27  ;;  %v5845_v50 = vadd.f32 %v9704_v0, %v5537_v21  ;;  %v6243_v61 = vshrl.u32 %v12911_v32, 16 }
 0x509   : > { %6678 = vrot.lane.b32.xlu1 %v6501_v1, %s9958_s24  ;;  %v5844_v2 = vadd.f32 %v5743_v43, %v5530_v36  ;;  %v5882_v63 = vadd.f32 %v12783_v26, %v5843_v44  ;;  %v12941_v31 = vrot.slane %v6239_v56, 1  ;;  %v6039_v9 = vshrl.u32 %v12870_v58, 16 }
 0x50a   : > { %v6049_v35 = vshll.u32 %v12892_v60, 16  ;;  %v6227_v19 = vsel %vm679_vm7, %v6222_v28, %v6226_v16  ;;  %v5884_v55 = vadd.f32 %v12783_v26, %v5845_v50  ;;  %v6545_v25 = vsel %vm1049_vm2, %v6500_v59, 0 }
 0x50b   : > { %v9657_v37 = vpop.f32.mrb[244].mxu0  ;;  %6594 = vrot.lane.b32.xlu0 %v6227_v19, %s9960_s20  ;;  %vm5914_vm13 = vcmp.gt.f32.partialorder %v5882_v63, 0.0  ;;  %v5946_v0 = vmul.f32 0.01, %v5882_v63  ;;  %v5883_v43 = vadd.f32 %v12783_v26, %v5844_v2  ;;  %v6245_v44 = vor.u32 %v6243_v61, %v12941_v31 }
 0x50c   : > { %v5541_v27 = vpop.f32.mrb[245].mxu0  ;;  %v6060_v30 = vshrl.u32 %v12937_v10, 16  ;;  %vm5916_vm14 = vcmp.gt.f32.partialorder %v5884_v55, 0.0  ;;  %v5948_v22 = vmul.f32 0.01, %v5884_v55  ;;  %v6041_v47 = vrot.slane %v6039_v9, 7 }
 0x50d   : > { %v12953_v16 = vpop.f32.mrb[40].mxu1  ;;  %vm5915_vm15 = vcmp.gt.f32.partialorder %v5883_v43, 0.0  ;;  %v5947_v21 = vmul.f32 0.01, %v5883_v43  ;;  %v6445_v59 = vsel %vm10081_vm8, %v6245_v44, 0  ;;  %v9658_v36 = vpop.f32.mrb[246].mxu0  ;;  %v5978_v1 = vsel %vm5914_vm13, %v5882_v63, %v5946_v0 }
 0x50e   : > { %v5770_v20 = vpop.f32.mrb[41].mxu1  ;;  %6600 = vrot.lane.b32.xlu1 %v6445_v59, %s9960_s20  ;;  %v14300_v56 = vshll.u32 %v12870_v58, 16  ;;  %v12962_v28 = vsel %vm10040_vm4, %v6041_v47, 0  ;;  %v6232_v50 = vshrl.u32 %v12917_v62, 16  ;;  %v5544_v2 = vpop.f32.mrb[247].mxu0  ;;  %v6234_v63 = vshll.u32 %v12917_v62, 16 }
 0x50f   : > { %v9712_v61 = vpop.f32.mrb[42].mxu1  ;;  %v5979_v9 = vsel %vm5915_vm15, %v5883_v43, %v5947_v21  ;;  %6680 = vrot.lane.b32.xlu0 %v6545_v25, %s9958_s24  ;;  %v6503_v19 = vrot.slane %v12962_v28, 1  ;;  %v5549_v0 = vadd.f32 %v9657_v37, %v12703_v6  ;;  %v5542_v59 = vadd.f32 %v5541_v27, %v12708_v53 }
 0x510   : > { %v6044_v18 = vor.u32 %v14300_v56, %v6041_v47  ;;  %v5772_v44 = vpop.f32.mrb[43].mxu1  ;;  %v12969_v58 = vpack.c.bf16 %v5979_v9, %v5978_v1  ;;  %v5552_v47 = vadd.f32 %v9658_v36, %v12713_v49  ;;  %v6236_v25 = vrot.slane %v6234_v63, 1 }
 0x511   : > { %v6547_v43 = vsel %vm1049_vm2, %v6503_v19, 0  ;;  %v5847_v21 = vadd.f32 %v12924_v48, %v5549_v0  ;;  %v5980_v6 = vsel %vm5916_vm14, %v5884_v55, %v5948_v22  ;;  %v5846_v37 = vadd.f32 %v12929_v15, %v5542_v59 }
 0x512   : > { %v12975_v20 = vsel %vm10040_vm4, 0, %v6044_v18  ;;  %6684 = vrot.lane.b32.xlu1 %v6547_v43, %s9958_s24  ;;  %v5848_v53 = vadd.f32 %v9708_v23, %v5552_v47  ;;  %v6254_v49 = vshll.u32 %v12962_v28, 16  ;;  %v6237_v36 = vor.u32 %v6236_v25, %v6232_v50 }
 0x513   : > { %v6502_v56 = vrot.slane %v12975_v20, 1  ;;  %v9661_v27 = vpop.f32.mrb[248].mxu0  ;;  %v5886_v1 = vadd.f32 %v12783_v26, %v5847_v21  ;;  %v6258_v2 = vshrl.u32 %v12962_v28, 16  ;;  %v5885_v61 = vadd.f32 %v12783_v26, %v5846_v37 }
 0x514   : > { %v5556_v48 = vpop.f32.mrb[249].mxu0  ;;  %v5887_v55 = vadd.f32 %v12783_v26, %v5848_v53  ;;  %v6256_v22 = vrot.slane %v6254_v49, 1  ;;  %v6046_v9 = vshrl.u32 %v12892_v60, 16  ;;  %v6242_v63 = vsel %vm679_vm7, %v6237_v36, %v12941_v31 }
 0x515   : > { %v6504_v18 = vsel %vm998_vm3, %v6502_v56, %v6503_v19  ;;  %v9715_v15 = vpop.f32.mrb[44].mxu1  ;;  %v9662_v23 = vpop.f32.mrb[250].mxu0  ;;  %vm5918_vm0 = vcmp.gt.f32.partialorder %v5886_v1, 0.0  ;;  %v5950_v50 = vmul.f32 0.01, %v5886_v1  ;;  %v6247_v0 = vshrl.u32 %v12975_v20, 16  ;;  %6598 = vrot.lane.b32.xlu0 %v6242_v63, %s9960_s20 }
 0x516   : > { %v12993_v19 = vpop.f32.mrb[45].mxu1  ;;  %v5558_v59 = vpop.f32.mrb[251].mxu0  ;;  %vm5917_vm1 = vcmp.gt.f32.partialorder %v5885_v61, 0.0  ;;  %v5949_v47 = vmul.f32 0.01, %v5885_v61  ;;  %vm5919_vm9 = vcmp.gt.f32.partialorder %v5887_v55, 0.0  ;;  %6682 = vrot.lane.b32.xlu1 %v6504_v18, %s9958_s24  ;;  %v6260_v21 = vor.u32 %v6258_v2, %v6256_v22 }
 0x517   : > { %v5951_v43 = vmul.f32 0.01, %v5887_v55  ;;  %v5982_v25 = vsel %vm5918_vm0, %v5886_v1, %v5950_v50  ;;  %v6048_v56 = vrot.slane %v6046_v9, 7  ;;  %v6249_v31 = vshll.u32 %v12975_v20, 16  ;;  %v12998_v37 = vpop.f32.mrb[46].mxu1 }
 0x518   : > { %v5981_v53 = vsel %vm5917_vm1, %v5885_v61, %v5949_v47  ;;  %v5564_v36 = vadd.f32 %v9661_v27, %v12721_v45  ;;  %v5559_v48 = vadd.f32 %v5558_v59, %v12726_v33  ;;  %v13002_v15 = vpop.f32.mrb[47].mxu1  ;;  %v6446_v1 = vsel %vm10081_vm8, %v6260_v21, 0  ;;  %v13015_v2 = vld [vmem:[%s14211_s9 + $0x8] sm:$0x7] }
 0x519   : > { %v5983_v49 = vsel %vm5919_vm9, %v5887_v55, %v5951_v43  ;;  %v13004_v23 = vpack.c.bf16 %v5981_v53, %v5980_v6  ;;  %v6051_v18 = vor.u32 %v6049_v35, %v6048_v56  ;;  %6604 = vrot.lane.b32.xlu0 %v6446_v1, %s9960_s20  ;;  %v13020_v33 = vsel %vm10040_vm4, %v6048_v56, 0  ;;  %9892 = vmatprep.subr.msk.bf16.mxu0 %vm1049_vm2, %v13015_v2 }
 0x51a   : > { %v13006_v63 = vpack.c.bf16 %v5983_v49, %v5982_v25  ;;  %14301 = vst [vmem:[#allocation2_spill] sm:$0xff] %v13020_v33  ;;  %v6251_v45 = vrot.slane %v6249_v31, 1  ;;  %v5850_v6 = vadd.f32 %v12953_v16, %v5564_v36  ;;  %v5849_v27 = vadd.f32 %v5772_v44, %v5559_v48 }
 0x51b   : > { %v9665_v61 = vpop.f32.mrb[252].mxu0  ;;  %v6056_v60 = vshll.u32 %v12894_v8, 16  ;;  %v13028_v35 = vrot.slane %v6060_v30, 7  ;;  %v6506_v55 = vrot.slane %v13020_v33, 1  ;;  %v6053_v9 = vshrl.u32 %v12894_v8, 16 }
 0x51c   : > { %v5570_v50 = vpop.f32.mrb[253].mxu0  ;;  %v6252_v59 = vor.u32 %v6251_v45, %v6247_v0  ;;  %v5889_v47 = vadd.f32 %v12783_v26, %v5850_v6  ;;  %v5888_v16 = vadd.f32 %v12783_v26, %v5849_v27  ;;  %v13036_v44 = vsel %vm10040_vm4, 0, %v6051_v18 }
 0x51d   : > { %14302 = vst [vmem:[#allocation3_spill] sm:$0xff] %v13036_v44  ;;  %v13038_v43 = vpop.f32.mrb[48].mxu1  ;;  %v9666_v25 = vpop.f32.mrb[254].mxu0  ;;  %v6549_v30 = vsel %vm1049_vm2, %v6506_v55, 0  ;;  %v6055_v21 = vrot.slane %v6053_v9, 7  ;;  %v6505_v56 = vrot.slane %v13036_v44, 1 }
 0x51e   : > { %v6269_v8 = vshll.u32 %v13020_v33, 16  ;;  %v13043_v31 = vpop.f32.mrb[49].mxu1  ;;  %v5573_v0 = vpop.f32.mrb[255].mxu0  ;;  %6688 = vrot.lane.b32.xlu1 %v6549_v30, %s9958_s24  ;;  %v6257_v53 = vsel %vm679_vm7, %v6252_v59, %v6256_v22  ;;  %vm5921_vm12 = vcmp.gt.f32.partialorder %v5889_v47, 0.0  ;;  %v5953_v49 = vmul.f32 0.01, %v5889_v47 }
 0x51f   : > { %vm5920_vm13 = vcmp.gt.f32.partialorder %v5888_v16, 0.0  ;;  %v13047_v36 = vpop.f32.mrb[50].mxu1  ;;  %6602 = vrot.lane.b32.xlu0 %v6257_v53, %s9960_s20  ;;  %v5952_v48 = vmul.f32 0.01, %v5888_v16  ;;  %v6058_v1 = vor.u32 %v6056_v60, %v6055_v21  ;;  %v13052_v18 = vsel %vm10040_vm4, %v6055_v21, 0 }
 0x520   : > { %14303 = vst [vmem:[#allocation66_spill] sm:$0xff] %v13052_v18  ;;  %v6507_v45 = vsel %vm998_vm3, %v6505_v56, %v6506_v55  ;;  %v5802_v6 = vpop.f32.mrb[51].mxu1  ;;  %v5985_v27 = vsel %vm5921_vm12, %v5889_v47, %v5953_v49  ;;  %v6509_v61 = vrot.slane %v13052_v18, 1  ;;  %v6271_v22 = vrot.slane %v6269_v8, 1 }
 0x521   : > { %v6273_v9 = vshrl.u32 %v13020_v33, 16  ;;  %v5984_v59 = vsel %vm5920_vm13, %v5888_v16, %v5952_v48  ;;  %v13059_v30 = vsel %vm10040_vm4, 0, %v6058_v1  ;;  %v5571_v60 = vadd.f32 %v5570_v50, %v12731_v5 }
 0x522   : > { %v5581_v53 = vadd.f32 %v9666_v25, %v12736_v39  ;;  %v13063_v21 = vpack.c.bf16 %v5985_v27, %v5984_v59  ;;  %v6551_v55 = vsel %vm1049_vm2, %v6509_v61, 0  ;;  %v6508_v47 = vrot.slane %v13059_v30, 1 }
 0x523   : > { %v6275_v56 = vor.u32 %v6273_v9, %v6271_v22  ;;  %v9669_v49 = vpop.f32.mrb[0].mxu0  ;;  %6692 = vrot.lane.b32.xlu1 %v6551_v55, %s9958_s24  ;;  %6686 = vrot.lane.b32.xlu0 %v6507_v45, %s9958_s24  ;;  %v5851_v16 = vadd.f32 %v12993_v19, %v5571_v60  ;;  %v5574_v5 = vadd.f32 %v5573_v0, %v12738_v7  ;;  %v6063_v39 = vshll.u32 %v12937_v10, 16 }
 0x524   : > { %v5853_v8 = vadd.f32 %v12998_v37, %v5581_v53  ;;  %v5585_v50 = vpop.f32.mrb[1].mxu0  ;;  %v6510_v25 = vsel %vm998_vm3, %v6508_v47, %v6509_v61  ;;  %v6262_v48 = vshrl.u32 %v13036_v44, 16  ;;  %v6264_v37 = vshll.u32 %v13036_v44, 16 }
 0x525   : > { %v13075_v1 = vpop.f32.mrb[52].mxu1  ;;  %v9670_v6 = vpop.f32.mrb[2].mxu0  ;;  %v5890_v27 = vadd.f32 %v12783_v26, %v5851_v16  ;;  %v5852_v19 = vadd.f32 %v13002_v15, %v5574_v5  ;;  %v6447_v10 = vsel %vm10081_vm8, %v6275_v56, 0  ;;  %v6284_v0 = vshll.u32 %v13052_v18, 16 }
 0x526   : > { %v5892_v45 = vadd.f32 %v12783_v26, %v5853_v8  ;;  %v5814_v9 = vpop.f32.mrb[53].mxu1  ;;  %v5588_v7 = vpop.f32.mrb[3].mxu0  ;;  %v6288_v61 = vshrl.u32 %v13052_v18, 16  ;;  %v6065_v59 = vor.u32 %v6063_v39, %v13028_v35  ;;  %v6266_v47 = vrot.slane %v6264_v37, 1 }
 0x527   : > { %v9724_v60 = vpop.f32.mrb[54].mxu1  ;;  %6690 = vrot.lane.b32.xlu1 %v6510_v25, %s9958_s24  ;;  %6608 = vrot.lane.b32.xlu0 %v6447_v10, %s9960_s20  ;;  %vm5922_vm14 = vcmp.gt.f32.partialorder %v5890_v27, 0.0  ;;  %v5954_v15 = vmul.f32 0.01, %v5890_v27  ;;  %v5891_v55 = vadd.f32 %v12783_v26, %v5852_v19  ;;  %v6286_v16 = vrot.slane %v6284_v0, 1 }
 0x528   : > { %vm5924_vm15 = vcmp.gt.f32.partialorder %v5892_v45, 0.0  ;;  %v5956_v53 = vmul.f32 0.01, %v5892_v45  ;;  %v13091_v56 = vsel %vm10040_vm4, 0, %v6065_v59  ;;  %v13093_v8 = vpop.f32.mrb[55].mxu1  ;;  %v6070_v5 = vshll.u32 %v12969_v58, 16 }
 0x529   : > { %v5986_v39 = vsel %vm5922_vm14, %v5890_v27, %v5954_v15  ;;  %v13099_v25 = vsel %vm10040_vm4, %v13028_v35, 0  ;;  %v6511_v9 = vrot.slane %v13091_v56, 1  ;;  %vm5923_vm0 = vcmp.gt.f32.partialorder %v5891_v55, 0.0 }
 0x52a   : > { %v5955_v19 = vmul.f32 0.01, %v5891_v55  ;;  %v6267_v37 = vor.u32 %v6266_v47, %v6262_v48  ;;  %v6290_v7 = vor.u32 %v6288_v61, %v6286_v16  ;;  %v5988_v0 = vsel %vm5924_vm15, %v5892_v45, %v5956_v53 }
 0x52b   : > { %v9673_v10 = vpop.f32.mrb[4].mxu0  ;;  %v6512_v59 = vrot.slane %v13099_v25, 1  ;;  %v6279_v60 = vshll.u32 %v13059_v30, 16  ;;  %v5593_v27 = vadd.f32 %v9669_v49, %v12746_v57  ;;  %v5586_v33 = vadd.f32 %v5585_v50, %v12753_v24 }
 0x52c   : > { %v5600_v15 = vpop.f32.mrb[5].mxu0  ;;  %v5987_v18 = vsel %vm5923_vm0, %v5891_v55, %v5955_v19  ;;  %v6272_v35 = vsel %vm679_vm7, %v6267_v37, %v6271_v22  ;;  %v6448_v44 = vsel %vm10081_vm8, %v6290_v7, 0  ;;  %v6277_v45 = vshrl.u32 %v13059_v30, 16 }
 0x52d   : > { %v9674_v48 = vpop.f32.mrb[6].mxu0  ;;  %v13110_v61 = vpack.c.bf16 %v5987_v18, %v5986_v39  ;;  %6606 = vrot.lane.b32.xlu1 %v6272_v35, %s9960_s20  ;;  %6612 = vrot.lane.b32.xlu0 %v6448_v44, %s9960_s20  ;;  %v6281_v53 = vrot.slane %v6279_v60, 1  ;;  %v5855_v57 = vadd.f32 %v13038_v43, %v5593_v27  ;;  %v6513_v22 = vsel %vm998_vm3, %v6511_v9, %v6512_v59 }
 0x52e   : > { %v5602_v49 = vpop.f32.mrb[7].mxu0  ;;  %v5854_v55 = vadd.f32 %v13043_v31, %v5586_v33  ;;  %v5596_v47 = vadd.f32 %v9670_v6, %v12758_v38  ;;  %v6299_v24 = vshll.u32 %v13099_v25, 16  ;;  %v6303_v39 = vshrl.u32 %v13099_v25, 16 }
 0x52f   : > { %v6282_v18 = vor.u32 %v6281_v53, %v6277_v45  ;;  %v5894_v50 = vadd.f32 %v12783_v26, %v5855_v57  ;;  %v6553_v44 = vsel %vm1049_vm2, %v6512_v59, 0  ;;  %v6067_v9 = vshrl.u32 %v12969_v58, 16 }
 0x530   : > { %v5893_v19 = vadd.f32 %v12783_v26, %v5854_v55  ;;  %v5856_v43 = vadd.f32 %v13047_v36, %v5596_v47  ;;  %v6301_v37 = vrot.slane %v6299_v24, 1  ;;  %v6292_v31 = vshrl.u32 %v13091_v56, 16 }
 0x531   : > { %6694 = vrot.lane.b32.xlu1 %v6513_v22, %s9958_s24  ;;  %v6287_v38 = vsel %vm679_vm7, %v6282_v18, %v6286_v16  ;;  %vm5926_vm1 = vcmp.gt.f32.partialorder %v5894_v50, 0.0  ;;  %v5958_v33 = vmul.f32 0.01, %v5894_v50  ;;  %v6069_v36 = vrot.slane %v6067_v9, 7 }
 0x532   : > { %6610 = vrot.lane.b32.xlu0 %v6287_v38, %s9960_s20  ;;  %vm5925_vm9 = vcmp.gt.f32.partialorder %v5893_v19, 0.0  ;;  %v5957_v6 = vmul.f32 0.01, %v5893_v19  ;;  %v5895_v7 = vadd.f32 %v12783_v26, %v5856_v43  ;;  %v6305_v59 = vor.u32 %v6303_v39, %v6301_v37 }
 0x533   : > { %v5990_v60 = vsel %vm5926_vm1, %v5894_v50, %v5958_v33  ;;  %v6294_v27 = vshll.u32 %v13091_v56, 16  ;;  %v5608_v58 = vadd.f32 %v9673_v10, %v12766_v54  ;;  %v6072_v45 = vor.u32 %v6070_v5, %v6069_v36 }
 0x534   : > { %v5989_v15 = vsel %vm5925_vm9, %v5893_v19, %v5957_v6  ;;  %vm5927_vm12 = vcmp.gt.f32.partialorder %v5895_v7, 0.0  ;;  %v5959_v16 = vmul.f32 0.01, %v5895_v7  ;;  %v6449_v35 = vsel %vm10081_vm8, %v6305_v59, 0 }
 0x535   : > { %v13135_v48 = vpack.c.bf16 %v5989_v15, %v5988_v0  ;;  %6616 = vrot.lane.b32.xlu1 %v6449_v35, %s9960_s20  ;;  %v13140_v53 = vsel %vm10040_vm4, %v6069_v36, 0  ;;  %v6296_v57 = vrot.slane %v6294_v27, 1  ;;  %v5858_v10 = vadd.f32 %v13075_v1, %v5608_v58 }
 0x536   : > { %v5991_v22 = vsel %vm5927_vm12, %v5895_v7, %v5959_v16  ;;  %6696 = vrot.lane.b32.xlu0 %v6553_v44, %s9958_s24  ;;  %v6515_v54 = vrot.slane %v13140_v53, 1  ;;  %v5603_v55 = vadd.f32 %v5602_v49, %v12771_v11  ;;  %v13150_v5 = vsel %vm10040_vm4, 0, %v6072_v45 }
 0x537   : > { %v13146_v47 = vpack.c.bf16 %v5991_v22, %v5990_v60  ;;  %v6297_v0 = vor.u32 %v6296_v57, %v6292_v31  ;;  %v5897_v18 = vadd.f32 %v12783_v26, %v5858_v10  ;;  %v6514_v39 = vrot.slane %v13150_v5, 1 }
 0x538   : > { %v6555_v24 = vsel %vm1049_vm2, %v6515_v54, 0  ;;  %v5857_v50 = vadd.f32 %v13093_v8, %v5603_v55  ;;  %v6314_v11 = vshll.u32 %v13140_v53, 16  ;;  %v6077_v49 = vshll.u32 %v13004_v23, 16 }
 0x539   : > { %6700 = vrot.lane.b32.xlu1 %v6555_v24, %s9958_s24  ;;  %v6302_v1 = vsel %vm679_vm7, %v6297_v0, %v6301_v37  ;;  %v5961_v44 = vmul.f32 0.01, %v5897_v18  ;;  %vm5929_vm13 = vcmp.gt.f32.partialorder %v5897_v18, 0.0  ;;  %v6318_v9 = vshrl.u32 %v13140_v53, 16 }
 0x53a   : > { %6614 = vrot.lane.b32.xlu0 %v6302_v1, %s9960_s20  ;;  %v5896_v19 = vadd.f32 %v12783_v26, %v5857_v50  ;;  %v6316_v43 = vrot.slane %v6314_v11, 1  ;;  %v6074_v8 = vshrl.u32 %v13004_v23, 16  ;;  %v6084_v38 = vshll.u32 %v13006_v63, 16 }
 0x53b   : > { %v6516_v37 = vsel %vm998_vm3, %v6514_v39, %v6515_v54  ;;  %v6309_v7 = vshll.u32 %v13150_v5, 16  ;;  %v6081_v26 = vshrl.u32 %v13006_v63, 16  ;;  %v6088_v59 = vshrl.u32 %v13063_v21, 16 }
 0x53c   : > { %vm5928_vm14 = vcmp.gt.f32.partialorder %v5896_v19, 0.0  ;;  %v5960_v33 = vmul.f32 0.01, %v5896_v19  ;;  %v6320_v31 = vor.u32 %v6318_v9, %v6316_v43  ;;  %v6076_v6 = vrot.slane %v6074_v8, 7 }
 0x53d   : > { %6698 = vrot.lane.b32.xlu1 %v6516_v37, %s9958_s24  ;;  %v5993_v60 = vsel %vm5929_vm13, %v5897_v18, %v5961_v44  ;;  %v6307_v23 = vshrl.u32 %v13150_v5, 16  ;;  %v6311_v35 = vrot.slane %v6309_v7, 1  ;;  %v6083_v45 = vrot.slane %v6081_v26, 7 }
 0x53e   : > { %v5992_v36 = vsel %vm5928_vm14, %v5896_v19, %v5960_v33  ;;  %v6450_v58 = vsel %vm10081_vm8, %v6320_v31, 0  ;;  %v6079_v15 = vor.u32 %v6077_v49, %v6076_v6  ;;  %v13177_v16 = vsel %vm10040_vm4, %v6076_v6, 0 }
 0x53f   : > { %v13171_v27 = vpack.c.bf16 %v5993_v60, %v5992_v36  ;;  %6620 = vrot.lane.b32.xlu0 %v6450_v58, %s9960_s20  ;;  %v6518_v63 = vrot.slane %v13177_v16, 1  ;;  %v6329_v57 = vshll.u32 %v13177_v16, 16  ;;  %v6312_v10 = vor.u32 %v6311_v35, %v6307_v23 }
 0x540   : > { %v13184_v22 = vsel %vm10040_vm4, 0, %v6079_v15  ;;  %v6086_v55 = vor.u32 %v6084_v38, %v6083_v45  ;;  %v13189_v0 = vsel %vm10040_vm4, %v6083_v45, 0  ;;  %v6090_v24 = vrot.slane %v6088_v59, 7 }
 0x541   : > { %v6557_v54 = vsel %vm1049_vm2, %v6518_v63, 0  ;;  %v6521_v18 = vrot.slane %v13189_v0, 1  ;;  %v6517_v50 = vrot.slane %v13184_v22, 1  ;;  %v6317_v39 = vsel %vm679_vm7, %v6312_v10, %v6316_v43 }
 0x542   : > { %6704 = vrot.lane.b32.xlu1 %v6557_v54, %s9958_s24  ;;  %v13197_v1 = vsel %vm10040_vm4, 0, %v6086_v55  ;;  %v6331_v11 = vrot.slane %v6329_v57, 1  ;;  %v6324_v49 = vshll.u32 %v13184_v22, 16  ;;  %v6091_v44 = vshll.u32 %v13063_v21, 16 }
 0x543   : > { %6618 = vrot.lane.b32.xlu0 %v6317_v39, %s9960_s20  ;;  %v6333_v19 = vshrl.u32 %v13177_v16, 16  ;;  %v6559_v9 = vsel %vm1049_vm2, %v6521_v18, 0  ;;  %v6520_v8 = vrot.slane %v13197_v1, 1  ;;  %v6344_v43 = vshll.u32 %v13189_v0, 16 }
 0x544   : > { %v6326_v38 = vrot.slane %v6324_v49, 1  ;;  %v6322_v33 = vshrl.u32 %v13184_v22, 16  ;;  %v6093_v37 = vor.u32 %v6091_v44, %v6090_v24  ;;  %v13210_v31 = vsel %vm10040_vm4, %v6090_v24, 0 }
 0x545   : > { %v6519_v21 = vsel %vm998_vm3, %v6517_v50, %v6518_v63  ;;  %v6335_v6 = vor.u32 %v6333_v19, %v6331_v11  ;;  %v6346_v7 = vrot.slane %v6344_v43, 1  ;;  %v6339_v26 = vshll.u32 %v13197_v1, 16 }
 0x546   : > { %6708 = vrot.lane.b32.xlu1 %v6559_v9, %s9958_s24  ;;  %v6095_v59 = vshrl.u32 %v13110_v61, 16  ;;  %v6522_v60 = vsel %vm998_vm3, %v6520_v8, %v6521_v18  ;;  %v6327_v36 = vor.u32 %v6326_v38, %v6322_v33  ;;  %v6348_v23 = vshrl.u32 %v13189_v0, 16 }
 0x547   : > { %6702 = vrot.lane.b32.xlu0 %v6519_v21, %s9958_s24  ;;  %v6359_v58 = vshll.u32 %v13210_v31, 16  ;;  %v13222_v15 = vsel %vm10040_vm4, 0, %v6093_v37  ;;  %v6102_v63 = vshrl.u32 %v13135_v48, 16  ;;  %v6451_v35 = vsel %vm10081_vm8, %v6335_v6, 0 }
 0x548   : > { %v6350_v45 = vor.u32 %v6348_v23, %v6346_v7  ;;  %v6341_v57 = vrot.slane %v6339_v26, 1  ;;  %v6097_v54 = vrot.slane %v6095_v59, 7  ;;  %v6332_v10 = vsel %vm679_vm7, %v6327_v36, %v6331_v11 }
 0x549   : > { %v6523_v55 = vrot.slane %v13222_v15, 1  ;;  %v6337_v24 = vshrl.u32 %v13197_v1, 16  ;;  %v6361_v18 = vrot.slane %v6359_v58, 1  ;;  %v6098_v50 = vshll.u32 %v13110_v61, 16 }
 0x54a   : > { %6706 = vrot.lane.b32.xlu1 %v6522_v60, %s9958_s24  ;;  %v6524_v39 = vrot.slane %v13210_v31, 1  ;;  %v6104_v49 = vrot.slane %v6102_v63, 7  ;;  %v6452_v44 = vsel %vm10081_vm8, %v6350_v45, 0  ;;  %v6363_v9 = vshrl.u32 %v13210_v31, 16 }
 0x54b   : > { %6624 = vrot.lane.b32.xlu0 %v6451_v35, %s9960_s20  ;;  %v6342_v19 = vor.u32 %v6341_v57, %v6337_v24  ;;  %v6354_v11 = vshll.u32 %v13222_v15, 16  ;;  %v6105_v8 = vshll.u32 %v13135_v48, 16  ;;  %v6100_v38 = vor.u32 %v6098_v50, %v6097_v54 }
 0x54c   : > { %v13242_v61 = vsel %vm10040_vm4, %v6097_v54, 0  ;;  %v6525_v43 = vsel %vm998_vm3, %v6523_v55, %v6524_v39  ;;  %v6365_v33 = vor.u32 %v6363_v9, %v6361_v18  ;;  %v6352_v36 = vshrl.u32 %v13222_v15, 16 }
 0x54d   : > { %v6107_v37 = vor.u32 %v6105_v8, %v6104_v49  ;;  %v6347_v21 = vsel %vm679_vm7, %v6342_v19, %v6346_v7  ;;  %v6356_v6 = vrot.slane %v6354_v11, 1  ;;  %v6374_v26 = vshll.u32 %v13242_v61, 16 }
 0x54e   : > { %6622 = vrot.lane.b32.xlu1 %v6332_v10, %s9960_s20  ;;  %v13251_v48 = vsel %vm10040_vm4, 0, %v6100_v38  ;;  %v6453_v59 = vsel %vm10081_vm8, %v6365_v33, 0  ;;  %v6527_v60 = vrot.slane %v13242_v61, 1  ;;  %v6109_v23 = vshrl.u32 %v13146_v47, 16 }
 0x54f   : > { %6628 = vrot.lane.b32.xlu0 %v6452_v44, %s9960_s20  ;;  %v13261_v7 = vsel %vm10040_vm4, 0, %v6107_v37  ;;  %v6561_v58 = vsel %vm1049_vm2, %v6524_v39, 0  ;;  %v6357_v63 = vor.u32 %v6356_v6, %v6352_v36  ;;  %v6376_v35 = vrot.slane %v6374_v26, 1 }
 0x550   : > { %v6369_v45 = vshll.u32 %v13251_v48, 16  ;;  %v6563_v57 = vsel %vm1049_vm2, %v6527_v60, 0  ;;  %v6526_v54 = vrot.slane %v13251_v48, 1  ;;  %v6378_v10 = vshrl.u32 %v13242_v61, 16 }
 0x551   : > { %v6384_v55 = vshll.u32 %v13261_v7, 16  ;;  %v6111_v24 = vrot.slane %v6109_v23, 7  ;;  %v6116_v50 = vshrl.u32 %v13171_v27, 16  ;;  %v13274_v39 = vsel %vm10040_vm4, %v6104_v49, 0 }
 0x552   : > { %6710 = vrot.lane.b32.xlu1 %v6525_v43, %s9958_s24  ;;  %v7342_v44 = vsel %vm1049_vm2, %v12861_v13, 0  ;;  %v6362_v19 = vsel %vm679_vm7, %v6357_v63, %v6361_v18  ;;  %v6380_v9 = vor.u32 %v6378_v10, %v6376_v35  ;;  %v6371_v11 = vrot.slane %v6369_v45, 1 }
 0x553   : > { %6626 = vrot.lane.b32.xlu0 %v6347_v21, %s9960_s20  ;;  %9776 = vmatpush3.bf16.msra.mxu1 %v7342_v44  ;;  %v6112_v38 = vshll.u32 %v13146_v47, 16  ;;  %v6367_v43 = vshrl.u32 %v13251_v48, 16  ;;  %v6528_v33 = vsel %vm998_vm3, %v6526_v54, %v6527_v60  ;;  %v6530_v49 = vrot.slane %v13274_v39, 1 }
 0x554   : > { %v6386_v37 = vrot.slane %v6384_v55, 1  ;;  %v6389_v21 = vshll.u32 %v13274_v39, 16  ;;  %v6118_v13 = vrot.slane %v6116_v50, 7  ;;  %v6454_v6 = vsel %vm10081_vm8, %v6380_v9, 0 }
 0x555   : > { %v6114_v18 = vor.u32 %v6112_v38, %v6111_v24  ;;  %v6372_v26 = vor.u32 %v6371_v11, %v6367_v43  ;;  %v6382_v47 = vshrl.u32 %v13261_v7, 16  ;;  %v6119_v23 = vshll.u32 %v13171_v27, 16 }
 0x556   : > { %6632 = vrot.lane.b32.xlu1 %v6453_v59, %s9960_s20  ;;  %v13293_v60 = vsel %vm10040_vm4, %v6111_v24, 0  ;;  %v6391_v45 = vrot.slane %v6389_v21, 1  ;;  %v13304_v27 = vsel %vm10040_vm4, %v6118_v13, 0  ;;  %v6393_v44 = vshrl.u32 %v13274_v39, 16 }
 0x557   : > { %6712 = vrot.lane.b32.xlu0 %v6561_v58, %s9958_s24  ;;  %v6565_v58 = vsel %vm1049_vm2, %v6530_v49, 0  ;;  %v6387_v63 = vor.u32 %v6386_v37, %v6382_v47  ;;  %v13300_v54 = vsel %vm10040_vm4, 0, %v6114_v18  ;;  %v6121_v10 = vor.u32 %v6119_v23, %v6118_v13 }
 0x558   : > { %v6377_v24 = vsel %vm679_vm7, %v6372_v26, %v6376_v35  ;;  %v6404_v50 = vshll.u32 %v13293_v60, 16  ;;  %v6532_v11 = vrot.slane %v13300_v54, 1  ;;  %v6419_v43 = vshll.u32 %v13304_v27, 16 }
 0x559   : > { %v6392_v9 = vsel %vm679_vm7, %v6387_v63, %v6391_v45  ;;  %v6395_v35 = vor.u32 %v6393_v44, %v6391_v45  ;;  %v13322_v37 = vsel %vm10040_vm4, 0, %v6121_v10  ;;  %v6533_v13 = vrot.slane %v13293_v60, 1 }
 0x55a   : > { %6716 = vrot.lane.b32.xlu1 %v6563_v57, %s9958_s24  ;;  %v6529_v57 = vrot.slane %v13261_v7, 1  ;;  %v6406_v18 = vrot.slane %v6404_v50, 1  ;;  %v6421_v23 = vrot.slane %v6419_v43, 1 }
 0x55b   : > { %6630 = vrot.lane.b32.xlu0 %v6362_v19, %s9960_s20  ;;  %v6534_v47 = vsel %vm998_vm3, %v6532_v11, %v6533_v13 }
 0x55c   : > { %v6669_v8 = vpop.permute.xlu1 %6668 }
 0x55e   : > { %6714 = vrot.lane.b32.xlu1 %v6528_v33, %s9958_s24 }
 0x55f   : > { %6636 = vrot.lane.b32.xlu0 %v6454_v6, %s9960_s20 }
 0x560   : > { %v6667_v36 = vpop.permute.xlu1 %6666 }
 0x561   : > { %v6589_v59 = vpop.permute.xlu0 %6588 }
 0x562   : > { %6720 = vrot.lane.b32.xlu1 %v6565_v58, %s9958_s24  ;;  %v6733_v55 = vsel %vm4015_vm5, %v12804_v42, %v6589_v59  ;;  %v6531_v42 = vsel %vm998_vm3, %v6529_v57, %v6530_v49  ;;  %v6408_v59 = vshrl.u32 %v13293_v60, 16  ;;  %v6536_v58 = vrot.slane %v13304_v27, 1 }
 0x563   : > { %6634 = vrot.lane.b32.xlu0 %v6377_v24, %s9960_s20  ;;  %v13315_v38 = vsel %vm1254_vm10, %v6733_v55, %v6669_v8  ;;  %v6399_v8 = vshll.u32 %v13300_v54, 16  ;;  %v6414_v55 = vshll.u32 %v13322_v37, 16 }
 0x564   : > { %v6890_v26 = vunpack.c.l.b16 %v13315_v38  ;;  %v6410_v57 = vor.u32 %v6408_v59, %v6406_v18 }
 0x565   : > { %v6673_v19 = vpop.permute.xlu1 %6672  ;;  %v6401_v10 = vrot.slane %v6399_v8, 1  ;;  %v13357_v8 = vld [vmem:[%s14208_s6] ss:$0 sm:$0xff] }
 0x566   : > { %v6587_v33 = vpop.permute.xlu0 %6586  ;;  %6638 = vrot.lane.b32.xlu1 %v6392_v9, %s9960_s20  ;;  %v6397_v9 = vshrl.u32 %v13300_v54, 16  ;;  %v6456_v11 = vsel %vm10081_vm8, %v6410_v57, 0 }
 0x567   : > { %v6731_v21 = vsel %vm4015_vm5, %v12812_v46, %v6587_v33  ;;  %6718 = vrot.lane.b32.xlu0 %v6531_v42, %s9958_s24  ;;  %v6535_v46 = vrot.slane %v13322_v37, 1  ;;  %v6416_v33 = vrot.slane %v6414_v55, 1 }
 0x568   : > { %v6795_v6 = vsel %vm1254_vm10, %v6731_v21, %v6667_v36  ;;  %v6455_v36 = vsel %vm10081_vm8, %v6395_v35, 0  ;;  %v6402_v43 = vor.u32 %v6401_v10, %v6397_v9  ;;  %v6412_v21 = vshrl.u32 %v13322_v37, 16  ;;  %v14304_v9 = vld [vmem:[#allocation38_spill] sm:$0xff] }
 0x569   : > { %v6889_v49 = vunpack.c.h.b16 %v6795_v6  ;;  %9727 = vmatprep.mubr.msk.bf16.mxu0 %vm4264_vm6, %v6795_v6  ;;  %v8687_v14 = vcombine.low %v11974_v40, %v6795_v6  ;;  %v6423_v40 = vshrl.u32 %v13304_v27, 16  ;;  %v6537_v50 = vsel %vm998_vm3, %v6535_v46, %v6536_v58 }
 0x56a   : > { %6722 = vrot.lane.b32.xlu1 %v6534_v47, %s9958_s24  ;;  %v6567_v47 = vsel %vm1049_vm2, %v6533_v13, 0  ;;  %v5122_v10 = vadd.f32 %v13357_v8, %v12621_v17 }
 0x56b   : > { %9778 = vmatmul.mubr.msk.bf16.vlgmr.msra.gmra.mrb[56].mxu1 %vm4264_vm6, %v8687_v14  ;;  %v7250_v45 = vpack.c.b16 %v6890_v26, %v6889_v49  ;;  %6640 = vrot.lane.b32.xlu0 %v6455_v36, %s9960_s20  ;;  %v6425_v44 = vor.u32 %v6423_v40, %v6421_v23  ;;  %v5123_v26 = vadd.f32 %v13357_v8, %v12631_v41 }
 0x56c   : > { %v6677_v63 = vpop.permute.xlu1 %6676  ;;  %v6407_v49 = vsel %vm679_vm7, %v6402_v43, %v6406_v18  ;;  %v6417_v14 = vor.u32 %v6416_v33, %v6412_v21  ;;  %v5125_v41 = vadd.f32 %v13357_v8, %v12639_v4  ;;  %v7564_v4 = vsel %vm1049_vm2, %v13015_v2, 0  ;;  %v14305_v21 = vld [vmem:[#allocation40_spill] sm:$0xff] }
 0x56d   : > { %v6671_v24 = vpop.permute.xlu0 %6670  ;;  %9781 = vmatprep.mubr.msk.bf16.mxu1 %vm4264_vm6, %v7250_v45  ;;  %v6457_v35 = vsel %vm10081_vm8, %v6425_v44, 0  ;;  %v5155_v45 = vmax.f32 %v5123_v26, 0.0  ;;  %v5154_v44 = vmax.f32 %v5122_v10, 0.0 }
 0x56e   : > { %6726 = vrot.lane.b32.xlu1 %v6537_v50, %s9958_s24  ;;  %v6422_v18 = vsel %vm679_vm7, %v6417_v14, %v6421_v23  ;;  %v5127_v50 = vadd.f32 %v13357_v8, %v12644_v12  ;;  %v14306_v14 = vld [vmem:[#allocation39_spill] sm:$0xff] }
 0x56f   : > { %6644 = vrot.lane.b32.xlu0 %v6456_v11, %s9960_s20  ;;  %v5124_v11 = vadd.f32 %v13357_v8, %v14304_v9  ;;  %v14311_v9 = vld [vmem:[#allocation47_spill] sm:$0xff] }
 0x570   : > { %v6675_v42 = vpop.permute.xlu1 %6674 }
 0x572   : > { %6648 = vrot.lane.b32.xlu1 %v6457_v35, %s9960_s20 }
 0x573   : > { %v6593_v6 = vpop.permute.xlu0 %6592  ;;  %6642 = vrot.lane.b32.xlu0 %v6407_v49, %s9960_s20  ;;  %v5156_v49 = vmax.f32 %v5124_v11, 0.0 }
 0x574   : > { %v6737_v51 = vsel %vm4015_vm5, %v12835_v34, %v6593_v6  ;;  %v5129_v6 = vadd.f32 %v13357_v8, %v14305_v21  ;;  %v14313_v21 = vld [vmem:[#allocation48_spill] sm:$0xff] }
 0x575   : > { %v6801_v46 = vsel %vm1254_vm10, %v6737_v51, %v6673_v19 }
 0x576   : > { %6724 = vrot.lane.b32.xlu1 %v6567_v47, %s9958_s24  ;;  %v6893_v13 = vunpack.c.l.b16 %v6801_v46  ;;  %v5161_v47 = vmax.f32 %v5129_v6, 0.0  ;;  %v5137_v6 = vadd.f32 %v13357_v8, %v14313_v21 }
 0x577   : > { %v6591_v59 = vpop.permute.xlu1 %6590  ;;  %6646 = vrot.lane.b32.xlu0 %v6422_v18, %s9960_s20 }
 0x578   : > { %v6735_v36 = vsel %vm4015_vm5, %v12866_v29, %v6591_v59 }
 0x579   : > { %v13375_v34 = vsel %vm1254_vm10, %v6735_v36, %v6671_v24  ;;  %v6597_v57 = vpop.permute.xlu0 %6596  ;;  %v5157_v24 = vmax.f32 %v5125_v41, 0.0 }
 0x57a   : > { %v6892_v19 = vunpack.c.h.b16 %v13375_v34  ;;  %v8655_v40 = vcombine.low %v13315_v38, %v13375_v34  ;;  %9782 = vmatmul.mubr.msk.bf16.gmra.mrb[60].mxu1 %vm4264_vm6, %v13375_v34  ;;  %v6741_v29 = vsel %vm4015_vm5, %v12856_v52, %v6597_v57  ;;  %7912 = vrot.lane.b32.xlu1 %v5155_v45, %s9958_s24  ;;  %v6569_v38 = vsel %vm1049_vm2, %v6536_v58, 0  ;;  %v14308_v45 = vld [vmem:[#allocation41_spill] sm:$0xff] }
 0x57b   : > { %v6679_v23 = vpop.permute.xlu1 %6678  ;;  %6728 = vrot.lane.b32.xlu0 %v6569_v38, %s9958_s24  ;;  %v6805_v52 = vsel %vm1254_vm10, %v6741_v29, %v6677_v63  ;;  %v5159_v63 = vmax.f32 %v5127_v50, 0.0  ;;  %v5128_v41 = vadd.f32 %v13357_v8, %v14308_v45  ;;  %v14310_v38 = vld [vmem:[#allocation42_spill] sm:$0xff] }
 0x57c   : > { %9728 = vmatmul.mubr.msk.bf16.vlgmr.msra.gmra.mrb[8].mxu0 %vm4264_vm6, %v8655_v40  ;;  %v6943_v55 = vpack.c.b16 %v6893_v13, %v6892_v19  ;;  %v6896_v43 = vunpack.c.l.b16 %v6805_v52  ;;  %v14309_v40 = vld [vmem:[#allocation46_spill] sm:$0xff] }
 0x57d   : > { %9826 = vmatpush3.bf16.msra.mxu0 %v7564_v4  ;;  %v6595_v2 = vpop.permute.xlu0 %6594  ;;  %v5133_v4 = vadd.f32 %v13357_v8, %v14309_v40  ;;  %v5160_v10 = vmax.f32 %v5128_v41, 0.0  ;;  %v5169_v41 = vmax.f32 %v5137_v6, 0.0  ;;  %v14322_v6 = vld [vmem:[#allocation3_spill] sm:$0xff] }
 0x57e   : > { %9731 = vmatprep.mubr.msk.bf16.mxu0 %vm4264_vm6, %v6943_v55  ;;  %v6739_v17 = vsel %vm4015_vm5, %v12877_v3, %v6595_v2  ;;  %7916 = vrot.lane.b32.xlu1 %v5157_v24, %s9958_s24  ;;  %v5130_v24 = vadd.f32 %v13357_v8, %v14310_v38 }
 0x57f   : > { %v6803_v58 = vsel %vm1254_vm10, %v6739_v17, %v6675_v42  ;;  %7910 = vrot.lane.b32.xlu0 %v5154_v44, %s9958_s24  ;;  %v5126_v42 = vadd.f32 %v13357_v8, %v14306_v14 }
 0x580   : > { %v6895_v12 = vunpack.c.h.b16 %v6803_v58  ;;  %v13403_v33 = vcombine.low %v6801_v46, %v6803_v58  ;;  %v6601_v35 = vpop.permute.xlu1 %6600  ;;  %v14307_v46 = vld [vmem:[#allocation44_spill] sm:$0xff] }
 0x581   : > { %v6681_v26 = vpop.permute.xlu0 %6680  ;;  %v5131_v59 = vadd.f32 %v13357_v8, %v14307_v46  ;;  %v6745_v36 = vsel %vm4015_vm5, %v12911_v32, %v6601_v35  ;;  %v5158_v18 = vmax.f32 %v5126_v42, 0.0  ;;  %v14314_v42 = vld [vmem:[#allocation45_spill] sm:$0xff] }
 0x582   : > { %v13408_v3 = vpack.c.b16 %v6896_v43, %v6895_v12  ;;  %9785 = vmatprep.mubr.msk.bf16.mxu1 %vm4264_vm6, %v13403_v33  ;;  %7920 = vrot.lane.b32.xlu1 %v5159_v63, %s9958_s24  ;;  %v6809_v57 = vsel %vm1254_vm10, %v6745_v36, %v6681_v26  ;;  %v5162_v43 = vmax.f32 %v5130_v24, 0.0  ;;  %v14312_v12 = vld [vmem:[#allocation43_spill] sm:$0xff] }
 0x583   : > { %7914 = vrot.lane.b32.xlu0 %v5156_v49, %s9958_s24  ;;  %v5163_v19 = vmax.f32 %v5131_v59, 0.0  ;;  %v6899_v50 = vunpack.c.l.b16 %v6809_v57  ;;  %v5132_v35 = vadd.f32 %v13357_v8, %v14312_v12 }
 0x584   : > { %9732 = vmatmul.mubr.msk.bf16.gmra.mrb[12].mxu0 %vm4264_vm6, %v6803_v58  ;;  %9786 = vmatmul.mubr.msk.bf16.gmra.mrb[64].mxu1 %vm4264_vm6, %v13408_v3  ;;  %v6685_v51 = vpop.permute.xlu1 %6684 }
 0x585   : > { %v5164_v14 = vmax.f32 %v5132_v35, 0.0 }
 0x586   : > { %7924 = vrot.lane.b32.xlu1 %v5161_v47, %s9958_s24  ;;  %v5134_v47 = vadd.f32 %v13357_v8, %v14314_v42 }
 0x587   : > { %v6599_v13 = vpop.permute.xlu0 %6598  ;;  %7918 = vrot.lane.b32.xlu0 %v5158_v18, %s9958_s24 }
 0x588   : > { %v6743_v29 = vsel %vm4015_vm5, %v12917_v62, %v6599_v13  ;;  %v6683_v55 = vpop.permute.xlu1 %6682  ;;  %v5165_v62 = vmax.f32 %v5133_v4, 0.0  ;;  %v5166_v40 = vmax.f32 %v5134_v47, 0.0  ;;  %v14316_v4 = vld [vmem:[#allocation49_spill] sm:$0xff] }
 0x589   : > { %v13433_v32 = vsel %vm1254_vm10, %v6743_v29, %v6679_v23  ;;  %v5135_v23 = vadd.f32 %v13357_v8, %v14311_v9  ;;  %v5136_v29 = vadd.f32 %v13357_v8, %v14316_v4 }
 0x58a   : > { %7928 = vrot.lane.b32.xlu1 %v5163_v19, %s9958_s24  ;;  %v6898_v2 = vunpack.c.h.b16 %v13433_v32  ;;  %9789 = vmatprep.mubr.msk.bf16.mxu1 %vm4264_vm6, %v13433_v32  ;;  %v8656_v17 = vcombine.low %v6805_v52, %v13433_v32 }
 0x58b   : > { %v6605_v44 = vpop.permute.xlu0 %6604  ;;  %7922 = vrot.lane.b32.xlu0 %v5160_v10, %s9958_s24  ;;  %v5167_v63 = vmax.f32 %v5135_v23, 0.0  ;;  %v14317_v10 = vld [vmem:[#allocation54_spill] sm:$0xff]  ;;  %v14320_v23 = vld [vmem:[#allocation55_spill] sm:$0xff] }
 0x58c   : > { %v6946_v11 = vpack.c.b16 %v6899_v50, %v6898_v2  ;;  %9735 = vmatprep.mubr.msk.bf16.mxu0 %vm4264_vm6, %v8656_v17  ;;  %v6749_v58 = vsel %vm4015_vm5, %v12962_v28, %v6605_v44  ;;  %v5168_v50 = vmax.f32 %v5136_v29, 0.0  ;;  %v14318_v2 = vld [vmem:[#allocation50_spill] sm:$0xff] }
 0x58d   : > { %v6813_v26 = vsel %vm1254_vm10, %v6749_v58, %v6685_v51  ;;  %v14315_v51 = vld [vmem:[#allocation52_spill] sm:$0xff]  ;;  %v5138_v17 = vadd.f32 %v13357_v8, %v14318_v2  ;;  %v14319_v44 = vld [vmem:[#allocation2_spill] sm:$0xff] }
 0x58e   : > { %7932 = vrot.lane.b32.xlu1 %v5165_v62, %s9958_s24  ;;  %9736 = vmatmul.mubr.msk.bf16.gmra.mrb[16].mxu0 %vm4264_vm6, %v6946_v11  ;;  %v6902_v59 = vunpack.c.l.b16 %v6813_v26  ;;  %v5139_v18 = vadd.f32 %v13357_v8, %v14315_v51  ;;  %v5143_v11 = vadd.f32 %v13357_v8, %v14320_v23 }
 0x58f   : > { %7926 = vrot.lane.b32.xlu0 %v5162_v43, %s9958_s24  ;;  %v5170_v58 = vmax.f32 %v5138_v17, 0.0  ;;  %v14321_v43 = vld [vmem:[#allocation51_spill] sm:$0xff]  ;;  %v14327_v17 = vld [vmem:[#allocation57_spill] sm:$0xff] }
 0x590   : > { %v6689_v52 = vpop.permute.xlu1 %6688  ;;  %v5140_v12 = vadd.f32 %v13357_v8, %v14321_v43  ;;  %v14328_v43 = vld [vmem:[#allocation62_spill] sm:$0xff] }
 0x591   : > { %v6603_v49 = vpop.permute.xlu0 %6602 }
 0x592   : > { %v6747_v28 = vsel %vm4015_vm5, %v12975_v20, %v6603_v49  ;;  %7936 = vrot.lane.b32.xlu1 %v5167_v63, %s9958_s24 }
 0x593   : > { %v6811_v46 = vsel %vm1254_vm10, %v6747_v28, %v6683_v55  ;;  %7930 = vrot.lane.b32.xlu0 %v5164_v14, %s9958_s24  ;;  %v5141_v55 = vadd.f32 %v13357_v8, %v14317_v10  ;;  %v5175_v28 = vmax.f32 %v5143_v11, 0.0  ;;  %v14323_v14 = vld [vmem:[#allocation56_spill] sm:$0xff] }
 0x594   : > { %v6901_v36 = vunpack.c.h.b16 %v6811_v46  ;;  %9739 = vmatprep.mubr.msk.bf16.mxu0 %vm4264_vm6, %v6811_v46  ;;  %v13463_v45 = vcombine.low %v6809_v57, %v6811_v46  ;;  %v5171_v57 = vmax.f32 %v5139_v18, 0.0  ;;  %v5145_v42 = vadd.f32 %v13357_v8, %v14323_v14  ;;  %v14324_v46 = vld [vmem:[#allocation66_spill] sm:$0xff]  ;;  %v14330_v14 = vld [vmem:[#allocation63_spill] sm:$0xff] }
 0x595   : > { %v6693_v20 = vpop.permute.xlu1 %6692  ;;  %v6687_v13 = vpop.permute.xlu0 %6686  ;;  %v5173_v9 = vmax.f32 %v5141_v55, 0.0  ;;  %v14326_v55 = vld [vmem:[#allocation60_spill] sm:$0xff] }
 0x596   : > { %9790 = vmatmul.mubr.msk.bf16.gmra.mrb[68].mxu1 %vm4264_vm6, %v13463_v45  ;;  %v13470_v19 = vpack.c.b16 %v6902_v59, %v6901_v36  ;;  %7940 = vrot.lane.b32.xlu1 %v5169_v41, %s9958_s24  ;;  %v5177_v10 = vmax.f32 %v5145_v42, 0.0  ;;  %v5151_v42 = vadd.f32 %v13357_v8, %v14330_v14 }
 0x597   : > { %7934 = vrot.lane.b32.xlu0 %v5166_v40, %s9958_s24  ;;  %v5172_v40 = vmax.f32 %v5140_v12, 0.0 }
 0x598   : > { %9793 = vmatprep.mubr.msk.bf16.mxu1 %vm4264_vm6, %v13470_v19 }
 0x599   : > { %v6691_v38 = vpop.permute.xlu1 %6690  ;;  %v6609_v24 = vpop.permute.xlu0 %6608 }
 0x59a   : > { %7944 = vrot.lane.b32.xlu1 %v5171_v57, %s9958_s24  ;;  %v6753_v62 = vsel %vm4015_vm5, %v14319_v44, %v6609_v24  ;;  %v5147_v24 = vadd.f32 %v13357_v8, %v14326_v55 }
 0x59b   : > { %7938 = vrot.lane.b32.xlu0 %v5168_v50, %s9958_s24  ;;  %v6817_v35 = vsel %vm1254_vm10, %v6753_v62, %v6689_v52  ;;  %v14325_v52 = vld [vmem:[#allocation53_spill] sm:$0xff] }
 0x59c   : > { %v5142_v36 = vadd.f32 %v13357_v8, %v14325_v52  ;;  %v6905_v41 = vunpack.c.l.b16 %v6817_v35 }
 0x59e   : > { %7948 = vrot.lane.b32.xlu1 %v5173_v9, %s9958_s24  ;;  %v5174_v50 = vmax.f32 %v5142_v36, 0.0  ;;  %v14331_v36 = vld [vmem:[#allocation59_spill] sm:$0xff] }
 0x59f   : > { %v6607_v63 = vpop.permute.xlu1 %6606  ;;  %v6613_v21 = vpop.permute.xlu0 %6612  ;;  %7942 = vrot.lane.b32.xlu0 %v5170_v58, %s9958_s24  ;;  %v5179_v58 = vmax.f32 %v5147_v24, 0.0 }
 0x5a0   : > { %v6751_v49 = vsel %vm4015_vm5, %v14322_v6, %v6607_v63  ;;  %v6757_v59 = vsel %vm4015_vm5, %v14324_v46, %v6613_v21  ;;  %v14329_v63 = vld [vmem:[#allocation58_spill] sm:$0xff] }
 0x5a1   : > { %v13498_v47 = vsel %vm1254_vm10, %v6751_v49, %v6687_v13  ;;  %v6821_v13 = vsel %vm1254_vm10, %v6757_v59, %v6693_v20  ;;  %v5144_v20 = vadd.f32 %v13357_v8, %v14327_v17  ;;  %v5146_v21 = vadd.f32 %v13357_v8, %v14329_v63 }
 0x5a2   : > { %v6904_v51 = vunpack.c.h.b16 %v13498_v47  ;;  %v8657_v18 = vcombine.low %v6813_v26, %v13498_v47  ;;  %9794 = vmatmul.mubr.msk.bf16.gmra.mrb[72].mxu1 %vm4264_vm6, %v13498_v47  ;;  %7952 = vrot.lane.b32.xlu1 %v5175_v28, %s9958_s24  ;;  %v6908_v44 = vunpack.c.l.b16 %v6821_v13 }
 0x5a3   : > { %v6695_v4 = vpop.permute.xlu1 %6694  ;;  %7946 = vrot.lane.b32.xlu0 %v5172_v40, %s9958_s24  ;;  %v5178_v52 = vmax.f32 %v5146_v21, 0.0 }
 0x5a4   : > { %v6611_v29 = vpop.permute.xlu0 %6610  ;;  %9740 = vmatmul.mubr.msk.bf16.gmra.mrb[20].mxu0 %vm4264_vm6, %v8657_v18  ;;  %v6949_v57 = vpack.c.b16 %v6905_v41, %v6904_v51  ;;  %v5148_v41 = vadd.f32 %v13357_v8, %v14331_v36 }
 0x5a5   : > { %v6755_v26 = vsel %vm4015_vm5, %v13059_v30, %v6611_v29  ;;  %v5149_v30 = vadd.f32 %v13357_v8, %v14328_v43 }
 0x5a6   : > { %v6819_v2 = vsel %vm1254_vm10, %v6755_v26, %v6691_v38  ;;  %9743 = vmatprep.mubr.msk.bf16.mxu0 %vm4264_vm6, %v6949_v57  ;;  %7956 = vrot.lane.b32.xlu1 %v5177_v10, %s9958_s24  ;;  %v5183_v57 = vmax.f32 %v5151_v42, 0.0  ;;  %v5180_v24 = vmax.f32 %v5148_v41, 0.0  ;;  %v14333_v26 = vld [vmem:[#allocation61_spill] sm:$0xff] }
 0x5a7   : > { %v6907_v62 = vunpack.c.h.b16 %v6819_v2  ;;  %v13520_v9 = vcombine.low %v6817_v35, %v6819_v2  ;;  %v6617_v23 = vpop.permute.xlu1 %6616  ;;  %7950 = vrot.lane.b32.xlu0 %v5174_v50, %s9958_s24  ;;  %v5176_v35 = vmax.f32 %v5144_v20, 0.0  ;;  %v5181_v28 = vmax.f32 %v5149_v30, 0.0 }
 0x5a8   : > { %v6697_v11 = vpop.permute.xlu0 %6696  ;;  %v6761_v38 = vsel %vm4015_vm5, %v13099_v25, %v6617_v23  ;;  %v5150_v50 = vadd.f32 %v13357_v8, %v14333_v26 }
 0x5a9   : > { %v13525_v12 = vpack.c.b16 %v6908_v44, %v6907_v62  ;;  %9797 = vmatprep.mubr.msk.bf16.mxu1 %vm4264_vm6, %v13520_v9  ;;  %v6825_v46 = vsel %vm1254_vm10, %v6761_v38, %v6697_v11  ;;  %v14334_v44 = vld [vmem:[#allocation65_spill] sm:$0xff] }
 0x5aa   : > { %7960 = vrot.lane.b32.xlu1 %v5179_v58, %s9958_s24  ;;  %v6911_v29 = vunpack.c.l.b16 %v6825_v46  ;;  %v5182_v20 = vmax.f32 %v5150_v50, 0.0  ;;  %v5152_v62 = vadd.f32 %v13357_v8, %v14334_v44 }
 0x5ab   : > { %9798 = vmatmul.mubr.msk.bf16.gmra.mrb[76].mxu1 %vm4264_vm6, %v13525_v12  ;;  %v6701_v6 = vpop.permute.xlu1 %6700  ;;  %7954 = vrot.lane.b32.xlu0 %v5176_v35, %s9958_s24 }
 0x5ac   : > { %v6615_v49 = vpop.permute.xlu0 %6614  ;;  %9744 = vmatmul.mubr.msk.bf16.gmra.mrb[24].mxu0 %vm4264_vm6, %v6819_v2 }
 0x5ad   : > { %v6759_v25 = vsel %vm4015_vm5, %v13091_v56, %v6615_v49  ;;  %v14332_v56 = vld [vmem:[#allocation64_spill] sm:$0xff] }
 0x5ae   : > { %v13545_v59 = vsel %vm1254_vm10, %v6759_v25, %v6695_v4  ;;  %7964 = vrot.lane.b32.xlu1 %v5181_v28, %s9958_s24  ;;  %v5153_v4 = vadd.f32 %v13357_v8, %v14332_v56  ;;  %v5184_v8 = vmax.f32 %v5152_v62, 0.0 }
 0x5af   : > { %v6910_v51 = vunpack.c.h.b16 %v13545_v59  ;;  %9801 = vmatprep.mubr.msk.bf16.mxu1 %vm4264_vm6, %v13545_v59  ;;  %v6699_v18 = vpop.permute.xlu1 %6698  ;;  %v8658_v40 = vcombine.low %v6821_v13, %v13545_v59  ;;  %7958 = vrot.lane.b32.xlu0 %v5178_v52, %s9958_s24 }
 0x5b0   : > { %v5185_v2 = vmax.f32 %v5153_v4, 0.0 }
 0x5b1   : > { %9747 = vmatprep.mubr.msk.bf16.mxu0 %vm4264_vm6, %v8658_v40  ;;  %v6952_v10 = vpack.c.b16 %v6911_v29, %v6910_v51  ;;  %v6621_v55 = vpop.permute.xlu0 %6620 }
 0x5b2   : > { %7968 = vrot.lane.b32.xlu1 %v5183_v57, %s9958_s24  ;;  %v6765_v13 = vsel %vm4015_vm5, %v13140_v53, %v6621_v55 }
 0x5b3   : > { %7962 = vrot.lane.b32.xlu0 %v5180_v24, %s9958_s24  ;;  %v6829_v23 = vsel %vm1254_vm10, %v6765_v13, %v6701_v6 }
 0x5b4   : > { %9748 = vmatmul.mubr.msk.bf16.gmra.mrb[28].mxu0 %vm4264_vm6, %v6952_v10  ;;  %v6705_v17 = vpop.permute.xlu1 %6704  ;;  %v6914_v30 = vunpack.c.l.b16 %v6829_v23 }
 0x5b5   : > { %v6619_v11 = vpop.permute.xlu0 %6618 }
 0x5b6   : > { %7972 = vrot.lane.b32.xlu1 %v5185_v2, %s9958_s24  ;;  %v6763_v58 = vsel %vm4015_vm5, %v13150_v5, %v6619_v11 }
 0x5b7   : > { %7966 = vrot.lane.b32.xlu0 %v5182_v20, %s9958_s24  ;;  %v6827_v53 = vsel %vm1254_vm10, %v6763_v58, %v6699_v18 }
 0x5b8   : > { %v6709_v43 = vpop.permute.xlu1 %6708  ;;  %v6913_v38 = vunpack.c.h.b16 %v6827_v53  ;;  %9751 = vmatprep.mubr.msk.bf16.mxu0 %vm4264_vm6, %v6827_v53  ;;  %v13574_v35 = vcombine.low %v6825_v46, %v6827_v53 }
 0x5b9   : > { %v6703_v63 = vpop.permute.xlu0 %6702 }
 0x5ba   : > { %9802 = vmatmul.mubr.msk.bf16.gmra.mrb[80].mxu1 %vm4264_vm6, %v13574_v35  ;;  %v13578_v21 = vpack.c.b16 %v6914_v30, %v6913_v38 }
 0x5bb   : > { %7970 = vrot.lane.b32.xlu0 %v5184_v8, %s9958_s24 }
 0x5bc   : > { %v6707_v5 = vpop.permute.xlu1 %6706  ;;  %9805 = vmatprep.mubr.msk.bf16.mxu1 %vm4264_vm6, %v13578_v21 }
 0x5bd   : > { %v6625_v6 = vpop.permute.xlu0 %6624 }
 0x5be   : > { %v6769_v49 = vsel %vm4015_vm5, %v13177_v16, %v6625_v6 }
 0x5bf   : > { %v6833_v28 = vsel %vm1254_vm10, %v6769_v49, %v6705_v17 }
 0x5c0   : > { %v6623_v14 = vpop.permute.xlu1 %6622  ;;  %v6917_v52 = vunpack.c.l.b16 %v6833_v28 }
 0x5c1   : > { %v6767_v42 = vsel %vm4015_vm5, %v13184_v22, %v6623_v14  ;;  %v6629_v25 = vpop.permute.xlu0 %6628 }
 0x5c2   : > { %v13589_v46 = vsel %vm1254_vm10, %v6767_v42, %v6703_v63  ;;  %v6773_v51 = vsel %vm4015_vm5, %v13189_v0, %v6629_v25 }
 0x5c3   : > { %v6916_v36 = vunpack.c.h.b16 %v13589_v46  ;;  %v8659_v41 = vcombine.low %v6829_v23, %v13589_v46  ;;  %9806 = vmatmul.mubr.msk.bf16.gmra.mrb[84].mxu1 %vm4264_vm6, %v13589_v46  ;;  %v6837_v22 = vsel %vm1254_vm10, %v6773_v51, %v6709_v43 }
 0x5c4   : > { %v6711_v16 = vpop.permute.xlu1 %6710  ;;  %v6920_v4 = vunpack.c.l.b16 %v6837_v22 }
 0x5c5   : > { %9752 = vmatmul.mubr.msk.bf16.gmra.mrb[32].mxu0 %vm4264_vm6, %v8659_v41  ;;  %v6955_v18 = vpack.c.b16 %v6917_v52, %v6916_v36  ;;  %v6627_v40 = vpop.permute.xlu0 %6626 }
 0x5c6   : > { %v6771_v29 = vsel %vm4015_vm5, %v13197_v1, %v6627_v40 }
 0x5c7   : > { %9755 = vmatprep.mubr.msk.bf16.mxu0 %vm4264_vm6, %v6955_v18  ;;  %v6835_v57 = vsel %vm1254_vm10, %v6771_v29, %v6707_v5 }
 0x5c8   : > { %v6633_v56 = vpop.permute.xlu1 %6632  ;;  %v6919_v0 = vunpack.c.h.b16 %v6835_v57  ;;  %v13603_v10 = vcombine.low %v6833_v28, %v6835_v57 }
 0x5c9   : > { %v6713_v55 = vpop.permute.xlu0 %6712  ;;  %v6777_v26 = vsel %vm4015_vm5, %v13210_v31, %v6633_v56 }
 0x5ca   : > { %v13605_v24 = vpack.c.b16 %v6920_v4, %v6919_v0  ;;  %9809 = vmatprep.mubr.msk.bf16.mxu1 %vm4264_vm6, %v13603_v10  ;;  %v6841_v1 = vsel %vm1254_vm10, %v6777_v26, %v6713_v55  ;;  %v13667_v55 = vld [vmem:[%s14204_s2] ss:$0 sm:$0xff] }
 0x5cb   : > { %v6923_v31 = vunpack.c.l.b16 %v6841_v1 }
 0x5cc   : > { %v6717_v50 = vpop.permute.xlu1 %6716  ;;  %9810 = vmatmul.mubr.msk.bf16.gmra.mrb[88].mxu1 %vm4264_vm6, %v13605_v24 }
 0x5cd   : > { %9756 = vmatmul.mubr.msk.bf16.gmra.mrb[36].mxu0 %vm4264_vm6, %v6835_v57  ;;  %v6631_v13 = vpop.permute.xlu0 %6630 }
 0x5ce   : > { %v6775_v2 = vsel %vm4015_vm5, %v13222_v15, %v6631_v13 }
 0x5cf   : > { %v13618_v17 = vsel %vm1254_vm10, %v6775_v2, %v6711_v16 }
 0x5d0   : > { %v6715_v20 = vpop.permute.xlu1 %6714  ;;  %v6922_v44 = vunpack.c.h.b16 %v13618_v17  ;;  %9813 = vmatprep.mubr.msk.bf16.mxu1 %vm4264_vm6, %v13618_v17  ;;  %v8660_v62 = vcombine.low %v6837_v22, %v13618_v17 }
 0x5d1   : > { %v6637_v23 = vpop.permute.xlu0 %6636 }
 0x5d2   : > { %v6958_v11 = vpack.c.b16 %v6923_v31, %v6922_v44  ;;  %v6781_v58 = vsel %vm4015_vm5, %v13242_v61, %v6637_v23  ;;  %9759 = vmatprep.mubr.msk.bf16.mxu0 %vm4264_vm6, %v8660_v62 }
 0x5d3   : > { %v6845_v53 = vsel %vm1254_vm10, %v6781_v58, %v6717_v50 }
 0x5d4   : > { %v6721_v15 = vpop.permute.xlu1 %6720  ;;  %v6926_v63 = vunpack.c.l.b16 %v6845_v53 }
 0x5d5   : > { %9760 = vmatmul.mubr.msk.bf16.gmra.mrb[40].mxu0 %vm4264_vm6, %v6958_v11  ;;  %v6635_v43 = vpop.permute.xlu0 %6634  ;;  %v14336_v11 = vld [vmem:[#allocation10_spill] sm:$0xff] }
 0x5d6   : > { %v6779_v30 = vsel %vm4015_vm5, %v13251_v48, %v6635_v43  ;;  %v2386_v58 = vadd.f32 %v13667_v55, %v14336_v11  ;;  %v14344_v11 = vld [vmem:[#allocation18_spill] sm:$0xff] }
 0x5d7   : > { %v6843_v38 = vsel %vm1254_vm10, %v6779_v30, %v6715_v20 }
 0x5d8   : > { %v6639_v8 = vpop.permute.xlu1 %6638  ;;  %v6925_v5 = vunpack.c.h.b16 %v6843_v38  ;;  %9763 = vmatprep.mubr.msk.bf16.mxu0 %vm4264_vm6, %v6843_v38  ;;  %v13633_v6 = vcombine.low %v6841_v1, %v6843_v38  ;;  %v14335_v1 = vld [vmem:[#allocation9_spill] sm:$0xff] }
 0x5d9   : > { %v6783_v61 = vsel %vm4015_vm5, %v13261_v7, %v6639_v8  ;;  %v6719_v49 = vpop.permute.xlu0 %6718 }
 0x5da   : > { %v13638_v28 = vsel %vm1254_vm10, %v6783_v61, %v6719_v49  ;;  %9814 = vmatmul.mubr.msk.bf16.gmra.mrb[92].mxu1 %vm4264_vm6, %v13633_v6  ;;  %v13642_v48 = vpack.c.b16 %v6926_v63, %v6925_v5  ;;  %v2418_v63 = vmax.f32 %v2386_v58, 0.0  ;;  %v14337_v5 = vld [vmem:[#allocation11_spill] sm:$0xff]  ;;  %v2396_v58 = vadd.f32 %v13667_v55, %v14344_v11 }
 0x5db   : > { %v8661_v14 = vcombine.low %v6845_v53, %v13638_v28  ;;  %v6928_v41 = vunpack.c.h.b16 %v13638_v28  ;;  %v2388_v61 = vadd.f32 %v13667_v55, %v14337_v5 }
 0x5dc   : > { %v6723_v42 = vpop.permute.xlu1 %6722  ;;  %9817 = vmatprep.mubr.msk.bf16.mxu1 %vm4264_vm6, %v13642_v48 }
 0x5dd   : > { %v6641_v25 = vpop.permute.xlu0 %6640  ;;  %9764 = vmatmul.mubr.msk.bf16.gmra.mrb[44].mxu0 %vm4264_vm6, %v8661_v14 }
 0x5de   : > { %v6785_v7 = vsel %vm4015_vm5, %v13274_v39, %v6641_v25  ;;  %v2420_v25 = vmax.f32 %v2388_v61, 0.0 }
 0x5df   : > { %v6849_v52 = vsel %vm1254_vm10, %v6785_v7, %v6721_v15  ;;  %v14338_v7 = vld [vmem:[#allocation14_spill] sm:$0xff] }
 0x5e0   : > { %v6727_v36 = vpop.permute.xlu1 %6726  ;;  %v6929_v51 = vunpack.c.l.b16 %v6849_v52 }
 0x5e1   : > { %v6645_v16 = vpop.permute.xlu0 %6644 }
 0x5e2   : > { %v6961_v18 = vpack.c.b16 %v6929_v51, %v6928_v41  ;;  %9818 = vmatmul.mubr.msk.bf16.gmra.mrb[96].mxu1 %vm4264_vm6, %v13638_v28  ;;  %v6789_v39 = vsel %vm4015_vm5, %v13293_v60, %v6645_v16  ;;  %v2384_v60 = vadd.f32 %v13667_v55, %v14335_v1  ;;  %v14339_v41 = vld [vmem:[#allocation12_spill] sm:$0xff] }
 0x5e3   : > { %v2387_v51 = vadd.f32 %v13667_v55, %v14339_v41  ;;  %v14347_v41 = vld [vmem:[#allocation19_spill] sm:$0xff] }
 0x5e4   : > { %v6649_v22 = vpop.permute.xlu1 %6648  ;;  %9767 = vmatprep.mubr.msk.bf16.mxu0 %vm4264_vm6, %v6961_v18 }
 0x5e5   : > { %v6643_v40 = vpop.permute.xlu0 %6642  ;;  %v6793_v62 = vsel %vm4015_vm5, %v13304_v27, %v6649_v22 }
 0x5e6   : > { %v6787_v29 = vsel %vm4015_vm5, %v13300_v54, %v6643_v40 }
 0x5e7   : > { %v6851_v57 = vsel %vm1254_vm10, %v6787_v29, %v6723_v42 }
 0x5e8   : > { %v6725_v56 = vpop.permute.xlu1 %6724  ;;  %v13660_v4 = vcombine.low %v6849_v52, %v6851_v57  ;;  %9768 = vmatmul.mubr.msk.bf16.gmra.mrb[48].mxu0 %vm4264_vm6, %v6851_v57  ;;  %v6931_v26 = vunpack.c.h.b16 %v6851_v57  ;;  %v2390_v52 = vadd.f32 %v13667_v55, %v14338_v7  ;;  %v14341_v57 = vld [vmem:[#allocation13_spill] sm:$0xff] }
 0x5e9   : > { %v6853_v0 = vsel %vm1254_vm10, %v6789_v39, %v6725_v56  ;;  %v6647_v54 = vpop.permute.xlu0 %6646  ;;  %v2419_v39 = vmax.f32 %v2387_v51, 0.0  ;;  %v2389_v56 = vadd.f32 %v13667_v55, %v14341_v57  ;;  %v2395_v51 = vadd.f32 %v13667_v55, %v14347_v41 }
 0x5ea   : > { %v6932_v50 = vunpack.c.l.b16 %v6853_v0  ;;  %v6791_v13 = vsel %vm4015_vm5, %v13322_v37, %v6647_v54  ;;  %9821 = vmatprep.mubr.msk.bf16.mxu1 %vm4264_vm6, %v13660_v4  ;;  %v2416_v37 = vmax.f32 %v2384_v60, 0.0  ;;  %v2422_v22 = vmax.f32 %v2390_v52, 0.0  ;;  %v14342_v54 = vld [vmem:[#allocation17_spill] sm:$0xff] }
 0x5eb   : > { %v13678_v20 = vsel %vm1254_vm10, %v6791_v13, %v6727_v36  ;;  %v2394_v1 = vadd.f32 %v13667_v55, %v14342_v54  ;;  %v2421_v13 = vmax.f32 %v2389_v56, 0.0  ;;  %v2427_v56 = vmax.f32 %v2395_v51, 0.0  ;;  %v14358_v51 = vld [vmem:[#allocation30_spill] sm:$0xff] }
 0x5ec   : > { %v13675_v2 = vpack.c.b16 %v6932_v50, %v6931_v26  ;;  %v13680_v31 = vpop.permute.xlu1 %7912  ;;  %v8662_v44 = vcombine.low %v6853_v0, %v13678_v20  ;;  %v6937_v53 = vunpack.c.h.b16 %v13678_v20 }
 0x5ed   : > { %v6729_v23 = vpop.permute.xlu0 %6728 }
 0x5ee   : > { %9822 = vmatmul.mubr.msk.bf16.gmra.mrb[100].mxu1 %vm4264_vm6, %v13675_v2  ;;  %v13690_v15 = vsel %vm1254_vm10, %v6793_v62, %v6729_v23  ;;  %9771 = vmatprep.mubr.msk.bf16.mxu0 %vm4264_vm6, %v8662_v44  ;;  %v14343_v44 = vld [vmem:[#allocation4_spill] sm:$0xff] }
 0x5ef   : > { %v6938_v43 = vunpack.c.l.b16 %v13690_v15  ;;  %v2391_v62 = vadd.f32 %v13667_v55, %v14343_v44 }
 0x5f0   : > { %v7917_v30 = vpop.permute.xlu1 %7916 }
 0x5f1   : > { %v13696_v27 = vsel %vm1254_vm10, %v2416_v37, %v7917_v30  ;;  %v6964_v38 = vpack.c.b16 %v6938_v43, %v6937_v53  ;;  %v13698_v8 = vpop.permute.xlu0 %7910  ;;  %v2426_v37 = vmax.f32 %v2394_v1, 0.0  ;;  %v2423_v30 = vmax.f32 %v2391_v62, 0.0 }
 0x5f3   : > { %9772 = vmatmul.mubr.msk.bf16.gmra.mrb[52].mxu0 %vm4264_vm6, %v6964_v38  ;;  %v14345_v38 = vld [vmem:[#allocation15_spill] sm:$0xff] }
 0x5f4   : > { %v7921_v49 = vpop.permute.xlu1 %7920  ;;  %9827 = vmatprep.mubr.msk.bf16.mxu0 %vm4264_vm6, %v13375_v34  ;;  %v14340_v34 = vld [vmem:[#allocation16_spill] sm:$0xff] }
 0x5f5   : > { %v13706_v14 = vsel %vm1254_vm10, %v2418_v63, %v7921_v49  ;;  %v13708_v42 = vpop.permute.xlu0 %7914  ;;  %v2392_v40 = vadd.f32 %v13667_v55, %v14340_v34  ;;  %v2393_v63 = vadd.f32 %v13667_v55, %v14345_v38  ;;  %v2428_v49 = vmax.f32 %v2396_v58, 0.0 }
 0x5f7   : > { %v2424_v50 = vmax.f32 %v2392_v40, 0.0  ;;  %v14348_v40 = vld [vmem:[#allocation24_spill] sm:$0xff] }
 0x5f8   : > { %v7925_v36 = vpop.permute.xlu1 %7924 }
 0x5f9   : > { %v13715_v16 = vsel %vm1254_vm10, %v2420_v25, %v7925_v36  ;;  %v13717_v18 = vpop.permute.xlu0 %7918  ;;  %v14346_v25 = vld [vmem:[#allocation22_spill] sm:$0xff]  ;;  %v2425_v36 = vmax.f32 %v2393_v63, 0.0 }
 0x5fa   : > { %v2398_v7 = vadd.f32 %v13667_v55, %v14346_v25  ;;  %v14356_v25 = vld [vmem:[#allocation23_spill] sm:$0xff] }
 0x5fb   : > { %9828 = vmatmul.mubr.msk.bf16.vlgmr.msra.gmra.mrb[56].mxu0 %vm4264_vm6, %v13403_v33 }
 0x5fc   : > { %v7929_v29 = vpop.permute.xlu1 %7928  ;;  %9831 = vmatprep.mubr.msk.bf16.mxu0 %vm4264_vm6, %v13408_v3  ;;  %v2430_v34 = vmax.f32 %v2398_v7, 0.0  ;;  %v2401_v7 = vadd.f32 %v13667_v55, %v14356_v25 }
 0x5fd   : > { %v13728_v0 = vsel %vm1254_vm10, %v2422_v22, %v7929_v29  ;;  %v7923_v26 = vpop.permute.xlu0 %7922  ;;  %v2400_v29 = vadd.f32 %v13667_v55, %v14348_v40 }
 0x5fe   : > { %v13733_v60 = vsel %vm1254_vm10, %v2419_v39, %v7923_v26  ;;  %v14349_v26 = vld [vmem:[#allocation20_spill] sm:$0xff]  ;;  %v2433_v40 = vmax.f32 %v2401_v7, 0.0 }
 0x600   : > { %v7933_v33 = vpop.permute.xlu1 %7932 }
 0x601   : > { %v13738_v23 = vsel %vm1254_vm10, %v2424_v50, %v7933_v33  ;;  %v7927_v3 = vpop.permute.xlu0 %7926  ;;  %v2397_v50 = vadd.f32 %v13667_v55, %v14349_v26  ;;  %v2432_v33 = vmax.f32 %v2400_v29, 0.0  ;;  %v14360_v29 = vld [vmem:[#allocation27_spill] sm:$0xff] }
 0x602   : > { %v13743_v53 = vsel %vm1254_vm10, %v2421_v13, %v7927_v3  ;;  %v14351_v13 = vld [vmem:[#allocation25_spill] sm:$0xff] }
 0x603   : > { %9832 = vmatmul.mubr.msk.bf16.gmra.mrb[60].mxu0 %vm4264_vm6, %v13433_v32  ;;  %v2402_v44 = vadd.f32 %v13667_v55, %v14351_v13  ;;  %v2429_v3 = vmax.f32 %v2397_v50, 0.0  ;;  %v14362_v50 = vld [vmem:[#allocation32_spill] sm:$0xff] }
 0x604   : > { %v7937_v43 = vpop.permute.xlu1 %7936  ;;  %9835 = vmatprep.mubr.msk.bf16.mxu0 %vm4264_vm6, %v13463_v45 }
 0x605   : > { %v13752_v5 = vsel %vm1254_vm10, %v2426_v37, %v7937_v43  ;;  %v7931_v61 = vpop.permute.xlu0 %7930  ;;  %v14352_v37 = vld [vmem:[#allocation21_spill] sm:$0xff]  ;;  %v2434_v43 = vmax.f32 %v2402_v44, 0.0 }
 0x606   : > { %v13757_v52 = vsel %vm1254_vm10, %v2423_v30, %v7931_v61  ;;  %v2399_v11 = vadd.f32 %v13667_v55, %v14352_v37  ;;  %v14354_v30 = vld [vmem:[#allocation26_spill] sm:$0xff] }
 0x607   : > { %v2404_v38 = vadd.f32 %v13667_v55, %v14354_v30 }
 0x608   : > { %v7941_v32 = vpop.permute.xlu1 %7940 }
 0x609   : > { %v13762_v22 = vsel %vm1254_vm10, %v2428_v49, %v7941_v32  ;;  %v7935_v45 = vpop.permute.xlu0 %7934  ;;  %v2431_v49 = vmax.f32 %v2399_v11, 0.0  ;;  %v2436_v41 = vmax.f32 %v2404_v38, 0.0 }
 0x60a   : > { %v13767_v39 = vsel %vm1254_vm10, %v2425_v36, %v7935_v45  ;;  %v2406_v45 = vadd.f32 %v13667_v55, %v14358_v51 }
 0x60b   : > { %9836 = vmatmul.mubr.msk.bf16.gmra.mrb[64].mxu0 %vm4264_vm6, %v13470_v19 }
 0x60c   : > { %v7945_v57 = vpop.permute.xlu1 %7944  ;;  %9839 = vmatprep.mubr.msk.bf16.mxu0 %vm4264_vm6, %v13498_v47  ;;  %v2438_v26 = vmax.f32 %v2406_v45, 0.0 }
 0x60d   : > { %v13776_v54 = vsel %vm1254_vm10, %v2430_v34, %v7945_v57  ;;  %v7939_v1 = vpop.permute.xlu0 %7938  ;;  %v2403_v57 = vadd.f32 %v13667_v55, %v14360_v29 }
 0x60e   : > { %14350 = vst [vmem:[#allocation38_spill] sm:$0xff] %v13776_v54  ;;  %v13781_v62 = vsel %vm1254_vm10, %v2427_v56, %v7939_v1  ;;  %v2408_v1 = vadd.f32 %v13667_v55, %v14362_v50 }
 0x60f   : > { %v2435_v44 = vmax.f32 %v2403_v57, 0.0 }
 0x610   : > { %v7949_v19 = vpop.permute.xlu1 %7948 }
 0x611   : > { %v13786_v58 = vsel %vm1254_vm10, %v2432_v33, %v7949_v19  ;;  %v7943_v47 = vpop.permute.xlu0 %7942  ;;  %v14364_v19 = vld [vmem:[#allocation28_spill] sm:$0xff] }
 0x612   : > { %14353 = vst [vmem:[#allocation40_spill] sm:$0xff] %v13786_v58  ;;  %v13791_v63 = vsel %vm1254_vm10, %v2429_v3, %v7943_v47  ;;  %v2405_v3 = vadd.f32 %v13667_v55, %v14364_v19  ;;  %v2440_v47 = vmax.f32 %v2408_v1, 0.0 }
 0x613   : > { %14355 = vst [vmem:[#allocation39_spill] sm:$0xff] %v13791_v63  ;;  %9840 = vmatmul.mubr.msk.bf16.gmra.mrb[68].mxu0 %vm4264_vm6, %v13520_v9 }
 0x614   : > { %v7953_v61 = vpop.permute.xlu1 %7952  ;;  %9843 = vmatprep.mubr.msk.bf16.mxu0 %vm4264_vm6, %v13525_v12 }
 0x615   : > { %v13800_v32 = vsel %vm1254_vm10, %v2434_v43, %v7953_v61  ;;  %v7947_v36 = vpop.permute.xlu0 %7946  ;;  %v14366_v43 = vld [vmem:[#allocation33_spill] sm:$0xff]  ;;  %v2437_v61 = vmax.f32 %v2405_v3, 0.0 }
 0x616   : > { %14357 = vst [vmem:[#allocation44_spill] sm:$0xff] %v13800_v32  ;;  %v13805_v34 = vsel %vm1254_vm10, %v2431_v49, %v7947_v36  ;;  %v2410_v30 = vadd.f32 %v13667_v55, %v14366_v43  ;;  %v14368_v49 = vld [vmem:[#allocation29_spill] sm:$0xff] }
 0x617   : > { %14359 = vst [vmem:[#allocation41_spill] sm:$0xff] %v13805_v34  ;;  %v2407_v25 = vadd.f32 %v13667_v55, %v14368_v49 }
 0x618   : > { %v7957_v9 = vpop.permute.xlu1 %7956  ;;  %v2442_v36 = vmax.f32 %v2410_v30, 0.0 }
 0x619   : > { %v13810_v56 = vsel %vm1254_vm10, %v2436_v41, %v7957_v9  ;;  %v7951_v12 = vpop.permute.xlu0 %7950  ;;  %v2439_v45 = vmax.f32 %v2407_v25, 0.0  ;;  %v14371_v9 = vld [vmem:[#allocation31_spill] sm:$0xff] }
 0x61a   : > { %14361 = vst [vmem:[#allocation46_spill] sm:$0xff] %v13810_v56  ;;  %v13815_v33 = vsel %vm1254_vm10, %v2433_v40, %v7951_v12  ;;  %v2409_v40 = vadd.f32 %v13667_v55, %v14371_v9 }
 0x61b   : > { %14363 = vst [vmem:[#allocation42_spill] sm:$0xff] %v13815_v33  ;;  %9844 = vmatmul.mubr.msk.bf16.gmra.mrb[72].mxu0 %vm4264_vm6, %v13545_v59 }
 0x61c   : > { %v7961_v13 = vpop.permute.xlu1 %7960  ;;  %9847 = vmatprep.mubr.msk.bf16.mxu0 %vm4264_vm6, %v13574_v35 }
 0x61d   : > { %v13824_v37 = vsel %vm1254_vm10, %v2438_v26, %v7961_v13  ;;  %v7955_v11 = vpop.permute.xlu0 %7954  ;;  %v2441_v26 = vmax.f32 %v2409_v40, 0.0 }
 0x61e   : > { %14365 = vst [vmem:[#allocation47_spill] sm:$0xff] %v13824_v37  ;;  %v13829_v38 = vsel %vm1254_vm10, %v2435_v44, %v7955_v11 }
 0x61f   : > { %14367 = vst [vmem:[#allocation43_spill] sm:$0xff] %v13829_v38 }
 0x620   : > { %v7965_v59 = vpop.permute.xlu1 %7964 }
 0x621   : > { %v13834_v7 = vsel %vm1254_vm10, %v2440_v47, %v7965_v59  ;;  %v7959_v35 = vpop.permute.xlu0 %7958 }
 0x622   : > { %14369 = vst [vmem:[#allocation48_spill] sm:$0xff] %v13834_v7  ;;  %v13837_v41 = vsel %vm1254_vm10, %v2437_v61, %v7959_v35 }
 0x623   : > { %14370 = vst [vmem:[#allocation45_spill] sm:$0xff] %v13837_v41  ;;  %9848 = vmatmul.mubr.msk.bf16.gmra.mrb[76].mxu0 %vm4264_vm6, %v13578_v21 }
 0x624   : > { %v7969_v51 = vpop.permute.xlu1 %7968  ;;  %9851 = vmatprep.mubr.msk.bf16.mxu0 %vm4264_vm6, %v13589_v46 }
 0x625   : > { %v13846_v29 = vsel %vm1254_vm10, %v2442_v36, %v7969_v51  ;;  %v7963_v57 = vpop.permute.xlu0 %7962 }
 0x626   : > { %14372 = vst [vmem:[#allocation52_spill] sm:$0xff] %v13846_v29  ;;  %v13849_v12 = vsel %vm1254_vm10, %v2439_v45, %v7963_v57 }
 0x627   : > { %14373 = vst [vmem:[#allocation49_spill] sm:$0xff] %v13849_v12 }
 0x629   : > { %v7967_v50 = vpop.permute.xlu0 %7966 }
 0x62a   : > { %v13852_v1 = vsel %vm1254_vm10, %v2441_v26, %v7967_v50 }
 0x62b   : > { %14374 = vst [vmem:[#allocation54_spill] sm:$0xff] %v13852_v1  ;;  %9852 = vmatmul.mubr.msk.bf16.gmra.mrb[80].mxu0 %vm4264_vm6, %v13603_v10  ;;  %v14375_v10 = vld [vmem:[#allocation36_spill] sm:$0xff] }
 0x62c   : > { %9855 = vmatprep.mubr.msk.bf16.mxu0 %vm4264_vm6, %v13605_v24  ;;  %v8720_v24 = vcombine.low %v13690_v15, %v14375_v10  ;;  %v14376_v15 = vld [vmem:[#allocation37_spill] sm:$0xff] }
 0x633   : > { %9856 = vmatmul.mubr.msk.bf16.gmra.mrb[84].mxu0 %vm4264_vm6, %v13618_v17 }
 0x634   : > { %9859 = vmatprep.mubr.msk.bf16.mxu0 %vm4264_vm6, %v13633_v6 }
 0x63b   : > { %9860 = vmatmul.mubr.msk.bf16.gmra.mrb[88].mxu0 %vm4264_vm6, %v13642_v48 }
 0x63c   : > { %9863 = vmatprep.mubr.msk.bf16.mxu0 %vm4264_vm6, %v13638_v28 }
 0x63e   : > { %v9779_v21 = vpop.f32.mrb[56].mxu1 }
 0x63f   : > { %v7378_v46 = vpop.f32.mrb[57].mxu1 }
 0x640   : > { %v9780_v13 = vpop.f32.mrb[58].mxu1 }
 0x641   : > { %v7381_v44 = vpop.f32.mrb[59].mxu1 }
 0x643   : > { %9864 = vmatmul.mubr.msk.bf16.gmra.mrb[92].mxu0 %vm4264_vm6, %v13660_v4 }
 0x644   : > { %9867 = vmatprep.mubr.msk.bf16.mxu0 %vm4264_vm6, %v13675_v2 }
 0x64b   : > { %9868 = vmatmul.mubr.msk.bf16.gmra.mrb[96].mxu0 %vm4264_vm6, %v13678_v20 }
 0x64c   : > { %9871 = vmatprep.mubr.msk.bf16.mxu0 %vm4264_vm6, %v8720_v24 }
 0x64d   : > { %v9783_v17 = vpop.f32.mrb[60].mxu1 }
 0x64e   : > { %v7393_v6 = vpop.f32.mrb[61].mxu1 }
 0x64f   : > { %v9729_v28 = vpop.f32.mrb[8].mxu0  ;;  %v9784_v48 = vpop.f32.mrb[62].mxu1 }
 0x650   : > { %v7074_v19 = vpop.f32.mrb[9].mxu0  ;;  %v7396_v3 = vpop.f32.mrb[63].mxu1 }
 0x651   : > { %v13875_v11 = vadd.f32 %v7378_v46, %v7074_v19  ;;  %v9730_v4 = vpop.f32.mrb[10].mxu0 }
 0x652   : > { %v13877_v47 = vadd.f32 %v9780_v13, %v9730_v4  ;;  %v7077_v2 = vpop.f32.mrb[11].mxu0 }
 0x653   : > { %v13879_v43 = vadd.f32 %v7381_v44, %v7077_v2  ;;  %9872 = vmatmul.mubr.msk.bf16.gmra.mrb[100].mxu0 %vm4264_vm6, %v14376_v15 }
 0x657   : > { %v9733_v30 = vpop.f32.mrb[12].mxu0  ;;  %v9787_v20 = vpop.f32.mrb[64].mxu1 }
 0x658   : > { %v13883_v59 = vadd.f32 %v9783_v17, %v9733_v30  ;;  %v7089_v61 = vpop.f32.mrb[13].mxu0  ;;  %v7408_v49 = vpop.f32.mrb[65].mxu1 }
 0x659   : > { %v13885_v25 = vadd.f32 %v7393_v6, %v7089_v61  ;;  %v9734_v35 = vpop.f32.mrb[14].mxu0  ;;  %v9788_v36 = vpop.f32.mrb[66].mxu1 }
 0x65a   : > { %v13887_v51 = vadd.f32 %v9784_v48, %v9734_v35  ;;  %v7092_v45 = vpop.f32.mrb[15].mxu0  ;;  %v7410_v9 = vpop.f32.mrb[67].mxu1 }
 0x661   : > { %v9737_v40 = vpop.f32.mrb[16].mxu0 }
 0x662   : > { %v13889_v57 = vadd.f32 %v9787_v20, %v9737_v40  ;;  %v7104_v26 = vpop.f32.mrb[17].mxu0 }
 0x663   : > { %v9738_v50 = vpop.f32.mrb[18].mxu0 }
 0x664   : > { %v7106_v21 = vpop.f32.mrb[19].mxu0 }
 0x665   : > { %v13891_v46 = vadd.f32 %v7410_v9, %v7106_v21 }
 0x669   : > { %v9791_v13 = vpop.f32.mrb[68].mxu1 }
 0x66a   : > { %v7422_v44 = vpop.f32.mrb[69].mxu1 }
 0x66b   : > { %v9792_v10 = vpop.f32.mrb[70].mxu1 }
 0x66c   : > { %v7425_v24 = vpop.f32.mrb[71].mxu1 }
 0x675   : > { %v9795_v17 = vpop.f32.mrb[72].mxu1 }
 0x676   : > { %v7437_v6 = vpop.f32.mrb[73].mxu1 }
 0x677   : > { %v9741_v28 = vpop.f32.mrb[20].mxu0  ;;  %v9796_v19 = vpop.f32.mrb[74].mxu1 }
 0x678   : > { %v7118_v48 = vpop.f32.mrb[21].mxu0  ;;  %v7440_v3 = vpop.f32.mrb[75].mxu1 }
 0x679   : > { %v13893_v4 = vadd.f32 %v7422_v44, %v7118_v48  ;;  %v9742_v2 = vpop.f32.mrb[22].mxu0 }
 0x67a   : > { %v13895_v15 = vadd.f32 %v9792_v10, %v9742_v2  ;;  %v7121_v30 = vpop.f32.mrb[23].mxu0 }
 0x67b   : > { %v13897_v20 = vadd.f32 %v7425_v24, %v7121_v30 }
 0x67e   : > { %v9799_v61 = vpop.f32.mrb[76].mxu1 }
 0x67f   : > { %v7452_v49 = vpop.f32.mrb[77].mxu1  ;;  %v9745_v35 = vpop.f32.mrb[24].mxu0 }
 0x680   : > { %v13899_v36 = vadd.f32 %v9795_v17, %v9745_v35  ;;  %v9800_v45 = vpop.f32.mrb[78].mxu1  ;;  %v7133_v9 = vpop.f32.mrb[25].mxu0 }
 0x681   : > { %v13901_v40 = vadd.f32 %v7437_v6, %v7133_v9  ;;  %v7454_v26 = vpop.f32.mrb[79].mxu1  ;;  %v9746_v50 = vpop.f32.mrb[26].mxu0 }
 0x682   : > { %v13903_v21 = vadd.f32 %v9796_v19, %v9746_v50  ;;  %v7136_v13 = vpop.f32.mrb[27].mxu0 }
 0x687   : > { %v9749_v44 = vpop.f32.mrb[28].mxu0 }
 0x688   : > { %v13905_v10 = vadd.f32 %v9799_v61, %v9749_v44  ;;  %v7148_v28 = vpop.f32.mrb[29].mxu0 }
 0x689   : > { %v9750_v24 = vpop.f32.mrb[30].mxu0 }
 0x68a   : > { %v7150_v48 = vpop.f32.mrb[31].mxu0 }
 0x68b   : > { %v13907_v3 = vadd.f32 %v7454_v26, %v7150_v48 }
 0x68d   : > { %v9803_v2 = vpop.f32.mrb[80].mxu1 }
 0x68e   : > { %v7466_v17 = vpop.f32.mrb[81].mxu1 }
 0x68f   : > { %v9804_v30 = vpop.f32.mrb[82].mxu1 }
 0x690   : > { %v7469_v49 = vpop.f32.mrb[83].mxu1 }
 0x696   : > { %v9807_v35 = vpop.f32.mrb[84].mxu1 }
 0x697   : > { %v7481_v6 = vpop.f32.mrb[85].mxu1 }
 0x698   : > { %v9753_v45 = vpop.f32.mrb[32].mxu0  ;;  %v9808_v9 = vpop.f32.mrb[86].mxu1 }
 0x699   : > { %v7162_v29 = vpop.f32.mrb[33].mxu0  ;;  %v7484_v19 = vpop.f32.mrb[87].mxu1 }
 0x69a   : > { %v13909_v50 = vadd.f32 %v7466_v17, %v7162_v29  ;;  %v9754_v13 = vpop.f32.mrb[34].mxu0 }
 0x69b   : > { %v13911_v61 = vadd.f32 %v9804_v30, %v9754_v13  ;;  %v7165_v44 = vpop.f32.mrb[35].mxu0 }
 0x69c   : > { %v13913_v28 = vadd.f32 %v7469_v49, %v7165_v44 }
 0x69f   : > { %v9811_v26 = vpop.f32.mrb[88].mxu1 }
 0x6a0   : > { %v9757_v24 = vpop.f32.mrb[36].mxu0  ;;  %v7496_v48 = vpop.f32.mrb[89].mxu1 }
 0x6a1   : > { %v13915_v2 = vadd.f32 %v9807_v35, %v9757_v24  ;;  %v7177_v1 = vpop.f32.mrb[37].mxu0  ;;  %v9812_v7 = vpop.f32.mrb[90].mxu1 }
 0x6a2   : > { %v13917_v12 = vadd.f32 %v7481_v6, %v7177_v1  ;;  %v9758_v45 = vpop.f32.mrb[38].mxu0  ;;  %v7498_v37 = vpop.f32.mrb[91].mxu1 }
 0x6a3   : > { %v13919_v19 = vadd.f32 %v9808_v9, %v9758_v45  ;;  %v7180_v29 = vpop.f32.mrb[39].mxu0 }
 0x6a8   : > { %v9761_v17 = vpop.f32.mrb[40].mxu0 }
 0x6a9   : > { %v13921_v30 = vadd.f32 %v9811_v26, %v9761_v17  ;;  %v7192_v13 = vpop.f32.mrb[41].mxu0 }
 0x6aa   : > { %v9762_v49 = vpop.f32.mrb[42].mxu0 }
 0x6ab   : > { %v7194_v44 = vpop.f32.mrb[43].mxu0 }
 0x6ac   : > { %v13923_v41 = vadd.f32 %v7498_v37, %v7194_v44 }
 0x6ad   : > { %v9815_v48 = vpop.f32.mrb[92].mxu1 }
 0x6ae   : > { %v7510_v35 = vpop.f32.mrb[93].mxu1 }
 0x6af   : > { %v9816_v24 = vpop.f32.mrb[94].mxu1 }
 0x6b0   : > { %v7513_v38 = vpop.f32.mrb[95].mxu1  ;;  %v9765_v7 = vpop.f32.mrb[44].mxu0 }
 0x6b1   : > { %v7206_v1 = vpop.f32.mrb[45].mxu0 }
 0x6b2   : > { %v13925_v6 = vadd.f32 %v7510_v35, %v7206_v1  ;;  %v9766_v56 = vpop.f32.mrb[46].mxu0 }
 0x6b3   : > { %v13927_v9 = vadd.f32 %v9816_v24, %v9766_v56  ;;  %v7209_v45 = vpop.f32.mrb[47].mxu0 }
 0x6b4   : > { %v13929_v29 = vadd.f32 %v7513_v38, %v7209_v45 }
 0x6b5   : > { %v9819_v26 = vpop.f32.mrb[96].mxu1 }
 0x6b6   : > { %v7525_v17 = vpop.f32.mrb[97].mxu1 }
 0x6b7   : > { %v9820_v13 = vpop.f32.mrb[98].mxu1 }
 0x6b8   : > { %v7528_v49 = vpop.f32.mrb[99].mxu1 }
 0x6bb   : > { %v9769_v37 = vpop.f32.mrb[48].mxu0 }
 0x6bc   : > { %v13931_v44 = vadd.f32 %v9819_v26, %v9769_v37  ;;  %v7221_v48 = vpop.f32.mrb[49].mxu0 }
 0x6bd   : > { %v13933_v32 = vadd.f32 %v7525_v17, %v7221_v48  ;;  %v9770_v7 = vpop.f32.mrb[50].mxu0  ;;  %v13944_v17 = vld [vmem:[%s14212_s10] ss:$0 sm:$0xff] }
 0x6be   : > { %v13935_v33 = vadd.f32 %v9820_v13, %v9770_v7  ;;  %v7224_v35 = vpop.f32.mrb[51].mxu0 }
 0x6c1   : > { %v9823_v1 = vpop.f32.mrb[100].mxu1 }
 0x6c2   : > { %v7540_v56 = vpop.f32.mrb[101].mxu1 }
 0x6c3   : > { %v9824_v24 = vpop.f32.mrb[102].mxu1 }
 0x6c4   : > { %v7542_v58 = vpop.f32.mrb[103].mxu1 }
 0x6c6   : > { %v9773_v38 = vpop.f32.mrb[52].mxu0 }
 0x6c7   : > { %v13937_v45 = vadd.f32 %v9823_v1, %v9773_v38  ;;  %v7236_v34 = vpop.f32.mrb[53].mxu0 }
 0x6c8   : > { %v9774_v54 = vpop.f32.mrb[54].mxu0 }
 0x6c9   : > { %v7238_v49 = vpop.f32.mrb[55].mxu0 }
 0x6ca   : > { %v13939_v63 = vadd.f32 %v7542_v58, %v7238_v49 }
 0x6ce   : > { %v9829_v26 = vpop.f32.mrb[56].mxu0 }
 0x6cf   : > { %v7600_v37 = vpop.f32.mrb[57].mxu0 }
 0x6d0   : > { %v7775_v13 = vadd.f32 %v7600_v37, %v13875_v11  ;;  %v9830_v48 = vpop.f32.mrb[58].mxu0 }
 0x6d1   : > { %v7777_v7 = vadd.f32 %v9830_v48, %v13877_v47  ;;  %v7603_v35 = vpop.f32.mrb[59].mxu0 }
 0x6d2   : > { %v7814_v1 = vadd.f32 %v13944_v17, %v7775_v13  ;;  %v7776_v54 = vadd.f32 %v7603_v35, %v13879_v43 }
 0x6d3   : > { %v7816_v58 = vadd.f32 %v13944_v17, %v7777_v7 }
 0x6d4   : > { %v7846_v34 = vmax.f32 %v7814_v1, 0.0  ;;  %v7815_v56 = vadd.f32 %v13944_v17, %v7776_v54 }
 0x6d5   : > { %v7848_v26 = vmax.f32 %v7816_v58, 0.0 }
 0x6d6   : > { %v7847_v24 = vmax.f32 %v7815_v56, 0.0  ;;  %v9833_v38 = vpop.f32.mrb[60].mxu0  ;;  %8038 = vrot.lane.b32.xlu0 %v7846_v34, %s9961_s14 }
 0x6d7   : > { %v7779_v11 = vadd.f32 %v9833_v38, %v13883_v59  ;;  %v7615_v49 = vpop.f32.mrb[61].mxu0 }
 0x6d8   : > { %v7778_v47 = vadd.f32 %v7615_v49, %v13885_v25  ;;  %8040 = vrot.lane.b32.xlu1 %v7847_v24, %s9961_s14  ;;  %v9834_v37 = vpop.f32.mrb[62].mxu0 }
 0x6d9   : > { %v7818_v43 = vadd.f32 %v13944_v17, %v7779_v11  ;;  %v7780_v13 = vadd.f32 %v9834_v37, %v13887_v51  ;;  %v7618_v48 = vpop.f32.mrb[63].mxu0 }
 0x6da   : > { %v7817_v7 = vadd.f32 %v13944_v17, %v7778_v47  ;;  %8042 = vrot.lane.b32.xlu0 %v7848_v26, %s9961_s14 }
 0x6db   : > { %v7850_v35 = vmax.f32 %v7818_v43, 0.0  ;;  %v7819_v59 = vadd.f32 %v13944_v17, %v7780_v13 }
 0x6dc   : > { %v7849_v1 = vmax.f32 %v7817_v7, 0.0 }
 0x6dd   : > { %v7851_v58 = vmax.f32 %v7819_v59, 0.0 }
 0x6de   : > { %8044 = vrot.lane.b32.xlu1 %v7849_v1, %s9961_s14  ;;  %v9837_v54 = vpop.f32.mrb[64].mxu0  ;;  %8046 = vrot.lane.b32.xlu0 %v7850_v35, %s9961_s14 }
 0x6df   : > { %v7782_v25 = vadd.f32 %v9837_v54, %v13889_v57  ;;  %v7630_v34 = vpop.f32.mrb[65].mxu0 }
 0x6e0   : > { %v9838_v56 = vpop.f32.mrb[66].mxu0 }
 0x6e1   : > { %v7821_v51 = vadd.f32 %v13944_v17, %v7782_v25  ;;  %v7632_v24 = vpop.f32.mrb[67].mxu0 }
 0x6e2   : > { %v7781_v38 = vadd.f32 %v7632_v24, %v13891_v46  ;;  %8048 = vrot.lane.b32.xlu1 %v7851_v58, %s9961_s14 }
 0x6e3   : > { %v7853_v11 = vmax.f32 %v7821_v51, 0.0 }
 0x6e4   : > { %v7820_v49 = vadd.f32 %v13944_v17, %v7781_v38 }
 0x6e6   : > { %v7852_v26 = vmax.f32 %v7820_v49, 0.0  ;;  %8052 = vrot.lane.b32.xlu1 %v7853_v11, %s9961_s14  ;;  %v9841_v47 = vpop.f32.mrb[68].mxu0 }
 0x6e7   : > { %v7644_v37 = vpop.f32.mrb[69].mxu0 }
 0x6e8   : > { %v7783_v57 = vadd.f32 %v7644_v37, %v13893_v4  ;;  %v9842_v43 = vpop.f32.mrb[70].mxu0  ;;  %8050 = vrot.lane.b32.xlu0 %v7852_v26, %s9961_s14 }
 0x6e9   : > { %v7785_v13 = vadd.f32 %v9842_v43, %v13895_v15  ;;  %v7647_v48 = vpop.f32.mrb[71].mxu0 }
 0x6ea   : > { %v7822_v46 = vadd.f32 %v13944_v17, %v7783_v57  ;;  %v7784_v7 = vadd.f32 %v7647_v48, %v13897_v20 }
 0x6eb   : > { %v7824_v1 = vadd.f32 %v13944_v17, %v7785_v13 }
 0x6ec   : > { %v7854_v35 = vmax.f32 %v7822_v46, 0.0  ;;  %v7823_v59 = vadd.f32 %v13944_v17, %v7784_v7 }
 0x6ed   : > { %v7856_v58 = vmax.f32 %v7824_v1, 0.0 }
 0x6ee   : > { %v7855_v54 = vmax.f32 %v7823_v59, 0.0  ;;  %v9845_v25 = vpop.f32.mrb[72].mxu0  ;;  %8054 = vrot.lane.b32.xlu0 %v7854_v35, %s9961_s14 }
 0x6ef   : > { %v7787_v4 = vadd.f32 %v9845_v25, %v13899_v36  ;;  %v7659_v34 = vpop.f32.mrb[73].mxu0 }
 0x6f0   : > { %v7786_v15 = vadd.f32 %v7659_v34, %v13901_v40  ;;  %8056 = vrot.lane.b32.xlu1 %v7855_v54, %s9961_s14  ;;  %v9846_v56 = vpop.f32.mrb[74].mxu0 }
 0x6f1   : > { %v7826_v20 = vadd.f32 %v13944_v17, %v7787_v4  ;;  %v7788_v51 = vadd.f32 %v9846_v56, %v13903_v21  ;;  %v7662_v24 = vpop.f32.mrb[75].mxu0 }
 0x6f2   : > { %v7825_v38 = vadd.f32 %v13944_v17, %v7786_v15  ;;  %8058 = vrot.lane.b32.xlu0 %v7856_v58, %s9961_s14 }
 0x6f3   : > { %v7858_v11 = vmax.f32 %v7826_v20, 0.0  ;;  %v7827_v36 = vadd.f32 %v13944_v17, %v7788_v51 }
 0x6f4   : > { %v7857_v49 = vmax.f32 %v7825_v38, 0.0 }
 0x6f5   : > { %v7859_v37 = vmax.f32 %v7827_v36, 0.0 }
 0x6f6   : > { %8060 = vrot.lane.b32.xlu1 %v7857_v49, %s9961_s14  ;;  %v9849_v26 = vpop.f32.mrb[76].mxu0  ;;  %8062 = vrot.lane.b32.xlu0 %v7858_v11, %s9961_s14 }
 0x6f7   : > { %v7790_v40 = vadd.f32 %v9849_v26, %v13905_v10  ;;  %v7674_v47 = vpop.f32.mrb[77].mxu0 }
 0x6f8   : > { %v9850_v57 = vpop.f32.mrb[78].mxu0 }
 0x6f9   : > { %v7829_v21 = vadd.f32 %v13944_v17, %v7790_v40  ;;  %v7676_v43 = vpop.f32.mrb[79].mxu0 }
 0x6fa   : > { %v7789_v13 = vadd.f32 %v7676_v43, %v13907_v3  ;;  %8064 = vrot.lane.b32.xlu1 %v7859_v37, %s9961_s14 }
 0x6fb   : > { %v7861_v48 = vmax.f32 %v7829_v21, 0.0 }
 0x6fc   : > { %v7828_v46 = vadd.f32 %v13944_v17, %v7789_v13 }
 0x6fe   : > { %v7860_v7 = vmax.f32 %v7828_v46, 0.0  ;;  %8068 = vrot.lane.b32.xlu1 %v7861_v48, %s9961_s14  ;;  %v9853_v35 = vpop.f32.mrb[80].mxu0 }
 0x6ff   : > { %v7688_v1 = vpop.f32.mrb[81].mxu0 }
 0x700   : > { %v7791_v10 = vadd.f32 %v7688_v1, %v13909_v50  ;;  %v9854_v59 = vpop.f32.mrb[82].mxu0  ;;  %8066 = vrot.lane.b32.xlu0 %v7860_v7, %s9961_s14 }
 0x701   : > { %v7793_v54 = vadd.f32 %v9854_v59, %v13911_v61  ;;  %v7691_v25 = vpop.f32.mrb[83].mxu0 }
 0x702   : > { %v7830_v3 = vadd.f32 %v13944_v17, %v7791_v10  ;;  %v7792_v4 = vadd.f32 %v7691_v25, %v13913_v28 }
 0x703   : > { %v7832_v58 = vadd.f32 %v13944_v17, %v7793_v54 }
 0x704   : > { %v7862_v34 = vmax.f32 %v7830_v3, 0.0  ;;  %v7831_v15 = vadd.f32 %v13944_v17, %v7792_v4 }
 0x705   : > { %v7864_v24 = vmax.f32 %v7832_v58, 0.0 }
 0x706   : > { %v7863_v56 = vmax.f32 %v7831_v15, 0.0  ;;  %v9857_v20 = vpop.f32.mrb[84].mxu0  ;;  %8070 = vrot.lane.b32.xlu0 %v7862_v34, %s9961_s14 }
 0x707   : > { %v7795_v50 = vadd.f32 %v9857_v20, %v13915_v2  ;;  %v7703_v51 = vpop.f32.mrb[85].mxu0 }
 0x708   : > { %v7794_v61 = vadd.f32 %v7703_v51, %v13917_v12  ;;  %8072 = vrot.lane.b32.xlu1 %v7863_v56, %s9961_s14  ;;  %v9858_v38 = vpop.f32.mrb[86].mxu0 }
 0x709   : > { %v7834_v28 = vadd.f32 %v13944_v17, %v7795_v50  ;;  %v7796_v11 = vadd.f32 %v9858_v38, %v13919_v19  ;;  %v7706_v49 = vpop.f32.mrb[87].mxu0 }
 0x70a   : > { %v7833_v36 = vadd.f32 %v13944_v17, %v7794_v61  ;;  %8074 = vrot.lane.b32.xlu0 %v7864_v24, %s9961_s14 }
 0x70b   : > { %v7866_v26 = vmax.f32 %v7834_v28, 0.0  ;;  %v7835_v2 = vadd.f32 %v13944_v17, %v7796_v11 }
 0x70c   : > { %v7865_v40 = vmax.f32 %v7833_v36, 0.0 }
 0x70d   : > { %v7867_v57 = vmax.f32 %v7835_v2, 0.0 }
 0x70e   : > { %8076 = vrot.lane.b32.xlu1 %v7865_v40, %s9961_s14  ;;  %v9861_v47 = vpop.f32.mrb[88].mxu0  ;;  %8078 = vrot.lane.b32.xlu0 %v7866_v26, %s9961_s14 }
 0x70f   : > { %v7798_v12 = vadd.f32 %v9861_v47, %v13921_v30  ;;  %v7718_v37 = vpop.f32.mrb[89].mxu0 }
 0x710   : > { %v9862_v21 = vpop.f32.mrb[90].mxu0 }
 0x711   : > { %v7837_v19 = vadd.f32 %v13944_v17, %v7798_v12  ;;  %v7720_v43 = vpop.f32.mrb[91].mxu0  ;;  %v14378_v21 = vld [vmem:[#allocation7_spill] sm:$0xff] }
 0x712   : > { %v7797_v13 = vadd.f32 %v7720_v43, %v13923_v41  ;;  %8080 = vrot.lane.b32.xlu1 %v7867_v57, %s9961_s14  ;;  %v14046_v43 = vpop.permute.xlu0 %7970 }
 0x713   : > { %v7869_v48 = vmax.f32 %v7837_v19, 0.0  ;;  %v2382_v19 = vadd.f32 %v13667_v55, %v14378_v21  ;;  %v14386_v21 = vld [vmem:[#allocation44_spill] sm:$0xff] }
 0x714   : > { %v7836_v46 = vadd.f32 %v13944_v17, %v7797_v13  ;;  %v14379_v13 = vld [vmem:[#allocation6_spill] sm:$0xff] }
 0x716   : > { %v7868_v7 = vmax.f32 %v7836_v46, 0.0  ;;  %8084 = vrot.lane.b32.xlu1 %v7869_v48, %s9961_s14  ;;  %v9865_v35 = vpop.f32.mrb[92].mxu0  ;;  %v2383_v48 = vadd.f32 %v13667_v55, %v14379_v13  ;;  %v14051_v46 = vpop.permute.xlu1 %7972  ;;  %v14387_v13 = vld [vmem:[#allocation46_spill] sm:$0xff] }
 0x717   : > { %v7732_v1 = vpop.f32.mrb[93].mxu0 }
 0x718   : > { %v7799_v30 = vadd.f32 %v7732_v1, %v13925_v6  ;;  %v9866_v10 = vpop.f32.mrb[94].mxu0  ;;  %8082 = vrot.lane.b32.xlu0 %v7868_v7, %s9961_s14 }
 0x719   : > { %v7801_v59 = vadd.f32 %v9866_v10, %v13927_v9  ;;  %v7735_v54 = vpop.f32.mrb[95].mxu0  ;;  %v14380_v10 = vld [vmem:[#allocation8_spill] sm:$0xff] }
 0x71a   : > { %v7838_v41 = vadd.f32 %v13944_v17, %v7799_v30  ;;  %v7800_v25 = vadd.f32 %v7735_v54, %v13929_v29  ;;  %v2415_v30 = vmax.f32 %v2383_v48, 0.0 }
 0x71b   : > { %v7840_v4 = vadd.f32 %v13944_v17, %v7801_v59  ;;  %v2385_v59 = vadd.f32 %v13667_v55, %v14380_v10 }
 0x71c   : > { %v7870_v3 = vmax.f32 %v7838_v41, 0.0  ;;  %v7839_v34 = vadd.f32 %v13944_v17, %v7800_v25 }
 0x71d   : > { %v7872_v20 = vmax.f32 %v7840_v4, 0.0  ;;  %v2417_v4 = vmax.f32 %v2385_v59, 0.0 }
 0x71e   : > { %v7871_v58 = vmax.f32 %v7839_v34, 0.0  ;;  %v9869_v15 = vpop.f32.mrb[96].mxu0  ;;  %8086 = vrot.lane.b32.xlu0 %v7870_v3, %s9961_s14 }
 0x71f   : > { %v7803_v6 = vadd.f32 %v9869_v15, %v13931_v44  ;;  %v7747_v56 = vpop.f32.mrb[97].mxu0 }
 0x720   : > { %v7802_v9 = vadd.f32 %v7747_v56, %v13933_v32  ;;  %8088 = vrot.lane.b32.xlu1 %v7871_v58, %s9961_s14  ;;  %v9870_v50 = vpop.f32.mrb[98].mxu0 }
 0x721   : > { %v7842_v29 = vadd.f32 %v13944_v17, %v7803_v6  ;;  %v7804_v51 = vadd.f32 %v9870_v50, %v13935_v33  ;;  %v7750_v24 = vpop.f32.mrb[99].mxu0 }
 0x722   : > { %v7841_v61 = vadd.f32 %v13944_v17, %v7802_v9  ;;  %8090 = vrot.lane.b32.xlu0 %v7872_v20, %s9961_s14 }
 0x723   : > { %v7874_v38 = vmax.f32 %v7842_v29, 0.0  ;;  %v7843_v44 = vadd.f32 %v13944_v17, %v7804_v51 }
 0x724   : > { %v7873_v28 = vmax.f32 %v7841_v61, 0.0 }
 0x725   : > { %v7875_v36 = vmax.f32 %v7843_v44, 0.0 }
 0x726   : > { %8092 = vrot.lane.b32.xlu1 %v7873_v28, %s9961_s14  ;;  %v9873_v11 = vpop.f32.mrb[100].mxu0  ;;  %8094 = vrot.lane.b32.xlu0 %v7874_v38, %s9961_s14 }
 0x727   : > { %v7806_v32 = vadd.f32 %v9873_v11, %v13937_v45  ;;  %v7762_v49 = vpop.f32.mrb[101].mxu0  ;;  %v14377_v45 = vld [vmem:[#allocation5_spill] sm:$0xff] }
 0x728   : > { %v9874_v33 = vpop.f32.mrb[102].mxu0  ;;  %v2381_v57 = vadd.f32 %v13667_v55, %v14377_v45 }
 0x729   : > { %v7845_v26 = vadd.f32 %v13944_v17, %v7806_v32  ;;  %v7764_v40 = vpop.f32.mrb[103].mxu0  ;;  %v14381_v32 = vld [vmem:[#allocation39_spill] sm:$0xff] }
 0x72a   : > { %v7805_v2 = vadd.f32 %v7764_v40, %v13939_v63  ;;  %8096 = vrot.lane.b32.xlu1 %v7875_v36, %s9961_s14  ;;  %v2413_v63 = vmax.f32 %v2381_v57, 0.0  ;;  %v14382_v36 = vld [vmem:[#allocation38_spill] sm:$0xff] }
 0x72b   : > { %v7877_v47 = vmax.f32 %v7845_v26, 0.0  ;;  %v14383_v26 = vld [vmem:[#allocation41_spill] sm:$0xff] }
 0x72c   : > { %v7844_v12 = vadd.f32 %v13944_v17, %v7805_v2  ;;  %v2414_v17 = vmax.f32 %v2382_v19, 0.0  ;;  %v8134_v7 = vsel %vm1254_vm10, %v2413_v63, %v13698_v8  ;;  %v8136_v8 = vsel %vm1254_vm10, %v2415_v30, %v13708_v42  ;;  %v14389_v30 = vld [vmem:[#allocation45_spill] sm:$0xff] }
 0x72e   : > { %v7876_v37 = vmax.f32 %v7844_v12, 0.0  ;;  %8100 = vrot.lane.b32.xlu1 %v7877_v47, %s9961_s14  ;;  %v8135_v54 = vsel %vm1254_vm10, %v2414_v17, %v13680_v31  ;;  %v8138_v31 = vsel %vm1254_vm10, %v2417_v4, %v13717_v18  ;;  %v14384_v47 = vld [vmem:[#allocation40_spill] sm:$0xff] }
 0x730   : > { %8098 = vrot.lane.b32.xlu0 %v7876_v37, %s9961_s14  ;;  %v14385_v37 = vld [vmem:[#allocation42_spill] sm:$0xff] }
 0x748   : > { %v8039_v35 = vpop.permute.xlu0 %8038 }
 0x749   : > { %v8166_v1 = vsel %vm4264_vm6, %v8134_v7, %v8039_v35  ;;  %v14388_v7 = vld [vmem:[#allocation43_spill] sm:$0xff] }
 0x74a   : > { %8198 = vst.msk [vmem:[%s14056_s21] sm:$0xff] %vm1323_vm11, %v8166_v1  ;;  %v8041_v41 = vpop.permute.xlu1 %8040 }
 0x74b   : > { %v8167_v25 = vsel %vm4264_vm6, %v8135_v54, %v8041_v41  ;;  %v14390_v54 = vld [vmem:[#allocation47_spill] sm:$0xff] }
 0x74c   : > { %8199 = vst.msk [vmem:[%s14056_s21 + $0x8] sm:$0xff] %vm1323_vm11, %v8167_v25  ;;  %v8043_v3 = vpop.permute.xlu0 %8042 }
 0x74d   : > { %v8168_v55 = vsel %vm4264_vm6, %v8136_v8, %v8043_v3  ;;  %v14391_v8 = vld [vmem:[#allocation49_spill] sm:$0xff] }
 0x74e   : > { %8200 = vst.msk [vmem:[%s14056_s21 + $0x10] sm:$0xff] %vm1323_vm11, %v8168_v55 }
 0x750   : > { %v8045_v34 = vpop.permute.xlu1 %8044  ;;  %v8047_v58 = vpop.permute.xlu0 %8046 }
 0x751   : > { %v8169_v15 = vsel %vm4264_vm6, %v13696_v27, %v8045_v34  ;;  %v8170_v42 = vsel %vm4264_vm6, %v8138_v31, %v8047_v58  ;;  %v14392_v31 = vld [vmem:[#allocation48_spill] sm:$0xff]  ;;  %v14393_v58 = vld [vmem:[#allocation54_spill] sm:$0xff] }
 0x752   : > { %8201 = vst.msk [vmem:[%s14056_s21 + $0x18] sm:$0xff] %vm1323_vm11, %v8169_v15  ;;  %8202 = vst.msk [vmem:[%s14056_s21 + $0x20] sm:$0xff] %vm1323_vm11, %v8170_v42  ;;  %v9948_v42 = vld [vmem:[%s14204_s2] ss:$0 sm:$0xff] }
 0x754   : > { %v8049_v6 = vpop.permute.xlu1 %8048 }
 0x755   : > { %v8171_v56 = vsel %vm4264_vm6, %v13706_v14, %v8049_v6  ;;  %v14394_v6 = vld [vmem:[#allocation34_spill] sm:$0xff] }
 0x756   : > { %8203 = vst.msk [vmem:[%s14056_s21 + $0x28] sm:$0xff] %vm1323_vm11, %v8171_v56  ;;  %v2412_v56 = vadd.f32 %v9948_v42, %v14394_v6 }
 0x758   : > { %v8053_v18 = vpop.permute.xlu1 %8052 }
 0x759   : > { %v8173_v20 = vsel %vm4264_vm6, %v13715_v16, %v8053_v18  ;;  %v14395_v18 = vld [vmem:[#allocation35_spill] sm:$0xff] }
 0x75a   : > { %8205 = vst.msk [vmem:[%s14056_s21 + $0x38] sm:$0xff] %vm1323_vm11, %v8173_v20  ;;  %v8051_v27 = vpop.permute.xlu0 %8050  ;;  %v2411_v20 = vadd.f32 %v9948_v42, %v14395_v18 }
 0x75b   : > { %v8172_v9 = vsel %vm4264_vm6, %v13733_v60, %v8051_v27 }
 0x75c   : > { %8204 = vst.msk [vmem:[%s14056_s21 + $0x30] sm:$0xff] %vm1323_vm11, %v8172_v9  ;;  %v14396_v9 = vld [vmem:[#allocation52_spill] sm:$0xff] }
 0x760   : > { %v8055_v50 = vpop.permute.xlu0 %8054 }
 0x761   : > { %v8174_v14 = vsel %vm4264_vm6, %v13743_v53, %v8055_v50 }
 0x762   : > { %8206 = vst.msk [vmem:[%s14056_s21 + $0x40] sm:$0xff] %vm1323_vm11, %v8174_v14  ;;  %v8057_v29 = vpop.permute.xlu1 %8056  ;;  %v2444_v14 = vmax.f32 %v2412_v56, 0.0 }
 0x763   : > { %v8175_v16 = vsel %vm4264_vm6, %v13728_v0, %v8057_v29  ;;  %v2443_v29 = vmax.f32 %v2411_v20, 0.0 }
 0x764   : > { %8207 = vst.msk [vmem:[%s14056_s21 + $0x48] sm:$0xff] %vm1323_vm11, %v8175_v16  ;;  %v8059_v51 = vpop.permute.xlu0 %8058  ;;  %v8165_v16 = vsel %vm1254_vm10, %v2444_v14, %v14051_v46 }
 0x765   : > { %v8176_v60 = vsel %vm4264_vm6, %v13757_v52, %v8059_v51 }
 0x766   : > { %8208 = vst.msk [vmem:[%s14056_s21 + $0x50] sm:$0xff] %vm1323_vm11, %v8176_v60 }
 0x768   : > { %v8061_v24 = vpop.permute.xlu1 %8060  ;;  %v8063_v61 = vpop.permute.xlu0 %8062 }
 0x769   : > { %v8177_v53 = vsel %vm4264_vm6, %v13738_v23, %v8061_v24  ;;  %v8178_v38 = vsel %vm4264_vm6, %v13767_v39, %v8063_v61  ;;  %v8164_v24 = vsel %vm1254_vm10, %v2443_v29, %v14046_v43 }
 0x76a   : > { %8209 = vst.msk [vmem:[%s14056_s21 + $0x58] sm:$0xff] %vm1323_vm11, %v8177_v53  ;;  %8210 = vst.msk [vmem:[%s14056_s21 + $0x60] sm:$0xff] %vm1323_vm11, %v8178_v38 }
 0x76c   : > { %v8065_v0 = vpop.permute.xlu1 %8064 }
 0x76d   : > { %v8179_v52 = vsel %vm4264_vm6, %v13752_v5, %v8065_v0 }
 0x76e   : > { %8211 = vst.msk [vmem:[%s14056_s21 + $0x68] sm:$0xff] %vm1323_vm11, %v8179_v52 }
 0x770   : > { %v8069_v28 = vpop.permute.xlu1 %8068 }
 0x771   : > { %v8181_v44 = vsel %vm4264_vm6, %v13762_v22, %v8069_v28 }
 0x772   : > { %8213 = vst.msk [vmem:[%s14056_s21 + $0x78] sm:$0xff] %vm1323_vm11, %v8181_v44  ;;  %v8067_v23 = vpop.permute.xlu0 %8066 }
 0x773   : > { %v8180_v39 = vsel %vm4264_vm6, %v13781_v62, %v8067_v23 }
 0x774   : > { %8212 = vst.msk [vmem:[%s14056_s21 + $0x70] sm:$0xff] %vm1323_vm11, %v8180_v39 }
 0x778   : > { %v8071_v11 = vpop.permute.xlu0 %8070 }
 0x779   : > { %v8182_v5 = vsel %vm4264_vm6, %v14381_v32, %v8071_v11 }
 0x77a   : > { %8214 = vst.msk [vmem:[%s14056_s21 + $0x80] sm:$0xff] %vm1323_vm11, %v8182_v5  ;;  %v8073_v49 = vpop.permute.xlu1 %8072 }
 0x77b   : > { %v8183_v22 = vsel %vm4264_vm6, %v14382_v36, %v8073_v49 }
 0x77c   : > { %8215 = vst.msk [vmem:[%s14056_s21 + $0x88] sm:$0xff] %vm1323_vm11, %v8183_v22  ;;  %v8075_v33 = vpop.permute.xlu0 %8074 }
 0x77d   : > { %v8184_v62 = vsel %vm4264_vm6, %v14383_v26, %v8075_v33 }
 0x77e   : > { %8216 = vst.msk [vmem:[%s14056_s21 + $0x90] sm:$0xff] %vm1323_vm11, %v8184_v62 }
 0x780   : > { %v8077_v40 = vpop.permute.xlu1 %8076  ;;  %v8079_v2 = vpop.permute.xlu0 %8078 }
 0x781   : > { %v8185_v12 = vsel %vm4264_vm6, %v14384_v47, %v8077_v40  ;;  %v8186_v45 = vsel %vm4264_vm6, %v14385_v37, %v8079_v2 }
 0x782   : > { %8217 = vst.msk [vmem:[%s14056_s21 + $0x98] sm:$0xff] %vm1323_vm11, %v8185_v12  ;;  %8218 = vst.msk [vmem:[%s14056_s21 + $0xa0] sm:$0xff] %vm1323_vm11, %v8186_v45 }
 0x784   : > { %v8081_v57 = vpop.permute.xlu1 %8080 }
 0x785   : > { %v8187_v19 = vsel %vm4264_vm6, %v14386_v21, %v8081_v57 }
 0x786   : > { %8219 = vst.msk [vmem:[%s14056_s21 + $0xa8] sm:$0xff] %vm1323_vm11, %v8187_v19 }
 0x788   : > { %v8085_v63 = vpop.permute.xlu1 %8084 }
 0x789   : > { %v8189_v48 = vsel %vm4264_vm6, %v14387_v13, %v8085_v63 }
 0x78a   : > { %8221 = vst.msk [vmem:[%s14056_s21 + $0xb8] sm:$0xff] %vm1323_vm11, %v8189_v48  ;;  %v8083_v17 = vpop.permute.xlu0 %8082 }
 0x78b   : > { %v8188_v35 = vsel %vm4264_vm6, %v14388_v7, %v8083_v17 }
 0x78c   : > { %8220 = vst.msk [vmem:[%s14056_s21 + $0xb0] sm:$0xff] %vm1323_vm11, %v8188_v35 }
 0x790   : > { %v8087_v1 = vpop.permute.xlu0 %8086 }
 0x791   : > { %v8190_v10 = vsel %vm4264_vm6, %v14389_v30, %v8087_v1 }
 0x792   : > { %8222 = vst.msk [vmem:[%s14056_s21 + $0xc0] sm:$0xff] %vm1323_vm11, %v8190_v10  ;;  %v8089_v59 = vpop.permute.xlu1 %8088 }
 0x793   : > { %v8191_v41 = vsel %vm4264_vm6, %v14390_v54, %v8089_v59 }
 0x794   : > { %8223 = vst.msk [vmem:[%s14056_s21 + $0xc8] sm:$0xff] %vm1323_vm11, %v8191_v41  ;;  %v8091_v25 = vpop.permute.xlu0 %8090 }
 0x795   : > { %v8192_v3 = vsel %vm4264_vm6, %v14391_v8, %v8091_v25 }
 0x796   : > { %8224 = vst.msk [vmem:[%s14056_s21 + $0xd0] sm:$0xff] %vm1323_vm11, %v8192_v3 }
 0x798   : > { %v8093_v55 = vpop.permute.xlu1 %8092  ;;  %v8095_v4 = vpop.permute.xlu0 %8094 }
 0x799   : > { %v8193_v34 = vsel %vm4264_vm6, %v14392_v31, %v8093_v55  ;;  %v8194_v15 = vsel %vm4264_vm6, %v14393_v58, %v8095_v4 }
 0x79a   : > { %8225 = vst.msk [vmem:[%s14056_s21 + $0xd8] sm:$0xff] %vm1323_vm11, %v8193_v34  ;;  %8226 = vst.msk [vmem:[%s14056_s21 + $0xe0] sm:$0xff] %vm1323_vm11, %v8194_v15 }
 0x79c   : > { %v8097_v27 = vpop.permute.xlu1 %8096 }
 0x79d   : > { %v8195_v50 = vsel %vm4264_vm6, %v14396_v9, %v8097_v27 }
 0x79e   : > { %8227 = vst.msk [vmem:[%s14056_s21 + $0xe8] sm:$0xff] %vm1323_vm11, %v8195_v50 }
 0x7a0   : > { %v8101_v51 = vpop.permute.xlu1 %8100 }
 0x7a1   : > { %v8197_v60 = vsel %vm4264_vm6, %v8165_v16, %v8101_v51 }
 0x7a2   : > { %8229 = vst.msk [vmem:[%s14056_s21 + $0xf8] sm:$0xff] %vm1323_vm11, %v8197_v60  ;;  %v8099_v61 = vpop.permute.xlu0 %8098 }
 0x7a3   : > { %v8196_v53 = vsel %vm4264_vm6, %v8164_v24, %v8099_v61 }
 0x7a4   : > { %8228 = vst.msk [vmem:[%s14056_s21 + $0xf0] sm:$0xff] %vm1323_vm11, %v8196_v53 }
 0x7a5 PF: > { %s21_s17 = sadd.s32 1, %s9955_s17  }
 0x7a6   : > { %p18_p4 = scmp.ge.s32.totalorder %s21_s17, 4  }
 0x7a8   :  { %20 = sbr.rel (!%p18_p4) target bundleno = 1 (0x1), region = 104 }

</bundles_post_ra>
